<compile_context>
chip_gen: v5e
topology: v5e:2x2
jax: 0.10.0
libtpu: 0.0.40
codegen_flags: <defaults>
</compile_context>

<pallas_src>
import functools

import jax
import jax.numpy as jnp
from jax.experimental import pallas as pl
from jax.experimental.pallas import tpu as pltpu

IN_DIM = 3 * 32 * 32   # 3072
HID_DIM = 500
HID_PAD = 512          # hidden padded to a multiple of 128 (clean MXU/lane tiling)
OUT_DIM = 10
MAX_TB = 1024          # max batch-tile rows per grid step
VMEM_LIMIT = 48 << 20  # safe on v7x's 64 MiB/TC; ample headroom on v5e/v6e (128 MiB)


def _round_up(x, m):
    return ((x + m - 1) // m) * m


def _mlp_kernel(x_ref, w1t_ref, b1_ref, w3t_ref, b3_ref, o_ref):
    # ---- fc1: (TB, 3072) bf16 @ (3072, 512) bf16 -> f32 accumulation ----
    h = jnp.dot(x_ref[...].astype(jnp.bfloat16), w1t_ref[...],
                preferred_element_type=jnp.float32)
    h = h + b1_ref[...]

    # f1 = relu on each half == relu on the whole tensor (elementwise).
    # Padded columns 500..511 stay exactly 0 (zero bf16 weights + zero bias).
    h = jnp.maximum(h, 0.0)

    # ---- fc3 in f32: (TB, 512) @ (512, 10) + (1, 10) ----
    # Padded rows of w3t are zero, so the pad contributes exactly nothing.
    y = jnp.dot(h, w3t_ref[...], preferred_element_type=jnp.float32) + b3_ref[...]

    # f2 = tanh on each half == tanh on the whole tensor (elementwise).
    y = jnp.tanh(y)

    # ---- log_softmax over dim=1 (numerically stable) ----
    m = jnp.max(y, axis=1, keepdims=True)
    s = y - m
    lse = jnp.log(jnp.sum(jnp.exp(s), axis=1, keepdims=True))
    o_ref[...] = (s - lse).astype(o_ref.dtype)


def pack_params(w1, b1, w3, b3):
    """One-time parameter packing: transpose, zero-pad hidden 500 -> 512,
    and store the fc1 weight panel in bfloat16 for the MXU.

    w1: (500, 3072), b1: (500,), w3: (10, 500), b3: (10,)
    Returns (w1t (3072,512) bf16, b1 (1,512) f32, w3t (512,10) f32, b3 (1,10) f32).
    """
    w1t = jnp.zeros((IN_DIM, HID_PAD), jnp.float32)
    w1t = w1t.at[:, :HID_DIM].set(jnp.asarray(w1, jnp.float32).T)
    w1t = w1t.astype(jnp.bfloat16)                       # bf16 MXU path, 3 MiB resident
    b1p = jnp.zeros((1, HID_PAD), jnp.float32)
    b1p = b1p.at[:, :HID_DIM].set(jnp.asarray(b1, jnp.float32).reshape(1, HID_DIM))
    w3t = jnp.zeros((HID_PAD, OUT_DIM), jnp.float32)
    w3t = w3t.at[:HID_DIM, :].set(jnp.asarray(w3, jnp.float32).T)
    b3p = jnp.asarray(b3, jnp.float32).reshape(1, OUT_DIM)
    return w1t, b1p, w3t, b3p


def _resident_spec(shape, single_buffer):
    """Constant-index weight/bias block (stays VMEM-resident across the grid).
    When supported, request a single buffer: the block index never changes so a
    second pipeline buffer is pure VMEM waste."""
    if single_buffer:
        return pl.BlockSpec(shape, lambda i: (0, 0), pipeline_mode=pl.Buffered(1))
    return pl.BlockSpec(shape, lambda i: (0, 0))


@functools.partial(jax.jit, static_argnames=("single_buffer_weights",))
def mlpnet_modified_forward(x_nchw, w1t_pad, b1_pad, w3t_pad, b3_2d,
                            single_buffer_weights=True):
    """x_nchw: (B, 3, 32, 32).  For best HBM bandwidth supply it as bfloat16.
    Packed params from pack_params().  Returns (B, 10) f32 log-probabilities."""
    B = x_nchw.shape[0]
    # torch .view(-1, 3*32*32) on a contiguous NCHW tensor == row-major reshape.
    x2d = x_nchw.reshape(B, IN_DIM)
    if x2d.dtype != jnp.bfloat16:
        # Fallback cast (costs one extra HBM pass); callers should pass bf16.
        x2d = x2d.astype(jnp.bfloat16)

    # Batch tile: multiple of 8 sublanes.  For batches >= 16 rows force at
    # least two grid steps so the "parallel" axis shards across v7x's two
    # TensorCores (no effect on single-TC v5e/v6e).
    B8 = _round_up(B, 8)
    if B8 >= 16:
        TB = min(MAX_TB, _round_up((B8 + 1) // 2, 8))
    else:
        TB = B8
    Bp = _round_up(B, TB)
    if Bp != B:
        x2d = jnp.pad(x2d, ((0, Bp - B), (0, 0)))

    out = pl.pallas_call(
        _mlp_kernel,
        out_shape=jax.ShapeDtypeStruct((Bp, OUT_DIM), jnp.float32),
        grid=(Bp // TB,),
        in_specs=[
            pl.BlockSpec((TB, IN_DIM), lambda i: (i, 0)),               # bf16 x tile
            _resident_spec((IN_DIM, HID_PAD), single_buffer_weights),   # w1t bf16
            _resident_spec((1, HID_PAD), single_buffer_weights),        # b1 f32
            _resident_spec((HID_PAD, OUT_DIM), single_buffer_weights),  # w3t f32
            _resident_spec((1, OUT_DIM), single_buffer_weights),        # b3 f32
        ],
        out_specs=pl.BlockSpec((TB, OUT_DIM), lambda i: (i, 0)),
        compiler_params=pltpu.CompilerParams(
            dimension_semantics=("parallel",),   # megacore batch sharding on v7x
            vmem_limit_bytes=VMEM_LIMIT,
        ),
    )(x2d, w1t_pad, b1_pad, w3t_pad, b3_2d)
    return out[:B]


def _init_params(key):
    """Deterministic init mimicking nn.Linear's U(-1/sqrt(fan_in), 1/sqrt(fan_in))."""
    k1, k2, k3, k4 = jax.random.split(key, 4)
    bound1 = 1.0 / jnp.sqrt(jnp.float32(IN_DIM))
    bound3 = 1.0 / jnp.sqrt(jnp.float32(HID_DIM))
    w1 = jax.random.uniform(k1, (HID_DIM, IN_DIM), jnp.float32, -bound1, bound1)
    b1 = jax.random.uniform(k2, (HID_DIM,), jnp.float32, -bound1, bound1)
    w3 = jax.random.uniform(k3, (OUT_DIM, HID_DIM), jnp.float32, -bound3, bound3)
    b3 = jax.random.uniform(k4, (OUT_DIM,), jnp.float32, -bound3, bound3)
    return w1, b1, w3, b3


def _reference_forward(x_nchw, w1, b1, w3, b3):
    """Pure-JAX f32 reference matching the PyTorch forward (with the explicit
    split/activation/concat), for a sanity check."""
    B = x_nchw.shape[0]
    x = x_nchw.reshape(B, IN_DIM).astype(jnp.float32)
    h = x @ w1.T + b1
    half = HID_DIM // 2
    h = jnp.concatenate(
        [jnp.maximum(h[:, :half], 0.0), jnp.maximum(h[:, half:], 0.0)], axis=1)
    y = h @ w3.T + b3
    half2 = OUT_DIM // 2
    y = jnp.concatenate([jnp.tanh(y[:, :half2]), jnp.tanh(y[:, half2:])], axis=1)
    return jax.nn.log_softmax(y, axis=1)


if __name__ == "__main__":
    key = jax.random.PRNGKey(0)
    kx, kp = jax.random.split(key)

    B = 8
    x = jax.random.normal(kx, (B, 3, 32, 32), dtype=jnp.float32)  # NCHW, like CIFAR
    # Materialize the bf16 copy in HBM once (the narrow x dtype must exist in
    # HBM for the DMA saving to be real — casting inside the kernel call
    # would just add an extra HBM pass).
    x_bf16 = jax.block_until_ready(x.astype(jnp.bfloat16))

    w1, b1, w3, b3 = _init_params(kp)
    packed = pack_params(w1, b1, w3, b3)   # one-time transpose + pad + bf16 w1t

    try:
        out = jax.block_until_ready(
            mlpnet_modified_forward(x_bf16, *packed, single_buffer_weights=True))
    except Exception:
        # Fallback for jax versions without BlockSpec(pipeline_mode=pl.Buffered(1)):
        # same kernel with default double-buffered weight blocks.
        out = jax.block_until_ready(
            mlpnet_modified_forward(x_bf16, *packed, single_buffer_weights=False))

    # The reference sees the same bf16-rounded x values; the remaining error is
    # the bf16 fc1 weights/matmul (f32-accumulated), well inside 2e-2 on the
    # log-probabilities.
    ref = _reference_forward(x_bf16, w1, b1, w3, b3)
    assert out.shape == (B, OUT_DIM)
    assert jnp.allclose(out, ref, atol=2e-2, rtol=2e-2), "mismatch vs reference"

    print("KERNEL_OK")
</pallas_src>

<mosaic_0001>
module attributes {stable_mosaic.version = 11 : i64} {
  func.func @_mlp_kernel(%arg0: i32, %arg1: memref<8x3072xbf16, #tpu.memory_space<vmem>>, %arg2: memref<3072x512xbf16, #tpu.memory_space<vmem>>, %arg3: memref<1x512xf32, #tpu.memory_space<vmem>>, %arg4: memref<512x10xf32, #tpu.memory_space<vmem>>, %arg5: memref<1x10xf32, #tpu.memory_space<vmem>>, %arg6: memref<8x10xf32, #tpu.memory_space<vmem>>) attributes {dimension_semantics = [#tpu.dimension_semantics<parallel>], iteration_bounds = array<i64: 1>, scalar_prefetch = 0 : i64, scratch_operands = 0 : i64, tpu.core_type = #tpu.core_type<tc>, window_params = [{transform_indices = @transform_0, window_bounds = array<i64: 8, 3072>}, {pipeline_mode = #tpu.pipeline_mode<synchronous>, transform_indices = @transform_1, window_bounds = array<i64: 3072, 512>}, {pipeline_mode = #tpu.pipeline_mode<synchronous>, transform_indices = @transform_2, window_bounds = array<i64: 1, 512>}, {pipeline_mode = #tpu.pipeline_mode<synchronous>, transform_indices = @transform_3, window_bounds = array<i64: 512, 10>}, {pipeline_mode = #tpu.pipeline_mode<synchronous>, transform_indices = @transform_4, window_bounds = array<i64: 1, 10>}, {transform_indices = @transform_5, window_bounds = array<i64: 8, 10>}]} {
    %c0 = arith.constant 0 : index
    %c0_0 = arith.constant 0 : index
    %0 = vector.load %arg1[%c0, %c0_0] : memref<8x3072xbf16, #tpu.memory_space<vmem>>, vector<8x3072xbf16>
    %c0_1 = arith.constant 0 : index
    %c0_2 = arith.constant 0 : index
    %1 = vector.load %arg2[%c0_1, %c0_2] : memref<3072x512xbf16, #tpu.memory_space<vmem>>, vector<3072x512xbf16>
    %cst = arith.constant dense<0.000000e+00> : vector<8x512xf32>
    %2 = tpu.matmul %0, %1, %cst {dimension_numbers = #tpu.dot_dimension_numbers<[1], [0], [0], [1], [0, 0, 1, 1], [], []>} : vector<8x3072xbf16>, vector<3072x512xbf16>, vector<8x512xf32> -> vector<8x512xf32>
    %c0_3 = arith.constant 0 : index
    %c0_4 = arith.constant 0 : index
    %3 = vector.load %arg3[%c0_3, %c0_4] : memref<1x512xf32, #tpu.memory_space<vmem>>, vector<1x512xf32>
    %4 = vector.broadcast %3 : vector<1x512xf32> to vector<8x512xf32>
    %5 = arith.addf %2, %4 : vector<8x512xf32>
    %cst_5 = arith.constant 0.000000e+00 : f32
    %6 = vector.broadcast %cst_5 : f32 to vector<8x512xf32>
    %7 = arith.maximumf %5, %6 : vector<8x512xf32>
    %c0_6 = arith.constant 0 : index
    %c0_7 = arith.constant 0 : index
    %8 = vector.load %arg4[%c0_6, %c0_7] : memref<512x10xf32, #tpu.memory_space<vmem>>, vector<512x10xf32>
    %cst_8 = arith.constant dense<0.000000e+00> : vector<8x10xf32>
    %9 = tpu.matmul %7, %8, %cst_8 {dimension_numbers = #tpu.dot_dimension_numbers<[1], [0], [0], [1], [0, 0, 1, 1], [], []>} : vector<8x512xf32>, vector<512x10xf32>, vector<8x10xf32> -> vector<8x10xf32>
    %c0_9 = arith.constant 0 : index
    %c0_10 = arith.constant 0 : index
    %10 = vector.load %arg5[%c0_9, %c0_10] : memref<1x10xf32, #tpu.memory_space<vmem>>, vector<1x10xf32>
    %11 = vector.broadcast %10 : vector<1x10xf32> to vector<8x10xf32>
    %12 = arith.addf %9, %11 : vector<8x10xf32>
    %13 = math.tanh %12 : vector<8x10xf32>
    %cst_11 = arith.constant dense<0xFF800000> : vector<8xf32>
    %14 = vector.multi_reduction <maximumf>, %13, %cst_11 [1] : vector<8x10xf32> to vector<8xf32>
    %15 = vector.shape_cast %14 : vector<8xf32> to vector<8x1xf32>
    %16 = vector.broadcast %15 : vector<8x1xf32> to vector<8x10xf32>
    %17 = arith.subf %13, %16 : vector<8x10xf32>
    %18 = math.exp %17 : vector<8x10xf32>
    %cst_12 = arith.constant dense<0.000000e+00> : vector<8xf32>
    %19 = vector.multi_reduction <add>, %18, %cst_12 [1] : vector<8x10xf32> to vector<8xf32>
    %20 = vector.shape_cast %19 : vector<8xf32> to vector<8x1xf32>
    %21 = math.log %20 : vector<8x1xf32>
    %22 = vector.broadcast %21 : vector<8x1xf32> to vector<8x10xf32>
    %23 = arith.subf %17, %22 : vector<8x10xf32>
    %c0_13 = arith.constant 0 : index
    %c0_14 = arith.constant 0 : index
    %24 = vector.load %arg6[%c0_13, %c0_14] : memref<8x10xf32, #tpu.memory_space<vmem>>, vector<8x10xf32>
    tpu.vector_store %arg6[%c0_13, %c0_14], %23 {strides = array<i32>} : memref<8x10xf32, #tpu.memory_space<vmem>>, vector<8x10xf32>,
    return
  }
  func.func @transform_0(%arg0: i32) -> (i32, i32) {
    %c0_i32 = arith.constant 0 : i32
    %c0_i32_0 = arith.constant 0 : i32
    return %arg0, %c0_i32 : i32, i32
  }
  func.func @transform_1(%arg0: i32) -> (i32, i32) {
    %c0_i32 = arith.constant 0 : i32
    %c0_i32_0 = arith.constant 0 : i32
    %c0_i32_1 = arith.constant 0 : i32
    return %c0_i32, %c0_i32_0 : i32, i32
  }
  func.func @transform_2(%arg0: i32) -> (i32, i32) {
    %c0_i32 = arith.constant 0 : i32
    %c0_i32_0 = arith.constant 0 : i32
    %c0_i32_1 = arith.constant 0 : i32
    return %c0_i32, %c0_i32_0 : i32, i32
  }
  func.func @transform_3(%arg0: i32) -> (i32, i32) {
    %c0_i32 = arith.constant 0 : i32
    %c0_i32_0 = arith.constant 0 : i32
    %c0_i32_1 = arith.constant 0 : i32
    return %c0_i32, %c0_i32_0 : i32, i32
  }
  func.func @transform_4(%arg0: i32) -> (i32, i32) {
    %c0_i32 = arith.constant 0 : i32
    %c0_i32_0 = arith.constant 0 : i32
    %c0_i32_1 = arith.constant 0 : i32
    return %c0_i32, %c0_i32_0 : i32, i32
  }
  func.func @transform_5(%arg0: i32) -> (i32, i32) {
    %c0_i32 = arith.constant 0 : i32
    %c0_i32_0 = arith.constant 0 : i32
    return %arg0, %c0_i32 : i32, i32
  }
}

module attributes {stable_mosaic.version = 11 : i64} {
  func.func @_mlp_kernel(%arg0: i32, %arg1: memref<8x3072xbf16, #tpu.memory_space<vmem>>, %arg2: memref<3072x512xbf16, #tpu.memory_space<vmem>>, %arg3: memref<1x512xf32, #tpu.memory_space<vmem>>, %arg4: memref<512x10xf32, #tpu.memory_space<vmem>>, %arg5: memref<1x10xf32, #tpu.memory_space<vmem>>, %arg6: memref<8x10xf32, #tpu.memory_space<vmem>>) attributes {dimension_semantics = [#tpu.dimension_semantics<parallel>], iteration_bounds = array<i64: 1>, scalar_prefetch = 0 : i64, scratch_operands = 0 : i64, tpu.core_type = #tpu.core_type<tc>, window_params = [{transform_indices = @transform_0, window_bounds = array<i64: 8, 3072>}, {pipeline_mode = #tpu.pipeline_mode<synchronous>, transform_indices = @transform_1, window_bounds = array<i64: 3072, 512>}, {pipeline_mode = #tpu.pipeline_mode<synchronous>, transform_indices = @transform_2, window_bounds = array<i64: 1, 512>}, {pipeline_mode = #tpu.pipeline_mode<synchronous>, transform_indices = @transform_3, window_bounds = array<i64: 512, 10>}, {pipeline_mode = #tpu.pipeline_mode<synchronous>, transform_indices = @transform_4, window_bounds = array<i64: 1, 10>}, {transform_indices = @transform_5, window_bounds = array<i64: 8, 10>}]} {
    %c0 = arith.constant 0 : index
    %c0_0 = arith.constant 0 : index
    %0 = vector.load %arg1[%c0, %c0_0] : memref<8x3072xbf16, #tpu.memory_space<vmem>>, vector<8x3072xbf16>
    %c0_1 = arith.constant 0 : index
    %c0_2 = arith.constant 0 : index
    %1 = vector.load %arg2[%c0_1, %c0_2] : memref<3072x512xbf16, #tpu.memory_space<vmem>>, vector<3072x512xbf16>
    %cst = arith.constant dense<0.000000e+00> : vector<8x512xf32>
    %2 = tpu.matmul %0, %1, %cst {dimension_numbers = #tpu.dot_dimension_numbers<[1], [0], [0], [1], [0, 0, 1, 1], [], []>} : vector<8x3072xbf16>, vector<3072x512xbf16>, vector<8x512xf32> -> vector<8x512xf32>
    %c0_3 = arith.constant 0 : index
    %c0_4 = arith.constant 0 : index
    %3 = vector.load %arg3[%c0_3, %c0_4] : memref<1x512xf32, #tpu.memory_space<vmem>>, vector<1x512xf32>
    %4 = vector.broadcast %3 : vector<1x512xf32> to vector<8x512xf32>
    %5 = arith.addf %2, %4 : vector<8x512xf32>
    %cst_5 = arith.constant 0.000000e+00 : f32
    %6 = vector.broadcast %cst_5 : f32 to vector<8x512xf32>
    %7 = arith.maximumf %5, %6 : vector<8x512xf32>
    %c0_6 = arith.constant 0 : index
    %c0_7 = arith.constant 0 : index
    %8 = vector.load %arg4[%c0_6, %c0_7] : memref<512x10xf32, #tpu.memory_space<vmem>>, vector<512x10xf32>
    %cst_8 = arith.constant dense<0.000000e+00> : vector<8x10xf32>
    %9 = tpu.matmul %7, %8, %cst_8 {dimension_numbers = #tpu.dot_dimension_numbers<[1], [0], [0], [1], [0, 0, 1, 1], [], []>} : vector<8x512xf32>, vector<512x10xf32>, vector<8x10xf32> -> vector<8x10xf32>
    %c0_9 = arith.constant 0 : index
    %c0_10 = arith.constant 0 : index
    %10 = vector.load %arg5[%c0_9, %c0_10] : memref<1x10xf32, #tpu.memory_space<vmem>>, vector<1x10xf32>
    %11 = vector.broadcast %10 : vector<1x10xf32> to vector<8x10xf32>
    %12 = arith.addf %9, %11 : vector<8x10xf32>
    %13 = math.tanh %12 : vector<8x10xf32>
    %cst_11 = arith.constant dense<0xFF800000> : vector<8xf32>
    %14 = vector.multi_reduction <maximumf>, %13, %cst_11 [1] : vector<8x10xf32> to vector<8xf32>
    %15 = vector.shape_cast %14 : vector<8xf32> to vector<8x1xf32>
    %16 = vector.broadcast %15 : vector<8x1xf32> to vector<8x10xf32>
    %17 = arith.subf %13, %16 : vector<8x10xf32>
    %18 = math.exp %17 : vector<8x10xf32>
    %cst_12 = arith.constant dense<0.000000e+00> : vector<8xf32>
    %19 = vector.multi_reduction <add>, %18, %cst_12 [1] : vector<8x10xf32> to vector<8xf32>
    %20 = vector.shape_cast %19 : vector<8xf32> to vector<8x1xf32>
    %21 = math.log %20 : vector<8x1xf32>
    %22 = vector.broadcast %21 : vector<8x1xf32> to vector<8x10xf32>
    %23 = arith.subf %17, %22 : vector<8x10xf32>
    %c0_13 = arith.constant 0 : index
    %c0_14 = arith.constant 0 : index
    %24 = vector.load %arg6[%c0_13, %c0_14] : memref<8x10xf32, #tpu.memory_space<vmem>>, vector<8x10xf32>
    tpu.vector_store %arg6[%c0_13, %c0_14], %23 {strides = array<i32>} : memref<8x10xf32, #tpu.memory_space<vmem>>, vector<8x10xf32>,
    return
  }
  func.func @transform_0(%arg0: i32) -> (i32, i32) {
    %c0_i32 = arith.constant 0 : i32
    %c0_i32_0 = arith.constant 0 : i32
    return %arg0, %c0_i32 : i32, i32
  }
  func.func @transform_1(%arg0: i32) -> (i32, i32) {
    %c0_i32 = arith.constant 0 : i32
    %c0_i32_0 = arith.constant 0 : i32
    %c0_i32_1 = arith.constant 0 : i32
    return %c0_i32, %c0_i32_0 : i32, i32
  }
  func.func @transform_2(%arg0: i32) -> (i32, i32) {
    %c0_i32 = arith.constant 0 : i32
    %c0_i32_0 = arith.constant 0 : i32
    %c0_i32_1 = arith.constant 0 : i32
    return %c0_i32, %c0_i32_0 : i32, i32
  }
  func.func @transform_3(%arg0: i32) -> (i32, i32) {
    %c0_i32 = arith.constant 0 : i32
    %c0_i32_0 = arith.constant 0 : i32
    %c0_i32_1 = arith.constant 0 : i32
    return %c0_i32, %c0_i32_0 : i32, i32
  }
  func.func @transform_4(%arg0: i32) -> (i32, i32) {
    %c0_i32 = arith.constant 0 : i32
    %c0_i32_0 = arith.constant 0 : i32
    %c0_i32_1 = arith.constant 0 : i32
    return %c0_i32, %c0_i32_0 : i32, i32
  }
  func.func @transform_5(%arg0: i32) -> (i32, i32) {
    %c0_i32 = arith.constant 0 : i32
    %c0_i32_0 = arith.constant 0 : i32
    return %arg0, %c0_i32 : i32, i32
  }
}

</mosaic_0001>

<bundles_post_ra>
// kernel: mlpnet_modified_forward.1
= control target key start
LH: loop header
LB: loop body
LE: loop exit
PB: predicated region body
PF: predicated region fallthrough
CT: control target
= control target key end

     0   :  { %10 = vsyncpa [#allocation3], 0  ;;  %s10658_s0 = inlined_call_operand.vmem [shape: bf16[8,3072], index: 0, kind: input, shape index: {}]   ;;  %s10659_s1 = inlined_call_operand.hbm [shape: bf16[3072,512], index: 1, kind: input, shape index: {}]   ;;  %s10660_s2 = inlined_call_operand.hbm [shape: f32[1,512], index: 2, kind: input, shape index: {}]   ;;  %s10661_s3 = inlined_call_operand.vmem [shape: f32[512,10], index: 3, kind: input, shape index: {}]   ;;  %s10662_s4 = inlined_call_operand.hbm [shape: f32[1,10], index: 4, kind: input, shape index: {}]   ;;  %s10663_s5 = inlined_call_operand.hbm [shape: f32[8,10], index: 5, kind: output, shape index: {}]  }
   0x1   :  { %11 = vsyncpa [#allocation6], 0  ;;  %s33_s20 = sshll.u32 %s10660_s2, 4  ;;  %s34_s20 = int_to_ptr.hbm [resolvable:$true] %s33_s20 }
   0x2   :  { %12 = vsyncpa [#allocation4], 0  ;;  %s10169_s21 = smov [#allocation5]   ;;  %s19_s25 = sshll.u32 %s10659_s1, 4  ;;  %s20_s25 = int_to_ptr.hbm [resolvable:$true] %s19_s25 }
   0x3   :  { %s35_s22 = sshll.u32 %s10169_s21, 4  ;;  %s10170_s26 = smov [#allocation2]   ;;  %s36_s22 = int_to_ptr.vmem [resolvable:$true] %s35_s22 }
   0x4   :  { %38 = dma.hbm_to_vmem [thread:$0]  %s34_s20, 64, %s36_s22, [#allocation6]  }
   0x5   :  { %s21_s27 = sshll.u32 %s10170_s26, 4  ;;  %s10171_s28 = smov 256   ;;  %s22_s27 = int_to_ptr.vmem [resolvable:$true] %s21_s27 }
   0x6   :  { %s10172_s29 = smov 16   ;;  %s46_s2 = sshll.u32 %s10662_s4, 4  ;;  %s47_s2 = int_to_ptr.hbm [resolvable:$true] %s46_s2 }
   0x7   :  { %27 = dma.hbm_to_vmem [thread:$0]  %s20_s25, 98304, %s22_s27, [#allocation3], %s10171_s28, %s10171_s28, %s10172_s29  }
   0x8   :  { %s10173_s7 = smov [#allocation7]  }
   0x9   :  { %s48_s8 = sshll.u32 %s10173_s7, 4  ;;  %s49_s8 = int_to_ptr.vmem [resolvable:$true] %s48_s8 }
   0xa   :  { %51 = dma.hbm_to_vmem [thread:$0]  %s47_s2, 16, %s49_s8, [#allocation6]  }
   0xb   :  { %10163 = dma.done.wait [#allocation3], 98304  }
   0xc   :  { %10164 = vsyncadd [#allocation3], 4294868992 }
   0xd   :  { %10165 = dma.done.wait [#allocation6], 80  }
   0xe   :  { %10166 = vsyncadd [#allocation6], 4294967216  ;;  %v6325_v0 = vld [vmem:[#allocation2 + $0xe0] sm:$0xf]  ;;  %v9313_v1 = vld [vmem:[#allocation2 + $0xec] sm:$0xf0] }
   0xf   :  { %v6453_v2 = vld [vmem:[#allocation2 + $0x1e0] sm:$0xf]  ;;  %v6326_v3 = vor.u32 %v9313_v1, %v6325_v0  ;;  %v9345_v4 = vld [vmem:[#allocation2 + $0x1ec] sm:$0xf0]  ;;  %vm6179_vm0 = vcmask 80896   ;;  %s6200_s17 = sshll.u32 %s10663_s5, 4  ;;  %s6201_s17 = int_to_ptr.hbm [resolvable:$true] %s6200_s17 }
  0x10   :  { %v6581_v5 = vld [vmem:[#allocation2 + $0x2e0] sm:$0xf]  ;;  %v9377_v6 = vld [vmem:[#allocation2 + $0x2ec] sm:$0xf0]  ;;  %v6454_v7 = vor.u32 %v9345_v4, %v6453_v2 }
  0x11   :  { %v6582_v8 = vor.u32 %v9377_v6, %v6581_v5  ;;  %v6709_v9 = vld [vmem:[#allocation2 + $0x3e0] sm:$0xf]  ;;  %v9409_v10 = vld [vmem:[#allocation2 + $0x3ec] sm:$0xf0]  ;;  %4778 = vmatpush.bf16.msra.mxu0 %v6326_v3 }
  0x12   :  { %v6309_v11 = vld [vmem:[#allocation2 + $0xc0] sm:$0xf]  ;;  %v6710_v12 = vor.u32 %v9409_v10, %v6709_v9  ;;  %v9309_v13 = vld [vmem:[#allocation2 + $0xcc] sm:$0xf0]  ;;  %4791 = vmatpush.bf16.msra.mxu1 %v6454_v7 }
  0x13   :  { %v6437_v14 = vld [vmem:[#allocation2 + $0x1c0] sm:$0xf]  ;;  %v9341_v15 = vld [vmem:[#allocation2 + $0x1cc] sm:$0xf0]  ;;  %4804 = vmatpush.bf16.msra.mxu2 %v6582_v8  ;;  %v6310_v16 = vor.u32 %v9309_v13, %v6309_v11 }
  0x14   :  { %v6438_v17 = vor.u32 %v9341_v15, %v6437_v14  ;;  %v6565_v18 = vld [vmem:[#allocation2 + $0x2c0] sm:$0xf]  ;;  %v9373_v19 = vld [vmem:[#allocation2 + $0x2cc] sm:$0xf0]  ;;  %4817 = vmatpush.bf16.msra.mxu3 %v6710_v12 }
  0x15   :  { %v6693_v20 = vld [vmem:[#allocation2 + $0x3c0] sm:$0xf]  ;;  %v6566_v21 = vor.u32 %v9373_v19, %v6565_v18  ;;  %v9405_v22 = vld [vmem:[#allocation2 + $0x3cc] sm:$0xf0]  ;;  %4779 = vmatpush.bf16.msra.mxu0 %v6310_v16 }
  0x16   :  { %v6293_v23 = vld [vmem:[#allocation2 + $0xa0] sm:$0xf]  ;;  %v9305_v24 = vld [vmem:[#allocation2 + $0xac] sm:$0xf0]  ;;  %v6694_v25 = vor.u32 %v9405_v22, %v6693_v20  ;;  %4792 = vmatpush.bf16.msra.mxu1 %v6438_v17 }
  0x17   :  { %v6421_v26 = vld [vmem:[#allocation2 + $0x1a0] sm:$0xf]  ;;  %v9337_v27 = vld [vmem:[#allocation2 + $0x1ac] sm:$0xf0]  ;;  %v6294_v29 = vor.u32 %v9305_v24, %v6293_v23  ;;  %4805 = vmatpush.bf16.msra.mxu2 %v6566_v21 }
  0x18   :  { %v6549_v28 = vld [vmem:[#allocation2 + $0x2a0] sm:$0xf]  ;;  %v9369_v30 = vld [vmem:[#allocation2 + $0x2ac] sm:$0xf0]  ;;  %v6422_v33 = vor.u32 %v9337_v27, %v6421_v26  ;;  %4818 = vmatpush.bf16.msra.mxu3 %v6694_v25 }
  0x19   :  { %v6677_v31 = vld [vmem:[#allocation2 + $0x3a0] sm:$0xf]  ;;  %v9401_v32 = vld [vmem:[#allocation2 + $0x3ac] sm:$0xf0]  ;;  %v6550_v34 = vor.u32 %v9369_v30, %v6549_v28  ;;  %4780 = vmatpush.bf16.msra.mxu0 %v6294_v29 }
  0x1a   :  { %v6277_v35 = vld [vmem:[#allocation2 + $0x80] sm:$0xf]  ;;  %v9301_v36 = vld [vmem:[#allocation2 + $0x8c] sm:$0xf0]  ;;  %v6678_v38 = vor.u32 %v9401_v32, %v6677_v31  ;;  %4793 = vmatpush.bf16.msra.mxu1 %v6422_v33 }
  0x1b   :  { %v6405_v37 = vld [vmem:[#allocation2 + $0x180] sm:$0xf]  ;;  %v9333_v39 = vld [vmem:[#allocation2 + $0x18c] sm:$0xf0]  ;;  %v6278_v44 = vor.u32 %v9301_v36, %v6277_v35  ;;  %4806 = vmatpush.bf16.msra.mxu2 %v6550_v34 }
  0x1c   :  { %v6533_v40 = vld [vmem:[#allocation2 + $0x280] sm:$0xf]  ;;  %v9365_v41 = vld [vmem:[#allocation2 + $0x28c] sm:$0xf0]  ;;  %v6406_v45 = vor.u32 %v9333_v39, %v6405_v37  ;;  %4819 = vmatpush.bf16.msra.mxu3 %v6678_v38 }
  0x1d   :  { %v6661_v42 = vld [vmem:[#allocation2 + $0x380] sm:$0xf]  ;;  %v9397_v43 = vld [vmem:[#allocation2 + $0x38c] sm:$0xf0]  ;;  %v6534_v46 = vor.u32 %v9365_v41, %v6533_v40  ;;  %4781 = vmatpush.bf16.msra.mxu0 %v6278_v44 }
  0x1e   :  { %v6261_v47 = vld [vmem:[#allocation2 + $0x60] sm:$0xf]  ;;  %v9297_v48 = vld [vmem:[#allocation2 + $0x6c] sm:$0xf0]  ;;  %v6662_v50 = vor.u32 %v9397_v43, %v6661_v42  ;;  %4794 = vmatpush.bf16.msra.mxu1 %v6406_v45 }
  0x1f   :  { %v6389_v49 = vld [vmem:[#allocation2 + $0x160] sm:$0xf]  ;;  %v9329_v51 = vld [vmem:[#allocation2 + $0x16c] sm:$0xf0]  ;;  %v6262_v56 = vor.u32 %v9297_v48, %v6261_v47  ;;  %4807 = vmatpush.bf16.msra.mxu2 %v6534_v46 }
  0x20   :  { %v6517_v52 = vld [vmem:[#allocation2 + $0x260] sm:$0xf]  ;;  %v9361_v53 = vld [vmem:[#allocation2 + $0x26c] sm:$0xf0]  ;;  %v6390_v57 = vor.u32 %v9329_v51, %v6389_v49  ;;  %4820 = vmatpush.bf16.msra.mxu3 %v6662_v50 }
  0x21   :  { %v6645_v54 = vld [vmem:[#allocation2 + $0x360] sm:$0xf]  ;;  %v9393_v55 = vld [vmem:[#allocation2 + $0x36c] sm:$0xf0]  ;;  %v6518_v58 = vor.u32 %v9361_v53, %v6517_v52  ;;  %4782 = vmatpush.bf16.msra.mxu0 %v6262_v56 }
  0x22   :  { %v6245_v59 = vld [vmem:[#allocation2 + $0x40] sm:$0xf]  ;;  %v9293_v60 = vld [vmem:[#allocation2 + $0x4c] sm:$0xf0]  ;;  %v6646_v62 = vor.u32 %v9393_v55, %v6645_v54  ;;  %4795 = vmatpush.bf16.msra.mxu1 %v6390_v57 }
  0x23   :  { %v6373_v61 = vld [vmem:[#allocation2 + $0x140] sm:$0xf]  ;;  %v9325_v63 = vld [vmem:[#allocation2 + $0x14c] sm:$0xf0]  ;;  %v6246_v4 = vor.u32 %v9293_v60, %v6245_v59  ;;  %4808 = vmatpush.bf16.msra.mxu2 %v6518_v58 }
  0x24   :  { %v6501_v0 = vld [vmem:[#allocation2 + $0x240] sm:$0xf]  ;;  %v9357_v1 = vld [vmem:[#allocation2 + $0x24c] sm:$0xf0]  ;;  %v6374_v5 = vor.u32 %v9325_v63, %v6373_v61  ;;  %4821 = vmatpush.bf16.msra.mxu3 %v6646_v62 }
  0x25   :  { %v6629_v2 = vld [vmem:[#allocation2 + $0x340] sm:$0xf]  ;;  %v9389_v3 = vld [vmem:[#allocation2 + $0x34c] sm:$0xf0]  ;;  %v6502_v6 = vor.u32 %v9357_v1, %v6501_v0  ;;  %4783 = vmatpush.bf16.msra.mxu0 %v6246_v4 }
  0x26   :  { %v6229_v7 = vld [vmem:[#allocation2 + $0x20] sm:$0xf]  ;;  %v9289_v8 = vld [vmem:[#allocation2 + $0x2c] sm:$0xf0]  ;;  %v6630_v10 = vor.u32 %v9389_v3, %v6629_v2  ;;  %4796 = vmatpush.bf16.msra.mxu1 %v6374_v5  ;;  %v65_v2 = vld [vmem:[%s10658_s0 + $0x8] sm:$0xff] }
  0x27   :  { %v6357_v9 = vld [vmem:[#allocation2 + $0x120] sm:$0xf]  ;;  %v9321_v11 = vld [vmem:[#allocation2 + $0x12c] sm:$0xf0]  ;;  %v6230_v16 = vor.u32 %v9289_v8, %v6229_v7  ;;  %4809 = vmatpush.bf16.msra.mxu2 %v6502_v6  ;;  %v868_v8 = vunpack.c.l.b16 %v65_v2 }
  0x28   :  { %v6485_v12 = vld [vmem:[#allocation2 + $0x220] sm:$0xf]  ;;  %v9353_v13 = vld [vmem:[#allocation2 + $0x22c] sm:$0xf0]  ;;  %v6358_v19 = vor.u32 %v9321_v11, %v6357_v9  ;;  %4822 = vmatpush.bf16.msra.mxu3 %v6630_v10  ;;  %v869_v10 = vunpack.c.h.b16 %v65_v2 }
  0x29   :  { %v6613_v14 = vld [vmem:[#allocation2 + $0x320] sm:$0xf]  ;;  %v9385_v15 = vld [vmem:[#allocation2 + $0x32c] sm:$0xf0]  ;;  %v6486_v20 = vor.u32 %v9353_v13, %v6485_v12  ;;  %4784 = vmatpush.bf16.msra.mxu0 %v6230_v16 }
  0x2a   :  { %v6213_v17 = vld [vmem:[#allocation2] sm:$0xf]  ;;  %v9285_v18 = vld [vmem:[#allocation2 + $0xc] sm:$0xf0]  ;;  %v6614_v24 = vor.u32 %v9385_v15, %v6613_v14  ;;  %4797 = vmatpush.bf16.msra.mxu1 %v6358_v19 }
  0x2b   :  { %v6341_v21 = vld [vmem:[#allocation2 + $0x100] sm:$0xf]  ;;  %v9317_v22 = vld [vmem:[#allocation2 + $0x10c] sm:$0xf0]  ;;  %v6214_v31 = vor.u32 %v9285_v18, %v6213_v17  ;;  %4810 = vmatpush.bf16.msra.mxu2 %v6486_v20  ;;  %v10220_v18 = vpack.c.b16 %v868_v8, %v868_v8  ;;  %v10224_v20 = vpack.c.b16 %v869_v10, %v869_v10 }
  0x2c   :  { %v6469_v23 = vld [vmem:[#allocation2 + $0x200] sm:$0xf]  ;;  %v9349_v25 = vld [vmem:[#allocation2 + $0x20c] sm:$0xf0]  ;;  %v6342_v35 = vor.u32 %v9317_v22, %v6341_v21  ;;  %4823 = vmatpush.bf16.msra.mxu3 %v6614_v24 }
  0x2d   :  { %v6597_v26 = vld [vmem:[#allocation2 + $0x300] sm:$0xf]  ;;  %v9381_v27 = vld [vmem:[#allocation2 + $0x30c] sm:$0xf0]  ;;  %v6470_v36 = vor.u32 %v9349_v25, %v6469_v23  ;;  %4785 = vmatpush.bf16.msra.mxu0 %v6214_v31 }
  0x2e   :  { %v6837_v28 = vld [vmem:[#allocation2 + $0x4e0] sm:$0xf]  ;;  %v9441_v29 = vld [vmem:[#allocation2 + $0x4ec] sm:$0xf0]  ;;  %v6598_v39 = vor.u32 %v9381_v27, %v6597_v26  ;;  %4798 = vmatpush.bf16.msra.mxu1 %v6342_v35 }
  0x2f   :  { %v6965_v30 = vld [vmem:[#allocation2 + $0x5e0] sm:$0xf]  ;;  %v9473_v32 = vld [vmem:[#allocation2 + $0x5ec] sm:$0xf0]  ;;  %v6838_v40 = vor.u32 %v9441_v29, %v6837_v28  ;;  %4811 = vmatpush.bf16.msra.mxu2 %v6470_v36 }
  0x30   :  { %v7093_v33 = vld [vmem:[#allocation2 + $0x6e0] sm:$0xf]  ;;  %v9505_v34 = vld [vmem:[#allocation2 + $0x6ec] sm:$0xf0]  ;;  %v6966_v41 = vor.u32 %v9473_v32, %v6965_v30  ;;  %4824 = vmatpush.bf16.msra.mxu3 %v6598_v39 }
  0x31   :  { %v7221_v37 = vld [vmem:[#allocation2 + $0x7e0] sm:$0xf]  ;;  %v9537_v38 = vld [vmem:[#allocation2 + $0x7ec] sm:$0xf0]  ;;  %v7094_v42 = vor.u32 %v9505_v34, %v7093_v33  ;;  %4830 = vmatpush.bf16.msrb.mxu0 %v6838_v40 }
  0x32   :  { %v6821_v43 = vld [vmem:[#allocation2 + $0x4c0] sm:$0xf]  ;;  %v9437_v44 = vld [vmem:[#allocation2 + $0x4cc] sm:$0xf0]  ;;  %v7222_v46 = vor.u32 %v9537_v38, %v7221_v37  ;;  %4843 = vmatpush.bf16.msrb.mxu1 %v6966_v41  ;;  %4812 = vmatmul.bf16.vlgmr.msra.gmra.mxu2 %v10220_v18 }
  0x33   :  { %v6949_v45 = vld [vmem:[#allocation2 + $0x5c0] sm:$0xf]  ;;  %v9469_v47 = vld [vmem:[#allocation2 + $0x5cc] sm:$0xf0]  ;;  %v6822_v52 = vor.u32 %v9437_v44, %v6821_v43  ;;  %4856 = vmatpush.bf16.msrb.mxu2 %v7094_v42  ;;  %4825 = vmatmul.bf16.vlgmr.msra.gmra.mxu3 %v10224_v20 }
  0x34   :  { %v7077_v48 = vld [vmem:[#allocation2 + $0x6c0] sm:$0xf]  ;;  %v9501_v49 = vld [vmem:[#allocation2 + $0x6cc] sm:$0xf0]  ;;  %v6950_v54 = vor.u32 %v9469_v47, %v6949_v45  ;;  %4869 = vmatpush.bf16.msrb.mxu3 %v7222_v46 }
  0x35   :  { %v7205_v50 = vld [vmem:[#allocation2 + $0x7c0] sm:$0xf]  ;;  %v9533_v51 = vld [vmem:[#allocation2 + $0x7cc] sm:$0xf0]  ;;  %v7078_v55 = vor.u32 %v9501_v49, %v7077_v48  ;;  %4831 = vmatpush.bf16.msrb.mxu0 %v6822_v52 }
  0x36   :  { %v6805_v53 = vld [vmem:[#allocation2 + $0x4a0] sm:$0xf]  ;;  %v9433_v56 = vld [vmem:[#allocation2 + $0x4ac] sm:$0xf0]  ;;  %v7206_v59 = vor.u32 %v9533_v51, %v7205_v50  ;;  %4844 = vmatpush.bf16.msrb.mxu1 %v6950_v54 }
  0x37   :  { %v6933_v57 = vld [vmem:[#allocation2 + $0x5a0] sm:$0xf]  ;;  %v9465_v58 = vld [vmem:[#allocation2 + $0x5ac] sm:$0xf0]  ;;  %v6806_v0 = vor.u32 %v9433_v56, %v6805_v53  ;;  %4857 = vmatpush.bf16.msrb.mxu2 %v7078_v55 }
  0x38   :  { %v7061_v60 = vld [vmem:[#allocation2 + $0x6a0] sm:$0xf]  ;;  %v9497_v61 = vld [vmem:[#allocation2 + $0x6ac] sm:$0xf0]  ;;  %v6934_v1 = vor.u32 %v9465_v58, %v6933_v57  ;;  %4870 = vmatpush.bf16.msrb.mxu3 %v7206_v59 }
  0x39   :  { %v7189_v62 = vld [vmem:[#allocation2 + $0x7a0] sm:$0xf]  ;;  %v9529_v63 = vld [vmem:[#allocation2 + $0x7ac] sm:$0xf0]  ;;  %v7062_v4 = vor.u32 %v9497_v61, %v7061_v60  ;;  %4832 = vmatpush.bf16.msrb.mxu0 %v6806_v0 }
  0x3a   :  { %v64_v3 = vld [vmem:[%s10658_s0] sm:$0xff]  ;;  %v9429_v6 = vld [vmem:[#allocation2 + $0x48c] sm:$0xf0]  ;;  %v7190_v11 = vor.u32 %v9529_v63, %v7189_v62  ;;  %4845 = vmatpush.bf16.msrb.mxu1 %v6934_v1 }
  0x3b   :  { %v6789_v5 = vld [vmem:[#allocation2 + $0x480] sm:$0xf]  ;;  %v866_v9 = vunpack.c.l.b16 %v64_v3  ;;  %v9461_v12 = vld [vmem:[#allocation2 + $0x58c] sm:$0xf0]  ;;  %v867_v15 = vunpack.c.h.b16 %v64_v3  ;;  %4858 = vmatpush.bf16.msrb.mxu2 %v7062_v4  ;;  %v67_v3 = vld [vmem:[%s10658_s0 + $0x18] sm:$0xff] }
  0x3c   :  { %v6917_v7 = vld [vmem:[#allocation2 + $0x580] sm:$0xf]  ;;  %v9493_v14 = vld [vmem:[#allocation2 + $0x68c] sm:$0xf0]  ;;  %v6790_v21 = vor.u32 %v9429_v6, %v6789_v5  ;;  %4871 = vmatpush.bf16.msrb.mxu3 %v7190_v11 }
  0x3d   :  { %v7045_v13 = vld [vmem:[#allocation2 + $0x680] sm:$0xf]  ;;  %v9525_v17 = vld [vmem:[#allocation2 + $0x78c] sm:$0xf0]  ;;  %v10222_v19 = vpack.c.b16 %v866_v9, %v866_v9  ;;  %v10226_v22 = vpack.c.b16 %v867_v15, %v867_v15  ;;  %v6918_v23 = vor.u32 %v9461_v12, %v6917_v7  ;;  %v872_v15 = vunpack.c.l.b16 %v67_v3 }
  0x3e   :  { %v7173_v16 = vld [vmem:[#allocation2 + $0x780] sm:$0xf]  ;;  %v7046_v24 = vor.u32 %v9493_v14, %v7045_v13  ;;  %v9425_v26 = vld [vmem:[#allocation2 + $0x46c] sm:$0xf0]  ;;  %4833 = vmatpush.bf16.msrb.mxu0 %v6790_v21 }
  0x3f   :  { %v6773_v25 = vld [vmem:[#allocation2 + $0x460] sm:$0xf]  ;;  %v7174_v28 = vor.u32 %v9525_v17, %v7173_v16  ;;  %v9457_v29 = vld [vmem:[#allocation2 + $0x56c] sm:$0xf0]  ;;  %4786 = vmatmul.bf16.vlgmr.msra.gmra.mxu0 %v10222_v19  ;;  %4799 = vmatmul.bf16.vlgmr.msra.gmra.mxu1 %v10226_v22 }
  0x40   :  { %v6901_v27 = vld [vmem:[#allocation2 + $0x560] sm:$0xf]  ;;  %v9489_v31 = vld [vmem:[#allocation2 + $0x66c] sm:$0xf0]  ;;  %v6774_v34 = vor.u32 %v9425_v26, %v6773_v25  ;;  %4846 = vmatpush.bf16.msrb.mxu1 %v6918_v23  ;;  %4859 = vmatpush.bf16.msrb.mxu2 %v7046_v24  ;;  %v873_v25 = vunpack.c.h.b16 %v67_v3 }
  0x41   :  { %v7029_v30 = vld [vmem:[#allocation2 + $0x660] sm:$0xf]  ;;  %v9521_v33 = vld [vmem:[#allocation2 + $0x76c] sm:$0xf0]  ;;  %v6902_v35 = vor.u32 %v9457_v29, %v6901_v27  ;;  %4872 = vmatpush.bf16.msrb.mxu3 %v7174_v28 }
  0x42   :  { %v7157_v32 = vld [vmem:[#allocation2 + $0x760] sm:$0xf]  ;;  %v7030_v36 = vor.u32 %v9489_v31, %v7029_v30  ;;  %v9421_v38 = vld [vmem:[#allocation2 + $0x44c] sm:$0xf0]  ;;  %4834 = vmatpush.bf16.msrb.mxu0 %v6774_v34 }
  0x43   :  { %v6757_v37 = vld [vmem:[#allocation2 + $0x440] sm:$0xf]  ;;  %v7158_v40 = vor.u32 %v9521_v33, %v7157_v32  ;;  %v9453_v41 = vld [vmem:[#allocation2 + $0x54c] sm:$0xf0] }
  0x44   :  { %v6885_v39 = vld [vmem:[#allocation2 + $0x540] sm:$0xf]  ;;  %v9485_v43 = vld [vmem:[#allocation2 + $0x64c] sm:$0xf0]  ;;  %v6758_v46 = vor.u32 %v9421_v38, %v6757_v37  ;;  %4847 = vmatpush.bf16.msrb.mxu1 %v6902_v35  ;;  %4860 = vmatpush.bf16.msrb.mxu2 %v7030_v36  ;;  %v10238_v38 = vpack.c.b16 %v872_v15, %v872_v15 }
  0x45   :  { %v7013_v42 = vld [vmem:[#allocation2 + $0x640] sm:$0xf]  ;;  %v9517_v45 = vld [vmem:[#allocation2 + $0x74c] sm:$0xf0]  ;;  %v6886_v47 = vor.u32 %v9453_v41, %v6885_v39  ;;  %4873 = vmatpush.bf16.msrb.mxu3 %v7158_v40 }
  0x46   :  { %v7141_v44 = vld [vmem:[#allocation2 + $0x740] sm:$0xf]  ;;  %v7014_v48 = vor.u32 %v9485_v43, %v7013_v42  ;;  %v9417_v50 = vld [vmem:[#allocation2 + $0x42c] sm:$0xf0]  ;;  %4835 = vmatpush.bf16.msrb.mxu0 %v6758_v46  ;;  %v10242_v42 = vpack.c.b16 %v873_v25, %v873_v25 }
  0x47   :  { %v6741_v49 = vld [vmem:[#allocation2 + $0x420] sm:$0xf]  ;;  %v7142_v52 = vor.u32 %v9517_v45, %v7141_v44  ;;  %v9449_v53 = vld [vmem:[#allocation2 + $0x52c] sm:$0xf0] }
  0x48   :  { %v6869_v51 = vld [vmem:[#allocation2 + $0x520] sm:$0xf]  ;;  %v9481_v55 = vld [vmem:[#allocation2 + $0x62c] sm:$0xf0]  ;;  %v6742_v59 = vor.u32 %v9417_v50, %v6741_v49  ;;  %4848 = vmatpush.bf16.msrb.mxu1 %v6886_v47  ;;  %4861 = vmatpush.bf16.msrb.mxu2 %v7014_v48 }
  0x49   :  { %v6997_v54 = vld [vmem:[#allocation2 + $0x620] sm:$0xf]  ;;  %v9513_v57 = vld [vmem:[#allocation2 + $0x72c] sm:$0xf0]  ;;  %v6870_v63 = vor.u32 %v9449_v53, %v6869_v51  ;;  %4874 = vmatpush.bf16.msrb.mxu3 %v7142_v52 }
  0x4a   :  { %v7125_v56 = vld [vmem:[#allocation2 + $0x720] sm:$0xf]  ;;  %v9413_v60 = vld [vmem:[#allocation2 + $0x40c] sm:$0xf0]  ;;  %v6998_v0 = vor.u32 %v9481_v55, %v6997_v54  ;;  %4836 = vmatpush.bf16.msrb.mxu0 %v6742_v59 }
  0x4b   :  { %v6725_v58 = vld [vmem:[#allocation2 + $0x400] sm:$0xf]  ;;  %v9445_v62 = vld [vmem:[#allocation2 + $0x50c] sm:$0xf0]  ;;  %v7126_v4 = vor.u32 %v9513_v57, %v7125_v56 }
  0x4c   :  { %v6853_v61 = vld [vmem:[#allocation2 + $0x500] sm:$0xf]  ;;  %v9477_v2 = vld [vmem:[#allocation2 + $0x60c] sm:$0xf0]  ;;  %v6726_v11 = vor.u32 %v9413_v60, %v6725_v58  ;;  %4849 = vmatpush.bf16.msrb.mxu1 %v6870_v63  ;;  %4862 = vmatpush.bf16.msrb.mxu2 %v6998_v0 }
  0x4d   :  { %v6981_v1 = vld [vmem:[#allocation2 + $0x600] sm:$0xf]  ;;  %v9509_v6 = vld [vmem:[#allocation2 + $0x70c] sm:$0xf0]  ;;  %v6854_v16 = vor.u32 %v9445_v62, %v6853_v61  ;;  %4875 = vmatpush.bf16.msrb.mxu3 %v7126_v4 }
  0x4e   :  { %v7109_v5 = vld [vmem:[#allocation2 + $0x700] sm:$0xf]  ;;  %v66_v7 = vld [vmem:[%s10658_s0 + $0x10] sm:$0xff]  ;;  %v6982_v17 = vor.u32 %v9477_v2, %v6981_v1  ;;  %4837 = vmatpush.bf16.msrb.mxu0 %v6726_v11 }
  0x4f   :  { %v7349_v8 = vld [vmem:[#allocation2 + $0x8e0] sm:$0xf]  ;;  %v9569_v9 = vld [vmem:[#allocation2 + $0x8ec] sm:$0xf0]  ;;  %v870_v24 = vunpack.c.l.b16 %v66_v7  ;;  %v7110_v26 = vor.u32 %v9509_v6, %v7109_v5  ;;  %v871_v28 = vunpack.c.h.b16 %v66_v7 }
  0x50   :  { %v7477_v10 = vld [vmem:[#allocation2 + $0x9e0] sm:$0xf]  ;;  %v9601_v12 = vld [vmem:[#allocation2 + $0x9ec] sm:$0xf0]  ;;  %v7350_v27 = vor.u32 %v9569_v9, %v7349_v8  ;;  %4850 = vmatpush.bf16.msrb.mxu1 %v6854_v16  ;;  %4863 = vmatpush.bf16.msrb.mxu2 %v6982_v17 }
  0x51   :  { %v7605_v13 = vld [vmem:[#allocation2 + $0xae0] sm:$0xf]  ;;  %v9633_v14 = vld [vmem:[#allocation2 + $0xaec] sm:$0xf0]  ;;  %v7478_v29 = vor.u32 %v9601_v12, %v7477_v10  ;;  %v10240_v41 = vpack.c.b16 %v870_v24, %v870_v24  ;;  %4876 = vmatpush.bf16.msrb.mxu3 %v7110_v26  ;;  %v10244_v44 = vpack.c.b16 %v871_v28, %v871_v28 }
  0x52   :  { %v7733_v21 = vld [vmem:[#allocation2 + $0xbe0] sm:$0xf]  ;;  %v9665_v23 = vld [vmem:[#allocation2 + $0xbec] sm:$0xf0]  ;;  %v7606_v30 = vor.u32 %v9633_v14, %v7605_v13  ;;  %4882 = vmatpush.bf16.msra.mxu0 %v7350_v27 }
  0x53   :  { %v7333_v31 = vld [vmem:[#allocation2 + $0x8c0] sm:$0xf]  ;;  %v9565_v32 = vld [vmem:[#allocation2 + $0x8cc] sm:$0xf0]  ;;  %v7734_v34 = vor.u32 %v9665_v23, %v7733_v21  ;;  %4864 = vmatmul.bf16.vlgmr.msrb.gmra.mxu2 %v10238_v38  ;;  %4838 = vmatmul.bf16.vlgmr.msrb.gmra.mxu0 %v10240_v41 }
  0x54   :  { %v7461_v33 = vld [vmem:[#allocation2 + $0x9c0] sm:$0xf]  ;;  %v9597_v35 = vld [vmem:[#allocation2 + $0x9cc] sm:$0xf0]  ;;  %v7334_v43 = vor.u32 %v9565_v32, %v7333_v31  ;;  %4895 = vmatpush.bf16.msra.mxu1 %v7478_v29  ;;  %4908 = vmatpush.bf16.msra.mxu2 %v7606_v30 }
  0x55   :  { %v7589_v36 = vld [vmem:[#allocation2 + $0xac0] sm:$0xf]  ;;  %v9629_v37 = vld [vmem:[#allocation2 + $0xacc] sm:$0xf0]  ;;  %v7462_v45 = vor.u32 %v9597_v35, %v7461_v33  ;;  %4921 = vmatpush.bf16.msra.mxu3 %v7734_v34  ;;  %4851 = vmatmul.bf16.vlgmr.msrb.gmra.mxu1 %v10244_v44 }
  0x56   :  { %v7717_v39 = vld [vmem:[#allocation2 + $0xbc0] sm:$0xf]  ;;  %v9661_v40 = vld [vmem:[#allocation2 + $0xbcc] sm:$0xf0]  ;;  %v7590_v46 = vor.u32 %v9629_v37, %v7589_v36  ;;  %4877 = vmatmul.bf16.vlgmr.msrb.gmra.mxu3 %v10242_v42  ;;  %4883 = vmatpush.bf16.msra.mxu0 %v7334_v43 }
  0x57   :  { %v7317_v47 = vld [vmem:[#allocation2 + $0x8a0] sm:$0xf]  ;;  %v9561_v48 = vld [vmem:[#allocation2 + $0x8ac] sm:$0xf0]  ;;  %v7718_v50 = vor.u32 %v9661_v40, %v7717_v39 }
  0x58   :  { %v7445_v49 = vld [vmem:[#allocation2 + $0x9a0] sm:$0xf]  ;;  %v9593_v51 = vld [vmem:[#allocation2 + $0x9ac] sm:$0xf0]  ;;  %v7318_v56 = vor.u32 %v9561_v48, %v7317_v47  ;;  %4896 = vmatpush.bf16.msra.mxu1 %v7462_v45  ;;  %4909 = vmatpush.bf16.msra.mxu2 %v7590_v46 }
  0x59   :  { %v7573_v52 = vld [vmem:[#allocation2 + $0xaa0] sm:$0xf]  ;;  %v9625_v53 = vld [vmem:[#allocation2 + $0xaac] sm:$0xf0]  ;;  %v7446_v57 = vor.u32 %v9593_v51, %v7445_v49  ;;  %4922 = vmatpush.bf16.msra.mxu3 %v7718_v50 }
  0x5a   :  { %v7701_v54 = vld [vmem:[#allocation2 + $0xba0] sm:$0xf]  ;;  %v9657_v55 = vld [vmem:[#allocation2 + $0xbac] sm:$0xf0]  ;;  %v7574_v58 = vor.u32 %v9625_v53, %v7573_v52  ;;  %4884 = vmatpush.bf16.msra.mxu0 %v7318_v56 }
  0x5b   :  { %v7301_v59 = vld [vmem:[#allocation2 + $0x880] sm:$0xf]  ;;  %v9557_v60 = vld [vmem:[#allocation2 + $0x88c] sm:$0xf0]  ;;  %v7702_v62 = vor.u32 %v9657_v55, %v7701_v54 }
  0x5c   :  { %v7429_v61 = vld [vmem:[#allocation2 + $0x980] sm:$0xf]  ;;  %v9589_v63 = vld [vmem:[#allocation2 + $0x98c] sm:$0xf0]  ;;  %v7302_v4 = vor.u32 %v9557_v60, %v7301_v59  ;;  %4897 = vmatpush.bf16.msra.mxu1 %v7446_v57  ;;  %4910 = vmatpush.bf16.msra.mxu2 %v7574_v58 }
  0x5d   :  { %v7557_v0 = vld [vmem:[#allocation2 + $0xa80] sm:$0xf]  ;;  %v9621_v1 = vld [vmem:[#allocation2 + $0xa8c] sm:$0xf0]  ;;  %v7430_v5 = vor.u32 %v9589_v63, %v7429_v61  ;;  %4923 = vmatpush.bf16.msra.mxu3 %v7702_v62  ;;  %v69_v61 = vld [vmem:[%s10658_s0 + $0x28] sm:$0xff] }
  0x5e   :  { %v7685_v2 = vld [vmem:[#allocation2 + $0xb80] sm:$0xf]  ;;  %v9653_v3 = vld [vmem:[#allocation2 + $0xb8c] sm:$0xf0]  ;;  %v7558_v6 = vor.u32 %v9621_v1, %v7557_v0  ;;  %4885 = vmatpush.bf16.msra.mxu0 %v7302_v4 }
  0x5f   :  { %v7285_v7 = vld [vmem:[#allocation2 + $0x860] sm:$0xf]  ;;  %v9553_v8 = vld [vmem:[#allocation2 + $0x86c] sm:$0xf0]  ;;  %v7686_v10 = vor.u32 %v9653_v3, %v7685_v2 }
  0x60   :  { %v7413_v9 = vld [vmem:[#allocation2 + $0x960] sm:$0xf]  ;;  %v9585_v11 = vld [vmem:[#allocation2 + $0x96c] sm:$0xf0]  ;;  %v7286_v16 = vor.u32 %v9553_v8, %v7285_v7  ;;  %4898 = vmatpush.bf16.msra.mxu1 %v7430_v5  ;;  %4911 = vmatpush.bf16.msra.mxu2 %v7558_v6 }
  0x61   :  { %v7541_v12 = vld [vmem:[#allocation2 + $0xa60] sm:$0xf]  ;;  %v9617_v13 = vld [vmem:[#allocation2 + $0xa6c] sm:$0xf0]  ;;  %v7414_v17 = vor.u32 %v9585_v11, %v7413_v9  ;;  %4924 = vmatpush.bf16.msra.mxu3 %v7686_v10  ;;  %v876_v10 = vunpack.c.l.b16 %v69_v61 }
  0x62   :  { %v7669_v14 = vld [vmem:[#allocation2 + $0xb60] sm:$0xf]  ;;  %v9649_v15 = vld [vmem:[#allocation2 + $0xb6c] sm:$0xf0]  ;;  %v7542_v21 = vor.u32 %v9617_v13, %v7541_v12  ;;  %4886 = vmatpush.bf16.msra.mxu0 %v7286_v16 }
  0x63   :  { %v7269_v23 = vld [vmem:[#allocation2 + $0x840] sm:$0xf]  ;;  %v9549_v24 = vld [vmem:[#allocation2 + $0x84c] sm:$0xf0]  ;;  %v7670_v26 = vor.u32 %v9649_v15, %v7669_v14  ;;  %v877_v14 = vunpack.c.h.b16 %v69_v61 }
  0x64   :  { %v7397_v25 = vld [vmem:[#allocation2 + $0x940] sm:$0xf]  ;;  %v9581_v27 = vld [vmem:[#allocation2 + $0x94c] sm:$0xf0]  ;;  %v7270_v32 = vor.u32 %v9549_v24, %v7269_v23  ;;  %4899 = vmatpush.bf16.msra.mxu1 %v7414_v17  ;;  %4912 = vmatpush.bf16.msra.mxu2 %v7542_v21 }
  0x65   :  { %v7525_v28 = vld [vmem:[#allocation2 + $0xa40] sm:$0xf]  ;;  %v9613_v29 = vld [vmem:[#allocation2 + $0xa4c] sm:$0xf0]  ;;  %v7398_v34 = vor.u32 %v9581_v27, %v7397_v25  ;;  %4925 = vmatpush.bf16.msra.mxu3 %v7670_v26 }
  0x66   :  { %v7653_v30 = vld [vmem:[#allocation2 + $0xb40] sm:$0xf]  ;;  %v9645_v31 = vld [vmem:[#allocation2 + $0xb4c] sm:$0xf0]  ;;  %v7526_v35 = vor.u32 %v9613_v29, %v7525_v28  ;;  %4887 = vmatpush.bf16.msra.mxu0 %v7270_v32  ;;  %v10258_v29 = vpack.c.b16 %v876_v10, %v876_v10 }
  0x67   :  { %v7253_v33 = vld [vmem:[#allocation2 + $0x820] sm:$0xf]  ;;  %v9545_v36 = vld [vmem:[#allocation2 + $0x82c] sm:$0xf0]  ;;  %v7654_v40 = vor.u32 %v9645_v31, %v7653_v30 }
  0x68   :  { %v7381_v37 = vld [vmem:[#allocation2 + $0x920] sm:$0xf]  ;;  %v9577_v39 = vld [vmem:[#allocation2 + $0x92c] sm:$0xf0]  ;;  %v7254_v49 = vor.u32 %v9545_v36, %v7253_v33  ;;  %4900 = vmatpush.bf16.msra.mxu1 %v7398_v34  ;;  %4913 = vmatpush.bf16.msra.mxu2 %v7526_v35  ;;  %v10262_v33 = vpack.c.b16 %v877_v14, %v877_v14 }
  0x69   :  { %v7509_v43 = vld [vmem:[#allocation2 + $0xa20] sm:$0xf]  ;;  %v9609_v45 = vld [vmem:[#allocation2 + $0xa2c] sm:$0xf0]  ;;  %v7382_v53 = vor.u32 %v9577_v39, %v7381_v37  ;;  %4926 = vmatpush.bf16.msra.mxu3 %v7654_v40 }
  0x6a   :  { %v7637_v46 = vld [vmem:[#allocation2 + $0xb20] sm:$0xf]  ;;  %v9641_v47 = vld [vmem:[#allocation2 + $0xb2c] sm:$0xf0]  ;;  %v7510_v54 = vor.u32 %v9609_v45, %v7509_v43  ;;  %4888 = vmatpush.bf16.msra.mxu0 %v7254_v49 }
  0x6b   :  { %v7237_v48 = vld [vmem:[#allocation2 + $0x800] sm:$0xf]  ;;  %v9541_v50 = vld [vmem:[#allocation2 + $0x80c] sm:$0xf0]  ;;  %v7638_v58 = vor.u32 %v9641_v47, %v7637_v46 }
  0x6c   :  { %v7365_v51 = vld [vmem:[#allocation2 + $0x900] sm:$0xf]  ;;  %v9573_v52 = vld [vmem:[#allocation2 + $0x90c] sm:$0xf0]  ;;  %v7238_v1 = vor.u32 %v9541_v50, %v7237_v48  ;;  %4901 = vmatpush.bf16.msra.mxu1 %v7382_v53  ;;  %4914 = vmatpush.bf16.msra.mxu2 %v7510_v54 }
  0x6d   :  { %v7493_v55 = vld [vmem:[#allocation2 + $0xa00] sm:$0xf]  ;;  %v9605_v56 = vld [vmem:[#allocation2 + $0xa0c] sm:$0xf0]  ;;  %v7366_v6 = vor.u32 %v9573_v52, %v7365_v51  ;;  %4927 = vmatpush.bf16.msra.mxu3 %v7638_v58 }
  0x6e   :  { %v68_v57 = vld [vmem:[%s10658_s0 + $0x20] sm:$0xff]  ;;  %v9637_v60 = vld [vmem:[#allocation2 + $0xb0c] sm:$0xf0]  ;;  %v7494_v7 = vor.u32 %v9605_v56, %v7493_v55  ;;  %4889 = vmatpush.bf16.msra.mxu0 %v7238_v1 }
  0x6f   :  { %v7621_v59 = vld [vmem:[#allocation2 + $0xb00] sm:$0xf]  ;;  %v9697_v63 = vld [vmem:[#allocation2 + $0xcec] sm:$0xf0]  ;;  %v874_v5 = vunpack.c.l.b16 %v68_v57  ;;  %v875_v11 = vunpack.c.h.b16 %v68_v57 }
  0x70   :  { %v7861_v62 = vld [vmem:[#allocation2 + $0xce0] sm:$0xf]  ;;  %v9729_v2 = vld [vmem:[#allocation2 + $0xdec] sm:$0xf0]  ;;  %v7622_v12 = vor.u32 %v9637_v60, %v7621_v59  ;;  %4902 = vmatpush.bf16.msra.mxu1 %v7366_v6  ;;  %4915 = vmatpush.bf16.msra.mxu2 %v7494_v7 }
  0x71   :  { %v7989_v0 = vld [vmem:[#allocation2 + $0xde0] sm:$0xf]  ;;  %v9761_v4 = vld [vmem:[#allocation2 + $0xeec] sm:$0xf0]  ;;  %v7862_v13 = vor.u32 %v9697_v63, %v7861_v62  ;;  %v10256_v25 = vpack.c.b16 %v874_v5, %v874_v5  ;;  %v10260_v30 = vpack.c.b16 %v875_v11, %v875_v11 }
  0x72   :  { %v8117_v3 = vld [vmem:[#allocation2 + $0xee0] sm:$0xf]  ;;  %v9793_v9 = vld [vmem:[#allocation2 + $0xfec] sm:$0xf0]  ;;  %v7990_v15 = vor.u32 %v9729_v2, %v7989_v0  ;;  %4928 = vmatpush.bf16.msra.mxu3 %v7622_v12 }
  0x73   :  { %v8245_v8 = vld [vmem:[#allocation2 + $0xfe0] sm:$0xf]  ;;  %v8118_v16 = vor.u32 %v9761_v4, %v8117_v3  ;;  %v9693_v21 = vld [vmem:[#allocation2 + $0xccc] sm:$0xf0]  ;;  %4934 = vmatpush.bf16.msrb.mxu0 %v7862_v13  ;;  %4916 = vmatmul.bf16.vlgmr.msra.gmra.mxu2 %v10258_v29 }
  0x74   :  { %v7845_v17 = vld [vmem:[#allocation2 + $0xcc0] sm:$0xf]  ;;  %v8246_v24 = vor.u32 %v9793_v9, %v8245_v8  ;;  %v9725_v26 = vld [vmem:[#allocation2 + $0xdcc] sm:$0xf0]  ;;  %4947 = vmatpush.bf16.msrb.mxu1 %v7990_v15  ;;  %4890 = vmatmul.bf16.vlgmr.msra.gmra.mxu0 %v10256_v25 }
  0x75   :  { %v7973_v23 = vld [vmem:[#allocation2 + $0xdc0] sm:$0xf]  ;;  %v9757_v28 = vld [vmem:[#allocation2 + $0xecc] sm:$0xf0]  ;;  %v7846_v34 = vor.u32 %v9693_v21, %v7845_v17  ;;  %4960 = vmatpush.bf16.msrb.mxu2 %v8118_v16  ;;  %4903 = vmatmul.bf16.vlgmr.msra.gmra.mxu1 %v10260_v30 }
  0x76   :  { %v8101_v27 = vld [vmem:[#allocation2 + $0xec0] sm:$0xf]  ;;  %v9789_v32 = vld [vmem:[#allocation2 + $0xfcc] sm:$0xf0]  ;;  %v7974_v35 = vor.u32 %v9725_v26, %v7973_v23  ;;  %4973 = vmatpush.bf16.msrb.mxu3 %v8246_v24 }
  0x77   :  { %v8229_v31 = vld [vmem:[#allocation2 + $0xfc0] sm:$0xf]  ;;  %v8102_v36 = vor.u32 %v9757_v28, %v8101_v27  ;;  %v9689_v39 = vld [vmem:[#allocation2 + $0xcac] sm:$0xf0]  ;;  %4929 = vmatmul.bf16.vlgmr.msra.gmra.mxu3 %v10262_v33  ;;  %4935 = vmatpush.bf16.msrb.mxu0 %v7846_v34 }
  0x78   :  { %v7829_v37 = vld [vmem:[#allocation2 + $0xca0] sm:$0xf]  ;;  %v8230_v43 = vor.u32 %v9789_v32, %v8229_v31  ;;  %v9721_v45 = vld [vmem:[#allocation2 + $0xdac] sm:$0xf0]  ;;  %4948 = vmatpush.bf16.msrb.mxu1 %v7974_v35 }
  0x79   :  { %v7957_v40 = vld [vmem:[#allocation2 + $0xda0] sm:$0xf]  ;;  %v9753_v47 = vld [vmem:[#allocation2 + $0xeac] sm:$0xf0]  ;;  %v7830_v50 = vor.u32 %v9689_v39, %v7829_v37  ;;  %4961 = vmatpush.bf16.msrb.mxu2 %v8102_v36 }
  0x7a   :  { %v8085_v46 = vld [vmem:[#allocation2 + $0xea0] sm:$0xf]  ;;  %v9785_v49 = vld [vmem:[#allocation2 + $0xfac] sm:$0xf0]  ;;  %v7958_v51 = vor.u32 %v9721_v45, %v7957_v40  ;;  %4974 = vmatpush.bf16.msrb.mxu3 %v8230_v43 }
  0x7b   :  { %v8213_v48 = vld [vmem:[#allocation2 + $0xfa0] sm:$0xf]  ;;  %v8086_v52 = vor.u32 %v9753_v47, %v8085_v46  ;;  %v9685_v54 = vld [vmem:[#allocation2 + $0xc8c] sm:$0xf0]  ;;  %4936 = vmatpush.bf16.msrb.mxu0 %v7830_v50 }
  0x7c   :  { %v7813_v53 = vld [vmem:[#allocation2 + $0xc80] sm:$0xf]  ;;  %v8214_v56 = vor.u32 %v9785_v49, %v8213_v48  ;;  %v9717_v57 = vld [vmem:[#allocation2 + $0xd8c] sm:$0xf0]  ;;  %4949 = vmatpush.bf16.msrb.mxu1 %v7958_v51 }
  0x7d   :  { %v7941_v55 = vld [vmem:[#allocation2 + $0xd80] sm:$0xf]  ;;  %v9749_v59 = vld [vmem:[#allocation2 + $0xe8c] sm:$0xf0]  ;;  %v7814_v62 = vor.u32 %v9685_v54, %v7813_v53  ;;  %4962 = vmatpush.bf16.msrb.mxu2 %v8086_v52 }
  0x7e   :  { %v8069_v58 = vld [vmem:[#allocation2 + $0xe80] sm:$0xf]  ;;  %v9781_v61 = vld [vmem:[#allocation2 + $0xf8c] sm:$0xf0]  ;;  %v7942_v63 = vor.u32 %v9717_v57, %v7941_v55  ;;  %4975 = vmatpush.bf16.msrb.mxu3 %v8214_v56 }
  0x7f   :  { %v8197_v60 = vld [vmem:[#allocation2 + $0xf80] sm:$0xf]  ;;  %v8070_v0 = vor.u32 %v9749_v59, %v8069_v58  ;;  %v9681_v2 = vld [vmem:[#allocation2 + $0xc6c] sm:$0xf0]  ;;  %4937 = vmatpush.bf16.msrb.mxu0 %v7814_v62  ;;  %v71_v59 = vld [vmem:[%s10658_s0 + $0x38] sm:$0xff] }
  0x80   :  { %v7797_v1 = vld [vmem:[#allocation2 + $0xc60] sm:$0xf]  ;;  %v8198_v4 = vor.u32 %v9781_v61, %v8197_v60  ;;  %v9713_v5 = vld [vmem:[#allocation2 + $0xd6c] sm:$0xf0]  ;;  %4950 = vmatpush.bf16.msrb.mxu1 %v7942_v63 }
  0x81   :  { %v7925_v3 = vld [vmem:[#allocation2 + $0xd60] sm:$0xf]  ;;  %v9745_v7 = vld [vmem:[#allocation2 + $0xe6c] sm:$0xf0]  ;;  %v7798_v10 = vor.u32 %v9681_v2, %v7797_v1  ;;  %4963 = vmatpush.bf16.msrb.mxu2 %v8070_v0 }
  0x82   :  { %v8053_v6 = vld [vmem:[#allocation2 + $0xe60] sm:$0xf]  ;;  %v9777_v9 = vld [vmem:[#allocation2 + $0xf6c] sm:$0xf0]  ;;  %v7926_v11 = vor.u32 %v9713_v5, %v7925_v3  ;;  %4976 = vmatpush.bf16.msrb.mxu3 %v8198_v4 }
  0x83   :  { %v8181_v8 = vld [vmem:[#allocation2 + $0xf60] sm:$0xf]  ;;  %v8054_v12 = vor.u32 %v9745_v7, %v8053_v6  ;;  %v9677_v14 = vld [vmem:[#allocation2 + $0xc4c] sm:$0xf0]  ;;  %4938 = vmatpush.bf16.msrb.mxu0 %v7798_v10 }
  0x84   :  { %v7781_v13 = vld [vmem:[#allocation2 + $0xc40] sm:$0xf]  ;;  %v8182_v16 = vor.u32 %v9777_v9, %v8181_v8  ;;  %v9709_v17 = vld [vmem:[#allocation2 + $0xd4c] sm:$0xf0]  ;;  %4951 = vmatpush.bf16.msrb.mxu1 %v7926_v11  ;;  %v880_v8 = vunpack.c.l.b16 %v71_v59 }
  0x85   :  { %v7909_v15 = vld [vmem:[#allocation2 + $0xd40] sm:$0xf]  ;;  %v9741_v23 = vld [vmem:[#allocation2 + $0xe4c] sm:$0xf0]  ;;  %v7782_v27 = vor.u32 %v9677_v14, %v7781_v13  ;;  %4964 = vmatpush.bf16.msrb.mxu2 %v8054_v12  ;;  %v881_v12 = vunpack.c.h.b16 %v71_v59 }
  0x86   :  { %v8037_v21 = vld [vmem:[#allocation2 + $0xe40] sm:$0xf]  ;;  %v9773_v26 = vld [vmem:[#allocation2 + $0xf4c] sm:$0xf0]  ;;  %v7910_v28 = vor.u32 %v9709_v17, %v7909_v15  ;;  %4977 = vmatpush.bf16.msrb.mxu3 %v8182_v16 }
  0x87   :  { %v8165_v24 = vld [vmem:[#allocation2 + $0xf40] sm:$0xf]  ;;  %v8038_v31 = vor.u32 %v9741_v23, %v8037_v21  ;;  %v9673_v34 = vld [vmem:[#allocation2 + $0xc2c] sm:$0xf0]  ;;  %4939 = vmatpush.bf16.msrb.mxu0 %v7782_v27 }
  0x88   :  { %v7765_v32 = vld [vmem:[#allocation2 + $0xc20] sm:$0xf]  ;;  %v8166_v36 = vor.u32 %v9773_v26, %v8165_v24  ;;  %v9705_v37 = vld [vmem:[#allocation2 + $0xd2c] sm:$0xf0]  ;;  %4952 = vmatpush.bf16.msrb.mxu1 %v7910_v28  ;;  %v10276_v28 = vpack.c.b16 %v880_v8, %v880_v8 }
  0x89   :  { %v7893_v35 = vld [vmem:[#allocation2 + $0xd20] sm:$0xf]  ;;  %v9737_v40 = vld [vmem:[#allocation2 + $0xe2c] sm:$0xf0]  ;;  %v7766_v47 = vor.u32 %v9673_v34, %v7765_v32  ;;  %4965 = vmatpush.bf16.msrb.mxu2 %v8038_v31 }
  0x8a   :  { %v8021_v39 = vld [vmem:[#allocation2 + $0xe20] sm:$0xf]  ;;  %v9769_v45 = vld [vmem:[#allocation2 + $0xf2c] sm:$0xf0]  ;;  %v7894_v51 = vor.u32 %v9705_v37, %v7893_v35  ;;  %4978 = vmatpush.bf16.msrb.mxu3 %v8166_v36  ;;  %v10280_v35 = vpack.c.b16 %v881_v12, %v881_v12 }
  0x8b   :  { %v8149_v43 = vld [vmem:[#allocation2 + $0xf20] sm:$0xf]  ;;  %v9669_v48 = vld [vmem:[#allocation2 + $0xc0c] sm:$0xf0]  ;;  %v8022_v52 = vor.u32 %v9737_v40, %v8021_v39  ;;  %4940 = vmatpush.bf16.msrb.mxu0 %v7766_v47 }
  0x8c   :  { %v7749_v46 = vld [vmem:[#allocation2 + $0xc00] sm:$0xf]  ;;  %v9701_v50 = vld [vmem:[#allocation2 + $0xd0c] sm:$0xf0]  ;;  %v8150_v56 = vor.u32 %v9769_v45, %v8149_v43  ;;  %4953 = vmatpush.bf16.msrb.mxu1 %v7894_v51 }
  0x8d   :  { %v7877_v49 = vld [vmem:[#allocation2 + $0xd00] sm:$0xf]  ;;  %v9733_v54 = vld [vmem:[#allocation2 + $0xe0c] sm:$0xf0]  ;;  %v7750_v63 = vor.u32 %v9669_v48, %v7749_v46  ;;  %4966 = vmatpush.bf16.msrb.mxu2 %v8022_v52 }
  0x8e   :  { %v8005_v53 = vld [vmem:[#allocation2 + $0xe00] sm:$0xf]  ;;  %v70_v55 = vld [vmem:[%s10658_s0 + $0x30] sm:$0xff]  ;;  %v7878_v4 = vor.u32 %v9701_v50, %v7877_v49  ;;  %4979 = vmatpush.bf16.msrb.mxu3 %v8150_v56 }
  0x8f   :  { %v8133_v57 = vld [vmem:[#allocation2 + $0xf00] sm:$0xf]  ;;  %v9765_v58 = vld [vmem:[#allocation2 + $0xf0c] sm:$0xf0]  ;;  %v878_v3 = vunpack.c.l.b16 %v70_v55  ;;  %v8006_v5 = vor.u32 %v9733_v54, %v8005_v53  ;;  %v879_v9 = vunpack.c.h.b16 %v70_v55  ;;  %4941 = vmatpush.bf16.msrb.mxu0 %v7750_v63 }
  0x90   :  { %v8373_v60 = vld [vmem:[#allocation2 + $0x10e0] sm:$0xf]  ;;  %v9825_v61 = vld [vmem:[#allocation2 + $0x10ec] sm:$0xf0]  ;;  %v8134_v10 = vor.u32 %v9765_v58, %v8133_v57  ;;  %4954 = vmatpush.bf16.msrb.mxu1 %v7878_v4 }
  0x91   :  { %v8501_v62 = vld [vmem:[#allocation2 + $0x11e0] sm:$0xf]  ;;  %v9857_v0 = vld [vmem:[#allocation2 + $0x11ec] sm:$0xf0]  ;;  %v8374_v11 = vor.u32 %v9825_v61, %v8373_v60  ;;  %v10274_v23 = vpack.c.b16 %v878_v3, %v878_v3  ;;  %4967 = vmatpush.bf16.msrb.mxu2 %v8006_v5  ;;  %v10278_v31 = vpack.c.b16 %v879_v9, %v879_v9 }
  0x92   :  { %v8629_v1 = vld [vmem:[#allocation2 + $0x12e0] sm:$0xf]  ;;  %v9889_v2 = vld [vmem:[#allocation2 + $0x12ec] sm:$0xf0]  ;;  %v8502_v13 = vor.u32 %v9857_v0, %v8501_v62  ;;  %4980 = vmatpush.bf16.msrb.mxu3 %v8134_v10 }
  0x93   :  { %v8757_v6 = vld [vmem:[#allocation2 + $0x13e0] sm:$0xf]  ;;  %v9921_v7 = vld [vmem:[#allocation2 + $0x13ec] sm:$0xf0]  ;;  %v8630_v14 = vor.u32 %v9889_v2, %v8629_v1  ;;  %4986 = vmatpush.bf16.msra.mxu0 %v8374_v11  ;;  %4955 = vmatmul.bf16.vlgmr.msrb.gmra.mxu1 %v10278_v31 }
  0x94   :  { %v8357_v15 = vld [vmem:[#allocation2 + $0x10c0] sm:$0xf]  ;;  %v9821_v16 = vld [vmem:[#allocation2 + $0x10cc] sm:$0xf0]  ;;  %v8758_v21 = vor.u32 %v9921_v7, %v8757_v6  ;;  %4999 = vmatpush.bf16.msra.mxu1 %v8502_v13  ;;  %4942 = vmatmul.bf16.vlgmr.msrb.gmra.mxu0 %v10274_v23 }
  0x95   :  { %v8485_v17 = vld [vmem:[#allocation2 + $0x11c0] sm:$0xf]  ;;  %v9853_v24 = vld [vmem:[#allocation2 + $0x11cc] sm:$0xf0]  ;;  %v8358_v36 = vor.u32 %v9821_v16, %v8357_v15  ;;  %5012 = vmatpush.bf16.msra.mxu2 %v8630_v14  ;;  %4981 = vmatmul.bf16.vlgmr.msrb.gmra.mxu3 %v10280_v35 }
  0x96   :  { %v8613_v26 = vld [vmem:[#allocation2 + $0x12c0] sm:$0xf]  ;;  %v9885_v27 = vld [vmem:[#allocation2 + $0x12cc] sm:$0xf0]  ;;  %v8486_v37 = vor.u32 %v9853_v24, %v8485_v17  ;;  %5025 = vmatpush.bf16.msra.mxu3 %v8758_v21  ;;  %4968 = vmatmul.bf16.vlgmr.msrb.gmra.mxu2 %v10276_v28 }
  0x97   :  { %v8741_v32 = vld [vmem:[#allocation2 + $0x13c0] sm:$0xf]  ;;  %v9917_v34 = vld [vmem:[#allocation2 + $0x13cc] sm:$0xf0]  ;;  %v8614_v39 = vor.u32 %v9885_v27, %v8613_v26  ;;  %4987 = vmatpush.bf16.msra.mxu0 %v8358_v36 }
  0x98   :  { %v8341_v40 = vld [vmem:[#allocation2 + $0x10a0] sm:$0xf]  ;;  %v9817_v43 = vld [vmem:[#allocation2 + $0x10ac] sm:$0xf0]  ;;  %v8742_v46 = vor.u32 %v9917_v34, %v8741_v32  ;;  %5000 = vmatpush.bf16.msra.mxu1 %v8486_v37 }
  0x99   :  { %v8469_v45 = vld [vmem:[#allocation2 + $0x11a0] sm:$0xf]  ;;  %v9849_v47 = vld [vmem:[#allocation2 + $0x11ac] sm:$0xf0]  ;;  %v8342_v52 = vor.u32 %v9817_v43, %v8341_v40  ;;  %5013 = vmatpush.bf16.msra.mxu2 %v8614_v39 }
  0x9a   :  { %v8597_v48 = vld [vmem:[#allocation2 + $0x12a0] sm:$0xf]  ;;  %v9881_v49 = vld [vmem:[#allocation2 + $0x12ac] sm:$0xf0]  ;;  %v8470_v53 = vor.u32 %v9849_v47, %v8469_v45  ;;  %5026 = vmatpush.bf16.msra.mxu3 %v8742_v46 }
  0x9b   :  { %v8725_v50 = vld [vmem:[#allocation2 + $0x13a0] sm:$0xf]  ;;  %v9913_v51 = vld [vmem:[#allocation2 + $0x13ac] sm:$0xf0]  ;;  %v8598_v54 = vor.u32 %v9881_v49, %v8597_v48  ;;  %4988 = vmatpush.bf16.msra.mxu0 %v8342_v52 }
  0x9c   :  { %v8325_v55 = vld [vmem:[#allocation2 + $0x1080] sm:$0xf]  ;;  %v9813_v56 = vld [vmem:[#allocation2 + $0x108c] sm:$0xf0]  ;;  %v8726_v58 = vor.u32 %v9913_v51, %v8725_v50  ;;  %5001 = vmatpush.bf16.msra.mxu1 %v8470_v53 }
  0x9d   :  { %v8453_v57 = vld [vmem:[#allocation2 + $0x1180] sm:$0xf]  ;;  %v9845_v59 = vld [vmem:[#allocation2 + $0x118c] sm:$0xf0]  ;;  %v8326_v0 = vor.u32 %v9813_v56, %v8325_v55  ;;  %5014 = vmatpush.bf16.msra.mxu2 %v8598_v54 }
  0x9e   :  { %v8581_v60 = vld [vmem:[#allocation2 + $0x1280] sm:$0xf]  ;;  %v9877_v61 = vld [vmem:[#allocation2 + $0x128c] sm:$0xf0]  ;;  %v8454_v1 = vor.u32 %v9845_v59, %v8453_v57  ;;  %5027 = vmatpush.bf16.msra.mxu3 %v8726_v58 }
  0x9f   :  { %v8709_v62 = vld [vmem:[#allocation2 + $0x1380] sm:$0xf]  ;;  %v9909_v63 = vld [vmem:[#allocation2 + $0x138c] sm:$0xf0]  ;;  %v8582_v2 = vor.u32 %v9877_v61, %v8581_v60  ;;  %4989 = vmatpush.bf16.msra.mxu0 %v8326_v0 }
  0xa0   :  { %v8309_v3 = vld [vmem:[#allocation2 + $0x1060] sm:$0xf]  ;;  %v9809_v4 = vld [vmem:[#allocation2 + $0x106c] sm:$0xf0]  ;;  %v8710_v6 = vor.u32 %v9909_v63, %v8709_v62  ;;  %5002 = vmatpush.bf16.msra.mxu1 %v8454_v1  ;;  %v73_v1 = vld [vmem:[%s10658_s0 + $0x48] sm:$0xff] }
  0xa1   :  { %v8437_v5 = vld [vmem:[#allocation2 + $0x1160] sm:$0xf]  ;;  %v9841_v7 = vld [vmem:[#allocation2 + $0x116c] sm:$0xf0]  ;;  %v8310_v12 = vor.u32 %v9809_v4, %v8309_v3  ;;  %5015 = vmatpush.bf16.msra.mxu2 %v8582_v2 }
  0xa2   :  { %v8565_v8 = vld [vmem:[#allocation2 + $0x1260] sm:$0xf]  ;;  %v9873_v9 = vld [vmem:[#allocation2 + $0x126c] sm:$0xf0]  ;;  %v8438_v13 = vor.u32 %v9841_v7, %v8437_v5  ;;  %5028 = vmatpush.bf16.msra.mxu3 %v8710_v6 }
  0xa3   :  { %v8693_v10 = vld [vmem:[#allocation2 + $0x1360] sm:$0xf]  ;;  %v9905_v11 = vld [vmem:[#allocation2 + $0x136c] sm:$0xf0]  ;;  %v8566_v14 = vor.u32 %v9873_v9, %v8565_v8  ;;  %4990 = vmatpush.bf16.msra.mxu0 %v8310_v12 }
  0xa4   :  { %v8293_v15 = vld [vmem:[#allocation2 + $0x1040] sm:$0xf]  ;;  %v9805_v16 = vld [vmem:[#allocation2 + $0x104c] sm:$0xf0]  ;;  %v8694_v21 = vor.u32 %v9905_v11, %v8693_v10  ;;  %5003 = vmatpush.bf16.msra.mxu1 %v8438_v13 }
  0xa5   :  { %v8421_v17 = vld [vmem:[#allocation2 + $0x1140] sm:$0xf]  ;;  %v9837_v24 = vld [vmem:[#allocation2 + $0x114c] sm:$0xf0]  ;;  %v8294_v36 = vor.u32 %v9805_v16, %v8293_v15  ;;  %5016 = vmatpush.bf16.msra.mxu2 %v8566_v14  ;;  %v884_v14 = vunpack.c.l.b16 %v73_v1 }
  0xa6   :  { %v8549_v26 = vld [vmem:[#allocation2 + $0x1240] sm:$0xf]  ;;  %v9869_v27 = vld [vmem:[#allocation2 + $0x124c] sm:$0xf0]  ;;  %v8422_v37 = vor.u32 %v9837_v24, %v8421_v17  ;;  %5029 = vmatpush.bf16.msra.mxu3 %v8694_v21  ;;  %v885_v21 = vunpack.c.h.b16 %v73_v1 }
  0xa7   :  { %v8677_v32 = vld [vmem:[#allocation2 + $0x1340] sm:$0xf]  ;;  %v9901_v34 = vld [vmem:[#allocation2 + $0x134c] sm:$0xf0]  ;;  %v8550_v39 = vor.u32 %v9869_v27, %v8549_v26  ;;  %4991 = vmatpush.bf16.msra.mxu0 %v8294_v36 }
  0xa8   :  { %v8277_v40 = vld [vmem:[#allocation2 + $0x1020] sm:$0xf]  ;;  %v9801_v43 = vld [vmem:[#allocation2 + $0x102c] sm:$0xf0]  ;;  %v8678_v46 = vor.u32 %v9901_v34, %v8677_v32  ;;  %5004 = vmatpush.bf16.msra.mxu1 %v8422_v37 }
  0xa9   :  { %v8405_v45 = vld [vmem:[#allocation2 + $0x1120] sm:$0xf]  ;;  %v9833_v47 = vld [vmem:[#allocation2 + $0x112c] sm:$0xf0]  ;;  %v8278_v53 = vor.u32 %v9801_v43, %v8277_v40  ;;  %5017 = vmatpush.bf16.msra.mxu2 %v8550_v39 }
  0xaa   :  { %v8533_v48 = vld [vmem:[#allocation2 + $0x1220] sm:$0xf]  ;;  %v9865_v49 = vld [vmem:[#allocation2 + $0x122c] sm:$0xf0]  ;;  %v8406_v57 = vor.u32 %v9833_v47, %v8405_v45  ;;  %5030 = vmatpush.bf16.msra.mxu3 %v8678_v46  ;;  %v10294_v45 = vpack.c.b16 %v884_v14, %v884_v14 }
  0xab   :  { %v8661_v50 = vld [vmem:[#allocation2 + $0x1320] sm:$0xf]  ;;  %v9897_v51 = vld [vmem:[#allocation2 + $0x132c] sm:$0xf0]  ;;  %v8534_v58 = vor.u32 %v9865_v49, %v8533_v48  ;;  %4992 = vmatpush.bf16.msra.mxu0 %v8278_v53  ;;  %v10298_v49 = vpack.c.b16 %v885_v21, %v885_v21 }
  0xac   :  { %v8261_v52 = vld [vmem:[#allocation2 + $0x1000] sm:$0xf]  ;;  %v9797_v54 = vld [vmem:[#allocation2 + $0x100c] sm:$0xf0]  ;;  %v8662_v62 = vor.u32 %v9897_v51, %v8661_v50  ;;  %5005 = vmatpush.bf16.msra.mxu1 %v8406_v57 }
  0xad   :  { %v8389_v55 = vld [vmem:[#allocation2 + $0x1100] sm:$0xf]  ;;  %v9829_v56 = vld [vmem:[#allocation2 + $0x110c] sm:$0xf0]  ;;  %v8262_v5 = vor.u32 %v9797_v54, %v8261_v52  ;;  %5018 = vmatpush.bf16.msra.mxu2 %v8534_v58 }
  0xae   :  { %v8517_v59 = vld [vmem:[#allocation2 + $0x1200] sm:$0xf]  ;;  %v9861_v60 = vld [vmem:[#allocation2 + $0x120c] sm:$0xf0]  ;;  %v8390_v10 = vor.u32 %v9829_v56, %v8389_v55  ;;  %5031 = vmatpush.bf16.msra.mxu3 %v8662_v62 }
  0xaf   :  { %v72_v61 = vld [vmem:[%s10658_s0 + $0x40] sm:$0xff]  ;;  %v9893_v0 = vld [vmem:[#allocation2 + $0x130c] sm:$0xf0]  ;;  %v8518_v11 = vor.u32 %v9861_v60, %v8517_v59  ;;  %4993 = vmatpush.bf16.msra.mxu0 %v8262_v5 }
  0xb0   :  { %v8645_v63 = vld [vmem:[#allocation2 + $0x1300] sm:$0xf]  ;;  %v9953_v3 = vld [vmem:[#allocation2 + $0x14ec] sm:$0xf0]  ;;  %v882_v9 = vunpack.c.l.b16 %v72_v61  ;;  %v883_v15 = vunpack.c.h.b16 %v72_v61  ;;  %5006 = vmatpush.bf16.msra.mxu1 %v8390_v10 }
  0xb1   :  { %v8885_v2 = vld [vmem:[#allocation2 + $0x14e0] sm:$0xf]  ;;  %v9985_v6 = vld [vmem:[#allocation2 + $0x15ec] sm:$0xf0]  ;;  %v8646_v16 = vor.u32 %v9893_v0, %v8645_v63  ;;  %5019 = vmatpush.bf16.msra.mxu2 %v8518_v11 }
  0xb2   :  { %v9013_v4 = vld [vmem:[#allocation2 + $0x15e0] sm:$0xf]  ;;  %v10017_v8 = vld [vmem:[#allocation2 + $0x16ec] sm:$0xf0]  ;;  %v8886_v17 = vor.u32 %v9953_v3, %v8885_v2  ;;  %v10292_v37 = vpack.c.b16 %v882_v9, %v882_v9  ;;  %v10296_v46 = vpack.c.b16 %v883_v15, %v883_v15 }
  0xb3   :  { %v9141_v7 = vld [vmem:[#allocation2 + $0x16e0] sm:$0xf]  ;;  %v10049_v13 = vld [vmem:[#allocation2 + $0x17ec] sm:$0xf0]  ;;  %v9014_v24 = vor.u32 %v9985_v6, %v9013_v4  ;;  %5032 = vmatpush.bf16.msra.mxu3 %v8646_v16 }
  0xb4   :  { %v9269_v12 = vld [vmem:[#allocation2 + $0x17e0] sm:$0xf]  ;;  %v9142_v26 = vor.u32 %v10017_v8, %v9141_v7  ;;  %v9949_v32 = vld [vmem:[#allocation2 + $0x14cc] sm:$0xf0]  ;;  %5038 = vmatpush.bf16.msrb.mxu0 %v8886_v17  ;;  %5020 = vmatmul.bf16.vlgmr.msra.gmra.mxu2 %v10294_v45 }
  0xb5   :  { %v8869_v27 = vld [vmem:[#allocation2 + $0x14c0] sm:$0xf]  ;;  %v9270_v36 = vor.u32 %v10049_v13, %v9269_v12  ;;  %v9981_v39 = vld [vmem:[#allocation2 + $0x15cc] sm:$0xf0]  ;;  %5051 = vmatpush.bf16.msrb.mxu1 %v9014_v24  ;;  %4994 = vmatmul.bf16.vlgmr.msra.gmra.mxu0 %v10292_v37 }
  0xb6   :  { %v8997_v34 = vld [vmem:[#allocation2 + $0x15c0] sm:$0xf]  ;;  %v10013_v43 = vld [vmem:[#allocation2 + $0x16cc] sm:$0xf0]  ;;  %v8870_v50 = vor.u32 %v9949_v32, %v8869_v27  ;;  %5064 = vmatpush.bf16.msrb.mxu2 %v9142_v26  ;;  %5007 = vmatmul.bf16.vlgmr.msra.gmra.mxu1 %v10296_v46 }
  0xb7   :  { %v9125_v40 = vld [vmem:[#allocation2 + $0x16c0] sm:$0xf]  ;;  %v10045_v48 = vld [vmem:[#allocation2 + $0x17cc] sm:$0xf0]  ;;  %v8998_v51 = vor.u32 %v9981_v39, %v8997_v34  ;;  %5077 = vmatpush.bf16.msrb.mxu3 %v9270_v36 }
  0xb8   :  { %v9253_v47 = vld [vmem:[#allocation2 + $0x17c0] sm:$0xf]  ;;  %v9126_v52 = vor.u32 %v10013_v43, %v9125_v40  ;;  %v9945_v54 = vld [vmem:[#allocation2 + $0x14ac] sm:$0xf0]  ;;  %5033 = vmatmul.bf16.vlgmr.msra.gmra.mxu3 %v10298_v49  ;;  %5039 = vmatpush.bf16.msrb.mxu0 %v8870_v50 }
  0xb9   :  { %v8853_v53 = vld [vmem:[#allocation2 + $0x14a0] sm:$0xf]  ;;  %v9254_v56 = vor.u32 %v10045_v48, %v9253_v47  ;;  %v9977_v57 = vld [vmem:[#allocation2 + $0x15ac] sm:$0xf0]  ;;  %5052 = vmatpush.bf16.msrb.mxu1 %v8998_v51 }
  0xba   :  { %v8981_v55 = vld [vmem:[#allocation2 + $0x15a0] sm:$0xf]  ;;  %v10009_v59 = vld [vmem:[#allocation2 + $0x16ac] sm:$0xf0]  ;;  %v8854_v62 = vor.u32 %v9945_v54, %v8853_v53  ;;  %5065 = vmatpush.bf16.msrb.mxu2 %v9126_v52 }
  0xbb   :  { %v9109_v58 = vld [vmem:[#allocation2 + $0x16a0] sm:$0xf]  ;;  %v10041_v61 = vld [vmem:[#allocation2 + $0x17ac] sm:$0xf0]  ;;  %v8982_v63 = vor.u32 %v9977_v57, %v8981_v55  ;;  %5078 = vmatpush.bf16.msrb.mxu3 %v9254_v56 }
  0xbc   :  { %v9237_v60 = vld [vmem:[#allocation2 + $0x17a0] sm:$0xf]  ;;  %v9110_v0 = vor.u32 %v10009_v59, %v9109_v58  ;;  %v9941_v2 = vld [vmem:[#allocation2 + $0x148c] sm:$0xf0]  ;;  %5040 = vmatpush.bf16.msrb.mxu0 %v8854_v62  ;;  %v4787_v57 = vpop.f32.mrf.mxu0 }
  0xbd   :  { %v8837_v1 = vld [vmem:[#allocation2 + $0x1480] sm:$0xf]  ;;  %v9238_v4 = vor.u32 %v10041_v61, %v9237_v60  ;;  %v9973_v5 = vld [vmem:[#allocation2 + $0x158c] sm:$0xf0]  ;;  %5053 = vmatpush.bf16.msrb.mxu1 %v8982_v63 }
  0xbe   :  { %v8965_v3 = vld [vmem:[#allocation2 + $0x1580] sm:$0xf]  ;;  %v10005_v7 = vld [vmem:[#allocation2 + $0x168c] sm:$0xf0]  ;;  %v8838_v10 = vor.u32 %v9941_v2, %v8837_v1  ;;  %5066 = vmatpush.bf16.msrb.mxu2 %v9110_v0  ;;  %v4800_v0 = vpop.f32.mrf.mxu1 }
  0xbf   :  { %v9093_v6 = vld [vmem:[#allocation2 + $0x1680] sm:$0xf]  ;;  %v10037_v9 = vld [vmem:[#allocation2 + $0x178c] sm:$0xf0]  ;;  %v8966_v12 = vor.u32 %v9973_v5, %v8965_v3  ;;  %5079 = vmatpush.bf16.msrb.mxu3 %v9238_v4 }
  0xc0   :  { %v9221_v8 = vld [vmem:[#allocation2 + $0x1780] sm:$0xf]  ;;  %v9094_v13 = vor.u32 %v10005_v7, %v9093_v6  ;;  %v9937_v14 = vld [vmem:[#allocation2 + $0x146c] sm:$0xf0]  ;;  %5041 = vmatpush.bf16.msrb.mxu0 %v8838_v10 }
  0xc1   :  { %v8821_v11 = vld [vmem:[#allocation2 + $0x1460] sm:$0xf]  ;;  %v9969_v16 = vld [vmem:[#allocation2 + $0x156c] sm:$0xf0]  ;;  %v9222_v17 = vor.u32 %v10037_v9, %v9221_v8  ;;  %5054 = vmatpush.bf16.msrb.mxu1 %v8966_v12 }
  0xc2   :  { %v8949_v15 = vld [vmem:[#allocation2 + $0x1560] sm:$0xf]  ;;  %v10001_v24 = vld [vmem:[#allocation2 + $0x166c] sm:$0xf0]  ;;  %v8822_v34 = vor.u32 %v9937_v14, %v8821_v11  ;;  %5067 = vmatpush.bf16.msrb.mxu2 %v9094_v13 }
  0xc3   :  { %v9077_v21 = vld [vmem:[#allocation2 + $0x1660] sm:$0xf]  ;;  %v10033_v32 = vld [vmem:[#allocation2 + $0x176c] sm:$0xf0]  ;;  %v8950_v39 = vor.u32 %v9969_v16, %v8949_v15  ;;  %5080 = vmatpush.bf16.msrb.mxu3 %v9222_v17 }
  0xc4   :  { %v844_v26 = vld [vmem:[#allocation5] sm:$0xf]  ;;  %v9078_v40 = vor.u32 %v10001_v24, %v9077_v21  ;;  %v9933_v43 = vld [vmem:[#allocation2 + $0x144c] sm:$0xf0]  ;;  %5042 = vmatpush.bf16.msrb.mxu0 %v8822_v34  ;;  %v4813_v21 = vpop.f32.mrf.mxu2 }
  0xc5   :  { %v9205_v27 = vld [vmem:[#allocation2 + $0x1760] sm:$0xf]  ;;  %v846_v48 = vperm.slane %v844_v26, 0  ;;  %v9965_v51 = vld [vmem:[#allocation2 + $0x154c] sm:$0xf0]  ;;  %5055 = vmatpush.bf16.msrb.mxu1 %v8950_v39 }
  0xc6   :  { %v8805_v36 = vld [vmem:[#allocation2 + $0x1440] sm:$0xf]  ;;  %v9206_v50 = vor.u32 %v10033_v32, %v9205_v27  ;;  %v9997_v53 = vld [vmem:[#allocation2 + $0x164c] sm:$0xf0]  ;;  %5068 = vmatpush.bf16.msrb.mxu2 %v9078_v40  ;;  %v75_v32 = vld [vmem:[%s10658_s0 + $0x58] sm:$0xff] }
  0xc7   :  { %v8933_v47 = vld [vmem:[#allocation2 + $0x1540] sm:$0xf]  ;;  %v10029_v55 = vld [vmem:[#allocation2 + $0x174c] sm:$0xf0]  ;;  %v8806_v56 = vor.u32 %v9933_v43, %v8805_v36  ;;  %v4788_v63 = vadd.f32 %v4787_v57, %v846_v48  ;;  %v4826_v36 = vpop.f32.mrf.mxu3  ;;  %v9311_v39 = vld [vmem:[#allocation2 + $0xe4] sm:$0xf] }
  0xc8   :  { %v9061_v52 = vld [vmem:[#allocation2 + $0x1640] sm:$0xf]  ;;  %v8934_v58 = vor.u32 %v9965_v51, %v8933_v47  ;;  %v9929_v61 = vld [vmem:[#allocation2 + $0x142c] sm:$0xf0]  ;;  %5081 = vmatpush.bf16.msrb.mxu3 %v9206_v50  ;;  %v6327_v40 = vld [vmem:[#allocation2 + $0xf0] sm:$0xf0] }
  0xc9   :  { %v9189_v54 = vld [vmem:[#allocation2 + $0x1740] sm:$0xf]  ;;  %v9062_v59 = vor.u32 %v9997_v53, %v9061_v52  ;;  %v9961_v2 = vld [vmem:[#allocation2 + $0x152c] sm:$0xf0]  ;;  %v4801_v8 = vadd.f32 %v4800_v0, %v4788_v63  ;;  %5043 = vmatpush.bf16.msrb.mxu0 %v8806_v56  ;;  %v9343_v43 = vld [vmem:[#allocation2 + $0x1e4] sm:$0xf]  ;;  %v6330_v63 = vor.u32 %v9311_v39, %v6327_v40  ;;  %v889_v0 = vunpack.c.h.b16 %v75_v32 }
  0xca   :  { %v8789_v60 = vld [vmem:[#allocation2 + $0x1420] sm:$0xf]  ;;  %v9190_v1 = vor.u32 %v10029_v55, %v9189_v54  ;;  %v9993_v4 = vld [vmem:[#allocation2 + $0x162c] sm:$0xf0]  ;;  %5056 = vmatpush.bf16.msrb.mxu1 %v8934_v58  ;;  %v6455_v48 = vld [vmem:[#allocation2 + $0x1f0] sm:$0xf0]  ;;  %v4789_v54 = vpop.f32.mrf.mxu0 }
  0xcb   :  { %v8917_v62 = vld [vmem:[#allocation2 + $0x1520] sm:$0xf]  ;;  %v10025_v6 = vld [vmem:[#allocation2 + $0x172c] sm:$0xf0]  ;;  %v8790_v9 = vor.u32 %v9929_v61, %v8789_v60  ;;  %5069 = vmatpush.bf16.msrb.mxu2 %v9062_v59  ;;  %v4814_v34 = vadd.f32 %v4813_v21, %v4801_v8  ;;  %v9375_v50 = vld [vmem:[#allocation2 + $0x2e4] sm:$0xf]  ;;  %v888_v59 = vunpack.c.l.b16 %v75_v32  ;;  %v4802_v61 = vpop.f32.mrf.mxu1 }
  0xcc   :  { %v9045_v3 = vld [vmem:[#allocation2 + $0x1620] sm:$0xf]  ;;  %v9925_v10 = vld [vmem:[#allocation2 + $0x140c] sm:$0xf0]  ;;  %v8918_v13 = vor.u32 %v9961_v2, %v8917_v62  ;;  %5082 = vmatpush.bf16.msrb.mxu3 %v9190_v1  ;;  %v6583_v51 = vld [vmem:[#allocation2 + $0x2f0] sm:$0xf0]  ;;  %v6458_v1 = vor.u32 %v9343_v43, %v6455_v48 }
  0xcd   :  { %v9173_v5 = vld [vmem:[#allocation2 + $0x1720] sm:$0xf]  ;;  %v9957_v12 = vld [vmem:[#allocation2 + $0x150c] sm:$0xf0]  ;;  %v9046_v14 = vor.u32 %v9993_v4, %v9045_v3  ;;  %5044 = vmatpush.bf16.msrb.mxu0 %v8790_v9  ;;  %v10310_v53 = vadd.f32 %v4826_v36, %v4814_v34  ;;  %v9407_v57 = vld [vmem:[#allocation2 + $0x3e4] sm:$0xf]  ;;  %v6586_v2 = vor.u32 %v9375_v50, %v6583_v51 }
  0xce   :  { %v8773_v7 = vld [vmem:[#allocation2 + $0x1400] sm:$0xf]  ;;  %v9989_v16 = vld [vmem:[#allocation2 + $0x160c] sm:$0xf0]  ;;  %v9174_v24 = vor.u32 %v10025_v6, %v9173_v5  ;;  %5057 = vmatpush.bf16.msrb.mxu1 %v8918_v13  ;;  %v6711_v58 = vld [vmem:[#allocation2 + $0x3f0] sm:$0xf0] }
  0xcf   :  { %v8901_v11 = vld [vmem:[#allocation2 + $0x1500] sm:$0xf]  ;;  %v74_v17 = vld [vmem:[%s10658_s0 + $0x50] sm:$0xff]  ;;  %v8774_v47 = vor.u32 %v9925_v10, %v8773_v7  ;;  %5070 = vmatpush.bf16.msrb.mxu2 %v9046_v14  ;;  %v9307_v3 = vld [vmem:[#allocation2 + $0xc4] sm:$0xf]  ;;  %v6714_v6 = vor.u32 %v9407_v57, %v6711_v58  ;;  %v4828_v21 = vpop.f32.mrf.mxu3 }
  0xd0   :  { %v9029_v15 = vld [vmem:[#allocation2 + $0x1600] sm:$0xf]  ;;  %v10021_v27 = vld [vmem:[#allocation2 + $0x170c] sm:$0xf0]  ;;  %v886_v52 = vunpack.c.l.b16 %v74_v17  ;;  %v8902_v55 = vor.u32 %v9957_v12, %v8901_v11  ;;  %v887_v60 = vunpack.c.h.b16 %v74_v17  ;;  %5083 = vmatpush.bf16.msrb.mxu3 %v9174_v24  ;;  %v6311_v4 = vld [vmem:[#allocation2 + $0xd0] sm:$0xf0]  ;;  %v10314_v11 = vpack.c.b16 %v888_v59, %v888_v59 }
  0xd1   :  { %v9157_v26 = vld [vmem:[#allocation2 + $0x1700] sm:$0xf]  ;;  %v9030_v56 = vor.u32 %v9989_v16, %v9029_v15  ;;  %v9339_v5 = vld [vmem:[#allocation2 + $0x1c4] sm:$0xf]  ;;  %5045 = vmatpush.bf16.msrb.mxu0 %v8774_v47  ;;  %v6439_v8 = vld [vmem:[#allocation2 + $0x1d0] sm:$0xf0]  ;;  %v4815_v15 = vpop.f32.mrf.mxu2  ;;  %v10318_v16 = vpack.c.b16 %v889_v0, %v889_v0  ;;  %v6314_v17 = vor.u32 %v9307_v3, %v6311_v4 }
  0xd2   :  { %v9158_v62 = vor.u32 %v10021_v27, %v9157_v26  ;;  %v10312_v7 = vpack.c.b16 %v886_v52, %v886_v52  ;;  %v9371_v9 = vld [vmem:[#allocation2 + $0x2c4] sm:$0xf]  ;;  %v6567_v10 = vld [vmem:[#allocation2 + $0x2d0] sm:$0xf0]  ;;  %5058 = vmatpush.bf16.msrb.mxu1 %v8902_v55  ;;  %v10316_v12 = vpack.c.b16 %v887_v60, %v887_v60  ;;  %v6442_v24 = vor.u32 %v9339_v5, %v6439_v8  ;;  %v4839_v0 = vpop.f32.mrf.mxu0 }
  0xd3   :  { %5071 = vmatpush.bf16.msrb.mxu2 %v9030_v56  ;;  %v9403_v13 = vld [vmem:[#allocation2 + $0x3c4] sm:$0xf]  ;;  %v6695_v14 = vld [vmem:[#allocation2 + $0x3d0] sm:$0xf0]  ;;  %v6570_v26 = vor.u32 %v9371_v9, %v6567_v10  ;;  %v4852_v8 = vpop.f32.mrf.mxu1 }
  0xd4   :  { %5084 = vmatpush.bf16.msrb.mxu3 %v9158_v62  ;;  %v9303_v27 = vld [vmem:[#allocation2 + $0xa4] sm:$0xf]  ;;  %v6295_v32 = vld [vmem:[#allocation2 + $0xb0] sm:$0xf0]  ;;  %5046 = vmatmul.bf16.vlgmr.msrb.gmra.mxu0 %v10312_v7  ;;  %v6698_v36 = vor.u32 %v9403_v13, %v6695_v14 }
  0xd5   :  { %5090 = vmatpush.bf16.msra.mxu0 %v6330_v63  ;;  %v9335_v34 = vld [vmem:[#allocation2 + $0x1a4] sm:$0xf]  ;;  %v6423_v39 = vld [vmem:[#allocation2 + $0x1b0] sm:$0xf0]  ;;  %5059 = vmatmul.bf16.vlgmr.msrb.gmra.mxu1 %v10316_v12  ;;  %v6298_v50 = vor.u32 %v9303_v27, %v6295_v32 }
  0xd6   :  { %5103 = vmatpush.bf16.msra.mxu1 %v6458_v1  ;;  %v9367_v40 = vld [vmem:[#allocation2 + $0x2a4] sm:$0xf]  ;;  %v6551_v43 = vld [vmem:[#allocation2 + $0x2b0] sm:$0xf0]  ;;  %5072 = vmatmul.bf16.vlgmr.msrb.gmra.mxu2 %v10314_v11  ;;  %v6426_v51 = vor.u32 %v9335_v34, %v6423_v39 }
  0xd7   :  { %5116 = vmatpush.bf16.msra.mxu2 %v6586_v2  ;;  %v9399_v47 = vld [vmem:[#allocation2 + $0x3a4] sm:$0xf]  ;;  %v6679_v48 = vld [vmem:[#allocation2 + $0x3b0] sm:$0xf0]  ;;  %5085 = vmatmul.bf16.vlgmr.msrb.gmra.mxu3 %v10318_v16  ;;  %v6554_v52 = vor.u32 %v9367_v40, %v6551_v43 }
  0xd8   :  { %5129 = vmatpush.bf16.msra.mxu3 %v6714_v6  ;;  %v9299_v54 = vld [vmem:[#allocation2 + $0x84] sm:$0xf]  ;;  %v6279_v55 = vld [vmem:[#allocation2 + $0x90] sm:$0xf0]  ;;  %v6682_v57 = vor.u32 %v9399_v47, %v6679_v48  ;;  %v4840_v6 = vadd.f32 %v4839_v0, %v10310_v53 }
  0xd9   :  { %5091 = vmatpush.bf16.msra.mxu0 %v6314_v17  ;;  %v9331_v56 = vld [vmem:[#allocation2 + $0x184] sm:$0xf]  ;;  %v6407_v58 = vld [vmem:[#allocation2 + $0x190] sm:$0xf0]  ;;  %v6282_v63 = vor.u32 %v9299_v54, %v6279_v55  ;;  %v4865_v39 = vpop.f32.mrf.mxu2 }
  0xda   :  { %5104 = vmatpush.bf16.msra.mxu1 %v6442_v24  ;;  %v9363_v59 = vld [vmem:[#allocation2 + $0x284] sm:$0xf]  ;;  %v6535_v60 = vld [vmem:[#allocation2 + $0x290] sm:$0xf0]  ;;  %v6410_v1 = vor.u32 %v9331_v56, %v6407_v58  ;;  %v4853_v21 = vadd.f32 %v4852_v8, %v4840_v6  ;;  %v4841_v56 = vpop.f32.mrf.mxu0 }
  0xdb   :  { %5117 = vmatpush.bf16.msra.mxu2 %v6570_v26  ;;  %v9395_v61 = vld [vmem:[#allocation2 + $0x384] sm:$0xf]  ;;  %v6663_v62 = vld [vmem:[#allocation2 + $0x390] sm:$0xf0]  ;;  %v6538_v2 = vor.u32 %v9363_v59, %v6535_v60 }
  0xdc   :  { %5130 = vmatpush.bf16.msra.mxu3 %v6698_v36  ;;  %v9295_v3 = vld [vmem:[#allocation2 + $0x64] sm:$0xf]  ;;  %v6263_v4 = vld [vmem:[#allocation2 + $0x70] sm:$0xf0]  ;;  %v6666_v9 = vor.u32 %v9395_v61, %v6663_v62  ;;  %v4866_v48 = vadd.f32 %v4865_v39, %v4853_v21  ;;  %v4854_v62 = vpop.f32.mrf.mxu1 }
  0xdd   :  { %5092 = vmatpush.bf16.msra.mxu0 %v6298_v50  ;;  %v9327_v5 = vld [vmem:[#allocation2 + $0x164] sm:$0xf]  ;;  %v6391_v10 = vld [vmem:[#allocation2 + $0x170] sm:$0xf0]  ;;  %v6266_v24 = vor.u32 %v9295_v3, %v6263_v4  ;;  %v4878_v50 = vpop.f32.mrf.mxu3 }
  0xde   :  { %5105 = vmatpush.bf16.msra.mxu1 %v6426_v51  ;;  %v9359_v13 = vld [vmem:[#allocation2 + $0x264] sm:$0xf]  ;;  %v6519_v14 = vld [vmem:[#allocation2 + $0x270] sm:$0xf0]  ;;  %v6394_v26 = vor.u32 %v9327_v5, %v6391_v10  ;;  %v10325_v55 = vadd.f32 %v4878_v50, %v4866_v48 }
  0xdf   :  { %5118 = vmatpush.bf16.msra.mxu2 %v6554_v52  ;;  %v9391_v15 = vld [vmem:[#allocation2 + $0x364] sm:$0xf]  ;;  %v6647_v17 = vld [vmem:[#allocation2 + $0x370] sm:$0xf0]  ;;  %v6522_v27 = vor.u32 %v9359_v13, %v6519_v14 }
  0xe0   :  { %5131 = vmatpush.bf16.msra.mxu3 %v6682_v57  ;;  %v9291_v32 = vld [vmem:[#allocation2 + $0x44] sm:$0xf]  ;;  %v6247_v34 = vld [vmem:[#allocation2 + $0x50] sm:$0xf0]  ;;  %v6650_v53 = vor.u32 %v9391_v15, %v6647_v17 }
  0xe1   :  { %5093 = vmatpush.bf16.msra.mxu0 %v6282_v63  ;;  %v9323_v36 = vld [vmem:[#allocation2 + $0x144] sm:$0xf]  ;;  %v6375_v40 = vld [vmem:[#allocation2 + $0x150] sm:$0xf0]  ;;  %v6250_v54 = vor.u32 %v9291_v32, %v6247_v34  ;;  %v4867_v17 = vpop.f32.mrf.mxu2 }
  0xe2   :  { %5106 = vmatpush.bf16.msra.mxu1 %v6410_v1  ;;  %v9355_v43 = vld [vmem:[#allocation2 + $0x244] sm:$0xf]  ;;  %v6503_v47 = vld [vmem:[#allocation2 + $0x250] sm:$0xf0]  ;;  %v6378_v57 = vor.u32 %v9323_v36, %v6375_v40 }
  0xe3   :  { %5119 = vmatpush.bf16.msra.mxu2 %v6538_v2  ;;  %v9387_v51 = vld [vmem:[#allocation2 + $0x344] sm:$0xf]  ;;  %v6631_v52 = vld [vmem:[#allocation2 + $0x350] sm:$0xf0]  ;;  %v6506_v58 = vor.u32 %v9355_v43, %v6503_v47 }
  0xe4   :  { %5132 = vmatpush.bf16.msra.mxu3 %v6666_v9  ;;  %v9287_v59 = vld [vmem:[#allocation2 + $0x24] sm:$0xf]  ;;  %v6231_v60 = vld [vmem:[#allocation2 + $0x30] sm:$0xf0]  ;;  %v6634_v63 = vor.u32 %v9387_v51, %v6631_v52 }
  0xe5   :  { %5094 = vmatpush.bf16.msra.mxu0 %v6266_v24  ;;  %v9319_v61 = vld [vmem:[#allocation2 + $0x124] sm:$0xf]  ;;  %v6359_v0 = vld [vmem:[#allocation2 + $0x130] sm:$0xf0]  ;;  %v6234_v5 = vor.u32 %v9287_v59, %v6231_v60  ;;  %v4880_v32 = vpop.f32.mrf.mxu3 }
  0xe6   :  { %5107 = vmatpush.bf16.msra.mxu1 %v6394_v26  ;;  %v9351_v1 = vld [vmem:[#allocation2 + $0x224] sm:$0xf]  ;;  %v6487_v2 = vld [vmem:[#allocation2 + $0x230] sm:$0xf0]  ;;  %v6362_v9 = vor.u32 %v9319_v61, %v6359_v0 }
  0xe7   :  { %5120 = vmatpush.bf16.msra.mxu2 %v6522_v27  ;;  %v9383_v3 = vld [vmem:[#allocation2 + $0x324] sm:$0xf]  ;;  %v6615_v4 = vld [vmem:[#allocation2 + $0x330] sm:$0xf0]  ;;  %v6490_v10 = vor.u32 %v9351_v1, %v6487_v2 }
  0xe8   :  { %5133 = vmatpush.bf16.msra.mxu3 %v6650_v53  ;;  %v9283_v6 = vld [vmem:[#allocation2 + $0x4] sm:$0xf]  ;;  %v6215_v8 = vld [vmem:[#allocation2 + $0x10] sm:$0xf0]  ;;  %v6618_v21 = vor.u32 %v9383_v3, %v6615_v4 }
  0xe9   :  { %5095 = vmatpush.bf16.msra.mxu0 %v6250_v54  ;;  %v9315_v13 = vld [vmem:[#allocation2 + $0x104] sm:$0xf]  ;;  %v6343_v14 = vld [vmem:[#allocation2 + $0x110] sm:$0xf0]  ;;  %v6218_v53 = vor.u32 %v9283_v6, %v6215_v8 }
  0xea   :  { %5108 = vmatpush.bf16.msra.mxu1 %v6378_v57  ;;  %v9347_v15 = vld [vmem:[#allocation2 + $0x204] sm:$0xf]  ;;  %v6471_v24 = vld [vmem:[#allocation2 + $0x210] sm:$0xf0]  ;;  %v6346_v48 = vor.u32 %v9315_v13, %v6343_v14 }
  0xeb   :  { %5121 = vmatpush.bf16.msra.mxu2 %v6506_v58  ;;  %v9379_v26 = vld [vmem:[#allocation2 + $0x304] sm:$0xf]  ;;  %v6599_v27 = vld [vmem:[#allocation2 + $0x310] sm:$0xf0]  ;;  %v6474_v50 = vor.u32 %v9347_v15, %v6471_v24 }
  0xec   :  { %5134 = vmatpush.bf16.msra.mxu3 %v6634_v63  ;;  %v9439_v34 = vld [vmem:[#allocation2 + $0x4e4] sm:$0xf]  ;;  %v6839_v36 = vld [vmem:[#allocation2 + $0x4f0] sm:$0xf0]  ;;  %v6602_v54 = vor.u32 %v9379_v26, %v6599_v27 }
  0xed   :  { %v9471_v39 = vld [vmem:[#allocation2 + $0x5e4] sm:$0xf]  ;;  %5096 = vmatpush.bf16.msra.mxu0 %v6234_v5  ;;  %v6967_v40 = vld [vmem:[#allocation2 + $0x5f0] sm:$0xf0]  ;;  %v6842_v56 = vor.u32 %v9439_v34, %v6839_v36 }
  0xee   :  { %v9503_v43 = vld [vmem:[#allocation2 + $0x6e4] sm:$0xf]  ;;  %v7095_v47 = vld [vmem:[#allocation2 + $0x6f0] sm:$0xf0]  ;;  %5109 = vmatpush.bf16.msra.mxu1 %v6362_v9  ;;  %v6970_v57 = vor.u32 %v9471_v39, %v6967_v40 }
  0xef   :  { %5122 = vmatpush.bf16.msra.mxu2 %v6490_v10  ;;  %v9535_v51 = vld [vmem:[#allocation2 + $0x7e4] sm:$0xf]  ;;  %v7223_v52 = vld [vmem:[#allocation2 + $0x7f0] sm:$0xf0]  ;;  %v7098_v58 = vor.u32 %v9503_v43, %v7095_v47 }
  0xf0   :  { %5135 = vmatpush.bf16.msra.mxu3 %v6618_v21  ;;  %v9435_v59 = vld [vmem:[#allocation2 + $0x4c4] sm:$0xf]  ;;  %v6823_v60 = vld [vmem:[#allocation2 + $0x4d0] sm:$0xf0]  ;;  %v7226_v62 = vor.u32 %v9535_v51, %v7223_v52 }
  0xf1   :  { %v9467_v61 = vld [vmem:[#allocation2 + $0x5c4] sm:$0xf]  ;;  %5097 = vmatpush.bf16.msra.mxu0 %v6218_v53  ;;  %v6951_v63 = vld [vmem:[#allocation2 + $0x5d0] sm:$0xf0]  ;;  %v6826_v4 = vor.u32 %v9435_v59, %v6823_v60 }
  0xf2   :  { %v9499_v0 = vld [vmem:[#allocation2 + $0x6c4] sm:$0xf]  ;;  %v7079_v1 = vld [vmem:[#allocation2 + $0x6d0] sm:$0xf0]  ;;  %5110 = vmatpush.bf16.msra.mxu1 %v6346_v48  ;;  %v6954_v5 = vor.u32 %v9467_v61, %v6951_v63  ;;  %v4891_v48 = vpop.f32.mrf.mxu0 }
  0xf3   :  { %5123 = vmatpush.bf16.msra.mxu2 %v6474_v50  ;;  %v9531_v2 = vld [vmem:[#allocation2 + $0x7c4] sm:$0xf]  ;;  %v7207_v3 = vld [vmem:[#allocation2 + $0x7d0] sm:$0xf0]  ;;  %v7082_v6 = vor.u32 %v9499_v0, %v7079_v1  ;;  %v4892_v52 = vadd.f32 %v4891_v48, %v10325_v55 }
  0xf4   :  { %5136 = vmatpush.bf16.msra.mxu3 %v6602_v54  ;;  %v9431_v8 = vld [vmem:[#allocation2 + $0x4a4] sm:$0xf]  ;;  %v6807_v9 = vld [vmem:[#allocation2 + $0x4b0] sm:$0xf0]  ;;  %v7210_v13 = vor.u32 %v9531_v2, %v7207_v3  ;;  %5098 = vmatmul.bf16.vlgmr.msra.gmra.mxu0 %v10222_v19 }
  0xf5   :  { %5142 = vmatpush.bf16.msrb.mxu0 %v6842_v56  ;;  %v9463_v10 = vld [vmem:[#allocation2 + $0x5a4] sm:$0xf]  ;;  %v6935_v14 = vld [vmem:[#allocation2 + $0x5b0] sm:$0xf0]  ;;  %v6810_v26 = vor.u32 %v9431_v8, %v6807_v9  ;;  %5111 = vmatmul.bf16.vlgmr.msra.gmra.mxu1 %v10226_v22  ;;  %v4904_v56 = vpop.f32.mrf.mxu1 }
  0xf6   :  { %5155 = vmatpush.bf16.msrb.mxu1 %v6970_v57  ;;  %v9495_v15 = vld [vmem:[#allocation2 + $0x6a4] sm:$0xf]  ;;  %v7063_v17 = vld [vmem:[#allocation2 + $0x6b0] sm:$0xf0]  ;;  %5124 = vmatmul.bf16.vlgmr.msra.gmra.mxu2 %v10220_v18  ;;  %v6938_v27 = vor.u32 %v9463_v10, %v6935_v14  ;;  %v4905_v63 = vadd.f32 %v4904_v56, %v4892_v52  ;;  %v4917_v14 = vpop.f32.mrf.mxu2 }
  0xf7   :  { %5168 = vmatpush.bf16.msrb.mxu2 %v7098_v58  ;;  %v9527_v21 = vld [vmem:[#allocation2 + $0x7a4] sm:$0xf]  ;;  %v7191_v24 = vld [vmem:[#allocation2 + $0x7b0] sm:$0xf0]  ;;  %5137 = vmatmul.bf16.vlgmr.msra.gmra.mxu3 %v10224_v20  ;;  %v7066_v32 = vor.u32 %v9495_v15, %v7063_v17 }
  0xf8   :  { %5181 = vmatpush.bf16.msrb.mxu3 %v7226_v62  ;;  %v9427_v34 = vld [vmem:[#allocation2 + $0x484] sm:$0xf]  ;;  %v6791_v36 = vld [vmem:[#allocation2 + $0x490] sm:$0xf0]  ;;  %v7194_v53 = vor.u32 %v9527_v21, %v7191_v24  ;;  %v4918_v24 = vadd.f32 %v4917_v14, %v4905_v63 }
  0xf9   :  { %5143 = vmatpush.bf16.msrb.mxu0 %v6826_v4  ;;  %v9459_v39 = vld [vmem:[#allocation2 + $0x584] sm:$0xf]  ;;  %v6919_v40 = vld [vmem:[#allocation2 + $0x590] sm:$0xf0]  ;;  %v6794_v54 = vor.u32 %v9427_v34, %v6791_v36 }
  0xfa   :  { %5156 = vmatpush.bf16.msrb.mxu1 %v6954_v5  ;;  %v9491_v43 = vld [vmem:[#allocation2 + $0x684] sm:$0xf]  ;;  %v7047_v47 = vld [vmem:[#allocation2 + $0x690] sm:$0xf0]  ;;  %v6922_v57 = vor.u32 %v9459_v39, %v6919_v40  ;;  %v4893_v34 = vpop.f32.mrf.mxu0 }
  0xfb   :  { %5169 = vmatpush.bf16.msrb.mxu2 %v7082_v6  ;;  %v9523_v50 = vld [vmem:[#allocation2 + $0x784] sm:$0xf]  ;;  %v7175_v51 = vld [vmem:[#allocation2 + $0x790] sm:$0xf0]  ;;  %v7050_v58 = vor.u32 %v9491_v43, %v7047_v47 }
  0xfc   :  { %5182 = vmatpush.bf16.msrb.mxu3 %v7210_v13  ;;  %v9423_v59 = vld [vmem:[#allocation2 + $0x464] sm:$0xf]  ;;  %v6775_v60 = vld [vmem:[#allocation2 + $0x470] sm:$0xf0]  ;;  %v7178_v62 = vor.u32 %v9523_v50, %v7175_v51 }
  0xfd   :  { %5144 = vmatpush.bf16.msrb.mxu0 %v6810_v26  ;;  %v9455_v61 = vld [vmem:[#allocation2 + $0x564] sm:$0xf]  ;;  %v6903_v0 = vld [vmem:[#allocation2 + $0x570] sm:$0xf0]  ;;  %v6778_v5 = vor.u32 %v9423_v59, %v6775_v60  ;;  %v4930_v26 = vpop.f32.mrf.mxu3  ;;  %v4906_v39 = vpop.f32.mrf.mxu1 }
  0xfe   :  { %5157 = vmatpush.bf16.msrb.mxu1 %v6938_v27  ;;  %v9487_v1 = vld [vmem:[#allocation2 + $0x664] sm:$0xf]  ;;  %v7031_v2 = vld [vmem:[#allocation2 + $0x670] sm:$0xf0]  ;;  %v6906_v55 = vor.u32 %v9455_v61, %v6903_v0 }
  0xff   :  { %5170 = vmatpush.bf16.msrb.mxu2 %v7066_v32  ;;  %v9519_v3 = vld [vmem:[#allocation2 + $0x764] sm:$0xf]  ;;  %v7159_v4 = vld [vmem:[#allocation2 + $0x770] sm:$0xf0]  ;;  %v7034_v6 = vor.u32 %v9487_v1, %v7031_v2 }
 0x100   :  { %5183 = vmatpush.bf16.msrb.mxu3 %v7194_v53  ;;  %v9419_v8 = vld [vmem:[#allocation2 + $0x444] sm:$0xf]  ;;  %v6759_v9 = vld [vmem:[#allocation2 + $0x450] sm:$0xf0]  ;;  %v7162_v13 = vor.u32 %v9519_v3, %v7159_v4  ;;  %v10332_v53 = vadd.f32 %v4930_v26, %v4918_v24 }
 0x101   :  { %5145 = vmatpush.bf16.msrb.mxu0 %v6794_v54  ;;  %v9451_v10 = vld [vmem:[#allocation2 + $0x544] sm:$0xf]  ;;  %v6887_v15 = vld [vmem:[#allocation2 + $0x550] sm:$0xf0]  ;;  %v6762_v36 = vor.u32 %v9419_v8, %v6759_v9 }
 0x102   :  { %5158 = vmatpush.bf16.msrb.mxu1 %v6922_v57  ;;  %v9483_v17 = vld [vmem:[#allocation2 + $0x644] sm:$0xf]  ;;  %v7015_v21 = vld [vmem:[#allocation2 + $0x650] sm:$0xf0]  ;;  %v6890_v40 = vor.u32 %v9451_v10, %v6887_v15 }
 0x103   :  { %5171 = vmatpush.bf16.msrb.mxu2 %v7050_v58  ;;  %v9515_v27 = vld [vmem:[#allocation2 + $0x744] sm:$0xf]  ;;  %v7143_v32 = vld [vmem:[#allocation2 + $0x750] sm:$0xf0]  ;;  %v7018_v43 = vor.u32 %v9483_v17, %v7015_v21 }
 0x104   :  { %5184 = vmatpush.bf16.msrb.mxu3 %v7178_v62  ;;  %v9415_v47 = vld [vmem:[#allocation2 + $0x424] sm:$0xf]  ;;  %v6743_v48 = vld [vmem:[#allocation2 + $0x430] sm:$0xf0]  ;;  %v7146_v51 = vor.u32 %v9515_v27, %v7143_v32 }
 0x105   :  { %5146 = vmatpush.bf16.msrb.mxu0 %v6778_v5  ;;  %v9447_v50 = vld [vmem:[#allocation2 + $0x524] sm:$0xf]  ;;  %v6871_v52 = vld [vmem:[#allocation2 + $0x530] sm:$0xf0]  ;;  %v6746_v59 = vor.u32 %v9415_v47, %v6743_v48 }
 0x106   :  { %5159 = vmatpush.bf16.msrb.mxu1 %v6906_v55  ;;  %v9479_v54 = vld [vmem:[#allocation2 + $0x624] sm:$0xf]  ;;  %v6999_v56 = vld [vmem:[#allocation2 + $0x630] sm:$0xf0]  ;;  %v6874_v62 = vor.u32 %v9447_v50, %v6871_v52 }
 0x107   :  { %5172 = vmatpush.bf16.msrb.mxu2 %v7034_v6  ;;  %v9511_v57 = vld [vmem:[#allocation2 + $0x724] sm:$0xf]  ;;  %v7127_v58 = vld [vmem:[#allocation2 + $0x730] sm:$0xf0]  ;;  %v7002_v63 = vor.u32 %v9479_v54, %v6999_v56  ;;  %v4919_v6 = vpop.f32.mrf.mxu2 }
 0x108   :  { %5185 = vmatpush.bf16.msrb.mxu3 %v7162_v13  ;;  %v9411_v60 = vld [vmem:[#allocation2 + $0x404] sm:$0xf]  ;;  %v6727_v61 = vld [vmem:[#allocation2 + $0x410] sm:$0xf0]  ;;  %v7130_v3 = vor.u32 %v9511_v57, %v7127_v58  ;;  %v4932_v13 = vpop.f32.mrf.mxu3 }
 0x109   :  { %5147 = vmatpush.bf16.msrb.mxu0 %v6762_v36  ;;  %v9443_v0 = vld [vmem:[#allocation2 + $0x504] sm:$0xf]  ;;  %v6855_v1 = vld [vmem:[#allocation2 + $0x510] sm:$0xf0]  ;;  %v6730_v14 = vor.u32 %v9411_v60, %v6727_v61 }
 0x10a   :  { %5160 = vmatpush.bf16.msrb.mxu1 %v6890_v40  ;;  %v9475_v2 = vld [vmem:[#allocation2 + $0x604] sm:$0xf]  ;;  %v6983_v4 = vld [vmem:[#allocation2 + $0x610] sm:$0xf0]  ;;  %v6858_v24 = vor.u32 %v9443_v0, %v6855_v1 }
 0x10b   :  { %5173 = vmatpush.bf16.msrb.mxu2 %v7018_v43  ;;  %v9507_v5 = vld [vmem:[#allocation2 + $0x704] sm:$0xf]  ;;  %v7111_v55 = vld [vmem:[#allocation2 + $0x710] sm:$0xf0]  ;;  %v6986_v26 = vor.u32 %v9475_v2, %v6983_v4 }
 0x10c   :  { %5186 = vmatpush.bf16.msrb.mxu3 %v7146_v51  ;;  %v9567_v8 = vld [vmem:[#allocation2 + $0x8e4] sm:$0xf]  ;;  %v7351_v9 = vld [vmem:[#allocation2 + $0x8f0] sm:$0xf0]  ;;  %v7114_v34 = vor.u32 %v9507_v5, %v7111_v55 }
 0x10d   :  { %v9599_v10 = vld [vmem:[#allocation2 + $0x9e4] sm:$0xf]  ;;  %5148 = vmatpush.bf16.msrb.mxu0 %v6746_v59  ;;  %v7479_v15 = vld [vmem:[#allocation2 + $0x9f0] sm:$0xf0]  ;;  %v7354_v36 = vor.u32 %v9567_v8, %v7351_v9 }
 0x10e   :  { %v9631_v17 = vld [vmem:[#allocation2 + $0xae4] sm:$0xf]  ;;  %v7607_v21 = vld [vmem:[#allocation2 + $0xaf0] sm:$0xf0]  ;;  %5161 = vmatpush.bf16.msrb.mxu1 %v6874_v62  ;;  %v7482_v39 = vor.u32 %v9599_v10, %v7479_v15 }
 0x10f   :  { %5174 = vmatpush.bf16.msrb.mxu2 %v7002_v63  ;;  %v9663_v27 = vld [vmem:[#allocation2 + $0xbe4] sm:$0xf]  ;;  %v7735_v32 = vld [vmem:[#allocation2 + $0xbf0] sm:$0xf0]  ;;  %v7610_v40 = vor.u32 %v9631_v17, %v7607_v21 }
 0x110   :  { %5187 = vmatpush.bf16.msrb.mxu3 %v7130_v3  ;;  %v9563_v43 = vld [vmem:[#allocation2 + $0x8c4] sm:$0xf]  ;;  %v7335_v47 = vld [vmem:[#allocation2 + $0x8d0] sm:$0xf0]  ;;  %v7738_v50 = vor.u32 %v9663_v27, %v7735_v32 }
 0x111   :  { %v9595_v48 = vld [vmem:[#allocation2 + $0x9c4] sm:$0xf]  ;;  %5149 = vmatpush.bf16.msrb.mxu0 %v6730_v14  ;;  %v7463_v51 = vld [vmem:[#allocation2 + $0x9d0] sm:$0xf0]  ;;  %v7338_v58 = vor.u32 %v9563_v43, %v7335_v47 }
 0x112   :  { %v9627_v52 = vld [vmem:[#allocation2 + $0xac4] sm:$0xf]  ;;  %v7591_v54 = vld [vmem:[#allocation2 + $0xad0] sm:$0xf0]  ;;  %5162 = vmatpush.bf16.msrb.mxu1 %v6858_v24  ;;  %v7466_v59 = vor.u32 %v9595_v48, %v7463_v51  ;;  %v4943_v24 = vpop.f32.mrf.mxu0 }
 0x113   :  { %5175 = vmatpush.bf16.msrb.mxu2 %v6986_v26  ;;  %v9659_v56 = vld [vmem:[#allocation2 + $0xbc4] sm:$0xf]  ;;  %v7719_v57 = vld [vmem:[#allocation2 + $0xbd0] sm:$0xf0]  ;;  %v7594_v60 = vor.u32 %v9627_v52, %v7591_v54  ;;  %v4944_v32 = vadd.f32 %v4943_v24, %v10332_v53 }
 0x114   :  { %5188 = vmatpush.bf16.msrb.mxu3 %v7114_v34  ;;  %v9559_v61 = vld [vmem:[#allocation2 + $0x8a4] sm:$0xf]  ;;  %v7319_v62 = vld [vmem:[#allocation2 + $0x8b0] sm:$0xf0]  ;;  %v7722_v0 = vor.u32 %v9659_v56, %v7719_v57  ;;  %5150 = vmatmul.bf16.vlgmr.msrb.gmra.mxu0 %v10240_v41 }
 0x115   :  { %5194 = vmatpush.bf16.msra.mxu0 %v7354_v36  ;;  %v9591_v63 = vld [vmem:[#allocation2 + $0x9a4] sm:$0xf]  ;;  %v7447_v1 = vld [vmem:[#allocation2 + $0x9b0] sm:$0xf0]  ;;  %v7322_v55 = vor.u32 %v9559_v61, %v7319_v62  ;;  %5163 = vmatmul.bf16.vlgmr.msrb.gmra.mxu1 %v10244_v44  ;;  %v4956_v36 = vpop.f32.mrf.mxu1 }
 0x116   :  { %5207 = vmatpush.bf16.msra.mxu1 %v7482_v39  ;;  %5176 = vmatmul.bf16.vlgmr.msrb.gmra.mxu2 %v10238_v38  ;;  %v9623_v2 = vld [vmem:[#allocation2 + $0xaa4] sm:$0xf]  ;;  %v7575_v3 = vld [vmem:[#allocation2 + $0xab0] sm:$0xf0]  ;;  %v7450_v6 = vor.u32 %v9591_v63, %v7447_v1  ;;  %v4957_v51 = vadd.f32 %v4956_v36, %v4944_v32 }
 0x117   :  { %5220 = vmatpush.bf16.msra.mxu2 %v7610_v40  ;;  %v9655_v4 = vld [vmem:[#allocation2 + $0xba4] sm:$0xf]  ;;  %v7703_v5 = vld [vmem:[#allocation2 + $0xbb0] sm:$0xf0]  ;;  %5189 = vmatmul.bf16.vlgmr.msrb.gmra.mxu3 %v10242_v42  ;;  %v7578_v8 = vor.u32 %v9623_v2, %v7575_v3 }
 0x118   :  { %5233 = vmatpush.bf16.msra.mxu3 %v7738_v50  ;;  %v9555_v9 = vld [vmem:[#allocation2 + $0x884] sm:$0xf]  ;;  %v7303_v10 = vld [vmem:[#allocation2 + $0x890] sm:$0xf0]  ;;  %v7706_v14 = vor.u32 %v9655_v4, %v7703_v5 }
 0x119   :  { %5195 = vmatpush.bf16.msra.mxu0 %v7338_v58  ;;  %v9587_v13 = vld [vmem:[#allocation2 + $0x984] sm:$0xf]  ;;  %v7431_v15 = vld [vmem:[#allocation2 + $0x990] sm:$0xf0]  ;;  %v7306_v34 = vor.u32 %v9555_v9, %v7303_v10  ;;  %v4969_v1 = vpop.f32.mrf.mxu2 }
 0x11a   :  { %5208 = vmatpush.bf16.msra.mxu1 %v7466_v59  ;;  %v9619_v17 = vld [vmem:[#allocation2 + $0xa84] sm:$0xf]  ;;  %v7559_v21 = vld [vmem:[#allocation2 + $0xa90] sm:$0xf0]  ;;  %v7434_v39 = vor.u32 %v9587_v13, %v7431_v15  ;;  %v4970_v5 = vadd.f32 %v4969_v1, %v4957_v51  ;;  %v4945_v9 = vpop.f32.mrf.mxu0 }
 0x11b   :  { %5221 = vmatpush.bf16.msra.mxu2 %v7594_v60  ;;  %v9651_v26 = vld [vmem:[#allocation2 + $0xb84] sm:$0xf]  ;;  %v7687_v27 = vld [vmem:[#allocation2 + $0xb90] sm:$0xf0]  ;;  %v7562_v40 = vor.u32 %v9619_v17, %v7559_v21 }
 0x11c   :  { %5234 = vmatpush.bf16.msra.mxu3 %v7722_v0  ;;  %v9551_v43 = vld [vmem:[#allocation2 + $0x864] sm:$0xf]  ;;  %v7287_v47 = vld [vmem:[#allocation2 + $0x870] sm:$0xf0]  ;;  %v7690_v50 = vor.u32 %v9651_v26, %v7687_v27 }
 0x11d   :  { %5196 = vmatpush.bf16.msra.mxu0 %v7322_v55  ;;  %v9583_v48 = vld [vmem:[#allocation2 + $0x964] sm:$0xf]  ;;  %v7415_v52 = vld [vmem:[#allocation2 + $0x970] sm:$0xf0]  ;;  %v7290_v59 = vor.u32 %v9551_v43, %v7287_v47  ;;  %v4982_v55 = vpop.f32.mrf.mxu3  ;;  %v4958_v13 = vpop.f32.mrf.mxu1 }
 0x11e   :  { %5209 = vmatpush.bf16.msra.mxu1 %v7450_v6  ;;  %v9615_v54 = vld [vmem:[#allocation2 + $0xa64] sm:$0xf]  ;;  %v7543_v56 = vld [vmem:[#allocation2 + $0xa70] sm:$0xf0]  ;;  %v7418_v53 = vor.u32 %v9583_v48, %v7415_v52 }
 0x11f   :  { %5222 = vmatpush.bf16.msra.mxu2 %v7578_v8  ;;  %v9647_v57 = vld [vmem:[#allocation2 + $0xb64] sm:$0xf]  ;;  %v7671_v58 = vld [vmem:[#allocation2 + $0xb70] sm:$0xf0]  ;;  %v7546_v60 = vor.u32 %v9615_v54, %v7543_v56 }
 0x120   :  { %5235 = vmatpush.bf16.msra.mxu3 %v7706_v14  ;;  %v9547_v61 = vld [vmem:[#allocation2 + $0x844] sm:$0xf]  ;;  %v7271_v62 = vld [vmem:[#allocation2 + $0x850] sm:$0xf0]  ;;  %v7674_v0 = vor.u32 %v9647_v57, %v7671_v58  ;;  %v10339_v14 = vadd.f32 %v4982_v55, %v4970_v5 }
 0x121   :  { %5197 = vmatpush.bf16.msra.mxu0 %v7306_v34  ;;  %v9579_v63 = vld [vmem:[#allocation2 + $0x944] sm:$0xf]  ;;  %v7399_v2 = vld [vmem:[#allocation2 + $0x950] sm:$0xf0]  ;;  %v7274_v10 = vor.u32 %v9547_v61, %v7271_v62 }
 0x122   :  { %5210 = vmatpush.bf16.msra.mxu1 %v7434_v39  ;;  %v9611_v3 = vld [vmem:[#allocation2 + $0xa44] sm:$0xf]  ;;  %v7527_v4 = vld [vmem:[#allocation2 + $0xa50] sm:$0xf0]  ;;  %v7402_v15 = vor.u32 %v9579_v63, %v7399_v2 }
 0x123   :  { %5223 = vmatpush.bf16.msra.mxu2 %v7562_v40  ;;  %v9643_v6 = vld [vmem:[#allocation2 + $0xb44] sm:$0xf]  ;;  %v7655_v8 = vld [vmem:[#allocation2 + $0xb50] sm:$0xf0]  ;;  %v7530_v17 = vor.u32 %v9611_v3, %v7527_v4 }
 0x124   :  { %5236 = vmatpush.bf16.msra.mxu3 %v7690_v50  ;;  %v9543_v21 = vld [vmem:[#allocation2 + $0x824] sm:$0xf]  ;;  %v7255_v24 = vld [vmem:[#allocation2 + $0x830] sm:$0xf0]  ;;  %v7658_v27 = vor.u32 %v9643_v6, %v7655_v8 }
 0x125   :  { %5198 = vmatpush.bf16.msra.mxu0 %v7290_v59  ;;  %v9575_v26 = vld [vmem:[#allocation2 + $0x924] sm:$0xf]  ;;  %v7383_v32 = vld [vmem:[#allocation2 + $0x930] sm:$0xf0]  ;;  %v7258_v43 = vor.u32 %v9543_v21, %v7255_v24 }
 0x126   :  { %5211 = vmatpush.bf16.msra.mxu1 %v7418_v53  ;;  %v9607_v34 = vld [vmem:[#allocation2 + $0xa24] sm:$0xf]  ;;  %v7511_v36 = vld [vmem:[#allocation2 + $0xa30] sm:$0xf0]  ;;  %v7386_v50 = vor.u32 %v9575_v26, %v7383_v32 }
 0x127   :  { %5224 = vmatpush.bf16.msra.mxu2 %v7546_v60  ;;  %v9639_v39 = vld [vmem:[#allocation2 + $0xb24] sm:$0xf]  ;;  %v7639_v40 = vld [vmem:[#allocation2 + $0xb30] sm:$0xf0]  ;;  %v7514_v51 = vor.u32 %v9607_v34, %v7511_v36  ;;  %v4971_v60 = vpop.f32.mrf.mxu2 }
 0x128   :  { %5237 = vmatpush.bf16.msra.mxu3 %v7674_v0  ;;  %v9539_v47 = vld [vmem:[#allocation2 + $0x804] sm:$0xf]  ;;  %v7239_v48 = vld [vmem:[#allocation2 + $0x810] sm:$0xf0]  ;;  %v7642_v57 = vor.u32 %v9639_v39, %v7639_v40  ;;  %v4984_v0 = vpop.f32.mrf.mxu3 }
 0x129   :  { %5199 = vmatpush.bf16.msra.mxu0 %v7274_v10  ;;  %v9571_v52 = vld [vmem:[#allocation2 + $0x904] sm:$0xf]  ;;  %v7367_v54 = vld [vmem:[#allocation2 + $0x910] sm:$0xf0]  ;;  %v7242_v1 = vor.u32 %v9539_v47, %v7239_v48 }
 0x12a   :  { %5212 = vmatpush.bf16.msra.mxu1 %v7402_v15  ;;  %v9603_v56 = vld [vmem:[#allocation2 + $0xa04] sm:$0xf]  ;;  %v7495_v58 = vld [vmem:[#allocation2 + $0xa10] sm:$0xf0]  ;;  %v7370_v5 = vor.u32 %v9571_v52, %v7367_v54 }
 0x12b   :  { %5225 = vmatpush.bf16.msra.mxu2 %v7530_v17  ;;  %v9635_v59 = vld [vmem:[#allocation2 + $0xb04] sm:$0xf]  ;;  %v7623_v53 = vld [vmem:[#allocation2 + $0xb10] sm:$0xf0]  ;;  %v7498_v55 = vor.u32 %v9603_v56, %v7495_v58 }
 0x12c   :  { %5238 = vmatpush.bf16.msra.mxu3 %v7658_v27  ;;  %v9695_v61 = vld [vmem:[#allocation2 + $0xce4] sm:$0xf]  ;;  %v7863_v62 = vld [vmem:[#allocation2 + $0xcf0] sm:$0xf0]  ;;  %v7626_v9 = vor.u32 %v9635_v59, %v7623_v53 }
 0x12d   :  { %v9727_v63 = vld [vmem:[#allocation2 + $0xde4] sm:$0xf]  ;;  %5200 = vmatpush.bf16.msra.mxu0 %v7258_v43  ;;  %v7991_v2 = vld [vmem:[#allocation2 + $0xdf0] sm:$0xf0]  ;;  %v7866_v10 = vor.u32 %v9695_v61, %v7863_v62 }
 0x12e   :  { %v9759_v3 = vld [vmem:[#allocation2 + $0xee4] sm:$0xf]  ;;  %v8119_v4 = vld [vmem:[#allocation2 + $0xef0] sm:$0xf0]  ;;  %5213 = vmatpush.bf16.msra.mxu1 %v7386_v50  ;;  %v7994_v13 = vor.u32 %v9727_v63, %v7991_v2 }
 0x12f   :  { %5226 = vmatpush.bf16.msra.mxu2 %v7514_v51  ;;  %v9791_v6 = vld [vmem:[#allocation2 + $0xfe4] sm:$0xf]  ;;  %v8247_v8 = vld [vmem:[#allocation2 + $0xff0] sm:$0xf0]  ;;  %v8122_v15 = vor.u32 %v9759_v3, %v8119_v4 }
 0x130   :  { %5239 = vmatpush.bf16.msra.mxu3 %v7642_v57  ;;  %v9691_v17 = vld [vmem:[#allocation2 + $0xcc4] sm:$0xf]  ;;  %v7847_v21 = vld [vmem:[#allocation2 + $0xcd0] sm:$0xf0]  ;;  %v8250_v26 = vor.u32 %v9791_v6, %v8247_v8 }
 0x131   :  { %v9723_v24 = vld [vmem:[#allocation2 + $0xdc4] sm:$0xf]  ;;  %5201 = vmatpush.bf16.msra.mxu0 %v7242_v1  ;;  %v7975_v27 = vld [vmem:[#allocation2 + $0xdd0] sm:$0xf0]  ;;  %v7850_v40 = vor.u32 %v9691_v17, %v7847_v21 }
 0x132   :  { %v9755_v32 = vld [vmem:[#allocation2 + $0xec4] sm:$0xf]  ;;  %v8103_v34 = vld [vmem:[#allocation2 + $0xed0] sm:$0xf0]  ;;  %5214 = vmatpush.bf16.msra.mxu1 %v7370_v5  ;;  %v7978_v43 = vor.u32 %v9723_v24, %v7975_v27  ;;  %v4995_v5 = vpop.f32.mrf.mxu0 }
 0x133   :  { %5227 = vmatpush.bf16.msra.mxu2 %v7498_v55  ;;  %v9787_v36 = vld [vmem:[#allocation2 + $0xfc4] sm:$0xf]  ;;  %v8231_v39 = vld [vmem:[#allocation2 + $0xfd0] sm:$0xf0]  ;;  %v8106_v47 = vor.u32 %v9755_v32, %v8103_v34  ;;  %v4996_v8 = vadd.f32 %v4995_v5, %v10339_v14 }
 0x134   :  { %5240 = vmatpush.bf16.msra.mxu3 %v7626_v9  ;;  %v9687_v48 = vld [vmem:[#allocation2 + $0xca4] sm:$0xf]  ;;  %v7831_v50 = vld [vmem:[#allocation2 + $0xcb0] sm:$0xf0]  ;;  %5202 = vmatmul.bf16.vlgmr.msra.gmra.mxu0 %v10256_v25  ;;  %v8234_v52 = vor.u32 %v9787_v36, %v8231_v39 }
 0x135   :  { %5246 = vmatpush.bf16.msrb.mxu0 %v7866_v10  ;;  %v9719_v51 = vld [vmem:[#allocation2 + $0xda4] sm:$0xf]  ;;  %v7959_v54 = vld [vmem:[#allocation2 + $0xdb0] sm:$0xf0]  ;;  %5215 = vmatmul.bf16.vlgmr.msra.gmra.mxu1 %v10260_v30  ;;  %v7834_v53 = vor.u32 %v9687_v48, %v7831_v50  ;;  %v5008_v10 = vpop.f32.mrf.mxu1 }
 0x136   :  { %5259 = vmatpush.bf16.msrb.mxu1 %v7994_v13  ;;  %v9751_v56 = vld [vmem:[#allocation2 + $0xea4] sm:$0xf]  ;;  %v8087_v57 = vld [vmem:[#allocation2 + $0xeb0] sm:$0xf0]  ;;  %5228 = vmatmul.bf16.vlgmr.msra.gmra.mxu2 %v10258_v29  ;;  %v7962_v60 = vor.u32 %v9719_v51, %v7959_v54  ;;  %v5009_v27 = vadd.f32 %v5008_v10, %v4996_v8 }
 0x137   :  { %5272 = vmatpush.bf16.msrb.mxu2 %v8122_v15  ;;  %v9783_v58 = vld [vmem:[#allocation2 + $0xfa4] sm:$0xf]  ;;  %v8215_v59 = vld [vmem:[#allocation2 + $0xfb0] sm:$0xf0]  ;;  %5241 = vmatmul.bf16.vlgmr.msra.gmra.mxu3 %v10262_v33  ;;  %v8090_v61 = vor.u32 %v9751_v56, %v8087_v57  ;;  %v5021_v54 = vpop.f32.mrf.mxu2 }
 0x138   :  { %5285 = vmatpush.bf16.msrb.mxu3 %v8250_v26  ;;  %v9683_v62 = vld [vmem:[#allocation2 + $0xc84] sm:$0xf]  ;;  %v7815_v63 = vld [vmem:[#allocation2 + $0xc90] sm:$0xf0]  ;;  %v8218_v1 = vor.u32 %v9783_v58, %v8215_v59  ;;  %v5022_v59 = vadd.f32 %v5021_v54, %v5009_v27 }
 0x139   :  { %5247 = vmatpush.bf16.msrb.mxu0 %v7850_v40  ;;  %v9715_v0 = vld [vmem:[#allocation2 + $0xd84] sm:$0xf]  ;;  %v7943_v2 = vld [vmem:[#allocation2 + $0xd90] sm:$0xf0]  ;;  %v7818_v9 = vor.u32 %v9683_v62, %v7815_v63 }
 0x13a   :  { %5260 = vmatpush.bf16.msrb.mxu1 %v7978_v43  ;;  %v9747_v3 = vld [vmem:[#allocation2 + $0xe84] sm:$0xf]  ;;  %v8071_v4 = vld [vmem:[#allocation2 + $0xe90] sm:$0xf0]  ;;  %v7946_v13 = vor.u32 %v9715_v0, %v7943_v2  ;;  %v4997_v62 = vpop.f32.mrf.mxu0 }
 0x13b   :  { %5273 = vmatpush.bf16.msrb.mxu2 %v8106_v47  ;;  %v9779_v55 = vld [vmem:[#allocation2 + $0xf84] sm:$0xf]  ;;  %v8199_v6 = vld [vmem:[#allocation2 + $0xf90] sm:$0xf0]  ;;  %v8074_v15 = vor.u32 %v9747_v3, %v8071_v4 }
 0x13c   :  { %5286 = vmatpush.bf16.msrb.mxu3 %v8234_v52  ;;  %v9679_v17 = vld [vmem:[#allocation2 + $0xc64] sm:$0xf]  ;;  %v7799_v21 = vld [vmem:[#allocation2 + $0xc70] sm:$0xf0]  ;;  %v8202_v26 = vor.u32 %v9779_v55, %v8199_v6 }
 0x13d   :  { %5248 = vmatpush.bf16.msrb.mxu0 %v7834_v53  ;;  %v9711_v24 = vld [vmem:[#allocation2 + $0xd64] sm:$0xf]  ;;  %v7927_v32 = vld [vmem:[#allocation2 + $0xd70] sm:$0xf0]  ;;  %v7802_v43 = vor.u32 %v9679_v17, %v7799_v21  ;;  %v5034_v53 = vpop.f32.mrf.mxu3  ;;  %v5010_v0 = vpop.f32.mrf.mxu1 }
 0x13e   :  { %5261 = vmatpush.bf16.msrb.mxu1 %v7962_v60  ;;  %v9743_v34 = vld [vmem:[#allocation2 + $0xe64] sm:$0xf]  ;;  %v8055_v36 = vld [vmem:[#allocation2 + $0xe70] sm:$0xf0]  ;;  %v7930_v14 = vor.u32 %v9711_v24, %v7927_v32 }
 0x13f   :  { %5274 = vmatpush.bf16.msrb.mxu2 %v8090_v61  ;;  %v9775_v39 = vld [vmem:[#allocation2 + $0xf64] sm:$0xf]  ;;  %v8183_v40 = vld [vmem:[#allocation2 + $0xf70] sm:$0xf0]  ;;  %v8058_v47 = vor.u32 %v9743_v34, %v8055_v36 }
 0x140   :  { %5287 = vmatpush.bf16.msrb.mxu3 %v8218_v1  ;;  %v9675_v48 = vld [vmem:[#allocation2 + $0xc44] sm:$0xf]  ;;  %v7783_v50 = vld [vmem:[#allocation2 + $0xc50] sm:$0xf0]  ;;  %v8186_v52 = vor.u32 %v9775_v39, %v8183_v40  ;;  %v10346_v1 = vadd.f32 %v5034_v53, %v5022_v59 }
 0x141   :  { %5249 = vmatpush.bf16.msrb.mxu0 %v7818_v9  ;;  %v9707_v51 = vld [vmem:[#allocation2 + $0xd44] sm:$0xf]  ;;  %v7911_v56 = vld [vmem:[#allocation2 + $0xd50] sm:$0xf0]  ;;  %v7786_v63 = vor.u32 %v9675_v48, %v7783_v50 }
 0x142   :  { %5262 = vmatpush.bf16.msrb.mxu1 %v7946_v13  ;;  %v9739_v57 = vld [vmem:[#allocation2 + $0xe44] sm:$0xf]  ;;  %v8039_v58 = vld [vmem:[#allocation2 + $0xe50] sm:$0xf0]  ;;  %v7914_v2 = vor.u32 %v9707_v51, %v7911_v56 }
 0x143   :  { %5275 = vmatpush.bf16.msrb.mxu2 %v8074_v15  ;;  %v9771_v60 = vld [vmem:[#allocation2 + $0xf44] sm:$0xf]  ;;  %v8167_v61 = vld [vmem:[#allocation2 + $0xf50] sm:$0xf0]  ;;  %v8042_v3 = vor.u32 %v9739_v57, %v8039_v58 }
 0x144   :  { %5288 = vmatpush.bf16.msrb.mxu3 %v8202_v26  ;;  %v9671_v4 = vld [vmem:[#allocation2 + $0xc24] sm:$0xf]  ;;  %v7767_v5 = vld [vmem:[#allocation2 + $0xc30] sm:$0xf0]  ;;  %v8170_v6 = vor.u32 %v9771_v60, %v8167_v61 }
 0x145   :  { %5250 = vmatpush.bf16.msrb.mxu0 %v7802_v43  ;;  %v9703_v55 = vld [vmem:[#allocation2 + $0xd24] sm:$0xf]  ;;  %v7895_v8 = vld [vmem:[#allocation2 + $0xd30] sm:$0xf0]  ;;  %v7770_v17 = vor.u32 %v9671_v4, %v7767_v5 }
 0x146   :  { %5263 = vmatpush.bf16.msrb.mxu1 %v7930_v14  ;;  %v9735_v9 = vld [vmem:[#allocation2 + $0xe24] sm:$0xf]  ;;  %v8023_v10 = vld [vmem:[#allocation2 + $0xe30] sm:$0xf0]  ;;  %v7898_v26 = vor.u32 %v9703_v55, %v7895_v8 }
 0x147   :  { %5276 = vmatpush.bf16.msrb.mxu2 %v8058_v47  ;;  %v9767_v13 = vld [vmem:[#allocation2 + $0xf24] sm:$0xf]  ;;  %v8151_v15 = vld [vmem:[#allocation2 + $0xf30] sm:$0xf0]  ;;  %v8026_v27 = vor.u32 %v9735_v9, %v8023_v10  ;;  %v5023_v47 = vpop.f32.mrf.mxu2 }
 0x148   :  { %5289 = vmatpush.bf16.msrb.mxu3 %v8186_v52  ;;  %v9667_v21 = vld [vmem:[#allocation2 + $0xc04] sm:$0xf]  ;;  %v7751_v24 = vld [vmem:[#allocation2 + $0xc10] sm:$0xf0]  ;;  %v8154_v39 = vor.u32 %v9767_v13, %v8151_v15  ;;  %v5036_v52 = vpop.f32.mrf.mxu3 }
 0x149   :  { %5251 = vmatpush.bf16.msrb.mxu0 %v7786_v63  ;;  %v9699_v32 = vld [vmem:[#allocation2 + $0xd04] sm:$0xf]  ;;  %v7879_v34 = vld [vmem:[#allocation2 + $0xd10] sm:$0xf0]  ;;  %v7754_v54 = vor.u32 %v9667_v21, %v7751_v24 }
 0x14a   :  { %5264 = vmatpush.bf16.msrb.mxu1 %v7914_v2  ;;  %v9731_v36 = vld [vmem:[#allocation2 + $0xe04] sm:$0xf]  ;;  %v8007_v40 = vld [vmem:[#allocation2 + $0xe10] sm:$0xf0]  ;;  %v7882_v59 = vor.u32 %v9699_v32, %v7879_v34 }
 0x14b   :  { %5277 = vmatpush.bf16.msrb.mxu2 %v8042_v3  ;;  %v9763_v43 = vld [vmem:[#allocation2 + $0xf04] sm:$0xf]  ;;  %v8135_v14 = vld [vmem:[#allocation2 + $0xf10] sm:$0xf0]  ;;  %v8010_v53 = vor.u32 %v9731_v36, %v8007_v40 }
 0x14c   :  { %5290 = vmatpush.bf16.msrb.mxu3 %v8170_v6  ;;  %v9823_v48 = vld [vmem:[#allocation2 + $0x10e4] sm:$0xf]  ;;  %v8375_v50 = vld [vmem:[#allocation2 + $0x10f0] sm:$0xf0]  ;;  %v8138_v62 = vor.u32 %v9763_v43, %v8135_v14 }
 0x14d   :  { %v9855_v51 = vld [vmem:[#allocation2 + $0x11e4] sm:$0xf]  ;;  %5252 = vmatpush.bf16.msrb.mxu0 %v7770_v17  ;;  %v8503_v56 = vld [vmem:[#allocation2 + $0x11f0] sm:$0xf0]  ;;  %v8378_v63 = vor.u32 %v9823_v48, %v8375_v50 }
 0x14e   :  { %v9887_v57 = vld [vmem:[#allocation2 + $0x12e4] sm:$0xf]  ;;  %v8631_v58 = vld [vmem:[#allocation2 + $0x12f0] sm:$0xf0]  ;;  %5265 = vmatpush.bf16.msrb.mxu1 %v7898_v26  ;;  %v8506_v0 = vor.u32 %v9855_v51, %v8503_v56 }
 0x14f   :  { %5278 = vmatpush.bf16.msrb.mxu2 %v8026_v27  ;;  %v9919_v60 = vld [vmem:[#allocation2 + $0x13e4] sm:$0xf]  ;;  %v8759_v61 = vld [vmem:[#allocation2 + $0x13f0] sm:$0xf0]  ;;  %v8634_v2 = vor.u32 %v9887_v57, %v8631_v58 }
 0x150   :  { %5291 = vmatpush.bf16.msrb.mxu3 %v8154_v39  ;;  %v9819_v3 = vld [vmem:[#allocation2 + $0x10c4] sm:$0xf]  ;;  %v8359_v4 = vld [vmem:[#allocation2 + $0x10d0] sm:$0xf0]  ;;  %v8762_v55 = vor.u32 %v9919_v60, %v8759_v61 }
 0x151   :  { %v9851_v5 = vld [vmem:[#allocation2 + $0x11c4] sm:$0xf]  ;;  %5253 = vmatpush.bf16.msrb.mxu0 %v7754_v54  ;;  %v8487_v6 = vld [vmem:[#allocation2 + $0x11d0] sm:$0xf0]  ;;  %v8362_v15 = vor.u32 %v9819_v3, %v8359_v4 }
 0x152   :  { %v9883_v8 = vld [vmem:[#allocation2 + $0x12c4] sm:$0xf]  ;;  %v8615_v9 = vld [vmem:[#allocation2 + $0x12d0] sm:$0xf0]  ;;  %5266 = vmatpush.bf16.msrb.mxu1 %v7882_v59  ;;  %v8490_v17 = vor.u32 %v9851_v5, %v8487_v6  ;;  %v5047_v59 = vpop.f32.mrf.mxu0 }
 0x153   :  { %5279 = vmatpush.bf16.msrb.mxu2 %v8010_v53  ;;  %v9915_v10 = vld [vmem:[#allocation2 + $0x13c4] sm:$0xf]  ;;  %v8743_v13 = vld [vmem:[#allocation2 + $0x13d0] sm:$0xf0]  ;;  %v8618_v21 = vor.u32 %v9883_v8, %v8615_v9  ;;  %v5048_v61 = vadd.f32 %v5047_v59, %v10346_v1 }
 0x154   :  { %5292 = vmatpush.bf16.msrb.mxu3 %v8138_v62  ;;  %v9815_v24 = vld [vmem:[#allocation2 + $0x10a4] sm:$0xf]  ;;  %v8343_v26 = vld [vmem:[#allocation2 + $0x10b0] sm:$0xf0]  ;;  %5254 = vmatmul.bf16.vlgmr.msrb.gmra.mxu0 %v10274_v23  ;;  %v8746_v32 = vor.u32 %v9915_v10, %v8743_v13 }
 0x155   :  { %5298 = vmatpush.bf16.msra.mxu0 %v8378_v63  ;;  %v9847_v27 = vld [vmem:[#allocation2 + $0x11a4] sm:$0xf]  ;;  %v8471_v34 = vld [vmem:[#allocation2 + $0x11b0] sm:$0xf0]  ;;  %5267 = vmatmul.bf16.vlgmr.msrb.gmra.mxu1 %v10278_v31  ;;  %v8346_v14 = vor.u32 %v9815_v24, %v8343_v26  ;;  %v5060_v63 = vpop.f32.mrf.mxu1 }
 0x156   :  { %5311 = vmatpush.bf16.msra.mxu1 %v8506_v0  ;;  %v9879_v36 = vld [vmem:[#allocation2 + $0x12a4] sm:$0xf]  ;;  %v8599_v39 = vld [vmem:[#allocation2 + $0x12b0] sm:$0xf0]  ;;  %5280 = vmatmul.bf16.vlgmr.msrb.gmra.mxu2 %v10276_v28  ;;  %v8474_v47 = vor.u32 %v9847_v27, %v8471_v34  ;;  %v5061_v6 = vadd.f32 %v5060_v63, %v5048_v61 }
 0x157   :  { %5324 = vmatpush.bf16.msra.mxu2 %v8634_v2  ;;  %v9911_v40 = vld [vmem:[#allocation2 + $0x13a4] sm:$0xf]  ;;  %v8727_v43 = vld [vmem:[#allocation2 + $0x13b0] sm:$0xf0]  ;;  %5293 = vmatmul.bf16.vlgmr.msrb.gmra.mxu3 %v10280_v35  ;;  %v8602_v48 = vor.u32 %v9879_v36, %v8599_v39 }
 0x158   :  { %5337 = vmatpush.bf16.msra.mxu3 %v8762_v55  ;;  %v9811_v50 = vld [vmem:[#allocation2 + $0x1084] sm:$0xf]  ;;  %v8327_v51 = vld [vmem:[#allocation2 + $0x1090] sm:$0xf0]  ;;  %v8730_v54 = vor.u32 %v9911_v40, %v8727_v43 }
 0x159   :  { %5299 = vmatpush.bf16.msra.mxu0 %v8362_v15  ;;  %v9843_v52 = vld [vmem:[#allocation2 + $0x1184] sm:$0xf]  ;;  %v8455_v56 = vld [vmem:[#allocation2 + $0x1190] sm:$0xf0]  ;;  %v8330_v62 = vor.u32 %v9811_v50, %v8327_v51  ;;  %v5073_v34 = vpop.f32.mrf.mxu2 }
 0x15a   :  { %5312 = vmatpush.bf16.msra.mxu1 %v8490_v17  ;;  %v9875_v57 = vld [vmem:[#allocation2 + $0x1284] sm:$0xf]  ;;  %v8583_v58 = vld [vmem:[#allocation2 + $0x1290] sm:$0xf0]  ;;  %v8458_v0 = vor.u32 %v9843_v52, %v8455_v56  ;;  %v5074_v43 = vadd.f32 %v5073_v34, %v5061_v6  ;;  %v5049_v50 = vpop.f32.mrf.mxu0 }
 0x15b   :  { %5325 = vmatpush.bf16.msra.mxu2 %v8618_v21  ;;  %v9907_v53 = vld [vmem:[#allocation2 + $0x1384] sm:$0xf]  ;;  %v8711_v60 = vld [vmem:[#allocation2 + $0x1390] sm:$0xf0]  ;;  %v8586_v2 = vor.u32 %v9875_v57, %v8583_v58 }
 0x15c   :  { %5338 = vmatpush.bf16.msra.mxu3 %v8746_v32  ;;  %v9807_v3 = vld [vmem:[#allocation2 + $0x1064] sm:$0xf]  ;;  %v8311_v4 = vld [vmem:[#allocation2 + $0x1070] sm:$0xf0]  ;;  %v8714_v55 = vor.u32 %v9907_v53, %v8711_v60 }
 0x15d   :  { %5300 = vmatpush.bf16.msra.mxu0 %v8346_v14  ;;  %v9839_v5 = vld [vmem:[#allocation2 + $0x1164] sm:$0xf]  ;;  %v8439_v8 = vld [vmem:[#allocation2 + $0x1170] sm:$0xf0]  ;;  %v8314_v17 = vor.u32 %v9807_v3, %v8311_v4  ;;  %v5086_v14 = vpop.f32.mrf.mxu3  ;;  %v5062_v52 = vpop.f32.mrf.mxu1 }
 0x15e   :  { %5313 = vmatpush.bf16.msra.mxu1 %v8474_v47  ;;  %v9871_v9 = vld [vmem:[#allocation2 + $0x1264] sm:$0xf]  ;;  %v8567_v10 = vld [vmem:[#allocation2 + $0x1270] sm:$0xf0]  ;;  %v8442_v1 = vor.u32 %v9839_v5, %v8439_v8 }
 0x15f   :  { %5326 = vmatpush.bf16.msra.mxu2 %v8602_v48  ;;  %v9903_v13 = vld [vmem:[#allocation2 + $0x1364] sm:$0xf]  ;;  %v8695_v15 = vld [vmem:[#allocation2 + $0x1370] sm:$0xf0]  ;;  %v8570_v21 = vor.u32 %v9871_v9, %v8567_v10 }
 0x160   :  { %5339 = vmatpush.bf16.msra.mxu3 %v8730_v54  ;;  %v9803_v24 = vld [vmem:[#allocation2 + $0x1044] sm:$0xf]  ;;  %v8295_v26 = vld [vmem:[#allocation2 + $0x1050] sm:$0xf0]  ;;  %v8698_v32 = vor.u32 %v9903_v13, %v8695_v15  ;;  %v10353_v54 = vadd.f32 %v5086_v14, %v5074_v43 }
 0x161   :  { %5301 = vmatpush.bf16.msra.mxu0 %v8330_v62  ;;  %v9835_v27 = vld [vmem:[#allocation2 + $0x1144] sm:$0xf]  ;;  %v8423_v36 = vld [vmem:[#allocation2 + $0x1150] sm:$0xf0]  ;;  %v8298_v51 = vor.u32 %v9803_v24, %v8295_v26 }
 0x162   :  { %5314 = vmatpush.bf16.msra.mxu1 %v8458_v0  ;;  %v9867_v39 = vld [vmem:[#allocation2 + $0x1244] sm:$0xf]  ;;  %v8551_v40 = vld [vmem:[#allocation2 + $0x1250] sm:$0xf0]  ;;  %v8426_v56 = vor.u32 %v9835_v27, %v8423_v36 }
 0x163   :  { %5327 = vmatpush.bf16.msra.mxu2 %v8586_v2  ;;  %v9899_v47 = vld [vmem:[#allocation2 + $0x1344] sm:$0xf]  ;;  %v8679_v48 = vld [vmem:[#allocation2 + $0x1350] sm:$0xf0]  ;;  %v8554_v57 = vor.u32 %v9867_v39, %v8551_v40 }
 0x164   :  { %5340 = vmatpush.bf16.msra.mxu3 %v8714_v55  ;;  %v9799_v58 = vld [vmem:[#allocation2 + $0x1024] sm:$0xf]  ;;  %v8279_v59 = vld [vmem:[#allocation2 + $0x1030] sm:$0xf0]  ;;  %v8682_v60 = vor.u32 %v9899_v47, %v8679_v48 }
 0x165   :  { %5302 = vmatpush.bf16.msra.mxu0 %v8314_v17  ;;  %v9831_v53 = vld [vmem:[#allocation2 + $0x1124] sm:$0xf]  ;;  %v8407_v61 = vld [vmem:[#allocation2 + $0x1130] sm:$0xf0]  ;;  %v8282_v3 = vor.u32 %v9799_v58, %v8279_v59 }
 0x166   :  { %5315 = vmatpush.bf16.msra.mxu1 %v8442_v1  ;;  %v9863_v62 = vld [vmem:[#allocation2 + $0x1224] sm:$0xf]  ;;  %v8535_v63 = vld [vmem:[#allocation2 + $0x1230] sm:$0xf0]  ;;  %v8410_v55 = vor.u32 %v9831_v53, %v8407_v61 }
 0x167   :  { %5328 = vmatpush.bf16.msra.mxu2 %v8570_v21  ;;  %v9895_v0 = vld [vmem:[#allocation2 + $0x1324] sm:$0xf]  ;;  %v8663_v2 = vld [vmem:[#allocation2 + $0x1330] sm:$0xf0]  ;;  %v8538_v6 = vor.u32 %v9863_v62, %v8535_v63  ;;  %v5075_v21 = vpop.f32.mrf.mxu2 }
 0x168   :  { %5341 = vmatpush.bf16.msra.mxu3 %v8698_v32  ;;  %v9795_v4 = vld [vmem:[#allocation2 + $0x1004] sm:$0xf]  ;;  %v8263_v5 = vld [vmem:[#allocation2 + $0x1010] sm:$0xf0]  ;;  %v8666_v13 = vor.u32 %v9895_v0, %v8663_v2  ;;  %v5088_v32 = vpop.f32.mrf.mxu3 }
 0x169   :  { %5303 = vmatpush.bf16.msra.mxu0 %v8298_v51  ;;  %v9827_v8 = vld [vmem:[#allocation2 + $0x1104] sm:$0xf]  ;;  %v8391_v9 = vld [vmem:[#allocation2 + $0x1110] sm:$0xf0]  ;;  %v8266_v34 = vor.u32 %v9795_v4, %v8263_v5 }
 0x16a   :  { %5316 = vmatpush.bf16.msra.mxu1 %v8426_v56  ;;  %v9859_v10 = vld [vmem:[#allocation2 + $0x1204] sm:$0xf]  ;;  %v8519_v15 = vld [vmem:[#allocation2 + $0x1210] sm:$0xf0]  ;;  %v8394_v43 = vor.u32 %v9827_v8, %v8391_v9 }
 0x16b   :  { %5329 = vmatpush.bf16.msra.mxu2 %v8554_v57  ;;  %v9891_v17 = vld [vmem:[#allocation2 + $0x1304] sm:$0xf]  ;;  %v8647_v1 = vld [vmem:[#allocation2 + $0x1310] sm:$0xf0]  ;;  %v8522_v14 = vor.u32 %v9859_v10, %v8519_v15 }
 0x16c   :  { %5342 = vmatpush.bf16.msra.mxu3 %v8682_v60  ;;  %v9951_v24 = vld [vmem:[#allocation2 + $0x14e4] sm:$0xf]  ;;  %v8887_v26 = vld [vmem:[#allocation2 + $0x14f0] sm:$0xf0]  ;;  %v8650_v50 = vor.u32 %v9891_v17, %v8647_v1 }
 0x16d   :  { %v9983_v27 = vld [vmem:[#allocation2 + $0x15e4] sm:$0xf]  ;;  %5304 = vmatpush.bf16.msra.mxu0 %v8282_v3  ;;  %v9015_v36 = vld [vmem:[#allocation2 + $0x15f0] sm:$0xf0]  ;;  %v8890_v51 = vor.u32 %v9951_v24, %v8887_v26 }
 0x16e   :  { %v10015_v39 = vld [vmem:[#allocation2 + $0x16e4] sm:$0xf]  ;;  %v9143_v40 = vld [vmem:[#allocation2 + $0x16f0] sm:$0xf0]  ;;  %5317 = vmatpush.bf16.msra.mxu1 %v8410_v55  ;;  %v9018_v52 = vor.u32 %v9983_v27, %v9015_v36 }
 0x16f   :  { %5330 = vmatpush.bf16.msra.mxu2 %v8538_v6  ;;  %v10047_v47 = vld [vmem:[#allocation2 + $0x17e4] sm:$0xf]  ;;  %v9271_v48 = vld [vmem:[#allocation2 + $0x17f0] sm:$0xf0]  ;;  %v9146_v56 = vor.u32 %v10015_v39, %v9143_v40 }
 0x170   :  { %5343 = vmatpush.bf16.msra.mxu3 %v8666_v13  ;;  %v9947_v57 = vld [vmem:[#allocation2 + $0x14c4] sm:$0xf]  ;;  %v8871_v58 = vld [vmem:[#allocation2 + $0x14d0] sm:$0xf0]  ;;  %v9274_v53 = vor.u32 %v10047_v47, %v9271_v48 }
 0x171   :  { %v9979_v59 = vld [vmem:[#allocation2 + $0x15c4] sm:$0xf]  ;;  %5305 = vmatpush.bf16.msra.mxu0 %v8266_v34  ;;  %v8999_v60 = vld [vmem:[#allocation2 + $0x15d0] sm:$0xf0]  ;;  %v8874_v2 = vor.u32 %v9947_v57, %v8871_v58  ;;  %v10064_v34 = vld [vmem:[#allocation5] sm:$0xf] }
 0x172   :  { %v10011_v61 = vld [vmem:[#allocation2 + $0x16c4] sm:$0xf]  ;;  %v9127_v62 = vld [vmem:[#allocation2 + $0x16d0] sm:$0xf0]  ;;  %5318 = vmatpush.bf16.msra.mxu1 %v8394_v43  ;;  %v9002_v3 = vor.u32 %v9979_v59, %v8999_v60  ;;  %v847_v36 = vperm.slane %v10064_v34, 1  ;;  %v5112_v60 = vpop.f32.mrf.mxu1 }
 0x173   :  { %5331 = vmatpush.bf16.msra.mxu2 %v8522_v14  ;;  %v10043_v63 = vld [vmem:[#allocation2 + $0x17c4] sm:$0xf]  ;;  %v9255_v0 = vld [vmem:[#allocation2 + $0x17d0] sm:$0xf0]  ;;  %v9130_v4 = vor.u32 %v10011_v61, %v9127_v62 }
 0x174   :  { %5344 = vmatpush.bf16.msra.mxu3 %v8650_v50  ;;  %v9943_v5 = vld [vmem:[#allocation2 + $0x14a4] sm:$0xf]  ;;  %v8855_v55 = vld [vmem:[#allocation2 + $0x14b0] sm:$0xf0]  ;;  %5306 = vmatmul.bf16.vlgmr.msra.gmra.mxu0 %v10292_v37  ;;  %v9258_v8 = vor.u32 %v10043_v63, %v9255_v0 }
 0x175   :  { %5350 = vmatpush.bf16.msrb.mxu0 %v8890_v51  ;;  %v9975_v6 = vld [vmem:[#allocation2 + $0x15a4] sm:$0xf]  ;;  %v8983_v9 = vld [vmem:[#allocation2 + $0x15b0] sm:$0xf0]  ;;  %5319 = vmatmul.bf16.vlgmr.msra.gmra.mxu1 %v10296_v46  ;;  %v8858_v1 = vor.u32 %v9943_v5, %v8855_v55  ;;  %v5099_v51 = vpop.f32.mrf.mxu0 }
 0x176   :  { %5363 = vmatpush.bf16.msrb.mxu1 %v9018_v52  ;;  %v10007_v10 = vld [vmem:[#allocation2 + $0x16a4] sm:$0xf]  ;;  %v9111_v13 = vld [vmem:[#allocation2 + $0x16b0] sm:$0xf0]  ;;  %5332 = vmatmul.bf16.vlgmr.msra.gmra.mxu2 %v10294_v45  ;;  %v8986_v24 = vor.u32 %v9975_v6, %v8983_v9 }
 0x177   :  { %5376 = vmatpush.bf16.msrb.mxu2 %v9146_v56  ;;  %v10039_v15 = vld [vmem:[#allocation2 + $0x17a4] sm:$0xf]  ;;  %v9239_v17 = vld [vmem:[#allocation2 + $0x17b0] sm:$0xf0]  ;;  %5345 = vmatmul.bf16.vlgmr.msra.gmra.mxu3 %v10298_v49  ;;  %v9114_v26 = vor.u32 %v10007_v10, %v9111_v13 }
 0x178   :  { %5389 = vmatpush.bf16.msrb.mxu3 %v9274_v53  ;;  %v9939_v21 = vld [vmem:[#allocation2 + $0x1484] sm:$0xf]  ;;  %v8839_v27 = vld [vmem:[#allocation2 + $0x1490] sm:$0xf0]  ;;  %v9242_v39 = vor.u32 %v10039_v15, %v9239_v17  ;;  %v5100_v53 = vadd.f32 %v5099_v51, %v847_v36 }
 0x179   :  { %5351 = vmatpush.bf16.msrb.mxu0 %v8874_v2  ;;  %v9971_v32 = vld [vmem:[#allocation2 + $0x1584] sm:$0xf]  ;;  %v8967_v40 = vld [vmem:[#allocation2 + $0x1590] sm:$0xf0]  ;;  %v8842_v50 = vor.u32 %v9939_v21, %v8839_v27  ;;  %v5125_v13 = vpop.f32.mrf.mxu2 }
 0x17a   :  { %5364 = vmatpush.bf16.msrb.mxu1 %v9002_v3  ;;  %v10003_v43 = vld [vmem:[#allocation2 + $0x1684] sm:$0xf]  ;;  %v9095_v14 = vld [vmem:[#allocation2 + $0x1690] sm:$0xf0]  ;;  %v8970_v52 = vor.u32 %v9971_v32, %v8967_v40 }
 0x17b   :  { %5377 = vmatpush.bf16.msrb.mxu2 %v9130_v4  ;;  %v10035_v47 = vld [vmem:[#allocation2 + $0x1784] sm:$0xf]  ;;  %v9223_v48 = vld [vmem:[#allocation2 + $0x1790] sm:$0xf0]  ;;  %v9098_v56 = vor.u32 %v10003_v43, %v9095_v14  ;;  %v5113_v4 = vadd.f32 %v5112_v60, %v5100_v53 }
 0x17c   :  { %5390 = vmatpush.bf16.msrb.mxu3 %v9258_v8  ;;  %v9935_v57 = vld [vmem:[#allocation2 + $0x1464] sm:$0xf]  ;;  %v8823_v58 = vld [vmem:[#allocation2 + $0x1470] sm:$0xf0]  ;;  %v9226_v61 = vor.u32 %v10035_v47, %v9223_v48 }
 0x17d   :  { %5352 = vmatpush.bf16.msrb.mxu0 %v8858_v1  ;;  %v9967_v59 = vld [vmem:[#allocation2 + $0x1564] sm:$0xf]  ;;  %v8951_v62 = vld [vmem:[#allocation2 + $0x1570] sm:$0xf0]  ;;  %v8826_v5 = vor.u32 %v9935_v57, %v8823_v58 }
 0x17e   :  { %5365 = vmatpush.bf16.msrb.mxu1 %v8986_v24  ;;  %v9999_v63 = vld [vmem:[#allocation2 + $0x1664] sm:$0xf]  ;;  %v9079_v0 = vld [vmem:[#allocation2 + $0x1670] sm:$0xf0]  ;;  %v8954_v55 = vor.u32 %v9967_v59, %v8951_v62  ;;  %v5126_v24 = vadd.f32 %v5125_v13, %v5113_v4  ;;  %v9314_v13 = vld [vmem:[#allocation2 + $0xf4] sm:$0xf0] }
 0x17f   :  { %5378 = vmatpush.bf16.msrb.mxu2 %v9114_v26  ;;  %v10031_v2 = vld [vmem:[#allocation2 + $0x1764] sm:$0xf]  ;;  %v9207_v3 = vld [vmem:[#allocation2 + $0x1770] sm:$0xf0]  ;;  %v9082_v6 = vor.u32 %v9999_v63, %v9079_v0  ;;  %v5138_v26 = vpop.f32.mrf.mxu3 }
 0x180   :  { %5391 = vmatpush.bf16.msrb.mxu3 %v9242_v39  ;;  %v9931_v8 = vld [vmem:[#allocation2 + $0x1444] sm:$0xf]  ;;  %v8807_v9 = vld [vmem:[#allocation2 + $0x1450] sm:$0xf0]  ;;  %v9210_v15 = vor.u32 %v10031_v2, %v9207_v3  ;;  %v10359_v36 = vadd.f32 %v5138_v26, %v5126_v24  ;;  %v5101_v39 = vpop.f32.mrf.mxu0  ;;  %v9378_v24 = vld [vmem:[#allocation2 + $0x2f4] sm:$0xf0] }
 0x181   :  { %5353 = vmatpush.bf16.msrb.mxu0 %v8842_v50  ;;  %v9963_v10 = vld [vmem:[#allocation2 + $0x1544] sm:$0xf]  ;;  %v8935_v17 = vld [vmem:[#allocation2 + $0x1550] sm:$0xf0]  ;;  %v8810_v34 = vor.u32 %v9931_v8, %v8807_v9  ;;  %v5114_v50 = vpop.f32.mrf.mxu1  ;;  %v5127_v4 = vpop.f32.mrf.mxu2 }
 0x182   :  { %5366 = vmatpush.bf16.msrb.mxu1 %v8970_v52  ;;  %v9995_v1 = vld [vmem:[#allocation2 + $0x1644] sm:$0xf]  ;;  %v9063_v21 = vld [vmem:[#allocation2 + $0x1650] sm:$0xf0]  ;;  %v8938_v40 = vor.u32 %v9963_v10, %v8935_v17  ;;  %v6333_v10 = vld [vmem:[#allocation2 + $0xe8] sm:$0xf] }
 0x183   :  { %5379 = vmatpush.bf16.msrb.mxu2 %v9098_v56  ;;  %v10027_v27 = vld [vmem:[#allocation2 + $0x1744] sm:$0xf]  ;;  %v9191_v32 = vld [vmem:[#allocation2 + $0x1750] sm:$0xf0]  ;;  %v9066_v43 = vor.u32 %v9995_v1, %v9063_v21  ;;  %v9346_v1 = vld [vmem:[#allocation2 + $0x1f4] sm:$0xf0] }
 0x184   :  { %5392 = vmatpush.bf16.msrb.mxu3 %v9226_v61  ;;  %v9927_v14 = vld [vmem:[#allocation2 + $0x1424] sm:$0xf]  ;;  %v8791_v47 = vld [vmem:[#allocation2 + $0x1430] sm:$0xf0]  ;;  %v9194_v51 = vor.u32 %v10027_v27, %v9191_v32  ;;  %v6589_v21 = vld [vmem:[#allocation2 + $0x2e8] sm:$0xf] }
 0x185   :  { %5354 = vmatpush.bf16.msrb.mxu0 %v8826_v5  ;;  %v9959_v48 = vld [vmem:[#allocation2 + $0x1524] sm:$0xf]  ;;  %v8919_v52 = vld [vmem:[#allocation2 + $0x1530] sm:$0xf0]  ;;  %v8794_v53 = vor.u32 %v9927_v14, %v8791_v47  ;;  %v6717_v32 = vld [vmem:[#allocation2 + $0x3e8] sm:$0xf]  ;;  %v6590_v14 = vor.u32 %v9378_v24, %v6589_v21 }
 0x186   :  { %5367 = vmatpush.bf16.msrb.mxu1 %v8954_v55  ;;  %v9991_v56 = vld [vmem:[#allocation2 + $0x1624] sm:$0xf]  ;;  %v9047_v57 = vld [vmem:[#allocation2 + $0x1630] sm:$0xf0]  ;;  %v8922_v62 = vor.u32 %v9959_v48, %v8919_v52  ;;  %v6317_v47 = vld [vmem:[#allocation2 + $0xc8] sm:$0xf] }
 0x187   :  { %5380 = vmatpush.bf16.msrb.mxu2 %v9082_v6  ;;  %v10023_v58 = vld [vmem:[#allocation2 + $0x1724] sm:$0xf]  ;;  %v9175_v59 = vld [vmem:[#allocation2 + $0x1730] sm:$0xf0]  ;;  %v9050_v63 = vor.u32 %v9991_v56, %v9047_v57  ;;  %v5140_v9 = vpop.f32.mrf.mxu3  ;;  %v9310_v48 = vld [vmem:[#allocation2 + $0xd4] sm:$0xf0] }
 0x188   :  { %5393 = vmatpush.bf16.msrb.mxu3 %v9210_v15  ;;  %v9923_v60 = vld [vmem:[#allocation2 + $0x1404] sm:$0xf]  ;;  %v8775_v61 = vld [vmem:[#allocation2 + $0x1410] sm:$0xf0]  ;;  %v9178_v5 = vor.u32 %v10023_v58, %v9175_v59  ;;  %v6461_v15 = vld [vmem:[#allocation2 + $0x1e8] sm:$0xf] }
 0x189   :  { %5355 = vmatpush.bf16.msrb.mxu0 %v8810_v34  ;;  %v9955_v0 = vld [vmem:[#allocation2 + $0x1504] sm:$0xf]  ;;  %v8903_v2 = vld [vmem:[#allocation2 + $0x1510] sm:$0xf0]  ;;  %v8778_v17 = vor.u32 %v9923_v60, %v8775_v61  ;;  %v9410_v34 = vld [vmem:[#allocation2 + $0x3f4] sm:$0xf0] }
 0x18a   :  { %5368 = vmatpush.bf16.msrb.mxu1 %v8938_v40  ;;  %v9987_v3 = vld [vmem:[#allocation2 + $0x1604] sm:$0xf]  ;;  %v9031_v55 = vld [vmem:[#allocation2 + $0x1610] sm:$0xf0]  ;;  %v8906_v26 = vor.u32 %v9955_v0, %v8903_v2  ;;  %v6334_v40 = vor.u32 %v9314_v13, %v6333_v10  ;;  %v6445_v50 = vld [vmem:[#allocation2 + $0x1c8] sm:$0xf] }
 0x18b   :  { %5381 = vmatpush.bf16.msrb.mxu2 %v9066_v43  ;;  %v10019_v6 = vld [vmem:[#allocation2 + $0x1704] sm:$0xf]  ;;  %v9159_v8 = vld [vmem:[#allocation2 + $0x1710] sm:$0xf0]  ;;  %v9034_v27 = vor.u32 %v9987_v3, %v9031_v55  ;;  %v6462_v43 = vor.u32 %v9346_v1, %v6461_v15  ;;  %v9342_v52 = vld [vmem:[#allocation2 + $0x1d4] sm:$0xf0] }
 0x18c   :  { %5394 = vmatpush.bf16.msrb.mxu3 %v9194_v51  ;;  %v9162_v39 = vor.u32 %v10019_v6, %v9159_v8  ;;  %v6718_v51 = vor.u32 %v9410_v34, %v6717_v32  ;;  %v6573_v56 = vld [vmem:[#allocation2 + $0x2c8] sm:$0xf]  ;;  %v9374_v57 = vld [vmem:[#allocation2 + $0x2d4] sm:$0xf0]  ;;  %v6446_v60 = vor.u32 %v9342_v52, %v6445_v50 }
 0x18d   :  { %5356 = vmatpush.bf16.msrb.mxu0 %v8794_v53  ;;  %v6701_v58 = vld [vmem:[#allocation2 + $0x3c8] sm:$0xf]  ;;  %v9406_v59 = vld [vmem:[#allocation2 + $0x3d4] sm:$0xf0]  ;;  %v6318_v53 = vor.u32 %v9310_v48, %v6317_v47  ;;  %v6574_v61 = vor.u32 %v9374_v57, %v6573_v56 }
 0x18e   :  { %5369 = vmatpush.bf16.msrb.mxu1 %v8922_v62  ;;  %v6301_v62 = vld [vmem:[#allocation2 + $0xa8] sm:$0xf]  ;;  %v6702_v2 = vor.u32 %v9406_v59, %v6701_v58  ;;  %v9338_v3 = vld [vmem:[#allocation2 + $0x1b4] sm:$0xf0] }
 0x18f   :  { %5382 = vmatpush.bf16.msrb.mxu2 %v9050_v63  ;;  %v9306_v63 = vld [vmem:[#allocation2 + $0xb4] sm:$0xf0]  ;;  %v6429_v0 = vld [vmem:[#allocation2 + $0x1a8] sm:$0xf] }
 0x190   :  { %5395 = vmatpush.bf16.msrb.mxu3 %v9178_v5  ;;  %v6557_v4 = vld [vmem:[#allocation2 + $0x2a8] sm:$0xf]  ;;  %v9370_v5 = vld [vmem:[#allocation2 + $0x2b4] sm:$0xf0]  ;;  %v6302_v8 = vor.u32 %v9306_v63, %v6301_v62  ;;  %v6430_v9 = vor.u32 %v9338_v3, %v6429_v0 }
 0x191   :  { %5357 = vmatpush.bf16.msrb.mxu0 %v8778_v17  ;;  %v6685_v55 = vld [vmem:[#allocation2 + $0x3a8] sm:$0xf]  ;;  %v9402_v6 = vld [vmem:[#allocation2 + $0x3b4] sm:$0xf0]  ;;  %v6558_v10 = vor.u32 %v9370_v5, %v6557_v4 }
 0x192   :  { %5370 = vmatpush.bf16.msrb.mxu1 %v8906_v26  ;;  %v6285_v13 = vld [vmem:[#allocation2 + $0x88] sm:$0xf]  ;;  %v9302_v15 = vld [vmem:[#allocation2 + $0x94] sm:$0xf0]  ;;  %v6686_v1 = vor.u32 %v9402_v6, %v6685_v55 }
 0x193   :  { %5383 = vmatpush.bf16.msrb.mxu2 %v9034_v27  ;;  %v6413_v17 = vld [vmem:[#allocation2 + $0x188] sm:$0xf]  ;;  %v9334_v21 = vld [vmem:[#allocation2 + $0x194] sm:$0xf0]  ;;  %v6286_v34 = vor.u32 %v9302_v15, %v6285_v13 }
 0x194   :  { %5396 = vmatpush.bf16.msrb.mxu3 %v9162_v39  ;;  %5358 = vmatmul.bf16.vlgmr.msrb.gmra.mxu0 %v10312_v7  ;;  %v6541_v24 = vld [vmem:[#allocation2 + $0x288] sm:$0xf]  ;;  %v9366_v26 = vld [vmem:[#allocation2 + $0x294] sm:$0xf0]  ;;  %v5151_v39 = vpop.f32.mrf.mxu0 }
 0x195   :  { %5402 = vmatpush.bf16.msra.mxu0 %v6334_v40  ;;  %5371 = vmatmul.bf16.vlgmr.msrb.gmra.mxu1 %v10316_v12  ;;  %v6669_v27 = vld [vmem:[#allocation2 + $0x388] sm:$0xf]  ;;  %v9398_v32 = vld [vmem:[#allocation2 + $0x394] sm:$0xf0]  ;;  %v6414_v40 = vor.u32 %v9334_v21, %v6413_v17  ;;  %v5152_v50 = vadd.f32 %v5151_v39, %v10359_v36 }
 0x196   :  { %5415 = vmatpush.bf16.msra.mxu1 %v6462_v43  ;;  %5384 = vmatmul.bf16.vlgmr.msrb.gmra.mxu2 %v10314_v11  ;;  %v6542_v43 = vor.u32 %v9366_v26, %v6541_v24  ;;  %v9298_v47 = vld [vmem:[#allocation2 + $0x74] sm:$0xf0]  ;;  %v6397_v48 = vld [vmem:[#allocation2 + $0x168] sm:$0xf]  ;;  %v6670_v52 = vor.u32 %v9398_v32, %v6669_v27 }
 0x197   :  { %5428 = vmatpush.bf16.msra.mxu2 %v6590_v14  ;;  %5397 = vmatmul.bf16.vlgmr.msrb.gmra.mxu3 %v10318_v16  ;;  %v6269_v14 = vld [vmem:[#allocation2 + $0x68] sm:$0xf]  ;;  %v9330_v56 = vld [vmem:[#allocation2 + $0x174] sm:$0xf0] }
 0x198   :  { %5441 = vmatpush.bf16.msra.mxu3 %v6718_v51  ;;  %v5164_v51 = vpop.f32.mrf.mxu1  ;;  %v6525_v57 = vld [vmem:[#allocation2 + $0x268] sm:$0xf]  ;;  %v9362_v58 = vld [vmem:[#allocation2 + $0x274] sm:$0xf0]  ;;  %v6398_v62 = vor.u32 %v9330_v56, %v6397_v48 }
 0x199   :  { %5403 = vmatpush.bf16.msra.mxu0 %v6318_v53  ;;  %v6653_v59 = vld [vmem:[#allocation2 + $0x368] sm:$0xf]  ;;  %v9394_v53 = vld [vmem:[#allocation2 + $0x374] sm:$0xf0]  ;;  %v6526_v63 = vor.u32 %v9362_v58, %v6525_v57  ;;  %v5177_v4 = vpop.f32.mrf.mxu2 }
 0x19a   :  { %5416 = vmatpush.bf16.msra.mxu1 %v6446_v60  ;;  %v5165_v60 = vadd.f32 %v5164_v51, %v5152_v50  ;;  %v6253_v0 = vld [vmem:[#allocation2 + $0x48] sm:$0xf]  ;;  %v6654_v36 = vor.u32 %v9394_v53, %v6653_v59  ;;  %v9326_v5 = vld [vmem:[#allocation2 + $0x154] sm:$0xf0] }
 0x19b   :  { %5429 = vmatpush.bf16.msra.mxu2 %v6574_v61  ;;  %v6270_v61 = vor.u32 %v9298_v47, %v6269_v14  ;;  %v6381_v3 = vld [vmem:[#allocation2 + $0x148] sm:$0xf]  ;;  %v9358_v6 = vld [vmem:[#allocation2 + $0x254] sm:$0xf0] }
 0x19c   :  { %5442 = vmatpush.bf16.msra.mxu3 %v6702_v2  ;;  %v9294_v2 = vld [vmem:[#allocation2 + $0x54] sm:$0xf0]  ;;  %v6509_v55 = vld [vmem:[#allocation2 + $0x248] sm:$0xf]  ;;  %v6382_v21 = vor.u32 %v9326_v5, %v6381_v3 }
 0x19d   :  { %5404 = vmatpush.bf16.msra.mxu0 %v6302_v8  ;;  %v5178_v8 = vadd.f32 %v5177_v4, %v5165_v60  ;;  %v9390_v13 = vld [vmem:[#allocation2 + $0x354] sm:$0xf0]  ;;  %v6254_v15 = vor.u32 %v9294_v2, %v6253_v0  ;;  %v6510_v24 = vor.u32 %v9358_v6, %v6509_v55  ;;  %v6237_v26 = vld [vmem:[#allocation2 + $0x28] sm:$0xf] }
 0x19e   :  { %5417 = vmatpush.bf16.msra.mxu1 %v6430_v9  ;;  %v5190_v9 = vpop.f32.mrf.mxu3  ;;  %v9290_v27 = vld [vmem:[#allocation2 + $0x34] sm:$0xf0]  ;;  %v6365_v32 = vld [vmem:[#allocation2 + $0x128] sm:$0xf] }
 0x19f   :  { %5430 = vmatpush.bf16.msra.mxu2 %v6558_v10  ;;  %v6637_v10 = vld [vmem:[#allocation2 + $0x348] sm:$0xf]  ;;  %v10366_v17 = vadd.f32 %v5190_v9, %v5178_v8  ;;  %v9354_v14 = vld [vmem:[#allocation2 + $0x234] sm:$0xf0]  ;;  %v6238_v50 = vor.u32 %v9290_v27, %v6237_v26 }
 0x1a0   :  { %5443 = vmatpush.bf16.msra.mxu3 %v6686_v1  ;;  %v5153_v1 = vpop.f32.mrf.mxu0  ;;  %v6638_v39 = vor.u32 %v9390_v13, %v6637_v10  ;;  %v6621_v47 = vld [vmem:[#allocation2 + $0x328] sm:$0xf]  ;;  %v9386_v48 = vld [vmem:[#allocation2 + $0x334] sm:$0xf0] }
 0x1a1   :  { %5405 = vmatpush.bf16.msra.mxu0 %v6286_v34  ;;  %v5166_v34 = vpop.f32.mrf.mxu1  ;;  %v6221_v51 = vld [vmem:[#allocation2 + $0x8] sm:$0xf]  ;;  %v9318_v59 = vld [vmem:[#allocation2 + $0x114] sm:$0xf0]  ;;  %v5179_v60 = vpop.f32.mrf.mxu2 }
 0x1a2   :  { %5418 = vmatpush.bf16.msra.mxu1 %v6414_v40  ;;  %v9322_v40 = vld [vmem:[#allocation2 + $0x134] sm:$0xf0]  ;;  %v6349_v58 = vld [vmem:[#allocation2 + $0x108] sm:$0xf] }
 0x1a3   :  { %5431 = vmatpush.bf16.msra.mxu2 %v6542_v43  ;;  %v6493_v43 = vld [vmem:[#allocation2 + $0x228] sm:$0xf]  ;;  %v6366_v56 = vor.u32 %v9322_v40, %v6365_v32  ;;  %v9382_v0 = vld [vmem:[#allocation2 + $0x314] sm:$0xf0]  ;;  %v6350_v9 = vor.u32 %v9318_v59, %v6349_v58 }
 0x1a4   :  { %5444 = vmatpush.bf16.msra.mxu3 %v6670_v52  ;;  %v9286_v52 = vld [vmem:[#allocation2 + $0x14] sm:$0xf0]  ;;  %v6494_v57 = vor.u32 %v9354_v14, %v6493_v43  ;;  %v6477_v53 = vld [vmem:[#allocation2 + $0x208] sm:$0xf] }
 0x1a5   :  { %5406 = vmatpush.bf16.msra.mxu0 %v6270_v61  ;;  %v6622_v61 = vor.u32 %v9386_v48, %v6621_v47  ;;  %v6845_v3 = vld [vmem:[#allocation2 + $0x4e8] sm:$0xf]  ;;  %v9442_v4 = vld [vmem:[#allocation2 + $0x4f4] sm:$0xf0]  ;;  %v6222_v5 = vor.u32 %v9286_v52, %v6221_v51 }
 0x1a6   :  { %5419 = vmatpush.bf16.msra.mxu1 %v6398_v62  ;;  %v9350_v62 = vld [vmem:[#allocation2 + $0x214] sm:$0xf0]  ;;  %v5192_v2 = vpop.f32.mrf.mxu3  ;;  %v7101_v6 = vld [vmem:[#allocation2 + $0x6e8] sm:$0xf] }
 0x1a7   :  { %5432 = vmatpush.bf16.msra.mxu2 %v6526_v63  ;;  %v6605_v63 = vld [vmem:[#allocation2 + $0x308] sm:$0xf]  ;;  %v9474_v55 = vld [vmem:[#allocation2 + $0x5f4] sm:$0xf0]  ;;  %v6478_v10 = vor.u32 %v9350_v62, %v6477_v53 }
 0x1a8   :  { %5445 = vmatpush.bf16.msra.mxu3 %v6654_v36  ;;  %v6973_v36 = vld [vmem:[#allocation2 + $0x5e8] sm:$0xf]  ;;  %v9506_v8 = vld [vmem:[#allocation2 + $0x6f4] sm:$0xf0]  ;;  %v6606_v1 = vor.u32 %v9382_v0, %v6605_v63 }
 0x1a9   :  { %5407 = vmatpush.bf16.msra.mxu0 %v6254_v15  ;;  %v7229_v13 = vld [vmem:[#allocation2 + $0x7e8] sm:$0xf]  ;;  %v9538_v15 = vld [vmem:[#allocation2 + $0x7f4] sm:$0xf0]  ;;  %v7102_v26 = vor.u32 %v9506_v8, %v7101_v6 }
 0x1aa   :  { %5420 = vmatpush.bf16.msra.mxu1 %v6382_v21  ;;  %v6846_v21 = vor.u32 %v9442_v4, %v6845_v3  ;;  %v6829_v27 = vld [vmem:[#allocation2 + $0x4c8] sm:$0xf]  ;;  %v9438_v32 = vld [vmem:[#allocation2 + $0x4d4] sm:$0xf0] }
 0x1ab   :  { %5433 = vmatpush.bf16.msra.mxu2 %v6510_v24  ;;  %v6974_v24 = vor.u32 %v9474_v55, %v6973_v36  ;;  %v6957_v34 = vld [vmem:[#allocation2 + $0x5c8] sm:$0xf]  ;;  %v9470_v40 = vld [vmem:[#allocation2 + $0x5d4] sm:$0xf0] }
 0x1ac   :  { %5446 = vmatpush.bf16.msra.mxu3 %v6638_v39  ;;  %v7230_v39 = vor.u32 %v9538_v15, %v7229_v13  ;;  %v7085_v43 = vld [vmem:[#allocation2 + $0x6c8] sm:$0xf]  ;;  %v9502_v14 = vld [vmem:[#allocation2 + $0x6d4] sm:$0xf0]  ;;  %v6958_v51 = vor.u32 %v9470_v40, %v6957_v34 }
 0x1ad   :  { %5408 = vmatpush.bf16.msra.mxu0 %v6238_v50  ;;  %v7213_v47 = vld [vmem:[#allocation2 + $0x7c8] sm:$0xf]  ;;  %v9534_v48 = vld [vmem:[#allocation2 + $0x7d4] sm:$0xf0]  ;;  %v6830_v50 = vor.u32 %v9438_v32, %v6829_v27  ;;  %v7086_v52 = vor.u32 %v9502_v14, %v7085_v43 }
 0x1ae   :  { %5421 = vmatpush.bf16.msra.mxu1 %v6366_v56  ;;  %v6813_v56 = vld [vmem:[#allocation2 + $0x4a8] sm:$0xf]  ;;  %v7214_v59 = vor.u32 %v9534_v48, %v7213_v47  ;;  %v9466_v53 = vld [vmem:[#allocation2 + $0x5b4] sm:$0xf0] }
 0x1af   :  { %5434 = vmatpush.bf16.msra.mxu2 %v6494_v57  ;;  %v9434_v57 = vld [vmem:[#allocation2 + $0x4b4] sm:$0xf0]  ;;  %v6941_v58 = vld [vmem:[#allocation2 + $0x5a8] sm:$0xf] }
 0x1b0   :  { %5447 = vmatpush.bf16.msra.mxu3 %v6622_v61  ;;  %v7069_v60 = vld [vmem:[#allocation2 + $0x6a8] sm:$0xf]  ;;  %v9498_v61 = vld [vmem:[#allocation2 + $0x6b4] sm:$0xf0]  ;;  %v6814_v0 = vor.u32 %v9434_v57, %v6813_v56  ;;  %v6942_v2 = vor.u32 %v9466_v53, %v6941_v58 }
 0x1b1   :  { %5409 = vmatpush.bf16.msra.mxu0 %v6222_v5  ;;  %v7197_v62 = vld [vmem:[#allocation2 + $0x7a8] sm:$0xf]  ;;  %v9530_v63 = vld [vmem:[#allocation2 + $0x7b4] sm:$0xf0]  ;;  %v7070_v3 = vor.u32 %v9498_v61, %v7069_v60 }
 0x1b2   :  { %5422 = vmatpush.bf16.msra.mxu1 %v6350_v9  ;;  %v6797_v4 = vld [vmem:[#allocation2 + $0x488] sm:$0xf]  ;;  %v9430_v36 = vld [vmem:[#allocation2 + $0x494] sm:$0xf0]  ;;  %v7198_v55 = vor.u32 %v9530_v63, %v7197_v62 }
 0x1b3   :  { %5435 = vmatpush.bf16.msra.mxu2 %v6478_v10  ;;  %v6925_v5 = vld [vmem:[#allocation2 + $0x588] sm:$0xf]  ;;  %v9462_v6 = vld [vmem:[#allocation2 + $0x594] sm:$0xf0]  ;;  %v5203_v10 = vpop.f32.mrf.mxu0 }
 0x1b4   :  { %5448 = vmatpush.bf16.msra.mxu3 %v6606_v1  ;;  %5410 = vmatmul.bf16.vlgmr.msra.gmra.mxu0 %v10222_v19  ;;  %v7053_v8 = vld [vmem:[#allocation2 + $0x688] sm:$0xf]  ;;  %v9494_v9 = vld [vmem:[#allocation2 + $0x694] sm:$0xf0]  ;;  %v5204_v1 = vadd.f32 %v5203_v10, %v10366_v17 }
 0x1b5   :  { %5454 = vmatpush.bf16.msrb.mxu0 %v6846_v21  ;;  %5423 = vmatmul.bf16.vlgmr.msra.gmra.mxu1 %v10226_v22  ;;  %v7181_v13 = vld [vmem:[#allocation2 + $0x788] sm:$0xf]  ;;  %v9526_v15 = vld [vmem:[#allocation2 + $0x794] sm:$0xf0]  ;;  %v6798_v21 = vor.u32 %v9430_v36, %v6797_v4  ;;  %v7054_v27 = vor.u32 %v9494_v9, %v7053_v8 }
 0x1b6   :  { %5467 = vmatpush.bf16.msrb.mxu1 %v6974_v24  ;;  %5436 = vmatmul.bf16.vlgmr.msra.gmra.mxu2 %v10220_v18  ;;  %v5216_v24 = vpop.f32.mrf.mxu1  ;;  %v6781_v32 = vld [vmem:[#allocation2 + $0x468] sm:$0xf]  ;;  %v9426_v34 = vld [vmem:[#allocation2 + $0x474] sm:$0xf0]  ;;  %v7182_v40 = vor.u32 %v9526_v15, %v7181_v13 }
 0x1b7   :  { %5480 = vmatpush.bf16.msrb.mxu2 %v7102_v26  ;;  %5449 = vmatmul.bf16.vlgmr.msra.gmra.mxu3 %v10224_v20  ;;  %v6926_v26 = vor.u32 %v9462_v6, %v6925_v5  ;;  %v5217_v43 = vadd.f32 %v5216_v24, %v5204_v1  ;;  %v9458_v14 = vld [vmem:[#allocation2 + $0x574] sm:$0xf0]  ;;  %v7037_v47 = vld [vmem:[#allocation2 + $0x668] sm:$0xf] }
 0x1b8   :  { %5493 = vmatpush.bf16.msrb.mxu3 %v7230_v39  ;;  %v6909_v39 = vld [vmem:[#allocation2 + $0x568] sm:$0xf]  ;;  %v9490_v48 = vld [vmem:[#allocation2 + $0x674] sm:$0xf0] }
 0x1b9   :  { %5455 = vmatpush.bf16.msrb.mxu0 %v6830_v50  ;;  %v7165_v50 = vld [vmem:[#allocation2 + $0x768] sm:$0xf]  ;;  %v6910_v17 = vor.u32 %v9458_v14, %v6909_v39  ;;  %v7038_v56 = vor.u32 %v9490_v48, %v7037_v47  ;;  %v9422_v58 = vld [vmem:[#allocation2 + $0x454] sm:$0xf0]  ;;  %v5229_v60 = vpop.f32.mrf.mxu2 }
 0x1ba   :  { %5468 = vmatpush.bf16.msrb.mxu1 %v6958_v51  ;;  %v9522_v51 = vld [vmem:[#allocation2 + $0x774] sm:$0xf0]  ;;  %v6765_v57 = vld [vmem:[#allocation2 + $0x448] sm:$0xf] }
 0x1bb   :  { %5481 = vmatpush.bf16.msrb.mxu2 %v7086_v52  ;;  %v6782_v52 = vor.u32 %v9426_v34, %v6781_v32  ;;  %v7166_v53 = vor.u32 %v9522_v51, %v7165_v50  ;;  %v9454_v61 = vld [vmem:[#allocation2 + $0x554] sm:$0xf0]  ;;  %v7021_v62 = vld [vmem:[#allocation2 + $0x648] sm:$0xf]  ;;  %v5205_v36 = vpop.f32.mrf.mxu0  ;;  %v6766_v5 = vor.u32 %v9422_v58, %v6765_v57 }
 0x1bc   :  { %5494 = vmatpush.bf16.msrb.mxu3 %v7214_v59  ;;  %v6893_v59 = vld [vmem:[#allocation2 + $0x548] sm:$0xf]  ;;  %v9486_v63 = vld [vmem:[#allocation2 + $0x654] sm:$0xf0] }
 0x1bd   :  { %5456 = vmatpush.bf16.msrb.mxu0 %v6814_v0  ;;  %v5230_v0 = vadd.f32 %v5229_v60, %v5217_v43  ;;  %v9518_v4 = vld [vmem:[#allocation2 + $0x754] sm:$0xf0]  ;;  %v6894_v8 = vor.u32 %v9454_v61, %v6893_v59  ;;  %v7022_v9 = vor.u32 %v9486_v63, %v7021_v62  ;;  %v6749_v10 = vld [vmem:[#allocation2 + $0x428] sm:$0xf] }
 0x1be   :  { %5469 = vmatpush.bf16.msrb.mxu1 %v6942_v2  ;;  %v5242_v2 = vpop.f32.mrf.mxu3  ;;  %v9418_v13 = vld [vmem:[#allocation2 + $0x434] sm:$0xf0]  ;;  %v6877_v15 = vld [vmem:[#allocation2 + $0x528] sm:$0xf] }
 0x1bf   :  { %5482 = vmatpush.bf16.msrb.mxu2 %v7070_v3  ;;  %v7149_v3 = vld [vmem:[#allocation2 + $0x748] sm:$0xf]  ;;  %v10373_v6 = vadd.f32 %v5242_v2, %v5230_v0  ;;  %v9514_v32 = vld [vmem:[#allocation2 + $0x734] sm:$0xf0]  ;;  %v6750_v34 = vor.u32 %v9418_v13, %v6749_v10 }
 0x1c0   :  { %5495 = vmatpush.bf16.msrb.mxu3 %v7198_v55  ;;  %v5218_v55 = vpop.f32.mrf.mxu1  ;;  %v7150_v1 = vor.u32 %v9518_v4, %v7149_v3  ;;  %v7005_v24 = vld [vmem:[#allocation2 + $0x628] sm:$0xf]  ;;  %v9446_v48 = vld [vmem:[#allocation2 + $0x514] sm:$0xf0] }
 0x1c1   :  { %5457 = vmatpush.bf16.msrb.mxu0 %v6798_v21  ;;  %v9450_v21 = vld [vmem:[#allocation2 + $0x534] sm:$0xf0]  ;;  %v6733_v39 = vld [vmem:[#allocation2 + $0x408] sm:$0xf]  ;;  %v5231_v57 = vpop.f32.mrf.mxu2 }
 0x1c2   :  { %5470 = vmatpush.bf16.msrb.mxu1 %v6926_v26  ;;  %v9482_v26 = vld [vmem:[#allocation2 + $0x634] sm:$0xf0]  ;;  %v6878_v43 = vor.u32 %v9450_v21, %v6877_v15  ;;  %v6861_v47 = vld [vmem:[#allocation2 + $0x508] sm:$0xf] }
 0x1c3   :  { %5483 = vmatpush.bf16.msrb.mxu2 %v7054_v27  ;;  %v7133_v27 = vld [vmem:[#allocation2 + $0x728] sm:$0xf]  ;;  %v7006_v14 = vor.u32 %v9482_v26, %v7005_v24  ;;  %v9570_v59 = vld [vmem:[#allocation2 + $0x8f4] sm:$0xf0]  ;;  %v6862_v2 = vor.u32 %v9446_v48, %v6861_v47 }
 0x1c4   :  { %5496 = vmatpush.bf16.msrb.mxu3 %v7182_v40  ;;  %v9414_v40 = vld [vmem:[#allocation2 + $0x414] sm:$0xf0]  ;;  %v6989_v50 = vld [vmem:[#allocation2 + $0x608] sm:$0xf]  ;;  %v7134_v51 = vor.u32 %v9514_v32, %v7133_v27 }
 0x1c5   :  { %5458 = vmatpush.bf16.msrb.mxu0 %v6782_v52  ;;  %v9478_v52 = vld [vmem:[#allocation2 + $0x614] sm:$0xf0]  ;;  %v7357_v58 = vld [vmem:[#allocation2 + $0x8e8] sm:$0xf]  ;;  %v6734_v61 = vor.u32 %v9414_v40, %v6733_v39 }
 0x1c6   :  { %5471 = vmatpush.bf16.msrb.mxu1 %v6910_v17  ;;  %v7117_v17 = vld [vmem:[#allocation2 + $0x708] sm:$0xf]  ;;  %v5244_v60 = vpop.f32.mrf.mxu3  ;;  %v9602_v62 = vld [vmem:[#allocation2 + $0x9f4] sm:$0xf0]  ;;  %v6990_v3 = vor.u32 %v9478_v52, %v6989_v50  ;;  %v7358_v55 = vor.u32 %v9570_v59, %v7357_v58 }
 0x1c7   :  { %5484 = vmatpush.bf16.msrb.mxu2 %v7038_v56  ;;  %v9510_v56 = vld [vmem:[#allocation2 + $0x714] sm:$0xf0]  ;;  %v7613_v63 = vld [vmem:[#allocation2 + $0xae8] sm:$0xf] }
 0x1c8   :  { %5497 = vmatpush.bf16.msrb.mxu3 %v7166_v53  ;;  %v7485_v53 = vld [vmem:[#allocation2 + $0x9e8] sm:$0xf]  ;;  %v9634_v0 = vld [vmem:[#allocation2 + $0xaf4] sm:$0xf0] }
 0x1c9   :  { %5459 = vmatpush.bf16.msrb.mxu0 %v6766_v5  ;;  %v7741_v4 = vld [vmem:[#allocation2 + $0xbe8] sm:$0xf]  ;;  %v9666_v36 = vld [vmem:[#allocation2 + $0xbf4] sm:$0xf0]  ;;  %v7118_v5 = vor.u32 %v9510_v56, %v7117_v17 }
 0x1ca   :  { %5472 = vmatpush.bf16.msrb.mxu1 %v6894_v8  ;;  %v7486_v8 = vor.u32 %v9602_v62, %v7485_v53  ;;  %v7341_v10 = vld [vmem:[#allocation2 + $0x8c8] sm:$0xf]  ;;  %v9566_v13 = vld [vmem:[#allocation2 + $0x8d4] sm:$0xf0] }
 0x1cb   :  { %5485 = vmatpush.bf16.msrb.mxu2 %v7022_v9  ;;  %v7614_v9 = vor.u32 %v9634_v0, %v7613_v63  ;;  %v7469_v15 = vld [vmem:[#allocation2 + $0x9c8] sm:$0xf]  ;;  %v9598_v21 = vld [vmem:[#allocation2 + $0x9d4] sm:$0xf0] }
 0x1cc   :  { %5498 = vmatpush.bf16.msrb.mxu3 %v7150_v1  ;;  %v7742_v1 = vor.u32 %v9666_v36, %v7741_v4  ;;  %v7597_v24 = vld [vmem:[#allocation2 + $0xac8] sm:$0xf]  ;;  %v9630_v26 = vld [vmem:[#allocation2 + $0xad4] sm:$0xf0]  ;;  %v7470_v39 = vor.u32 %v9598_v21, %v7469_v15 }
 0x1cd   :  { %5460 = vmatpush.bf16.msrb.mxu0 %v6750_v34  ;;  %v7725_v27 = vld [vmem:[#allocation2 + $0xbc8] sm:$0xf]  ;;  %v9662_v32 = vld [vmem:[#allocation2 + $0xbd4] sm:$0xf0]  ;;  %v7342_v34 = vor.u32 %v9566_v13, %v7341_v10  ;;  %v7598_v40 = vor.u32 %v9630_v26, %v7597_v24 }
 0x1ce   :  { %5473 = vmatpush.bf16.msrb.mxu1 %v6878_v43  ;;  %v7325_v43 = vld [vmem:[#allocation2 + $0x8a8] sm:$0xf]  ;;  %v7726_v48 = vor.u32 %v9662_v32, %v7725_v27  ;;  %v9594_v50 = vld [vmem:[#allocation2 + $0x9b4] sm:$0xf0] }
 0x1cf   :  { %5486 = vmatpush.bf16.msrb.mxu2 %v7006_v14  ;;  %v9562_v14 = vld [vmem:[#allocation2 + $0x8b4] sm:$0xf0]  ;;  %v7453_v47 = vld [vmem:[#allocation2 + $0x9a8] sm:$0xf] }
 0x1d0   :  { %5499 = vmatpush.bf16.msrb.mxu3 %v7134_v51  ;;  %v7581_v51 = vld [vmem:[#allocation2 + $0xaa8] sm:$0xf]  ;;  %v9626_v52 = vld [vmem:[#allocation2 + $0xab4] sm:$0xf0]  ;;  %v7326_v57 = vor.u32 %v9562_v14, %v7325_v43  ;;  %v7454_v58 = vor.u32 %v9594_v50, %v7453_v47 }
 0x1d1   :  { %5461 = vmatpush.bf16.msrb.mxu0 %v6734_v61  ;;  %v7709_v17 = vld [vmem:[#allocation2 + $0xba8] sm:$0xf]  ;;  %v9658_v56 = vld [vmem:[#allocation2 + $0xbb4] sm:$0xf0]  ;;  %v7582_v59 = vor.u32 %v9626_v52, %v7581_v51 }
 0x1d2   :  { %5474 = vmatpush.bf16.msrb.mxu1 %v6862_v2  ;;  %v7309_v53 = vld [vmem:[#allocation2 + $0x888] sm:$0xf]  ;;  %v9558_v60 = vld [vmem:[#allocation2 + $0x894] sm:$0xf0]  ;;  %v7710_v62 = vor.u32 %v9658_v56, %v7709_v17 }
 0x1d3   :  { %5487 = vmatpush.bf16.msrb.mxu2 %v6990_v3  ;;  %v7437_v61 = vld [vmem:[#allocation2 + $0x988] sm:$0xf]  ;;  %v9590_v63 = vld [vmem:[#allocation2 + $0x994] sm:$0xf0]  ;;  %v5255_v3 = vpop.f32.mrf.mxu0 }
 0x1d4   :  { %5500 = vmatpush.bf16.msrb.mxu3 %v7118_v5  ;;  %5462 = vmatmul.bf16.vlgmr.msrb.gmra.mxu0 %v10240_v41  ;;  %v7565_v0 = vld [vmem:[#allocation2 + $0xa88] sm:$0xf]  ;;  %v9622_v2 = vld [vmem:[#allocation2 + $0xa94] sm:$0xf0]  ;;  %v5256_v5 = vadd.f32 %v5255_v3, %v10373_v6 }
 0x1d5   :  { %5506 = vmatpush.bf16.msra.mxu0 %v7358_v55  ;;  %5475 = vmatmul.bf16.vlgmr.msrb.gmra.mxu1 %v10244_v44  ;;  %v7693_v4 = vld [vmem:[#allocation2 + $0xb88] sm:$0xf]  ;;  %v9654_v36 = vld [vmem:[#allocation2 + $0xb94] sm:$0xf0]  ;;  %v7310_v55 = vor.u32 %v9558_v60, %v7309_v53  ;;  %v7566_v10 = vor.u32 %v9622_v2, %v7565_v0 }
 0x1d6   :  { %5519 = vmatpush.bf16.msra.mxu1 %v7486_v8  ;;  %5488 = vmatmul.bf16.vlgmr.msrb.gmra.mxu2 %v10238_v38  ;;  %v5268_v8 = vpop.f32.mrf.mxu1  ;;  %v7293_v13 = vld [vmem:[#allocation2 + $0x868] sm:$0xf]  ;;  %v9554_v15 = vld [vmem:[#allocation2 + $0x874] sm:$0xf0]  ;;  %v7694_v21 = vor.u32 %v9654_v36, %v7693_v4 }
 0x1d7   :  { %5532 = vmatpush.bf16.msra.mxu2 %v7614_v9  ;;  %5501 = vmatmul.bf16.vlgmr.msrb.gmra.mxu3 %v10242_v42  ;;  %v7438_v9 = vor.u32 %v9590_v63, %v7437_v61  ;;  %v5269_v24 = vadd.f32 %v5268_v8, %v5256_v5  ;;  %v9586_v26 = vld [vmem:[#allocation2 + $0x974] sm:$0xf0]  ;;  %v7549_v27 = vld [vmem:[#allocation2 + $0xa68] sm:$0xf] }
 0x1d8   :  { %5545 = vmatpush.bf16.msra.mxu3 %v7742_v1  ;;  %v7421_v1 = vld [vmem:[#allocation2 + $0x968] sm:$0xf]  ;;  %v9618_v32 = vld [vmem:[#allocation2 + $0xa74] sm:$0xf0] }
 0x1d9   :  { %5507 = vmatpush.bf16.msra.mxu0 %v7342_v34  ;;  %v7677_v34 = vld [vmem:[#allocation2 + $0xb68] sm:$0xf]  ;;  %v7422_v6 = vor.u32 %v9586_v26, %v7421_v1  ;;  %v7550_v43 = vor.u32 %v9618_v32, %v7549_v27  ;;  %v9550_v47 = vld [vmem:[#allocation2 + $0x854] sm:$0xf0]  ;;  %v5281_v51 = vpop.f32.mrf.mxu2 }
 0x1da   :  { %5520 = vmatpush.bf16.msra.mxu1 %v7470_v39  ;;  %v9650_v39 = vld [vmem:[#allocation2 + $0xb74] sm:$0xf0]  ;;  %v7277_v14 = vld [vmem:[#allocation2 + $0x848] sm:$0xf] }
 0x1db   :  { %5533 = vmatpush.bf16.msra.mxu2 %v7598_v40  ;;  %v7294_v40 = vor.u32 %v9554_v15, %v7293_v13  ;;  %v7678_v50 = vor.u32 %v9650_v39, %v7677_v34  ;;  %v9582_v52 = vld [vmem:[#allocation2 + $0x954] sm:$0xf0]  ;;  %v7533_v17 = vld [vmem:[#allocation2 + $0xa48] sm:$0xf]  ;;  %v5257_v60 = vpop.f32.mrf.mxu0  ;;  %v7278_v61 = vor.u32 %v9550_v47, %v7277_v14 }
 0x1dc   :  { %5546 = vmatpush.bf16.msra.mxu3 %v7726_v48  ;;  %v7405_v48 = vld [vmem:[#allocation2 + $0x948] sm:$0xf]  ;;  %v9614_v56 = vld [vmem:[#allocation2 + $0xa54] sm:$0xf0] }
 0x1dd   :  { %5508 = vmatpush.bf16.msra.mxu0 %v7326_v57  ;;  %v5282_v57 = vadd.f32 %v5281_v51, %v5269_v24  ;;  %v9646_v53 = vld [vmem:[#allocation2 + $0xb54] sm:$0xf0]  ;;  %v7406_v0 = vor.u32 %v9582_v52, %v7405_v48  ;;  %v7534_v2 = vor.u32 %v9614_v56, %v7533_v17  ;;  %v7261_v3 = vld [vmem:[#allocation2 + $0x828] sm:$0xf] }
 0x1de   :  { %5521 = vmatpush.bf16.msra.mxu1 %v7454_v58  ;;  %v5294_v58 = vpop.f32.mrf.mxu3  ;;  %v9546_v4 = vld [vmem:[#allocation2 + $0x834] sm:$0xf0]  ;;  %v7389_v36 = vld [vmem:[#allocation2 + $0x928] sm:$0xf] }
 0x1df   :  { %5534 = vmatpush.bf16.msra.mxu2 %v7582_v59  ;;  %v7661_v59 = vld [vmem:[#allocation2 + $0xb48] sm:$0xf]  ;;  %v10380_v63 = vadd.f32 %v5294_v58, %v5282_v57  ;;  %v9642_v13 = vld [vmem:[#allocation2 + $0xb34] sm:$0xf0]  ;;  %v7262_v15 = vor.u32 %v9546_v4, %v7261_v3 }
 0x1e0   :  { %5547 = vmatpush.bf16.msra.mxu3 %v7710_v62  ;;  %v5270_v62 = vpop.f32.mrf.mxu1  ;;  %v7662_v5 = vor.u32 %v9646_v53, %v7661_v59  ;;  %v7517_v8 = vld [vmem:[#allocation2 + $0xa28] sm:$0xf]  ;;  %v9574_v32 = vld [vmem:[#allocation2 + $0x914] sm:$0xf0] }
 0x1e1   :  { %5509 = vmatpush.bf16.msra.mxu0 %v7310_v55  ;;  %v9578_v55 = vld [vmem:[#allocation2 + $0x934] sm:$0xf0]  ;;  %v7245_v1 = vld [vmem:[#allocation2 + $0x808] sm:$0xf]  ;;  %v5283_v14 = vpop.f32.mrf.mxu2 }
 0x1e2   :  { %5522 = vmatpush.bf16.msra.mxu1 %v7438_v9  ;;  %v9610_v9 = vld [vmem:[#allocation2 + $0xa34] sm:$0xf0]  ;;  %v7390_v24 = vor.u32 %v9578_v55, %v7389_v36  ;;  %v7373_v27 = vld [vmem:[#allocation2 + $0x908] sm:$0xf] }
 0x1e3   :  { %5535 = vmatpush.bf16.msra.mxu2 %v7566_v10  ;;  %v7645_v10 = vld [vmem:[#allocation2 + $0xb28] sm:$0xf]  ;;  %v7518_v26 = vor.u32 %v9610_v9, %v7517_v8  ;;  %v9698_v48 = vld [vmem:[#allocation2 + $0xcf4] sm:$0xf0]  ;;  %v7374_v58 = vor.u32 %v9574_v32, %v7373_v27 }
 0x1e4   :  { %5548 = vmatpush.bf16.msra.mxu3 %v7694_v21  ;;  %v9542_v21 = vld [vmem:[#allocation2 + $0x814] sm:$0xf0]  ;;  %v7501_v34 = vld [vmem:[#allocation2 + $0xa08] sm:$0xf]  ;;  %v7646_v39 = vor.u32 %v9642_v13, %v7645_v10 }
 0x1e5   :  { %5510 = vmatpush.bf16.msra.mxu0 %v7294_v40  ;;  %v9606_v40 = vld [vmem:[#allocation2 + $0xa14] sm:$0xf0]  ;;  %v7869_v47 = vld [vmem:[#allocation2 + $0xce8] sm:$0xf]  ;;  %v7246_v52 = vor.u32 %v9542_v21, %v7245_v1 }
 0x1e6   :  { %5523 = vmatpush.bf16.msra.mxu1 %v7422_v6  ;;  %v7629_v6 = vld [vmem:[#allocation2 + $0xb08] sm:$0xf]  ;;  %v5296_v51 = vpop.f32.mrf.mxu3  ;;  %v9730_v17 = vld [vmem:[#allocation2 + $0xdf4] sm:$0xf0]  ;;  %v7502_v59 = vor.u32 %v9606_v40, %v7501_v34  ;;  %v7870_v62 = vor.u32 %v9698_v48, %v7869_v47 }
 0x1e7   :  { %5536 = vmatpush.bf16.msra.mxu2 %v7550_v43  ;;  %v9638_v43 = vld [vmem:[#allocation2 + $0xb14] sm:$0xf0]  ;;  %v8125_v56 = vld [vmem:[#allocation2 + $0xee8] sm:$0xf] }
 0x1e8   :  { %5549 = vmatpush.bf16.msra.mxu3 %v7678_v50  ;;  %v7997_v50 = vld [vmem:[#allocation2 + $0xde8] sm:$0xf]  ;;  %v9762_v57 = vld [vmem:[#allocation2 + $0xef4] sm:$0xf0] }
 0x1e9   :  { %5511 = vmatpush.bf16.msra.mxu0 %v7278_v61  ;;  %v8253_v53 = vld [vmem:[#allocation2 + $0xfe8] sm:$0xf]  ;;  %v9794_v60 = vld [vmem:[#allocation2 + $0xff4] sm:$0xf0]  ;;  %v7630_v61 = vor.u32 %v9638_v43, %v7629_v6 }
 0x1ea   :  { %5524 = vmatpush.bf16.msra.mxu1 %v7406_v0  ;;  %v7998_v0 = vor.u32 %v9730_v17, %v7997_v50  ;;  %v7853_v3 = vld [vmem:[#allocation2 + $0xcc8] sm:$0xf]  ;;  %v9694_v4 = vld [vmem:[#allocation2 + $0xcd4] sm:$0xf0] }
 0x1eb   :  { %5537 = vmatpush.bf16.msra.mxu2 %v7534_v2  ;;  %v8126_v2 = vor.u32 %v9762_v57, %v8125_v56  ;;  %v7981_v36 = vld [vmem:[#allocation2 + $0xdc8] sm:$0xf]  ;;  %v9726_v55 = vld [vmem:[#allocation2 + $0xdd4] sm:$0xf0] }
 0x1ec   :  { %5550 = vmatpush.bf16.msra.mxu3 %v7662_v5  ;;  %v8254_v5 = vor.u32 %v9794_v60, %v8253_v53  ;;  %v8109_v8 = vld [vmem:[#allocation2 + $0xec8] sm:$0xf]  ;;  %v9758_v9 = vld [vmem:[#allocation2 + $0xed4] sm:$0xf0]  ;;  %v7982_v1 = vor.u32 %v9726_v55, %v7981_v36 }
 0x1ed   :  { %5512 = vmatpush.bf16.msra.mxu0 %v7262_v15  ;;  %v8237_v10 = vld [vmem:[#allocation2 + $0xfc8] sm:$0xf]  ;;  %v9790_v13 = vld [vmem:[#allocation2 + $0xfd4] sm:$0xf0]  ;;  %v7854_v15 = vor.u32 %v9694_v4, %v7853_v3  ;;  %v8110_v21 = vor.u32 %v9758_v9, %v8109_v8 }
 0x1ee   :  { %5525 = vmatpush.bf16.msra.mxu1 %v7390_v24  ;;  %v7837_v24 = vld [vmem:[#allocation2 + $0xca8] sm:$0xf]  ;;  %v8238_v32 = vor.u32 %v9790_v13, %v8237_v10  ;;  %v9722_v34 = vld [vmem:[#allocation2 + $0xdb4] sm:$0xf0] }
 0x1ef   :  { %5538 = vmatpush.bf16.msra.mxu2 %v7518_v26  ;;  %v9690_v26 = vld [vmem:[#allocation2 + $0xcb4] sm:$0xf0]  ;;  %v7965_v27 = vld [vmem:[#allocation2 + $0xda8] sm:$0xf] }
 0x1f0   :  { %5551 = vmatpush.bf16.msra.mxu3 %v7646_v39  ;;  %v8093_v39 = vld [vmem:[#allocation2 + $0xea8] sm:$0xf]  ;;  %v9754_v40 = vld [vmem:[#allocation2 + $0xeb4] sm:$0xf0]  ;;  %v7838_v14 = vor.u32 %v9690_v26, %v7837_v24  ;;  %v7966_v47 = vor.u32 %v9722_v34, %v7965_v27 }
 0x1f1   :  { %5513 = vmatpush.bf16.msra.mxu0 %v7246_v52  ;;  %v8221_v6 = vld [vmem:[#allocation2 + $0xfa8] sm:$0xf]  ;;  %v9786_v43 = vld [vmem:[#allocation2 + $0xfb4] sm:$0xf0]  ;;  %v8094_v48 = vor.u32 %v9754_v40, %v8093_v39 }
 0x1f2   :  { %5526 = vmatpush.bf16.msra.mxu1 %v7374_v58  ;;  %v7821_v50 = vld [vmem:[#allocation2 + $0xc88] sm:$0xf]  ;;  %v9686_v51 = vld [vmem:[#allocation2 + $0xc94] sm:$0xf0]  ;;  %v8222_v17 = vor.u32 %v9786_v43, %v8221_v6 }
 0x1f3   :  { %5539 = vmatpush.bf16.msra.mxu2 %v7502_v59  ;;  %v7949_v52 = vld [vmem:[#allocation2 + $0xd88] sm:$0xf]  ;;  %v9718_v56 = vld [vmem:[#allocation2 + $0xd94] sm:$0xf0]  ;;  %v5307_v59 = vpop.f32.mrf.mxu0 }
 0x1f4   :  { %5552 = vmatpush.bf16.msra.mxu3 %v7630_v61  ;;  %5514 = vmatmul.bf16.vlgmr.msra.gmra.mxu0 %v10256_v25  ;;  %v8077_v57 = vld [vmem:[#allocation2 + $0xe88] sm:$0xf]  ;;  %v9750_v58 = vld [vmem:[#allocation2 + $0xe94] sm:$0xf0]  ;;  %v5308_v61 = vadd.f32 %v5307_v59, %v10380_v63 }
 0x1f5   :  { %5558 = vmatpush.bf16.msrb.mxu0 %v7870_v62  ;;  %5527 = vmatmul.bf16.vlgmr.msra.gmra.mxu1 %v10260_v30  ;;  %v8205_v53 = vld [vmem:[#allocation2 + $0xf88] sm:$0xf]  ;;  %v9782_v60 = vld [vmem:[#allocation2 + $0xf94] sm:$0xf0]  ;;  %v7822_v62 = vor.u32 %v9686_v51, %v7821_v50  ;;  %v8078_v3 = vor.u32 %v9750_v58, %v8077_v57 }
 0x1f6   :  { %5571 = vmatpush.bf16.msrb.mxu1 %v7998_v0  ;;  %5540 = vmatmul.bf16.vlgmr.msra.gmra.mxu2 %v10258_v29  ;;  %v5320_v0 = vpop.f32.mrf.mxu1  ;;  %v7805_v4 = vld [vmem:[#allocation2 + $0xc68] sm:$0xf]  ;;  %v9682_v36 = vld [vmem:[#allocation2 + $0xc74] sm:$0xf0]  ;;  %v8206_v55 = vor.u32 %v9782_v60, %v8205_v53 }
 0x1f7   :  { %5584 = vmatpush.bf16.msrb.mxu2 %v8126_v2  ;;  %5553 = vmatmul.bf16.vlgmr.msra.gmra.mxu3 %v10262_v33  ;;  %v7950_v2 = vor.u32 %v9718_v56, %v7949_v52  ;;  %v5321_v8 = vadd.f32 %v5320_v0, %v5308_v61  ;;  %v9714_v9 = vld [vmem:[#allocation2 + $0xd74] sm:$0xf0]  ;;  %v8061_v10 = vld [vmem:[#allocation2 + $0xe68] sm:$0xf] }
 0x1f8   :  { %5597 = vmatpush.bf16.msrb.mxu3 %v8254_v5  ;;  %v7933_v5 = vld [vmem:[#allocation2 + $0xd68] sm:$0xf]  ;;  %v9746_v13 = vld [vmem:[#allocation2 + $0xe74] sm:$0xf0] }
 0x1f9   :  { %5559 = vmatpush.bf16.msrb.mxu0 %v7854_v15  ;;  %v8189_v15 = vld [vmem:[#allocation2 + $0xf68] sm:$0xf]  ;;  %v7934_v63 = vor.u32 %v9714_v9, %v7933_v5  ;;  %v8062_v24 = vor.u32 %v9746_v13, %v8061_v10  ;;  %v9678_v27 = vld [vmem:[#allocation2 + $0xc54] sm:$0xf0]  ;;  %v5333_v39 = vpop.f32.mrf.mxu2 }
 0x1fa   :  { %5572 = vmatpush.bf16.msrb.mxu1 %v7982_v1  ;;  %v9778_v1 = vld [vmem:[#allocation2 + $0xf74] sm:$0xf0]  ;;  %v7789_v26 = vld [vmem:[#allocation2 + $0xc48] sm:$0xf] }
 0x1fb   :  { %5585 = vmatpush.bf16.msrb.mxu2 %v8110_v21  ;;  %v7806_v21 = vor.u32 %v9682_v36, %v7805_v4  ;;  %v8190_v34 = vor.u32 %v9778_v1, %v8189_v15  ;;  %v9710_v40 = vld [vmem:[#allocation2 + $0xd54] sm:$0xf0]  ;;  %v8045_v6 = vld [vmem:[#allocation2 + $0xe48] sm:$0xf]  ;;  %v5309_v51 = vpop.f32.mrf.mxu0  ;;  %v7790_v52 = vor.u32 %v9678_v27, %v7789_v26 }
 0x1fc   :  { %5598 = vmatpush.bf16.msrb.mxu3 %v8238_v32  ;;  %v7917_v32 = vld [vmem:[#allocation2 + $0xd48] sm:$0xf]  ;;  %v9742_v43 = vld [vmem:[#allocation2 + $0xe54] sm:$0xf0] }
 0x1fd   :  { %5560 = vmatpush.bf16.msrb.mxu0 %v7838_v14  ;;  %v5334_v14 = vadd.f32 %v5333_v39, %v5321_v8  ;;  %v9774_v50 = vld [vmem:[#allocation2 + $0xf54] sm:$0xf0]  ;;  %v7918_v57 = vor.u32 %v9710_v40, %v7917_v32  ;;  %v8046_v58 = vor.u32 %v9742_v43, %v8045_v6  ;;  %v7773_v59 = vld [vmem:[#allocation2 + $0xc28] sm:$0xf] }
 0x1fe   :  { %5573 = vmatpush.bf16.msrb.mxu1 %v7966_v47  ;;  %v5346_v47 = vpop.f32.mrf.mxu3  ;;  %v9674_v53 = vld [vmem:[#allocation2 + $0xc34] sm:$0xf0]  ;;  %v7901_v60 = vld [vmem:[#allocation2 + $0xd28] sm:$0xf] }
 0x1ff   :  { %5586 = vmatpush.bf16.msrb.mxu2 %v8094_v48  ;;  %v8173_v48 = vld [vmem:[#allocation2 + $0xf48] sm:$0xf]  ;;  %v10387_v56 = vadd.f32 %v5346_v47, %v5334_v14  ;;  %v9770_v4 = vld [vmem:[#allocation2 + $0xf34] sm:$0xf0]  ;;  %v7774_v36 = vor.u32 %v9674_v53, %v7773_v59 }
 0x200   :  { %5599 = vmatpush.bf16.msrb.mxu3 %v8222_v17  ;;  %v5322_v17 = vpop.f32.mrf.mxu1  ;;  %v8174_v61 = vor.u32 %v9774_v50, %v8173_v48  ;;  %v8029_v0 = vld [vmem:[#allocation2 + $0xe28] sm:$0xf]  ;;  %v9702_v13 = vld [vmem:[#allocation2 + $0xd14] sm:$0xf0] }
 0x201   :  { %5561 = vmatpush.bf16.msrb.mxu0 %v7822_v62  ;;  %v9706_v62 = vld [vmem:[#allocation2 + $0xd34] sm:$0xf0]  ;;  %v7757_v5 = vld [vmem:[#allocation2 + $0xc08] sm:$0xf]  ;;  %v5335_v26 = vpop.f32.mrf.mxu2 }
 0x202   :  { %5574 = vmatpush.bf16.msrb.mxu1 %v7950_v2  ;;  %v9738_v2 = vld [vmem:[#allocation2 + $0xe34] sm:$0xf0]  ;;  %v7902_v8 = vor.u32 %v9706_v62, %v7901_v60  ;;  %v7885_v10 = vld [vmem:[#allocation2 + $0xd08] sm:$0xf] }
 0x203   :  { %5587 = vmatpush.bf16.msrb.mxu2 %v8078_v3  ;;  %v8157_v3 = vld [vmem:[#allocation2 + $0xf28] sm:$0xf]  ;;  %v8030_v9 = vor.u32 %v9738_v2, %v8029_v0  ;;  %v9826_v32 = vld [vmem:[#allocation2 + $0x10f4] sm:$0xf0]  ;;  %v7886_v47 = vor.u32 %v9702_v13, %v7885_v10 }
 0x204   :  { %5600 = vmatpush.bf16.msrb.mxu3 %v8206_v55  ;;  %v9670_v55 = vld [vmem:[#allocation2 + $0xc14] sm:$0xf0]  ;;  %v8013_v15 = vld [vmem:[#allocation2 + $0xe08] sm:$0xf]  ;;  %v8158_v1 = vor.u32 %v9770_v4, %v8157_v3 }
 0x205   :  { %5562 = vmatpush.bf16.msrb.mxu0 %v7806_v21  ;;  %v9734_v21 = vld [vmem:[#allocation2 + $0xe14] sm:$0xf0]  ;;  %v8381_v27 = vld [vmem:[#allocation2 + $0x10e8] sm:$0xf]  ;;  %v7758_v40 = vor.u32 %v9670_v55, %v7757_v5 }
 0x206   :  { %5575 = vmatpush.bf16.msrb.mxu1 %v7934_v63  ;;  %v8141_v63 = vld [vmem:[#allocation2 + $0xf08] sm:$0xf]  ;;  %v5348_v39 = vpop.f32.mrf.mxu3  ;;  %v9858_v6 = vld [vmem:[#allocation2 + $0x11f4] sm:$0xf0]  ;;  %v8014_v48 = vor.u32 %v9734_v21, %v8013_v15  ;;  %v8382_v17 = vor.u32 %v9826_v32, %v8381_v27 }
 0x207   :  { %5588 = vmatpush.bf16.msrb.mxu2 %v8062_v24  ;;  %v9766_v24 = vld [vmem:[#allocation2 + $0xf14] sm:$0xf0]  ;;  %v8637_v43 = vld [vmem:[#allocation2 + $0x12e8] sm:$0xf] }
 0x208   :  { %5601 = vmatpush.bf16.msrb.mxu3 %v8190_v34  ;;  %v8509_v34 = vld [vmem:[#allocation2 + $0x11e8] sm:$0xf]  ;;  %v9890_v14 = vld [vmem:[#allocation2 + $0x12f4] sm:$0xf0] }
 0x209   :  { %5563 = vmatpush.bf16.msrb.mxu0 %v7790_v52  ;;  %v8765_v50 = vld [vmem:[#allocation2 + $0x13e8] sm:$0xf]  ;;  %v9922_v51 = vld [vmem:[#allocation2 + $0x13f4] sm:$0xf0]  ;;  %v8142_v52 = vor.u32 %v9766_v24, %v8141_v63 }
 0x20a   :  { %5576 = vmatpush.bf16.msrb.mxu1 %v7918_v57  ;;  %v8510_v57 = vor.u32 %v9858_v6, %v8509_v34  ;;  %v8365_v59 = vld [vmem:[#allocation2 + $0x10c8] sm:$0xf]  ;;  %v9822_v53 = vld [vmem:[#allocation2 + $0x10d4] sm:$0xf0] }
 0x20b   :  { %5589 = vmatpush.bf16.msrb.mxu2 %v8046_v58  ;;  %v8638_v58 = vor.u32 %v9890_v14, %v8637_v43  ;;  %v8493_v60 = vld [vmem:[#allocation2 + $0x11c8] sm:$0xf]  ;;  %v9854_v62 = vld [vmem:[#allocation2 + $0x11d4] sm:$0xf0] }
 0x20c   :  { %5602 = vmatpush.bf16.msrb.mxu3 %v8174_v61  ;;  %v8766_v61 = vor.u32 %v9922_v51, %v8765_v50  ;;  %v8621_v0 = vld [vmem:[#allocation2 + $0x12c8] sm:$0xf]  ;;  %v9886_v2 = vld [vmem:[#allocation2 + $0x12d4] sm:$0xf0]  ;;  %v8494_v5 = vor.u32 %v9854_v62, %v8493_v60 }
 0x20d   :  { %5564 = vmatpush.bf16.msrb.mxu0 %v7774_v36  ;;  %v8749_v3 = vld [vmem:[#allocation2 + $0x13c8] sm:$0xf]  ;;  %v9918_v4 = vld [vmem:[#allocation2 + $0x13d4] sm:$0xf0]  ;;  %v8366_v36 = vor.u32 %v9822_v53, %v8365_v59  ;;  %v8622_v55 = vor.u32 %v9886_v2, %v8621_v0 }
 0x20e   :  { %5577 = vmatpush.bf16.msrb.mxu1 %v7902_v8  ;;  %v8349_v8 = vld [vmem:[#allocation2 + $0x10a8] sm:$0xf]  ;;  %v8750_v13 = vor.u32 %v9918_v4, %v8749_v3  ;;  %v9850_v15 = vld [vmem:[#allocation2 + $0x11b4] sm:$0xf0] }
 0x20f   :  { %5590 = vmatpush.bf16.msrb.mxu2 %v8030_v9  ;;  %v9818_v9 = vld [vmem:[#allocation2 + $0x10b4] sm:$0xf0]  ;;  %v8477_v10 = vld [vmem:[#allocation2 + $0x11a8] sm:$0xf] }
 0x210   :  { %5603 = vmatpush.bf16.msrb.mxu3 %v8158_v1  ;;  %v8605_v1 = vld [vmem:[#allocation2 + $0x12a8] sm:$0xf]  ;;  %v9882_v21 = vld [vmem:[#allocation2 + $0x12b4] sm:$0xf0]  ;;  %v8350_v26 = vor.u32 %v9818_v9, %v8349_v8  ;;  %v8478_v27 = vor.u32 %v9850_v15, %v8477_v10 }
 0x211   :  { %5565 = vmatpush.bf16.msrb.mxu0 %v7758_v40  ;;  %v8733_v63 = vld [vmem:[#allocation2 + $0x13a8] sm:$0xf]  ;;  %v9914_v24 = vld [vmem:[#allocation2 + $0x13b4] sm:$0xf0]  ;;  %v8606_v32 = vor.u32 %v9882_v21, %v8605_v1 }
 0x212   :  { %5578 = vmatpush.bf16.msrb.mxu1 %v7886_v47  ;;  %v8333_v34 = vld [vmem:[#allocation2 + $0x1088] sm:$0xf]  ;;  %v9814_v39 = vld [vmem:[#allocation2 + $0x1094] sm:$0xf0]  ;;  %v8734_v6 = vor.u32 %v9914_v24, %v8733_v63 }
 0x213   :  { %5591 = vmatpush.bf16.msrb.mxu2 %v8014_v48  ;;  %v8461_v40 = vld [vmem:[#allocation2 + $0x1188] sm:$0xf]  ;;  %v9846_v43 = vld [vmem:[#allocation2 + $0x1194] sm:$0xf0]  ;;  %v5359_v48 = vpop.f32.mrf.mxu0 }
 0x214   :  { %5604 = vmatpush.bf16.msrb.mxu3 %v8142_v52  ;;  %5566 = vmatmul.bf16.vlgmr.msrb.gmra.mxu0 %v10274_v23  ;;  %v8589_v14 = vld [vmem:[#allocation2 + $0x1288] sm:$0xf]  ;;  %v9878_v47 = vld [vmem:[#allocation2 + $0x1294] sm:$0xf0]  ;;  %v5360_v52 = vadd.f32 %v5359_v48, %v10387_v56 }
 0x215   :  { %5610 = vmatpush.bf16.msra.mxu0 %v8382_v17  ;;  %5579 = vmatmul.bf16.vlgmr.msrb.gmra.mxu1 %v10278_v31  ;;  %v8717_v50 = vld [vmem:[#allocation2 + $0x1388] sm:$0xf]  ;;  %v9910_v51 = vld [vmem:[#allocation2 + $0x1394] sm:$0xf0]  ;;  %v8334_v17 = vor.u32 %v9814_v39, %v8333_v34  ;;  %v8590_v59 = vor.u32 %v9878_v47, %v8589_v14 }
 0x216   :  { %5623 = vmatpush.bf16.msra.mxu1 %v8510_v57  ;;  %5592 = vmatmul.bf16.vlgmr.msrb.gmra.mxu2 %v10276_v28  ;;  %v5372_v57 = vpop.f32.mrf.mxu1  ;;  %v8317_v53 = vld [vmem:[#allocation2 + $0x1068] sm:$0xf]  ;;  %v9810_v60 = vld [vmem:[#allocation2 + $0x1074] sm:$0xf0]  ;;  %v8718_v62 = vor.u32 %v9910_v51, %v8717_v50 }
 0x217   :  { %5636 = vmatpush.bf16.msra.mxu2 %v8638_v58  ;;  %5605 = vmatmul.bf16.vlgmr.msrb.gmra.mxu3 %v10280_v35  ;;  %v8462_v58 = vor.u32 %v9846_v43, %v8461_v40  ;;  %v5373_v0 = vadd.f32 %v5372_v57, %v5360_v52  ;;  %v9842_v2 = vld [vmem:[#allocation2 + $0x1174] sm:$0xf0]  ;;  %v8573_v3 = vld [vmem:[#allocation2 + $0x1268] sm:$0xf] }
 0x218   :  { %5649 = vmatpush.bf16.msra.mxu3 %v8766_v61  ;;  %v8445_v61 = vld [vmem:[#allocation2 + $0x1168] sm:$0xf]  ;;  %v9874_v4 = vld [vmem:[#allocation2 + $0x1274] sm:$0xf0] }
 0x219   :  { %5611 = vmatpush.bf16.msra.mxu0 %v8366_v36  ;;  %v8701_v36 = vld [vmem:[#allocation2 + $0x1368] sm:$0xf]  ;;  %v8446_v56 = vor.u32 %v9842_v2, %v8445_v61  ;;  %v8574_v8 = vor.u32 %v9874_v4, %v8573_v3  ;;  %v9806_v10 = vld [vmem:[#allocation2 + $0x1054] sm:$0xf0]  ;;  %v5385_v1 = vpop.f32.mrf.mxu2 }
 0x21a   :  { %5624 = vmatpush.bf16.msra.mxu1 %v8494_v5  ;;  %v9906_v5 = vld [vmem:[#allocation2 + $0x1374] sm:$0xf0]  ;;  %v8301_v9 = vld [vmem:[#allocation2 + $0x1048] sm:$0xf] }
 0x21b   :  { %5637 = vmatpush.bf16.msra.mxu2 %v8622_v55  ;;  %v8318_v55 = vor.u32 %v9810_v60, %v8317_v53  ;;  %v8702_v15 = vor.u32 %v9906_v5, %v8701_v36  ;;  %v9838_v21 = vld [vmem:[#allocation2 + $0x1154] sm:$0xf0]  ;;  %v8557_v63 = vld [vmem:[#allocation2 + $0x1248] sm:$0xf]  ;;  %v5361_v39 = vpop.f32.mrf.mxu0  ;;  %v8302_v40 = vor.u32 %v9806_v10, %v8301_v9 }
 0x21c   :  { %5650 = vmatpush.bf16.msra.mxu3 %v8750_v13  ;;  %v8429_v13 = vld [vmem:[#allocation2 + $0x1148] sm:$0xf]  ;;  %v9870_v24 = vld [vmem:[#allocation2 + $0x1254] sm:$0xf0] }
 0x21d   :  { %5612 = vmatpush.bf16.msra.mxu0 %v8350_v26  ;;  %v5386_v26 = vadd.f32 %v5385_v1, %v5373_v0  ;;  %v9902_v34 = vld [vmem:[#allocation2 + $0x1354] sm:$0xf0]  ;;  %v8430_v14 = vor.u32 %v9838_v21, %v8429_v13  ;;  %v8558_v47 = vor.u32 %v9870_v24, %v8557_v63  ;;  %v8285_v48 = vld [vmem:[#allocation2 + $0x1028] sm:$0xf] }
 0x21e   :  { %5625 = vmatpush.bf16.msra.mxu1 %v8478_v27  ;;  %v5398_v27 = vpop.f32.mrf.mxu3  ;;  %v9802_v50 = vld [vmem:[#allocation2 + $0x1034] sm:$0xf0]  ;;  %v8413_v51 = vld [vmem:[#allocation2 + $0x1128] sm:$0xf] }
 0x21f   :  { %5638 = vmatpush.bf16.msra.mxu2 %v8606_v32  ;;  %v8685_v32 = vld [vmem:[#allocation2 + $0x1348] sm:$0xf]  ;;  %v10394_v43 = vadd.f32 %v5398_v27, %v5386_v26  ;;  %v9898_v53 = vld [vmem:[#allocation2 + $0x1334] sm:$0xf0]  ;;  %v8286_v60 = vor.u32 %v9802_v50, %v8285_v48 }
 0x220   :  { %5651 = vmatpush.bf16.msra.mxu3 %v8734_v6  ;;  %v5374_v6 = vpop.f32.mrf.mxu1  ;;  %v8686_v52 = vor.u32 %v9902_v34, %v8685_v32  ;;  %v8541_v57 = vld [vmem:[#allocation2 + $0x1228] sm:$0xf]  ;;  %v9830_v4 = vld [vmem:[#allocation2 + $0x1114] sm:$0xf0] }
 0x221   :  { %5613 = vmatpush.bf16.msra.mxu0 %v8334_v17  ;;  %v9834_v17 = vld [vmem:[#allocation2 + $0x1134] sm:$0xf0]  ;;  %v8269_v61 = vld [vmem:[#allocation2 + $0x1008] sm:$0xf]  ;;  %v5387_v9 = vpop.f32.mrf.mxu2 }
 0x222   :  { %5626 = vmatpush.bf16.msra.mxu1 %v8462_v58  ;;  %v9866_v58 = vld [vmem:[#allocation2 + $0x1234] sm:$0xf0]  ;;  %v8414_v0 = vor.u32 %v9834_v17, %v8413_v51  ;;  %v8397_v3 = vld [vmem:[#allocation2 + $0x1108] sm:$0xf] }
 0x223   :  { %5639 = vmatpush.bf16.msra.mxu2 %v8590_v59  ;;  %v8669_v59 = vld [vmem:[#allocation2 + $0x1328] sm:$0xf]  ;;  %v8542_v2 = vor.u32 %v9866_v58, %v8541_v57  ;;  %v9954_v13 = vld [vmem:[#allocation2 + $0x14f4] sm:$0xf0]  ;;  %v8398_v27 = vor.u32 %v9830_v4, %v8397_v3 }
 0x224   :  { %5652 = vmatpush.bf16.msra.mxu3 %v8718_v62  ;;  %v9798_v62 = vld [vmem:[#allocation2 + $0x1014] sm:$0xf0]  ;;  %v8525_v36 = vld [vmem:[#allocation2 + $0x1208] sm:$0xf]  ;;  %v8670_v5 = vor.u32 %v9898_v53, %v8669_v59 }
 0x225   :  { %5614 = vmatpush.bf16.msra.mxu0 %v8318_v55  ;;  %v9862_v55 = vld [vmem:[#allocation2 + $0x1214] sm:$0xf0]  ;;  %v8893_v10 = vld [vmem:[#allocation2 + $0x14e8] sm:$0xf]  ;;  %v8270_v21 = vor.u32 %v9798_v62, %v8269_v61 }
 0x226   :  { %5627 = vmatpush.bf16.msra.mxu1 %v8446_v56  ;;  %v8653_v56 = vld [vmem:[#allocation2 + $0x1308] sm:$0xf]  ;;  %v5400_v1 = vpop.f32.mrf.mxu3  ;;  %v9986_v63 = vld [vmem:[#allocation2 + $0x15f4] sm:$0xf0]  ;;  %v8526_v32 = vor.u32 %v9862_v55, %v8525_v36  ;;  %v8894_v6 = vor.u32 %v9954_v13, %v8893_v10 }
 0x227   :  { %5640 = vmatpush.bf16.msra.mxu2 %v8574_v8  ;;  %v9894_v8 = vld [vmem:[#allocation2 + $0x1314] sm:$0xf0]  ;;  %v9149_v24 = vld [vmem:[#allocation2 + $0x16e8] sm:$0xf] }
 0x228   :  { %5653 = vmatpush.bf16.msra.mxu3 %v8702_v15  ;;  %v9021_v15 = vld [vmem:[#allocation2 + $0x15e8] sm:$0xf]  ;;  %v10018_v26 = vld [vmem:[#allocation2 + $0x16f4] sm:$0xf0] }
 0x229   :  { %5615 = vmatpush.bf16.msra.mxu0 %v8302_v40  ;;  %v9277_v34 = vld [vmem:[#allocation2 + $0x17e8] sm:$0xf]  ;;  %v10050_v39 = vld [vmem:[#allocation2 + $0x17f4] sm:$0xf0]  ;;  %v8654_v40 = vor.u32 %v9894_v8, %v8653_v56 }
 0x22a   :  { %5628 = vmatpush.bf16.msra.mxu1 %v8430_v14  ;;  %v9022_v14 = vor.u32 %v9986_v63, %v9021_v15  ;;  %v8877_v48 = vld [vmem:[#allocation2 + $0x14c8] sm:$0xf]  ;;  %v9950_v50 = vld [vmem:[#allocation2 + $0x14d4] sm:$0xf0] }
 0x22b   :  { %5641 = vmatpush.bf16.msra.mxu2 %v8558_v47  ;;  %v9150_v47 = vor.u32 %v10018_v26, %v9149_v24  ;;  %v9005_v51 = vld [vmem:[#allocation2 + $0x15c8] sm:$0xf]  ;;  %v9982_v17 = vld [vmem:[#allocation2 + $0x15d4] sm:$0xf0] }
 0x22c   :  { %5654 = vmatpush.bf16.msra.mxu3 %v8686_v52  ;;  %v9278_v52 = vor.u32 %v10050_v39, %v9277_v34  ;;  %v9133_v57 = vld [vmem:[#allocation2 + $0x16c8] sm:$0xf]  ;;  %v10014_v58 = vld [vmem:[#allocation2 + $0x16d4] sm:$0xf0]  ;;  %v9006_v61 = vor.u32 %v9982_v17, %v9005_v51 }
 0x22d   :  { %5616 = vmatpush.bf16.msra.mxu0 %v8286_v60  ;;  %v9261_v59 = vld [vmem:[#allocation2 + $0x17c8] sm:$0xf]  ;;  %v10046_v53 = vld [vmem:[#allocation2 + $0x17d4] sm:$0xf0]  ;;  %v8878_v60 = vor.u32 %v9950_v50, %v8877_v48  ;;  %v9134_v62 = vor.u32 %v10014_v58, %v9133_v57 }
 0x22e   :  { %5629 = vmatpush.bf16.msra.mxu1 %v8414_v0  ;;  %v8861_v0 = vld [vmem:[#allocation2 + $0x14a8] sm:$0xf]  ;;  %v9262_v4 = vor.u32 %v10046_v53, %v9261_v59  ;;  %v9978_v36 = vld [vmem:[#allocation2 + $0x15b4] sm:$0xf0] }
 0x22f   :  { %5642 = vmatpush.bf16.msra.mxu2 %v8542_v2  ;;  %v9946_v2 = vld [vmem:[#allocation2 + $0x14b4] sm:$0xf0]  ;;  %v8989_v3 = vld [vmem:[#allocation2 + $0x15a8] sm:$0xf] }
 0x230   :  { %5655 = vmatpush.bf16.msra.mxu3 %v8670_v5  ;;  %v9117_v5 = vld [vmem:[#allocation2 + $0x16a8] sm:$0xf]  ;;  %v10010_v55 = vld [vmem:[#allocation2 + $0x16b4] sm:$0xf0]  ;;  %v8862_v9 = vor.u32 %v9946_v2, %v8861_v0  ;;  %v8990_v10 = vor.u32 %v9978_v36, %v8989_v3 }
 0x231   :  { %5617 = vmatpush.bf16.msra.mxu0 %v8270_v21  ;;  %v9245_v56 = vld [vmem:[#allocation2 + $0x17a8] sm:$0xf]  ;;  %v10042_v8 = vld [vmem:[#allocation2 + $0x17b4] sm:$0xf0]  ;;  %v9118_v13 = vor.u32 %v10010_v55, %v9117_v5 }
 0x232   :  { %5630 = vmatpush.bf16.msra.mxu1 %v8398_v27  ;;  %v8845_v15 = vld [vmem:[#allocation2 + $0x1488] sm:$0xf]  ;;  %v9942_v1 = vld [vmem:[#allocation2 + $0x1494] sm:$0xf0]  ;;  %v9246_v63 = vor.u32 %v10042_v8, %v9245_v56  ;;  %v10402_v51 = vpop.f32.mrf.mxu1 }
 0x233   :  { %5643 = vmatpush.bf16.msra.mxu2 %v8526_v32  ;;  %v8973_v21 = vld [vmem:[#allocation2 + $0x1588] sm:$0xf]  ;;  %v9974_v24 = vld [vmem:[#allocation2 + $0x1594] sm:$0xf0]  ;;  %v8846_v39 = vor.u32 %v9942_v1, %v8845_v15 }
 0x234   :  { %5656 = vmatpush.bf16.msra.mxu3 %v8654_v40  ;;  %5618 = vmatmul.bf16.vlgmr.msra.gmra.mxu0 %v10292_v37  ;;  %v9101_v26 = vld [vmem:[#allocation2 + $0x1688] sm:$0xf]  ;;  %v10006_v27 = vld [vmem:[#allocation2 + $0x1694] sm:$0xf0]  ;;  %v10400_v40 = vpop.f32.mrf.mxu0 }
 0x235   :  { %5662 = vmatpush.bf16.msrb.mxu0 %v8894_v6  ;;  %5631 = vmatmul.bf16.vlgmr.msra.gmra.mxu1 %v10296_v46  ;;  %v9229_v32 = vld [vmem:[#allocation2 + $0x1788] sm:$0xf]  ;;  %v10038_v34 = vld [vmem:[#allocation2 + $0x1794] sm:$0xf0]  ;;  %v8974_v6 = vor.u32 %v9974_v24, %v8973_v21 }
 0x236   :  { %5675 = vmatpush.bf16.msrb.mxu1 %v9022_v14  ;;  %5644 = vmatmul.bf16.vlgmr.msra.gmra.mxu2 %v10294_v45  ;;  %v9102_v14 = vor.u32 %v10006_v27, %v9101_v26  ;;  %v9938_v48 = vld [vmem:[#allocation2 + $0x1474] sm:$0xf0]  ;;  %v8957_v50 = vld [vmem:[#allocation2 + $0x1568] sm:$0xf] }
 0x237   :  { %5688 = vmatpush.bf16.msrb.mxu2 %v9150_v47  ;;  %5657 = vmatmul.bf16.vlgmr.msra.gmra.mxu3 %v10298_v49  ;;  %v8829_v47 = vld [vmem:[#allocation2 + $0x1468] sm:$0xf]  ;;  %v9970_v17 = vld [vmem:[#allocation2 + $0x1574] sm:$0xf0] }
 0x238   :  { %5701 = vmatpush.bf16.msrb.mxu3 %v9278_v52  ;;  %v9230_v52 = vor.u32 %v10038_v34, %v9229_v32  ;;  %v9085_v57 = vld [vmem:[#allocation2 + $0x1668] sm:$0xf]  ;;  %v10002_v58 = vld [vmem:[#allocation2 + $0x1674] sm:$0xf0] }
 0x239   :  { %5663 = vmatpush.bf16.msrb.mxu0 %v8878_v60  ;;  %v9213_v59 = vld [vmem:[#allocation2 + $0x1768] sm:$0xf]  ;;  %v10034_v53 = vld [vmem:[#allocation2 + $0x1774] sm:$0xf0]  ;;  %v8830_v60 = vor.u32 %v9938_v48, %v8829_v47  ;;  %v10065_v48 = vld [vmem:[#allocation5] sm:$0xf] }
 0x23a   :  { %5676 = vmatpush.bf16.msrb.mxu1 %v9006_v61  ;;  %v8958_v61 = vor.u32 %v9970_v17, %v8957_v50  ;;  %v8813_v0 = vld [vmem:[#allocation2 + $0x1448] sm:$0xf]  ;;  %v9934_v2 = vld [vmem:[#allocation2 + $0x1454] sm:$0xf0]  ;;  %v9214_v36 = vor.u32 %v10034_v53, %v9213_v59  ;;  %v10406_v8 = vpop.f32.mrf.mxu3  ;;  %v5426_v27 = vpop.f32.mrf.mxu1  ;;  %v848_v50 = vperm.slane %v10065_v48, 2 }
 0x23b   :  { %5689 = vmatpush.bf16.msrb.mxu2 %v9134_v62  ;;  %v9086_v62 = vor.u32 %v10002_v58, %v9085_v57  ;;  %v8941_v3 = vld [vmem:[#allocation2 + $0x1548] sm:$0xf]  ;;  %v9966_v5 = vld [vmem:[#allocation2 + $0x1554] sm:$0xf0]  ;;  %v6719_v27 = vld [vmem:[#allocation2 + $0x3f8] sm:$0xf0] }
 0x23c   :  { %5702 = vmatpush.bf16.msrb.mxu3 %v9262_v4  ;;  %v10404_v4 = vpop.f32.mrf.mxu2  ;;  %v9069_v55 = vld [vmem:[#allocation2 + $0x1648] sm:$0xf]  ;;  %v9998_v56 = vld [vmem:[#allocation2 + $0x1654] sm:$0xf0]  ;;  %v5413_v15 = vpop.f32.mrf.mxu0  ;;  %v8942_v1 = vor.u32 %v9966_v5, %v8941_v3  ;;  %v9340_v48 = vld [vmem:[#allocation2 + $0x1cc] sm:$0xf] }
 0x23d   :  { %5664 = vmatpush.bf16.msrb.mxu0 %v8862_v9  ;;  %v9197_v9 = vld [vmem:[#allocation2 + $0x1748] sm:$0xf]  ;;  %v9070_v21 = vor.u32 %v9998_v56, %v9069_v55  ;;  %v9930_v24 = vld [vmem:[#allocation2 + $0x1434] sm:$0xf0]  ;;  %v9312_v55 = vld [vmem:[#allocation2 + $0xec] sm:$0xf] }
 0x23e   :  { %5677 = vmatpush.bf16.msrb.mxu1 %v8990_v10  ;;  %v10030_v10 = vld [vmem:[#allocation2 + $0x1754] sm:$0xf0]  ;;  %v8925_v26 = vld [vmem:[#allocation2 + $0x1528] sm:$0xf]  ;;  %v6335_v56 = vld [vmem:[#allocation2 + $0xf8] sm:$0xf0] }
 0x23f   :  { %5690 = vmatpush.bf16.msrb.mxu2 %v9118_v13  ;;  %v8814_v13 = vor.u32 %v9934_v2, %v8813_v0  ;;  %v9198_v32 = vor.u32 %v10030_v10, %v9197_v9  ;;  %v9962_v34 = vld [vmem:[#allocation2 + $0x1534] sm:$0xf0]  ;;  %v8781_v17 = vld [vmem:[#allocation2 + $0x1408] sm:$0xf]  ;;  %v9344_v9 = vld [vmem:[#allocation2 + $0x1ec] sm:$0xf]  ;;  %v5412_v10 = vadd.f32 %v10400_v40, %v848_v50 }
 0x240   :  { %5703 = vmatpush.bf16.msrb.mxu3 %v9246_v63  ;;  %v8797_v63 = vld [vmem:[#allocation2 + $0x1428] sm:$0xf]  ;;  %v10026_v47 = vld [vmem:[#allocation2 + $0x1734] sm:$0xf0]  ;;  %v8926_v58 = vor.u32 %v9962_v34, %v8925_v26  ;;  %v6463_v15 = vld [vmem:[#allocation2 + $0x1f8] sm:$0xf0]  ;;  %v6338_v34 = vor.u32 %v9312_v55, %v6335_v56 }
 0x241   :  { %5665 = vmatpush.bf16.msrb.mxu0 %v8846_v39  ;;  %v9053_v39 = vld [vmem:[#allocation2 + $0x1628] sm:$0xf]  ;;  %v9926_v57 = vld [vmem:[#allocation2 + $0x1414] sm:$0xf0]  ;;  %v9408_v26 = vld [vmem:[#allocation2 + $0x3ec] sm:$0xf]  ;;  %v5425_v40 = vadd.f32 %v10402_v51, %v5412_v10 }
 0x242   :  { %5678 = vmatpush.bf16.msrb.mxu1 %v8974_v6  ;;  %v9994_v6 = vld [vmem:[#allocation2 + $0x1634] sm:$0xf0]  ;;  %v8909_v53 = vld [vmem:[#allocation2 + $0x1508] sm:$0xf]  ;;  %v5452_v5 = vpop.f32.mrf.mxu3  ;;  %v6722_v50 = vor.u32 %v9408_v26, %v6719_v27  ;;  %v6303_v51 = vld [vmem:[#allocation2 + $0xb8] sm:$0xf0] }
 0x243   :  { %5691 = vmatpush.bf16.msrb.mxu2 %v9102_v14  ;;  %v9181_v14 = vld [vmem:[#allocation2 + $0x1728] sm:$0xf]  ;;  %v9054_v59 = vor.u32 %v9994_v6, %v9053_v39  ;;  %v9990_v2 = vld [vmem:[#allocation2 + $0x1614] sm:$0xf0]  ;;  %v6466_v39 = vor.u32 %v9344_v9, %v6463_v15  ;;  %v9368_v5 = vld [vmem:[#allocation2 + $0x2ac] sm:$0xf] }
 0x244   :  { %5704 = vmatpush.bf16.msrb.mxu3 %v9230_v52  ;;  %v8798_v52 = vor.u32 %v9930_v24, %v8797_v63  ;;  %v9182_v0 = vor.u32 %v10026_v47, %v9181_v14  ;;  %v9165_v3 = vld [vmem:[#allocation2 + $0x1708] sm:$0xf]  ;;  %v9308_v14 = vld [vmem:[#allocation2 + $0xcc] sm:$0xf]  ;;  %v6319_v47 = vld [vmem:[#allocation2 + $0xd8] sm:$0xf0] }
 0x245   :  { %5666 = vmatpush.bf16.msrb.mxu0 %v8830_v60  ;;  %v9958_v60 = vld [vmem:[#allocation2 + $0x1514] sm:$0xf0]  ;;  %v6559_v55 = vld [vmem:[#allocation2 + $0x2b8] sm:$0xf0]  ;;  %v9400_v56 = vld [vmem:[#allocation2 + $0x3ac] sm:$0xf] }
 0x246   :  { %5679 = vmatpush.bf16.msrb.mxu1 %v8958_v61  ;;  %v9037_v61 = vld [vmem:[#allocation2 + $0x1608] sm:$0xf]  ;;  %v8910_v63 = vor.u32 %v9958_v60, %v8909_v53  ;;  %v6322_v53 = vor.u32 %v9308_v14, %v6319_v47  ;;  %v6687_v9 = vld [vmem:[#allocation2 + $0x3b8] sm:$0xf0]  ;;  %v9364_v27 = vld [vmem:[#allocation2 + $0x28c] sm:$0xf] }
 0x247   :  { %5692 = vmatpush.bf16.msrb.mxu2 %v9086_v62  ;;  %v5439_v62 = vpop.f32.mrf.mxu2  ;;  %v9038_v24 = vor.u32 %v9990_v2, %v9037_v61  ;;  %v9336_v2 = vld [vmem:[#allocation2 + $0x1ac] sm:$0xf]  ;;  %v6415_v26 = vld [vmem:[#allocation2 + $0x198] sm:$0xf0] }
 0x248   :  { %5705 = vmatpush.bf16.msrb.mxu3 %v9214_v36  ;;  %v10022_v36 = vld [vmem:[#allocation2 + $0x1714] sm:$0xf0]  ;;  %v5438_v62 = vadd.f32 %v10404_v4, %v5425_v40  ;;  %v9296_v40 = vld [vmem:[#allocation2 + $0x6c] sm:$0xf] }
 0x249   :  { %5667 = vmatpush.bf16.msrb.mxu0 %v8814_v13  ;;  %v8782_v13 = vor.u32 %v9926_v57, %v8781_v17  ;;  %v9372_v17 = vld [vmem:[#allocation2 + $0x2cc] sm:$0xf]  ;;  %v6575_v57 = vld [vmem:[#allocation2 + $0x2d8] sm:$0xf0] }
 0x24a   :  { %5680 = vmatpush.bf16.msrb.mxu1 %v8942_v1  ;;  %v9376_v1 = vld [vmem:[#allocation2 + $0x2ec] sm:$0xf]  ;;  %v6578_v61 = vor.u32 %v9372_v17, %v6575_v57  ;;  %v5451_v15 = vadd.f32 %v10406_v8, %v5438_v62 }
 0x24b   :  { %5693 = vmatpush.bf16.msrb.mxu2 %v9070_v21  ;;  %v6591_v21 = vld [vmem:[#allocation2 + $0x2f8] sm:$0xf0]  ;;  %v9328_v8 = vld [vmem:[#allocation2 + $0x16c] sm:$0xf] }
 0x24c   :  { %5706 = vmatpush.bf16.msrb.mxu3 %v9198_v32  ;;  %v9166_v32 = vor.u32 %v10022_v36, %v9165_v3  ;;  %v6594_v6 = vor.u32 %v9376_v1, %v6591_v21  ;;  %v6431_v36 = vld [vmem:[#allocation2 + $0x1b8] sm:$0xf0]  ;;  %v9300_v1 = vld [vmem:[#allocation2 + $0x8c] sm:$0xf] }
 0x24d   :  { %5668 = vmatpush.bf16.msrb.mxu0 %v8798_v52  ;;  %v6447_v52 = vld [vmem:[#allocation2 + $0x1d8] sm:$0xf0]  ;;  %v6434_v10 = vor.u32 %v9336_v2, %v6431_v36 }
 0x24e   :  { %5681 = vmatpush.bf16.msrb.mxu1 %v8926_v58  ;;  %v9404_v58 = vld [vmem:[#allocation2 + $0x3cc] sm:$0xf]  ;;  %v6450_v60 = vor.u32 %v9340_v48, %v6447_v52  ;;  %v6287_v21 = vld [vmem:[#allocation2 + $0x98] sm:$0xf0] }
 0x24f   :  { %5694 = vmatpush.bf16.msrb.mxu2 %v9054_v59  ;;  %v6703_v59 = vld [vmem:[#allocation2 + $0x3d8] sm:$0xf0] }
 0x250   :  { %5707 = vmatpush.bf16.msrb.mxu3 %v9182_v0  ;;  %v9304_v0 = vld [vmem:[#allocation2 + $0xac] sm:$0xf]  ;;  %v6706_v3 = vor.u32 %v9404_v58, %v6703_v59  ;;  %v6399_v58 = vld [vmem:[#allocation2 + $0x178] sm:$0xf0] }
 0x251   :  { %5669 = vmatpush.bf16.msrb.mxu0 %v8782_v13  ;;  %v6306_v4 = vor.u32 %v9304_v0, %v6303_v51  ;;  %v6562_v13 = vor.u32 %v9368_v5, %v6559_v55  ;;  %v5463_v14 = vpop.f32.mrf.mxu0  ;;  %v9360_v59 = vld [vmem:[#allocation2 + $0x26c] sm:$0xf]  ;;  %v6402_v51 = vor.u32 %v9328_v8, %v6399_v58  ;;  %v6255_v36 = vld [vmem:[#allocation2 + $0x58] sm:$0xf0] }
 0x252   :  { %5682 = vmatpush.bf16.msrb.mxu1 %v8910_v63  ;;  %v9332_v63 = vld [vmem:[#allocation2 + $0x18c] sm:$0xf]  ;;  %v5464_v52 = vadd.f32 %v5463_v14, %v5451_v15  ;;  %v5476_v17 = vpop.f32.mrf.mxu1  ;;  %v6223_v58 = vld [vmem:[#allocation2 + $0x18] sm:$0xf0] }
 0x253   :  { %5695 = vmatpush.bf16.msrb.mxu2 %v9038_v24  ;;  %v6690_v24 = vor.u32 %v9400_v56, %v6687_v9  ;;  %v6418_v47 = vor.u32 %v9332_v63, %v6415_v26  ;;  %v9324_v5 = vld [vmem:[#allocation2 + $0x14c] sm:$0xf]  ;;  %v6383_v9 = vld [vmem:[#allocation2 + $0x158] sm:$0xf0] }
 0x254   :  { %5708 = vmatpush.bf16.msrb.mxu3 %v9166_v32  ;;  %5670 = vmatmul.bf16.vlgmr.msrb.gmra.mxu0 %v10312_v7  ;;  %v6543_v32 = vld [vmem:[#allocation2 + $0x298] sm:$0xf0]  ;;  %v5477_v62 = vadd.f32 %v5476_v17, %v5464_v52  ;;  %v9384_v8 = vld [vmem:[#allocation2 + $0x32c] sm:$0xf] }
 0x255   :  { %5714 = vmatpush.bf16.msra.mxu0 %v6338_v34  ;;  %5683 = vmatmul.bf16.vlgmr.msrb.gmra.mxu1 %v10316_v12  ;;  %v9396_v34 = vld [vmem:[#allocation2 + $0x38c] sm:$0xf]  ;;  %v6546_v48 = vor.u32 %v9364_v27, %v6543_v32  ;;  %v6386_v27 = vor.u32 %v9324_v5, %v6383_v9  ;;  %v6623_v52 = vld [vmem:[#allocation2 + $0x338] sm:$0xf0] }
 0x256   :  { %5727 = vmatpush.bf16.msra.mxu1 %v6466_v39  ;;  %5696 = vmatmul.bf16.vlgmr.msrb.gmra.mxu2 %v10314_v11  ;;  %v6671_v39 = vld [vmem:[#allocation2 + $0x398] sm:$0xf0]  ;;  %v9472_v9 = vld [vmem:[#allocation2 + $0x5ec] sm:$0xf] }
 0x257   :  { %5740 = vmatpush.bf16.msra.mxu2 %v6594_v6  ;;  %5709 = vmatmul.bf16.vlgmr.msrb.gmra.mxu3 %v10318_v16  ;;  %v6290_v6 = vor.u32 %v9300_v1, %v6287_v21  ;;  %v6674_v57 = vor.u32 %v9396_v34, %v6671_v39  ;;  %v9388_v1 = vld [vmem:[#allocation2 + $0x34c] sm:$0xf]  ;;  %v6639_v21 = vld [vmem:[#allocation2 + $0x358] sm:$0xf0] }
 0x258   :  { %5753 = vmatpush.bf16.msra.mxu3 %v6722_v50  ;;  %v6271_v50 = vld [vmem:[#allocation2 + $0x78] sm:$0xf0]  ;;  %v9288_v34 = vld [vmem:[#allocation2 + $0x2c] sm:$0xf] }
 0x259   :  { %5715 = vmatpush.bf16.msra.mxu0 %v6322_v53  ;;  %v6527_v53 = vld [vmem:[#allocation2 + $0x278] sm:$0xf0]  ;;  %v6274_v0 = vor.u32 %v9296_v40, %v6271_v50  ;;  %v5489_v55 = vpop.f32.mrf.mxu2  ;;  %v5465_v26 = vpop.f32.mrf.mxu0  ;;  %v9352_v40 = vld [vmem:[#allocation2 + $0x22c] sm:$0xf] }
 0x25a   :  { %5728 = vmatpush.bf16.msra.mxu1 %v6450_v60  ;;  %v9392_v60 = vld [vmem:[#allocation2 + $0x36c] sm:$0xf]  ;;  %v6530_v2 = vor.u32 %v9360_v59, %v6527_v53  ;;  %v5502_v15 = vpop.f32.mrf.mxu3  ;;  %v6239_v39 = vld [vmem:[#allocation2 + $0x38] sm:$0xf0]  ;;  %v5478_v14 = vpop.f32.mrf.mxu1 }
 0x25b   :  { %5741 = vmatpush.bf16.msra.mxu2 %v6578_v61  ;;  %v6655_v61 = vld [vmem:[#allocation2 + $0x378] sm:$0xf0]  ;;  %v6242_v17 = vor.u32 %v9288_v34, %v6239_v39 }
 0x25c   :  { %5754 = vmatpush.bf16.msra.mxu3 %v6706_v3  ;;  %v9292_v3 = vld [vmem:[#allocation2 + $0x4c] sm:$0xf]  ;;  %v6658_v56 = vor.u32 %v9392_v60, %v6655_v61  ;;  %v6495_v50 = vld [vmem:[#allocation2 + $0x238] sm:$0xf0] }
 0x25d   :  { %5716 = vmatpush.bf16.msra.mxu0 %v6306_v4  ;;  %v9356_v4 = vld [vmem:[#allocation2 + $0x24c] sm:$0xf]  ;;  %v6258_v63 = vor.u32 %v9292_v3, %v6255_v36  ;;  %v6498_v53 = vor.u32 %v9352_v40, %v6495_v50  ;;  %v6351_v61 = vld [vmem:[#allocation2 + $0x118] sm:$0xf0] }
 0x25e   :  { %5729 = vmatpush.bf16.msra.mxu1 %v6434_v10  ;;  %v6511_v10 = vld [vmem:[#allocation2 + $0x258] sm:$0xf0]  ;;  %v9316_v60 = vld [vmem:[#allocation2 + $0x10c] sm:$0xf] }
 0x25f   :  { %5742 = vmatpush.bf16.msra.mxu2 %v6562_v13  ;;  %v5490_v13 = vadd.f32 %v5489_v55, %v5477_v62  ;;  %v6514_v32 = vor.u32 %v9356_v4, %v6511_v10  ;;  %v9348_v62 = vld [vmem:[#allocation2 + $0x20c] sm:$0xf]  ;;  %v6607_v36 = vld [vmem:[#allocation2 + $0x318] sm:$0xf0] }
 0x260   :  { %5755 = vmatpush.bf16.msra.mxu3 %v6690_v24  ;;  %v9380_v3 = vld [vmem:[#allocation2 + $0x30c] sm:$0xf]  ;;  %v6975_v10 = vld [vmem:[#allocation2 + $0x5f8] sm:$0xf0] }
 0x261   :  { %5717 = vmatpush.bf16.msra.mxu0 %v6290_v6  ;;  %v10416_v24 = vadd.f32 %v5502_v15, %v5490_v13  ;;  %v9320_v6 = vld [vmem:[#allocation2 + $0x12c] sm:$0xf]  ;;  %v7103_v15 = vld [vmem:[#allocation2 + $0x6f8] sm:$0xf0]  ;;  %v6978_v34 = vor.u32 %v9472_v9, %v6975_v10 }
 0x262   :  { %5730 = vmatpush.bf16.msra.mxu1 %v6418_v47  ;;  %v6642_v47 = vor.u32 %v9388_v1, %v6639_v21  ;;  %v5504_v5 = vpop.f32.mrf.mxu3  ;;  %v9440_v55 = vld [vmem:[#allocation2 + $0x4ec] sm:$0xf]  ;;  %v6354_v1 = vor.u32 %v9316_v60, %v6351_v61  ;;  %v7231_v26 = vld [vmem:[#allocation2 + $0x7f8] sm:$0xf0] }
 0x263   :  { %5743 = vmatpush.bf16.msra.mxu2 %v6546_v48  ;;  %v6367_v48 = vld [vmem:[#allocation2 + $0x138] sm:$0xf0]  ;;  %v9504_v13 = vld [vmem:[#allocation2 + $0x6ec] sm:$0xf] }
 0x264   :  { %5756 = vmatpush.bf16.msra.mxu3 %v6674_v57  ;;  %v9284_v57 = vld [vmem:[#allocation2 + $0xc] sm:$0xf]  ;;  %v6370_v59 = vor.u32 %v9320_v6, %v6367_v48  ;;  %v7106_v39 = vor.u32 %v9504_v13, %v7103_v15  ;;  %v6831_v14 = vld [vmem:[#allocation2 + $0x4d8] sm:$0xf0] }
 0x265   :  { %5718 = vmatpush.bf16.msra.mxu0 %v6274_v0  ;;  %v5491_v0 = vpop.f32.mrf.mxu2  ;;  %v6226_v4 = vor.u32 %v9284_v57, %v6223_v58  ;;  %v9436_v6 = vld [vmem:[#allocation2 + $0x4cc] sm:$0xf]  ;;  %v6959_v40 = vld [vmem:[#allocation2 + $0x5d8] sm:$0xf0] }
 0x266   :  { %5731 = vmatpush.bf16.msra.mxu1 %v6402_v51  ;;  %v6626_v51 = vor.u32 %v9384_v8, %v6623_v52  ;;  %v9500_v50 = vld [vmem:[#allocation2 + $0x6cc] sm:$0xf]  ;;  %v7087_v8 = vld [vmem:[#allocation2 + $0x6d8] sm:$0xf0]  ;;  %v6834_v57 = vor.u32 %v9436_v6, %v6831_v14 }
 0x267   :  { %5744 = vmatpush.bf16.msra.mxu2 %v6530_v2  ;;  %v6479_v2 = vld [vmem:[#allocation2 + $0x218] sm:$0xf0]  ;;  %v9532_v52 = vld [vmem:[#allocation2 + $0x7cc] sm:$0xf] }
 0x268   :  { %5757 = vmatpush.bf16.msra.mxu3 %v6658_v56  ;;  %v6847_v56 = vld [vmem:[#allocation2 + $0x4f8] sm:$0xf0]  ;;  %v6482_v21 = vor.u32 %v9348_v62, %v6479_v2  ;;  %v9464_v61 = vld [vmem:[#allocation2 + $0x5ac] sm:$0xf] }
 0x269   :  { %5719 = vmatpush.bf16.msra.mxu0 %v6258_v63  ;;  %v9536_v63 = vld [vmem:[#allocation2 + $0x7ec] sm:$0xf]  ;;  %v6815_v60 = vld [vmem:[#allocation2 + $0x4b8] sm:$0xf0] }
 0x26a   :  { %5732 = vmatpush.bf16.msra.mxu1 %v6386_v27  ;;  %v6610_v27 = vor.u32 %v9380_v3, %v6607_v36  ;;  %v7234_v48 = vor.u32 %v9536_v63, %v7231_v26  ;;  %v6943_v0 = vld [vmem:[#allocation2 + $0x5b8] sm:$0xf0]  ;;  %v9528_v3 = vld [vmem:[#allocation2 + $0x7ac] sm:$0xf] }
 0x26b   :  { %5745 = vmatpush.bf16.msra.mxu2 %v6514_v32  ;;  %v6850_v32 = vor.u32 %v9440_v55, %v6847_v56  ;;  %v7071_v2 = vld [vmem:[#allocation2 + $0x6b8] sm:$0xf0]  ;;  %v6946_v55 = vor.u32 %v9464_v61, %v6943_v0  ;;  %v9428_v9 = vld [vmem:[#allocation2 + $0x48c] sm:$0xf] }
 0x26c   :  { %5758 = vmatpush.bf16.msra.mxu3 %v6642_v47  ;;  %v9468_v47 = vld [vmem:[#allocation2 + $0x5cc] sm:$0xf]  ;;  %v7199_v36 = vld [vmem:[#allocation2 + $0x7b8] sm:$0xf0] }
 0x26d   :  { %5720 = vmatpush.bf16.msra.mxu0 %v6242_v17  ;;  %v7215_v17 = vld [vmem:[#allocation2 + $0x7d8] sm:$0xf0]  ;;  %v6962_v58 = vor.u32 %v9468_v47, %v6959_v40  ;;  %v9460_v10 = vld [vmem:[#allocation2 + $0x58c] sm:$0xf]  ;;  %v7202_v13 = vor.u32 %v9528_v3, %v7199_v36 }
 0x26e   :  { %5733 = vmatpush.bf16.msra.mxu1 %v6370_v59  ;;  %v7090_v59 = vor.u32 %v9500_v50, %v7087_v8  ;;  %v7218_v62 = vor.u32 %v9532_v52, %v7215_v17  ;;  %v9492_v15 = vld [vmem:[#allocation2 + $0x68c] sm:$0xf]  ;;  %v7183_v63 = vld [vmem:[#allocation2 + $0x798] sm:$0xf0] }
 0x26f   :  { %5746 = vmatpush.bf16.msra.mxu2 %v6498_v53  ;;  %v9432_v53 = vld [vmem:[#allocation2 + $0x4ac] sm:$0xf]  ;;  %v7039_v50 = vld [vmem:[#allocation2 + $0x678] sm:$0xf0] }
 0x270   :  { %5759 = vmatpush.bf16.msra.mxu3 %v6626_v51  ;;  %v9496_v51 = vld [vmem:[#allocation2 + $0x6ac] sm:$0xf]  ;;  %v6818_v5 = vor.u32 %v9432_v53, %v6815_v60  ;;  %v7167_v52 = vld [vmem:[#allocation2 + $0x778] sm:$0xf0] }
 0x271   :  { %5721 = vmatpush.bf16.msra.mxu0 %v6226_v4  ;;  %v7074_v56 = vor.u32 %v9496_v51, %v7071_v2  ;;  %v6799_v4 = vld [vmem:[#allocation2 + $0x498] sm:$0xf0]  ;;  %v9456_v6 = vld [vmem:[#allocation2 + $0x56c] sm:$0xf] }
 0x272   :  { %5734 = vmatpush.bf16.msra.mxu1 %v6354_v1  ;;  %v7055_v1 = vld [vmem:[#allocation2 + $0x698] sm:$0xf0]  ;;  %v6802_v26 = vor.u32 %v9428_v9, %v6799_v4  ;;  %v9488_v40 = vld [vmem:[#allocation2 + $0x66c] sm:$0xf] }
 0x273   :  { %5747 = vmatpush.bf16.msra.mxu2 %v6482_v21  ;;  %v5515_v21 = vpop.f32.mrf.mxu0  ;;  %v9520_v8 = vld [vmem:[#allocation2 + $0x76c] sm:$0xf]  ;;  %v7023_v51 = vld [vmem:[#allocation2 + $0x658] sm:$0xf0] }
 0x274   :  { %5760 = vmatpush.bf16.msra.mxu3 %v6610_v27  ;;  %5722 = vmatmul.bf16.vlgmr.msra.gmra.mxu0 %v10222_v19  ;;  %v9524_v19 = vld [vmem:[#allocation2 + $0x78c] sm:$0xf]  ;;  %v7170_v60 = vor.u32 %v9520_v8, %v7167_v52  ;;  %v7119_v52 = vld [vmem:[#allocation2 + $0x718] sm:$0xf0] }
 0x275   :  { %5766 = vmatpush.bf16.msrb.mxu0 %v6850_v32  ;;  %5735 = vmatmul.bf16.vlgmr.msra.gmra.mxu1 %v10226_v22  ;;  %v5528_v22 = vpop.f32.mrf.mxu1  ;;  %v7058_v32 = vor.u32 %v9492_v15, %v7055_v1  ;;  %v7186_v14 = vor.u32 %v9524_v19, %v7183_v63  ;;  %v9452_v53 = vld [vmem:[#allocation2 + $0x54c] sm:$0xf]  ;;  %v6751_v15 = vld [vmem:[#allocation2 + $0x438] sm:$0xf0] }
 0x276   :  { %5779 = vmatpush.bf16.msrb.mxu1 %v6978_v34  ;;  %5748 = vmatmul.bf16.vlgmr.msra.gmra.mxu2 %v10220_v18  ;;  %v6927_v18 = vld [vmem:[#allocation2 + $0x598] sm:$0xf0]  ;;  %v9424_v34 = vld [vmem:[#allocation2 + $0x46c] sm:$0xf] }
 0x277   :  { %5792 = vmatpush.bf16.msrb.mxu2 %v7106_v39  ;;  %5761 = vmatmul.bf16.vlgmr.msra.gmra.mxu3 %v10224_v20  ;;  %v5516_v20 = vadd.f32 %v5515_v21, %v10416_v24  ;;  %v6930_v27 = vor.u32 %v9460_v10, %v6927_v18  ;;  %v6783_v39 = vld [vmem:[#allocation2 + $0x478] sm:$0xf0]  ;;  %v9484_v0 = vld [vmem:[#allocation2 + $0x64c] sm:$0xf] }
 0x278   :  { %5805 = vmatpush.bf16.msrb.mxu3 %v7234_v48  ;;  %v6911_v48 = vld [vmem:[#allocation2 + $0x578] sm:$0xf0]  ;;  %v6786_v17 = vor.u32 %v9424_v34, %v6783_v39  ;;  %v9516_v36 = vld [vmem:[#allocation2 + $0x74c] sm:$0xf] }
 0x279   :  { %5767 = vmatpush.bf16.msrb.mxu0 %v6834_v57  ;;  %v5529_v47 = vadd.f32 %v5528_v22, %v5516_v20  ;;  %v6914_v24 = vor.u32 %v9456_v6, %v6911_v48  ;;  %v7042_v57 = vor.u32 %v9488_v40, %v7039_v50  ;;  %v5541_v61 = vpop.f32.mrf.mxu2  ;;  %v9416_v18 = vld [vmem:[#allocation2 + $0x42c] sm:$0xf]  ;;  %v6879_v19 = vld [vmem:[#allocation2 + $0x538] sm:$0xf0] }
 0x27a   :  { %5780 = vmatpush.bf16.msrb.mxu1 %v6962_v58  ;;  %v9420_v58 = vld [vmem:[#allocation2 + $0x44c] sm:$0xf]  ;;  %v5554_v3 = vpop.f32.mrf.mxu3  ;;  %v7007_v20 = vld [vmem:[#allocation2 + $0x638] sm:$0xf0] }
 0x27b   :  { %5793 = vmatpush.bf16.msrb.mxu2 %v7090_v59  ;;  %v6767_v59 = vld [vmem:[#allocation2 + $0x458] sm:$0xf0]  ;;  %v5542_v2 = vadd.f32 %v5541_v61, %v5529_v47  ;;  %v9448_v1 = vld [vmem:[#allocation2 + $0x52c] sm:$0xf] }
 0x27c   :  { %5806 = vmatpush.bf16.msrb.mxu3 %v7218_v62  ;;  %v6895_v62 = vld [vmem:[#allocation2 + $0x558] sm:$0xf0]  ;;  %v9480_v63 = vld [vmem:[#allocation2 + $0x62c] sm:$0xf]  ;;  %v6882_v39 = vor.u32 %v9448_v1, %v6879_v19 }
 0x27d   :  { %5768 = vmatpush.bf16.msrb.mxu0 %v6818_v5  ;;  %v7151_v5 = vld [vmem:[#allocation2 + $0x758] sm:$0xf0]  ;;  %v5530_v9 = vpop.f32.mrf.mxu1  ;;  %v10423_v4 = vadd.f32 %v5554_v3, %v5542_v2  ;;  %v6898_v10 = vor.u32 %v9452_v53, %v6895_v62  ;;  %v7010_v6 = vor.u32 %v9480_v63, %v7007_v20  ;;  %v9476_v48 = vld [vmem:[#allocation2 + $0x60c] sm:$0xf] }
 0x27e   :  { %5781 = vmatpush.bf16.msrb.mxu1 %v6946_v55  ;;  %v5517_v55 = vpop.f32.mrf.mxu0  ;;  %v7154_v21 = vor.u32 %v9516_v36, %v7151_v5  ;;  %v7135_v22 = vld [vmem:[#allocation2 + $0x738] sm:$0xf0]  ;;  %v9508_v8 = vld [vmem:[#allocation2 + $0x70c] sm:$0xf] }
 0x27f   :  { %5794 = vmatpush.bf16.msrb.mxu2 %v7074_v56  ;;  %v6770_v56 = vor.u32 %v9420_v58, %v6767_v59  ;;  %v6735_v34 = vld [vmem:[#allocation2 + $0x418] sm:$0xf0]  ;;  %v9600_v58 = vld [vmem:[#allocation2 + $0x9ec] sm:$0xf]  ;;  %v7122_v36 = vor.u32 %v9508_v8, %v7119_v52 }
 0x280   :  { %5807 = vmatpush.bf16.msrb.mxu3 %v7202_v13  ;;  %v7026_v13 = vor.u32 %v9484_v0, %v7023_v51  ;;  %v6863_v47 = vld [vmem:[#allocation2 + $0x518] sm:$0xf0]  ;;  %v9632_v61 = vld [vmem:[#allocation2 + $0xaec] sm:$0xf] }
 0x281   :  { %5769 = vmatpush.bf16.msrb.mxu0 %v6802_v26  ;;  %v9512_v26 = vld [vmem:[#allocation2 + $0x72c] sm:$0xf]  ;;  %v6991_v50 = vld [vmem:[#allocation2 + $0x618] sm:$0xf0] }
 0x282   :  { %5782 = vmatpush.bf16.msrb.mxu1 %v6930_v27  ;;  %v6754_v27 = vor.u32 %v9416_v18, %v6751_v15  ;;  %v7138_v40 = vor.u32 %v9512_v26, %v7135_v22  ;;  %v5556_v59 = vpop.f32.mrf.mxu3  ;;  %v7615_v62 = vld [vmem:[#allocation2 + $0xaf8] sm:$0xf0]  ;;  %v6994_v51 = vor.u32 %v9476_v48, %v6991_v50  ;;  %v9664_v2 = vld [vmem:[#allocation2 + $0xbec] sm:$0xf] }
 0x283   :  { %5795 = vmatpush.bf16.msrb.mxu2 %v7058_v32  ;;  %v9412_v32 = vld [vmem:[#allocation2 + $0x40c] sm:$0xf]  ;;  %v7743_v3 = vld [vmem:[#allocation2 + $0xbf8] sm:$0xf0] }
 0x284   :  { %5808 = vmatpush.bf16.msrb.mxu3 %v7186_v14  ;;  %v9444_v14 = vld [vmem:[#allocation2 + $0x50c] sm:$0xf]  ;;  %v6738_v53 = vor.u32 %v9412_v32, %v6735_v34  ;;  %v7746_v18 = vor.u32 %v9664_v2, %v7743_v3  ;;  %v7471_v15 = vld [vmem:[#allocation2 + $0x9d8] sm:$0xf0] }
 0x285   :  { %5770 = vmatpush.bf16.msrb.mxu0 %v6786_v17  ;;  %v5543_v17 = vpop.f32.mrf.mxu2  ;;  %v6866_v0 = vor.u32 %v9444_v14, %v6863_v47  ;;  %v9564_v9 = vld [vmem:[#allocation2 + $0x8cc] sm:$0xf]  ;;  %v7727_v63 = vld [vmem:[#allocation2 + $0xbd8] sm:$0xf0] }
 0x286   :  { %5783 = vmatpush.bf16.msrb.mxu1 %v6914_v24  ;;  %v9568_v24 = vld [vmem:[#allocation2 + $0x8ec] sm:$0xf]  ;;  %v7327_v32 = vld [vmem:[#allocation2 + $0x8b8] sm:$0xf0] }
 0x287   :  { %5796 = vmatpush.bf16.msrb.mxu2 %v7042_v57  ;;  %v7359_v57 = vld [vmem:[#allocation2 + $0x8f8] sm:$0xf0]  ;;  %v9628_v1 = vld [vmem:[#allocation2 + $0xacc] sm:$0xf] }
 0x288   :  { %5809 = vmatpush.bf16.msrb.mxu3 %v7170_v60  ;;  %v7487_v60 = vld [vmem:[#allocation2 + $0x9f8] sm:$0xf0]  ;;  %v7362_v5 = vor.u32 %v9568_v24, %v7359_v57  ;;  %v9660_v19 = vld [vmem:[#allocation2 + $0xbcc] sm:$0xf] }
 0x289   :  { %5771 = vmatpush.bf16.msrb.mxu0 %v6770_v56  ;;  %v7490_v55 = vor.u32 %v9600_v58, %v7487_v60  ;;  %v7618_v56 = vor.u32 %v9632_v61, %v7615_v62  ;;  %v9592_v34 = vld [vmem:[#allocation2 + $0x9ac] sm:$0xf]  ;;  %v7583_v47 = vld [vmem:[#allocation2 + $0xab8] sm:$0xf0] }
 0x28a   :  { %5784 = vmatpush.bf16.msrb.mxu1 %v6898_v10  ;;  %v7343_v10 = vld [vmem:[#allocation2 + $0x8d8] sm:$0xf0]  ;;  %v9624_v14 = vld [vmem:[#allocation2 + $0xaac] sm:$0xf] }
 0x28b   :  { %5797 = vmatpush.bf16.msrb.mxu2 %v7026_v13  ;;  %v9596_v13 = vld [vmem:[#allocation2 + $0x9cc] sm:$0xf]  ;;  %v7346_v20 = vor.u32 %v9564_v9, %v7343_v10  ;;  %v7586_v52 = vor.u32 %v9624_v14, %v7583_v47  ;;  %v7311_v24 = vld [vmem:[#allocation2 + $0x898] sm:$0xf0] }
 0x28c   :  { %5810 = vmatpush.bf16.msrb.mxu3 %v7154_v21  ;;  %v7599_v21 = vld [vmem:[#allocation2 + $0xad8] sm:$0xf0]  ;;  %v7474_v26 = vor.u32 %v9596_v13, %v7471_v15  ;;  %v9656_v48 = vld [vmem:[#allocation2 + $0xbac] sm:$0xf] }
 0x28d   :  { %5772 = vmatpush.bf16.msrb.mxu0 %v6754_v27  ;;  %v7602_v22 = vor.u32 %v9628_v1, %v7599_v21  ;;  %v9560_v27 = vld [vmem:[#allocation2 + $0x8ac] sm:$0xf]  ;;  %v7439_v58 = vld [vmem:[#allocation2 + $0x998] sm:$0xf0] }
 0x28e   :  { %5785 = vmatpush.bf16.msrb.mxu1 %v6882_v39  ;;  %v7730_v39 = vor.u32 %v9660_v19, %v7727_v63  ;;  %v7330_v50 = vor.u32 %v9560_v27, %v7327_v32  ;;  %v9556_v17 = vld [vmem:[#allocation2 + $0x88c] sm:$0xf]  ;;  %v7695_v61 = vld [vmem:[#allocation2 + $0xb98] sm:$0xf0] }
 0x28f   :  { %5798 = vmatpush.bf16.msrb.mxu2 %v7010_v6  ;;  %v7455_v6 = vld [vmem:[#allocation2 + $0x9b8] sm:$0xf0]  ;;  %v9620_v59 = vld [vmem:[#allocation2 + $0xa8c] sm:$0xf]  ;;  %v7314_v62 = vor.u32 %v9556_v17, %v7311_v24 }
 0x290   :  { %5811 = vmatpush.bf16.msrb.mxu3 %v7138_v40  ;;  %v7711_v40 = vld [vmem:[#allocation2 + $0xbb8] sm:$0xf0]  ;;  %v7458_v8 = vor.u32 %v9592_v34, %v7455_v6  ;;  %v9552_v2 = vld [vmem:[#allocation2 + $0x86c] sm:$0xf] }
 0x291   :  { %5773 = vmatpush.bf16.msrb.mxu0 %v6738_v53  ;;  %v7714_v57 = vor.u32 %v9656_v48, %v7711_v40  ;;  %v7567_v53 = vld [vmem:[#allocation2 + $0xa98] sm:$0xf0]  ;;  %v5567_v60 = vpop.f32.mrf.mxu0  ;;  %v9616_v9 = vld [vmem:[#allocation2 + $0xa6c] sm:$0xf] }
 0x292   :  { %5786 = vmatpush.bf16.msrb.mxu1 %v6866_v0  ;;  %v7295_v3 = vld [vmem:[#allocation2 + $0x878] sm:$0xf0]  ;;  %v9648_v13 = vld [vmem:[#allocation2 + $0xb6c] sm:$0xf] }
 0x293   :  { %5799 = vmatpush.bf16.msrb.mxu2 %v6994_v51  ;;  %v7570_v51 = vor.u32 %v9620_v59, %v7567_v53  ;;  %v7551_v10 = vld [vmem:[#allocation2 + $0xa78] sm:$0xf0]  ;;  %v7298_v15 = vor.u32 %v9552_v2, %v7295_v3  ;;  %v9548_v21 = vld [vmem:[#allocation2 + $0x84c] sm:$0xf] }
 0x294   :  { %5812 = vmatpush.bf16.msrb.mxu3 %v7122_v36  ;;  %5774 = vmatmul.bf16.vlgmr.msrb.gmra.mxu0 %v10240_v41  ;;  %v9652_v41 = vld [vmem:[#allocation2 + $0xb8c] sm:$0xf]  ;;  %v7554_v1 = vor.u32 %v9616_v9, %v7551_v10  ;;  %v7279_v19 = vld [vmem:[#allocation2 + $0x858] sm:$0xf0] }
 0x295   :  { %5818 = vmatpush.bf16.msra.mxu0 %v7362_v5  ;;  %5787 = vmatmul.bf16.vlgmr.msrb.gmra.mxu1 %v10244_v44  ;;  %v5580_v44 = vpop.f32.mrf.mxu1  ;;  %v9584_v36 = vld [vmem:[#allocation2 + $0x96c] sm:$0xf]  ;;  %v7698_v5 = vor.u32 %v9652_v41, %v7695_v61  ;;  %v7535_v32 = vld [vmem:[#allocation2 + $0xa58] sm:$0xf0]  ;;  %v7282_v48 = vor.u32 %v9548_v21, %v7279_v19 }
 0x296   :  { %5831 = vmatpush.bf16.msra.mxu1 %v7490_v55  ;;  %5800 = vmatmul.bf16.vlgmr.msrb.gmra.mxu2 %v10238_v38  ;;  %v9588_v38 = vld [vmem:[#allocation2 + $0x98c] sm:$0xf]  ;;  %v7663_v14 = vld [vmem:[#allocation2 + $0xb58] sm:$0xf0] }
 0x297   :  { %5844 = vmatpush.bf16.msra.mxu2 %v7618_v56  ;;  %5813 = vmatmul.bf16.vlgmr.msrb.gmra.mxu3 %v10242_v42  ;;  %v5568_v42 = vadd.f32 %v5567_v60, %v10423_v4  ;;  %v7442_v0 = vor.u32 %v9588_v38, %v7439_v58  ;;  %v7423_v56 = vld [vmem:[#allocation2 + $0x978] sm:$0xf0]  ;;  %v9580_v63 = vld [vmem:[#allocation2 + $0x94c] sm:$0xf] }
 0x298   :  { %5857 = vmatpush.bf16.msra.mxu3 %v7746_v18  ;;  %v7679_v18 = vld [vmem:[#allocation2 + $0xb78] sm:$0xf0]  ;;  %v7426_v4 = vor.u32 %v9584_v36, %v7423_v56  ;;  %v9612_v27 = vld [vmem:[#allocation2 + $0xa4c] sm:$0xf] }
 0x299   :  { %5819 = vmatpush.bf16.msra.mxu0 %v7346_v20  ;;  %v5581_v55 = vadd.f32 %v5580_v44, %v5568_v42  ;;  %v7682_v20 = vor.u32 %v9648_v13, %v7679_v18  ;;  %v9644_v6 = vld [vmem:[#allocation2 + $0xb4c] sm:$0xf]  ;;  %v5569_v47 = vpop.f32.mrf.mxu0  ;;  %v7263_v24 = vld [vmem:[#allocation2 + $0x838] sm:$0xf0] }
 0x29a   :  { %5832 = vmatpush.bf16.msra.mxu1 %v7474_v26  ;;  %v5593_v26 = vpop.f32.mrf.mxu2  ;;  %v9544_v17 = vld [vmem:[#allocation2 + $0x82c] sm:$0xf]  ;;  %v7391_v58 = vld [vmem:[#allocation2 + $0x938] sm:$0xf0] }
 0x29b   :  { %5845 = vmatpush.bf16.msra.mxu2 %v7602_v22  ;;  %v7407_v22 = vld [vmem:[#allocation2 + $0x958] sm:$0xf0]  ;;  %v5594_v34 = vadd.f32 %v5593_v26, %v5581_v55  ;;  %v9576_v38 = vld [vmem:[#allocation2 + $0x92c] sm:$0xf]  ;;  %v7266_v61 = vor.u32 %v9544_v17, %v7263_v24 }
 0x29c   :  { %5858 = vmatpush.bf16.msra.mxu3 %v7730_v39  ;;  %v5606_v39 = vpop.f32.mrf.mxu3  ;;  %v9608_v59 = vld [vmem:[#allocation2 + $0xa2c] sm:$0xf]  ;;  %v7519_v53 = vld [vmem:[#allocation2 + $0xa38] sm:$0xf0]  ;;  %v7394_v44 = vor.u32 %v9576_v38, %v7391_v58 }
 0x29d   :  { %5820 = vmatpush.bf16.msra.mxu0 %v7330_v50  ;;  %v5582_v40 = vpop.f32.mrf.mxu1  ;;  %v10430_v50 = vadd.f32 %v5606_v39, %v5594_v34  ;;  %v9640_v60 = vld [vmem:[#allocation2 + $0xb2c] sm:$0xf]  ;;  %v7647_v41 = vld [vmem:[#allocation2 + $0xb38] sm:$0xf0] }
 0x29e   :  { %5833 = vmatpush.bf16.msra.mxu1 %v7458_v8  ;;  %v7410_v8 = vor.u32 %v9580_v63, %v7407_v22  ;;  %v9540_v42 = vld [vmem:[#allocation2 + $0x80c] sm:$0xf]  ;;  %v7375_v2 = vld [vmem:[#allocation2 + $0x918] sm:$0xf0]  ;;  %v7650_v36 = vor.u32 %v9640_v60, %v7647_v41 }
 0x29f   :  { %5846 = vmatpush.bf16.msra.mxu2 %v7586_v52  ;;  %v7538_v52 = vor.u32 %v9612_v27, %v7535_v32  ;;  %v9604_v3 = vld [vmem:[#allocation2 + $0xa0c] sm:$0xf]  ;;  %v7631_v56 = vld [vmem:[#allocation2 + $0xb18] sm:$0xf0] }
 0x2a0   :  { %5859 = vmatpush.bf16.msra.mxu3 %v7714_v57  ;;  %v7666_v57 = vor.u32 %v9644_v6, %v7663_v14  ;;  %v9636_v55 = vld [vmem:[#allocation2 + $0xb0c] sm:$0xf]  ;;  %v7871_v13 = vld [vmem:[#allocation2 + $0xcf8] sm:$0xf0] }
 0x2a1   :  { %5821 = vmatpush.bf16.msra.mxu0 %v7314_v62  ;;  %v7247_v62 = vld [vmem:[#allocation2 + $0x818] sm:$0xf0]  ;;  %v9696_v10 = vld [vmem:[#allocation2 + $0xcec] sm:$0xf]  ;;  %v7634_v27 = vor.u32 %v9636_v55, %v7631_v56 }
 0x2a2   :  { %5834 = vmatpush.bf16.msra.mxu1 %v7442_v0  ;;  %v7522_v0 = vor.u32 %v9608_v59, %v7519_v53  ;;  %v5595_v9 = vpop.f32.mrf.mxu2  ;;  %v9728_v18 = vld [vmem:[#allocation2 + $0xdec] sm:$0xf]  ;;  %v8127_v19 = vld [vmem:[#allocation2 + $0xef8] sm:$0xf0]  ;;  %v7874_v32 = vor.u32 %v9696_v10, %v7871_v13 }
 0x2a3   :  { %5847 = vmatpush.bf16.msra.mxu2 %v7570_v51  ;;  %v9572_v51 = vld [vmem:[#allocation2 + $0x90c] sm:$0xf]  ;;  %v8255_v22 = vld [vmem:[#allocation2 + $0xff8] sm:$0xf0] }
 0x2a4   :  { %5860 = vmatpush.bf16.msra.mxu3 %v7698_v5  ;;  %v7503_v5 = vld [vmem:[#allocation2 + $0xa18] sm:$0xf0]  ;;  %v9760_v21 = vld [vmem:[#allocation2 + $0xeec] sm:$0xf]  ;;  %v7378_v63 = vor.u32 %v9572_v51, %v7375_v2 }
 0x2a5   :  { %5822 = vmatpush.bf16.msra.mxu0 %v7298_v15  ;;  %v5608_v15 = vpop.f32.mrf.mxu3  ;;  %v9792_v26 = vld [vmem:[#allocation2 + $0xfec] sm:$0xf]  ;;  %v8130_v39 = vor.u32 %v9760_v21, %v8127_v19  ;;  %v7855_v14 = vld [vmem:[#allocation2 + $0xcd8] sm:$0xf0] }
 0x2a6   :  { %5835 = vmatpush.bf16.msra.mxu1 %v7426_v4  ;;  %v7250_v4 = vor.u32 %v9540_v42, %v7247_v62  ;;  %v9692_v6 = vld [vmem:[#allocation2 + $0xccc] sm:$0xf]  ;;  %v7983_v40 = vld [vmem:[#allocation2 + $0xdd8] sm:$0xf0] }
 0x2a7   :  { %5848 = vmatpush.bf16.msra.mxu2 %v7554_v1  ;;  %v7999_v1 = vld [vmem:[#allocation2 + $0xdf8] sm:$0xf0]  ;;  %v9724_v47 = vld [vmem:[#allocation2 + $0xdcc] sm:$0xf]  ;;  %v7858_v38 = vor.u32 %v9692_v6, %v7855_v14 }
 0x2a8   :  { %5861 = vmatpush.bf16.msra.mxu3 %v7682_v20  ;;  %v7506_v20 = vor.u32 %v9604_v3, %v7503_v5  ;;  %v8002_v34 = vor.u32 %v9728_v18, %v7999_v1  ;;  %v9788_v17 = vld [vmem:[#allocation2 + $0xfcc] sm:$0xf]  ;;  %v8239_v24 = vld [vmem:[#allocation2 + $0xfd8] sm:$0xf0] }
 0x2a9   :  { %5823 = vmatpush.bf16.msra.mxu0 %v7282_v48  ;;  %v8258_v48 = vor.u32 %v9792_v26, %v8255_v22  ;;  %v9688_v59 = vld [vmem:[#allocation2 + $0xcac] sm:$0xf]  ;;  %v7839_v53 = vld [vmem:[#allocation2 + $0xcb8] sm:$0xf0]  ;;  %v8242_v41 = vor.u32 %v9788_v17, %v8239_v24 }
 0x2aa   :  { %5836 = vmatpush.bf16.msra.mxu1 %v7410_v8  ;;  %v9756_v8 = vld [vmem:[#allocation2 + $0xecc] sm:$0xf]  ;;  %v8095_v62 = vld [vmem:[#allocation2 + $0xeb8] sm:$0xf0]  ;;  %v7842_v51 = vor.u32 %v9688_v59, %v7839_v53 }
 0x2ab   :  { %5849 = vmatpush.bf16.msra.mxu2 %v7538_v52  ;;  %v8111_v52 = vld [vmem:[#allocation2 + $0xed8] sm:$0xf0]  ;;  %v9720_v60 = vld [vmem:[#allocation2 + $0xdac] sm:$0xf] }
 0x2ac   :  { %5862 = vmatpush.bf16.msra.mxu3 %v7666_v57  ;;  %v7986_v57 = vor.u32 %v9724_v47, %v7983_v40  ;;  %v8114_v58 = vor.u32 %v9756_v8, %v8111_v52  ;;  %v9752_v42 = vld [vmem:[#allocation2 + $0xeac] sm:$0xf]  ;;  %v7951_v56 = vld [vmem:[#allocation2 + $0xd98] sm:$0xf0] }
 0x2ad   :  { %5824 = vmatpush.bf16.msra.mxu0 %v7266_v61  ;;  %v7967_v61 = vld [vmem:[#allocation2 + $0xdb8] sm:$0xf0]  ;;  %v8098_v3 = vor.u32 %v9752_v42, %v8095_v62  ;;  %v9716_v5 = vld [vmem:[#allocation2 + $0xd8c] sm:$0xf] }
 0x2ae   :  { %5837 = vmatpush.bf16.msra.mxu1 %v7394_v44  ;;  %v9784_v44 = vld [vmem:[#allocation2 + $0xfac] sm:$0xf]  ;;  %v7970_v2 = vor.u32 %v9720_v60, %v7967_v61  ;;  %v8207_v13 = vld [vmem:[#allocation2 + $0xf98] sm:$0xf0] }
 0x2af   :  { %5850 = vmatpush.bf16.msra.mxu2 %v7522_v0  ;;  %v8223_v0 = vld [vmem:[#allocation2 + $0xfb8] sm:$0xf0]  ;;  %v9748_v9 = vld [vmem:[#allocation2 + $0xe8c] sm:$0xf] }
 0x2b0   :  { %5863 = vmatpush.bf16.msra.mxu3 %v7650_v36  ;;  %v9684_v36 = vld [vmem:[#allocation2 + $0xc8c] sm:$0xf]  ;;  %v8226_v55 = vor.u32 %v9784_v44, %v8223_v0  ;;  %v7807_v19 = vld [vmem:[#allocation2 + $0xc78] sm:$0xf0] }
 0x2b1   :  { %5825 = vmatpush.bf16.msra.mxu0 %v7250_v4  ;;  %v5619_v10 = vpop.f32.mrf.mxu0  ;;  %v7954_v4 = vor.u32 %v9716_v5, %v7951_v56  ;;  %v9680_v21 = vld [vmem:[#allocation2 + $0xc6c] sm:$0xf]  ;;  %v7935_v22 = vld [vmem:[#allocation2 + $0xd78] sm:$0xf0] }
 0x2b2   :  { %5838 = vmatpush.bf16.msra.mxu1 %v7378_v63  ;;  %v5632_v15 = vpop.f32.mrf.mxu1  ;;  %v9712_v63 = vld [vmem:[#allocation2 + $0xd6c] sm:$0xf]  ;;  %v7810_v6 = vor.u32 %v9680_v21, %v7807_v19  ;;  %v7919_v17 = vld [vmem:[#allocation2 + $0xd58] sm:$0xf0] }
 0x2b3   :  { %5851 = vmatpush.bf16.msra.mxu2 %v7506_v20  ;;  %v9676_v47 = vld [vmem:[#allocation2 + $0xc4c] sm:$0xf]  ;;  %v8175_v53 = vld [vmem:[#allocation2 + $0xf58] sm:$0xf0] }
 0x2b4   :  { %5864 = vmatpush.bf16.msra.mxu3 %v7634_v27  ;;  %5826 = vmatmul.bf16.vlgmr.msra.gmra.mxu0 %v10256_v25  ;;  %v7823_v25 = vld [vmem:[#allocation2 + $0xc98] sm:$0xf0]  ;;  %v9744_v27 = vld [vmem:[#allocation2 + $0xe6c] sm:$0xf] }
 0x2b5   :  { %5870 = vmatpush.bf16.msrb.mxu0 %v7874_v32  ;;  %5839 = vmatmul.bf16.vlgmr.msra.gmra.mxu1 %v10260_v30  ;;  %v9780_v30 = vld [vmem:[#allocation2 + $0xf8c] sm:$0xf]  ;;  %v7826_v18 = vor.u32 %v9684_v36, %v7823_v25  ;;  %v8063_v32 = vld [vmem:[#allocation2 + $0xe78] sm:$0xf0] }
 0x2b6   :  { %5883 = vmatpush.bf16.msrb.mxu1 %v8002_v34  ;;  %5852 = vmatmul.bf16.vlgmr.msra.gmra.mxu2 %v10258_v29  ;;  %v8079_v29 = vld [vmem:[#allocation2 + $0xe98] sm:$0xf0]  ;;  %v8210_v20 = vor.u32 %v9780_v30, %v8207_v13  ;;  %v9776_v34 = vld [vmem:[#allocation2 + $0xf6c] sm:$0xf]  ;;  %v8066_v14 = vor.u32 %v9744_v27, %v8063_v32 }
 0x2b7   :  { %5896 = vmatpush.bf16.msrb.mxu2 %v8130_v39  ;;  %5865 = vmatmul.bf16.vlgmr.msra.gmra.mxu3 %v10262_v33  ;;  %v5620_v33 = vadd.f32 %v5619_v10, %v10430_v50  ;;  %v8082_v1 = vor.u32 %v9748_v9, %v8079_v29  ;;  %v8191_v39 = vld [vmem:[#allocation2 + $0xf78] sm:$0xf0]  ;;  %v7938_v50 = vor.u32 %v9712_v63, %v7935_v22  ;;  %v9708_v40 = vld [vmem:[#allocation2 + $0xd4c] sm:$0xf] }
 0x2b8   :  { %5909 = vmatpush.bf16.msrb.mxu3 %v8258_v48  ;;  %v7791_v48 = vld [vmem:[#allocation2 + $0xc58] sm:$0xf0]  ;;  %v8194_v8 = vor.u32 %v9776_v34, %v8191_v39  ;;  %v9740_v24 = vld [vmem:[#allocation2 + $0xe4c] sm:$0xf]  ;;  %v7922_v62 = vor.u32 %v9708_v40, %v7919_v17 }
 0x2b9   :  { %5871 = vmatpush.bf16.msrb.mxu0 %v7858_v38  ;;  %v5633_v26 = vadd.f32 %v5632_v15, %v5620_v33  ;;  %v5645_v52 = vpop.f32.mrf.mxu2  ;;  %v8047_v38 = vld [vmem:[#allocation2 + $0xe58] sm:$0xf0]  ;;  %v9772_v59 = vld [vmem:[#allocation2 + $0xf4c] sm:$0xf]  ;;  %v5621_v60 = vpop.f32.mrf.mxu0 }
 0x2ba   :  { %5884 = vmatpush.bf16.msrb.mxu1 %v7986_v57  ;;  %v5634_v61 = vpop.f32.mrf.mxu1  ;;  %v8050_v44 = vor.u32 %v9740_v24, %v8047_v38  ;;  %v9672_v0 = vld [vmem:[#allocation2 + $0xc2c] sm:$0xf]  ;;  %v7903_v36 = vld [vmem:[#allocation2 + $0xd38] sm:$0xf0] }
 0x2bb   :  { %5897 = vmatpush.bf16.msrb.mxu2 %v8114_v58  ;;  %v5646_v57 = vadd.f32 %v5645_v52, %v5633_v26  ;;  %v5658_v58 = vpop.f32.mrf.mxu3  ;;  %v9736_v25 = vld [vmem:[#allocation2 + $0xe2c] sm:$0xf]  ;;  %v8031_v5 = vld [vmem:[#allocation2 + $0xe38] sm:$0xf0] }
 0x2bc   :  { %5910 = vmatpush.bf16.msrb.mxu3 %v8242_v41  ;;  %v7794_v41 = vor.u32 %v9676_v47, %v7791_v48  ;;  %v8159_v56 = vld [vmem:[#allocation2 + $0xf38] sm:$0xf0]  ;;  %v9668_v29 = vld [vmem:[#allocation2 + $0xc0c] sm:$0xf]  ;;  %v8034_v13 = vor.u32 %v9736_v25, %v8031_v5 }
 0x2bd   :  { %5872 = vmatpush.bf16.msrb.mxu0 %v7842_v51  ;;  %v10437_v42 = vadd.f32 %v5658_v58, %v5646_v57  ;;  %v7775_v51 = vld [vmem:[#allocation2 + $0xc38] sm:$0xf0]  ;;  %v9700_v33 = vld [vmem:[#allocation2 + $0xd0c] sm:$0xf] }
 0x2be   :  { %5885 = vmatpush.bf16.msrb.mxu1 %v7970_v2  ;;  %v9704_v2 = vld [vmem:[#allocation2 + $0xd2c] sm:$0xf]  ;;  %v7778_v9 = vor.u32 %v9672_v0, %v7775_v51  ;;  %v7759_v10 = vld [vmem:[#allocation2 + $0xc18] sm:$0xf0] }
 0x2bf   :  { %5898 = vmatpush.bf16.msrb.mxu2 %v8098_v3  ;;  %v8178_v3 = vor.u32 %v9772_v59, %v8175_v53  ;;  %v7906_v30 = vor.u32 %v9704_v2, %v7903_v36  ;;  %v9732_v15 = vld [vmem:[#allocation2 + $0xe0c] sm:$0xf]  ;;  %v8143_v19 = vld [vmem:[#allocation2 + $0xf18] sm:$0xf0]  ;;  %v7762_v32 = vor.u32 %v9668_v29, %v7759_v10 }
 0x2c0   :  { %5911 = vmatpush.bf16.msrb.mxu3 %v8226_v55  ;;  %v9768_v55 = vld [vmem:[#allocation2 + $0xf2c] sm:$0xf]  ;;  %v8383_v26 = vld [vmem:[#allocation2 + $0x10f8] sm:$0xf0] }
 0x2c1   :  { %5873 = vmatpush.bf16.msrb.mxu0 %v7826_v18  ;;  %v7887_v18 = vld [vmem:[#allocation2 + $0xd18] sm:$0xf0]  ;;  %v9764_v21 = vld [vmem:[#allocation2 + $0xf0c] sm:$0xf]  ;;  %v5647_v63 = vpop.f32.mrf.mxu2 }
 0x2c2   :  { %5886 = vmatpush.bf16.msrb.mxu1 %v7954_v4  ;;  %v8162_v4 = vor.u32 %v9768_v55, %v8159_v56  ;;  %v9856_v22 = vld [vmem:[#allocation2 + $0x11ec] sm:$0xf]  ;;  %v8511_v34 = vld [vmem:[#allocation2 + $0x11f8] sm:$0xf0]  ;;  %v8146_v40 = vor.u32 %v9764_v21, %v8143_v19 }
 0x2c3   :  { %5899 = vmatpush.bf16.msrb.mxu2 %v8082_v1  ;;  %v8015_v1 = vld [vmem:[#allocation2 + $0xe18] sm:$0xf0]  ;;  %v5660_v27 = vpop.f32.mrf.mxu3  ;;  %v9888_v39 = vld [vmem:[#allocation2 + $0x12ec] sm:$0xf]  ;;  %v8514_v52 = vor.u32 %v9856_v22, %v8511_v34 }
 0x2c4   :  { %5912 = vmatpush.bf16.msrb.mxu3 %v8210_v20  ;;  %v9824_v20 = vld [vmem:[#allocation2 + $0x10ec] sm:$0xf]  ;;  %v8767_v48 = vld [vmem:[#allocation2 + $0x13f8] sm:$0xf0] }
 0x2c5   :  { %5874 = vmatpush.bf16.msrb.mxu0 %v7810_v6  ;;  %v8639_v6 = vld [vmem:[#allocation2 + $0x12f8] sm:$0xf0]  ;;  %v9920_v47 = vld [vmem:[#allocation2 + $0x13ec] sm:$0xf] }
 0x2c6   :  { %5887 = vmatpush.bf16.msrb.mxu1 %v7938_v50  ;;  %v7890_v50 = vor.u32 %v9700_v33, %v7887_v18  ;;  %v8642_v17 = vor.u32 %v9888_v39, %v8639_v6  ;;  %v9820_v24 = vld [vmem:[#allocation2 + $0x10cc] sm:$0xf]  ;;  %v8367_v38 = vld [vmem:[#allocation2 + $0x10d8] sm:$0xf0]  ;;  %v8770_v58 = vor.u32 %v9920_v47, %v8767_v48 }
 0x2c7   :  { %5900 = vmatpush.bf16.msrb.mxu2 %v8066_v14  ;;  %v8018_v14 = vor.u32 %v9732_v15, %v8015_v1  ;;  %v9852_v57 = vld [vmem:[#allocation2 + $0x11cc] sm:$0xf]  ;;  %v8495_v59 = vld [vmem:[#allocation2 + $0x11d8] sm:$0xf0] }
 0x2c8   :  { %5913 = vmatpush.bf16.msrb.mxu3 %v8194_v8  ;;  %v8386_v8 = vor.u32 %v9824_v20, %v8383_v26  ;;  %v9884_v53 = vld [vmem:[#allocation2 + $0x12cc] sm:$0xf]  ;;  %v8623_v60 = vld [vmem:[#allocation2 + $0x12d8] sm:$0xf0] }
 0x2c9   :  { %5875 = vmatpush.bf16.msrb.mxu0 %v7794_v41  ;;  %v9916_v41 = vld [vmem:[#allocation2 + $0x13cc] sm:$0xf]  ;;  %v8751_v61 = vld [vmem:[#allocation2 + $0x13d8] sm:$0xf0]  ;;  %v8626_v0 = vor.u32 %v9884_v53, %v8623_v60 }
 0x2ca   :  { %5888 = vmatpush.bf16.msrb.mxu1 %v7922_v62  ;;  %v8370_v62 = vor.u32 %v9820_v24, %v8367_v38  ;;  %v9816_v51 = vld [vmem:[#allocation2 + $0x10ac] sm:$0xf]  ;;  %v8351_v2 = vld [vmem:[#allocation2 + $0x10b8] sm:$0xf0]  ;;  %v8754_v36 = vor.u32 %v9916_v41, %v8751_v61 }
 0x2cb   :  { %5901 = vmatpush.bf16.msrb.mxu2 %v8050_v44  ;;  %v8498_v44 = vor.u32 %v9852_v57, %v8495_v59  ;;  %v8479_v25 = vld [vmem:[#allocation2 + $0x11b8] sm:$0xf0]  ;;  %v9880_v5 = vld [vmem:[#allocation2 + $0x12ac] sm:$0xf]  ;;  %v8354_v29 = vor.u32 %v9816_v51, %v8351_v2 }
 0x2cc   :  { %5914 = vmatpush.bf16.msrb.mxu3 %v8178_v3  ;;  %v9848_v3 = vld [vmem:[#allocation2 + $0x11ac] sm:$0xf]  ;;  %v8607_v55 = vld [vmem:[#allocation2 + $0x12b8] sm:$0xf0] }
 0x2cd   :  { %5876 = vmatpush.bf16.msrb.mxu0 %v7778_v9  ;;  %v9912_v56 = vld [vmem:[#allocation2 + $0x13ac] sm:$0xf]  ;;  %v8735_v9 = vld [vmem:[#allocation2 + $0x13b8] sm:$0xf0]  ;;  %v8482_v10 = vor.u32 %v9848_v3, %v8479_v25 }
 0x2ce   :  { %5889 = vmatpush.bf16.msrb.mxu1 %v7906_v30  ;;  %v8610_v30 = vor.u32 %v9880_v5, %v8607_v55  ;;  %v9844_v33 = vld [vmem:[#allocation2 + $0x118c] sm:$0xf]  ;;  %v8738_v18 = vor.u32 %v9912_v56, %v8735_v9  ;;  %v8463_v15 = vld [vmem:[#allocation2 + $0x1198] sm:$0xf0] }
 0x2cf   :  { %5902 = vmatpush.bf16.msrb.mxu2 %v8034_v13  ;;  %v9812_v13 = vld [vmem:[#allocation2 + $0x108c] sm:$0xf]  ;;  %v8719_v21 = vld [vmem:[#allocation2 + $0x1398] sm:$0xf0]  ;;  %v8466_v20 = vor.u32 %v9844_v33, %v8463_v15 }
 0x2d0   :  { %5915 = vmatpush.bf16.msrb.mxu3 %v8162_v4  ;;  %v9876_v4 = vld [vmem:[#allocation2 + $0x128c] sm:$0xf]  ;;  %v8319_v27 = vld [vmem:[#allocation2 + $0x1078] sm:$0xf0] }
 0x2d1   :  { %5877 = vmatpush.bf16.msrb.mxu0 %v7762_v32  ;;  %v5671_v1 = vpop.f32.mrf.mxu0  ;;  %v9808_v22 = vld [vmem:[#allocation2 + $0x106c] sm:$0xf]  ;;  %v8447_v6 = vld [vmem:[#allocation2 + $0x1178] sm:$0xf0] }
 0x2d2   :  { %5890 = vmatpush.bf16.msrb.mxu1 %v7890_v50  ;;  %v5684_v63 = vpop.f32.mrf.mxu1  ;;  %v9840_v32 = vld [vmem:[#allocation2 + $0x116c] sm:$0xf]  ;;  %v8703_v48 = vld [vmem:[#allocation2 + $0x1378] sm:$0xf0] }
 0x2d3   :  { %5903 = vmatpush.bf16.msrb.mxu2 %v8018_v14  ;;  %v9872_v50 = vld [vmem:[#allocation2 + $0x126c] sm:$0xf]  ;;  %v8575_v14 = vld [vmem:[#allocation2 + $0x1278] sm:$0xf0] }
 0x2d4   :  { %5916 = vmatpush.bf16.msrb.mxu3 %v8146_v40  ;;  %5878 = vmatmul.bf16.vlgmr.msrb.gmra.mxu0 %v10274_v23  ;;  %v8335_v23 = vld [vmem:[#allocation2 + $0x1098] sm:$0xf0]  ;;  %v9904_v47 = vld [vmem:[#allocation2 + $0x136c] sm:$0xf]  ;;  %v8322_v40 = vor.u32 %v9808_v22, %v8319_v27 }
 0x2d5   :  { %5922 = vmatpush.bf16.msra.mxu0 %v8386_v8  ;;  %5891 = vmatmul.bf16.vlgmr.msrb.gmra.mxu1 %v10278_v31  ;;  %v9908_v31 = vld [vmem:[#allocation2 + $0x138c] sm:$0xf]  ;;  %v8338_v19 = vor.u32 %v9812_v13, %v8335_v23  ;;  %v8578_v8 = vor.u32 %v9872_v50, %v8575_v14  ;;  %v8706_v38 = vor.u32 %v9904_v47, %v8703_v48  ;;  %v8559_v53 = vld [vmem:[#allocation2 + $0x1258] sm:$0xf0] }
 0x2d6   :  { %5935 = vmatpush.bf16.msra.mxu1 %v8514_v52  ;;  %5904 = vmatmul.bf16.vlgmr.msrb.gmra.mxu2 %v10276_v28  ;;  %v8591_v28 = vld [vmem:[#allocation2 + $0x1298] sm:$0xf0]  ;;  %v8722_v34 = vor.u32 %v9908_v31, %v8719_v21  ;;  %v9804_v52 = vld [vmem:[#allocation2 + $0x104c] sm:$0xf] }
 0x2d7   :  { %5948 = vmatpush.bf16.msra.mxu2 %v8642_v17  ;;  %5917 = vmatmul.bf16.vlgmr.msrb.gmra.mxu3 %v10280_v35  ;;  %v5672_v35 = vadd.f32 %v5671_v1, %v10437_v42  ;;  %v8594_v26 = vor.u32 %v9876_v4, %v8591_v28  ;;  %v8450_v42 = vor.u32 %v9840_v32, %v8447_v6  ;;  %v8303_v17 = vld [vmem:[#allocation2 + $0x1058] sm:$0xf0]  ;;  %v9836_v24 = vld [vmem:[#allocation2 + $0x114c] sm:$0xf] }
 0x2d8   :  { %5961 = vmatpush.bf16.msra.mxu3 %v8770_v58  ;;  %v8431_v58 = vld [vmem:[#allocation2 + $0x1158] sm:$0xf0]  ;;  %v9868_v59 = vld [vmem:[#allocation2 + $0x124c] sm:$0xf] }
 0x2d9   :  { %5923 = vmatpush.bf16.msra.mxu0 %v8370_v62  ;;  %v5685_v39 = vadd.f32 %v5684_v63, %v5672_v35  ;;  %v5697_v57 = vpop.f32.mrf.mxu2  ;;  %v9900_v61 = vld [vmem:[#allocation2 + $0x134c] sm:$0xf]  ;;  %v8687_v62 = vld [vmem:[#allocation2 + $0x1358] sm:$0xf0]  ;;  %v8434_v3 = vor.u32 %v9836_v24, %v8431_v58 }
 0x2da   :  { %5936 = vmatpush.bf16.msra.mxu1 %v8498_v44  ;;  %v5710_v41 = vpop.f32.mrf.mxu3  ;;  %v5673_v44 = vpop.f32.mrf.mxu0  ;;  %v9800_v25 = vld [vmem:[#allocation2 + $0x102c] sm:$0xf]  ;;  %v8287_v5 = vld [vmem:[#allocation2 + $0x1038] sm:$0xf0]  ;;  %v8690_v56 = vor.u32 %v9900_v61, %v8687_v62 }
 0x2db   :  { %5949 = vmatpush.bf16.msra.mxu2 %v8626_v0  ;;  %v5698_v60 = vadd.f32 %v5697_v57, %v5685_v39  ;;  %v8306_v0 = vor.u32 %v9804_v52, %v8303_v17  ;;  %v5686_v51 = vpop.f32.mrf.mxu1  ;;  %v9832_v55 = vld [vmem:[#allocation2 + $0x112c] sm:$0xf]  ;;  %v8415_v9 = vld [vmem:[#allocation2 + $0x1138] sm:$0xf0]  ;;  %v8290_v23 = vor.u32 %v9800_v25, %v8287_v5 }
 0x2dc   :  { %5962 = vmatpush.bf16.msra.mxu3 %v8754_v36  ;;  %v8562_v36 = vor.u32 %v9868_v59, %v8559_v53  ;;  %v8671_v13 = vld [vmem:[#allocation2 + $0x1338] sm:$0xf0]  ;;  %v9796_v33 = vld [vmem:[#allocation2 + $0x100c] sm:$0xf]  ;;  %v8418_v15 = vor.u32 %v9832_v55, %v8415_v9 }
 0x2dd   :  { %5924 = vmatpush.bf16.msra.mxu0 %v8354_v29  ;;  %v10444_v2 = vadd.f32 %v5710_v41, %v5698_v60  ;;  %v9864_v29 = vld [vmem:[#allocation2 + $0x122c] sm:$0xf]  ;;  %v8399_v1 = vld [vmem:[#allocation2 + $0x1118] sm:$0xf0] }
 0x2de   :  { %5937 = vmatpush.bf16.msra.mxu1 %v8482_v10  ;;  %v8543_v10 = vld [vmem:[#allocation2 + $0x1238] sm:$0xf0]  ;;  %v9828_v28 = vld [vmem:[#allocation2 + $0x110c] sm:$0xf] }
 0x2df   :  { %5950 = vmatpush.bf16.msra.mxu2 %v8610_v30  ;;  %v9896_v30 = vld [vmem:[#allocation2 + $0x132c] sm:$0xf]  ;;  %v8546_v4 = vor.u32 %v9864_v29, %v8543_v10  ;;  %v8527_v35 = vld [vmem:[#allocation2 + $0x1218] sm:$0xf0]  ;;  %v8402_v14 = vor.u32 %v9828_v28, %v8399_v1 }
 0x2e0   :  { %5963 = vmatpush.bf16.msra.mxu3 %v8738_v18  ;;  %v8271_v18 = vld [vmem:[#allocation2 + $0x1018] sm:$0xf0]  ;;  %v9860_v31 = vld [vmem:[#allocation2 + $0x120c] sm:$0xf]  ;;  %v8674_v21 = vor.u32 %v9896_v30, %v8671_v13 }
 0x2e1   :  { %5925 = vmatpush.bf16.msra.mxu0 %v8338_v19  ;;  %v9892_v19 = vld [vmem:[#allocation2 + $0x130c] sm:$0xf]  ;;  %v8655_v63 = vld [vmem:[#allocation2 + $0x1318] sm:$0xf0]  ;;  %v8530_v47 = vor.u32 %v9860_v31, %v8527_v35 }
 0x2e2   :  { %5938 = vmatpush.bf16.msra.mxu1 %v8466_v20  ;;  %v5699_v20 = vpop.f32.mrf.mxu2  ;;  %v8895_v22 = vld [vmem:[#allocation2 + $0x14f8] sm:$0xf0]  ;;  %v9984_v27 = vld [vmem:[#allocation2 + $0x15ec] sm:$0xf]  ;;  %v5712_v32 = vpop.f32.mrf.mxu3 }
 0x2e3   :  { %5951 = vmatpush.bf16.msra.mxu2 %v8594_v26  ;;  %v9952_v26 = vld [vmem:[#allocation2 + $0x14ec] sm:$0xf]  ;;  %v9023_v39 = vld [vmem:[#allocation2 + $0x15f8] sm:$0xf0] }
 0x2e4   :  { %5964 = vmatpush.bf16.msra.mxu3 %v8722_v34  ;;  %v8274_v34 = vor.u32 %v9796_v33, %v8271_v18  ;;  %v10016_v6 = vld [vmem:[#allocation2 + $0x16ec] sm:$0xf]  ;;  %v9151_v50 = vld [vmem:[#allocation2 + $0x16f8] sm:$0xf0]  ;;  %v9026_v52 = vor.u32 %v9984_v27, %v9023_v39  ;;  %v10066_v18 = vld [vmem:[#allocation5] sm:$0xf] }
 0x2e5   :  { %5926 = vmatpush.bf16.msra.mxu0 %v8322_v40  ;;  %v10048_v48 = vld [vmem:[#allocation2 + $0x17ec] sm:$0xf]  ;;  %v9279_v40 = vld [vmem:[#allocation2 + $0x17f8] sm:$0xf0]  ;;  %v9154_v17 = vor.u32 %v10016_v6, %v9151_v50 }
 0x2e6   :  { %5939 = vmatpush.bf16.msra.mxu1 %v8450_v42  ;;  %v8658_v42 = vor.u32 %v9892_v19, %v8655_v63  ;;  %v9948_v24 = vld [vmem:[#allocation2 + $0x14cc] sm:$0xf]  ;;  %v9282_v58 = vor.u32 %v10048_v48, %v9279_v40  ;;  %v9007_v59 = vld [vmem:[#allocation2 + $0x15d8] sm:$0xf0] }
 0x2e7   :  { %5952 = vmatpush.bf16.msra.mxu2 %v8578_v8  ;;  %v8898_v8 = vor.u32 %v9952_v26, %v8895_v22  ;;  %v9980_v57 = vld [vmem:[#allocation2 + $0x15cc] sm:$0xf]  ;;  %v9135_v60 = vld [vmem:[#allocation2 + $0x16d8] sm:$0xf0] }
 0x2e8   :  { %5965 = vmatpush.bf16.msra.mxu3 %v8706_v38  ;;  %v8879_v38 = vld [vmem:[#allocation2 + $0x14d8] sm:$0xf0]  ;;  %v10012_v53 = vld [vmem:[#allocation2 + $0x16cc] sm:$0xf]  ;;  %v9010_v44 = vor.u32 %v9980_v57, %v9007_v59 }
 0x2e9   :  { %5927 = vmatpush.bf16.msra.mxu0 %v8306_v0  ;;  %v10044_v41 = vld [vmem:[#allocation2 + $0x17cc] sm:$0xf]  ;;  %v9263_v61 = vld [vmem:[#allocation2 + $0x17d8] sm:$0xf0]  ;;  %v8882_v62 = vor.u32 %v9948_v24, %v8879_v38  ;;  %v9138_v0 = vor.u32 %v10012_v53, %v9135_v60 }
 0x2ea   :  { %5940 = vmatpush.bf16.msra.mxu1 %v8434_v3  ;;  %v9944_v51 = vld [vmem:[#allocation2 + $0x14ac] sm:$0xf]  ;;  %v8863_v3 = vld [vmem:[#allocation2 + $0x14b8] sm:$0xf0]  ;;  %v9266_v25 = vor.u32 %v10044_v41, %v9263_v61 }
 0x2eb   :  { %5953 = vmatpush.bf16.msra.mxu2 %v8562_v36  ;;  %v9976_v36 = vld [vmem:[#allocation2 + $0x15ac] sm:$0xf]  ;;  %v8991_v5 = vld [vmem:[#allocation2 + $0x15b8] sm:$0xf0]  ;;  %v8866_v10 = vor.u32 %v9944_v51, %v8863_v3 }
 0x2ec   :  { %5966 = vmatpush.bf16.msra.mxu3 %v8690_v56  ;;  %v10008_v55 = vld [vmem:[#allocation2 + $0x16ac] sm:$0xf]  ;;  %v9119_v56 = vld [vmem:[#allocation2 + $0x16b8] sm:$0xf0]  ;;  %v8994_v13 = vor.u32 %v9976_v36, %v8991_v5 }
 0x2ed   :  { %5928 = vmatpush.bf16.msra.mxu0 %v8290_v23  ;;  %v10040_v9 = vld [vmem:[#allocation2 + $0x17ac] sm:$0xf]  ;;  %v9247_v29 = vld [vmem:[#allocation2 + $0x17b8] sm:$0xf0]  ;;  %v9122_v23 = vor.u32 %v10008_v55, %v9119_v56 }
 0x2ee   :  { %5941 = vmatpush.bf16.msra.mxu1 %v8418_v15  ;;  %v9940_v30 = vld [vmem:[#allocation2 + $0x148c] sm:$0xf]  ;;  %v849_v15 = vperm.slane %v10066_v18, 3  ;;  %v9231_v31 = vld [vmem:[#allocation2 + $0x1798] sm:$0xf0] }
 0x2ef   :  { %5954 = vmatpush.bf16.msra.mxu2 %v8546_v4  ;;  %v9972_v33 = vld [vmem:[#allocation2 + $0x158c] sm:$0xf]  ;;  %v9250_v4 = vor.u32 %v10040_v9, %v9247_v29  ;;  %v8831_v20 = vld [vmem:[#allocation2 + $0x1478] sm:$0xf0] }
 0x2f0   :  { %5967 = vmatpush.bf16.msra.mxu3 %v8674_v21  ;;  %v10004_v28 = vld [vmem:[#allocation2 + $0x168c] sm:$0xf]  ;;  %v9087_v6 = vld [vmem:[#allocation2 + $0x1678] sm:$0xf0] }
 0x2f1   :  { %5929 = vmatpush.bf16.msra.mxu0 %v8274_v34  ;;  %v10036_v1 = vld [vmem:[#allocation2 + $0x178c] sm:$0xf]  ;;  %v5723_v21 = vpop.f32.mrf.mxu0  ;;  %v8959_v34 = vld [vmem:[#allocation2 + $0x1578] sm:$0xf0] }
 0x2f2   :  { %5942 = vmatpush.bf16.msra.mxu1 %v8402_v14  ;;  %v9936_v63 = vld [vmem:[#allocation2 + $0x146c] sm:$0xf]  ;;  %v5724_v22 = vadd.f32 %v5723_v21, %v849_v15  ;;  %v5736_v27 = vpop.f32.mrf.mxu1  ;;  %v9234_v32 = vor.u32 %v10036_v1, %v9231_v31  ;;  %v9215_v14 = vld [vmem:[#allocation2 + $0x1778] sm:$0xf0] }
 0x2f3   :  { %5955 = vmatpush.bf16.msra.mxu2 %v8530_v47  ;;  %v9968_v26 = vld [vmem:[#allocation2 + $0x156c] sm:$0xf]  ;;  %v8834_v48 = vor.u32 %v9936_v63, %v8831_v20  ;;  %v8943_v57 = vld [vmem:[#allocation2 + $0x1558] sm:$0xf0] }
 0x2f4   :  { %5968 = vmatpush.bf16.msra.mxu3 %v8658_v42  ;;  %5930 = vmatmul.bf16.vlgmr.msra.gmra.mxu0 %v10292_v37  ;;  %v8847_v37 = vld [vmem:[#allocation2 + $0x1498] sm:$0xf0]  ;;  %v10000_v39 = vld [vmem:[#allocation2 + $0x166c] sm:$0xf]  ;;  %v5737_v47 = vadd.f32 %v5736_v27, %v5724_v22  ;;  %v8962_v40 = vor.u32 %v9968_v26, %v8959_v34  ;;  %v6044_v34 = vld [vmem:[%s10661_s3 + $0x70] sm:$0xff] }
 0x2f5   :  { %5974 = vmatpush.bf16.msrb.mxu0 %v8898_v8  ;;  %5943 = vmatmul.bf16.vlgmr.msra.gmra.mxu1 %v10296_v46  ;;  %v9103_v46 = vld [vmem:[#allocation2 + $0x1698] sm:$0xf0]  ;;  %v10032_v50 = vld [vmem:[#allocation2 + $0x176c] sm:$0xf]  ;;  %v9090_v42 = vor.u32 %v10000_v39, %v9087_v6  ;;  %v6060_v39 = vld [vmem:[%s10661_s3 + $0xf0] sm:$0xff] }
 0x2f6   :  { %5987 = vmatpush.bf16.msrb.mxu1 %v9026_v52  ;;  %5956 = vmatmul.bf16.vlgmr.msra.gmra.mxu2 %v10294_v45  ;;  %v8975_v45 = vld [vmem:[#allocation2 + $0x1598] sm:$0xf0]  ;;  %v9106_v19 = vor.u32 %v10004_v28, %v9103_v46  ;;  %v9932_v8 = vld [vmem:[#allocation2 + $0x144c] sm:$0xf]  ;;  %v9218_v38 = vor.u32 %v10032_v50, %v9215_v14  ;;  %v6076_v6 = vld [vmem:[%s10661_s3 + $0x170] sm:$0xff] }
 0x2f7   :  { %6000 = vmatpush.bf16.msrb.mxu2 %v9154_v17  ;;  %5969 = vmatmul.bf16.vlgmr.msra.gmra.mxu3 %v10298_v49  ;;  %v8850_v49 = vor.u32 %v9940_v30, %v8847_v37  ;;  %v8978_v35 = vor.u32 %v9972_v33, %v8975_v45  ;;  %v8815_v52 = vld [vmem:[#allocation2 + $0x1458] sm:$0xf0]  ;;  %v9964_v17 = vld [vmem:[#allocation2 + $0x154c] sm:$0xf] }
 0x2f8   :  { %6013 = vmatpush.bf16.msrb.mxu3 %v9282_v58  ;;  %v9996_v58 = vld [vmem:[#allocation2 + $0x164c] sm:$0xf]  ;;  %v9071_v59 = vld [vmem:[#allocation2 + $0x1658] sm:$0xf0]  ;;  %v8946_v51 = vor.u32 %v9964_v17, %v8943_v57 }
 0x2f9   :  { %5975 = vmatpush.bf16.msrb.mxu0 %v8882_v62  ;;  %v5749_v24 = vpop.f32.mrf.mxu2  ;;  %v10028_v41 = vld [vmem:[#allocation2 + $0x174c] sm:$0xf]  ;;  %v9199_v61 = vld [vmem:[#allocation2 + $0x1758] sm:$0xf0]  ;;  %v8818_v62 = vor.u32 %v9932_v8, %v8815_v52  ;;  %v9074_v3 = vor.u32 %v9996_v58, %v9071_v59  ;;  %v6040_v8 = vld [vmem:[%s10661_s3 + $0x50] sm:$0xff] }
 0x2fa   :  { %5988 = vmatpush.bf16.msrb.mxu1 %v9010_v44  ;;  %v5750_v53 = vadd.f32 %v5749_v24, %v5737_v47  ;;  %v5762_v60 = vpop.f32.mrf.mxu3  ;;  %v9928_v36 = vld [vmem:[#allocation2 + $0x142c] sm:$0xf]  ;;  %v5738_v55 = vpop.f32.mrf.mxu1  ;;  %v9202_v56 = vor.u32 %v10028_v41, %v9199_v61  ;;  %v8927_v9 = vld [vmem:[#allocation2 + $0x1538] sm:$0xf0]  ;;  %v6056_v52 = vld [vmem:[%s10661_s3 + $0xd0] sm:$0xff] }
 0x2fb   :  { %6001 = vmatpush.bf16.msrb.mxu2 %v9138_v0  ;;  %v5725_v0 = vpop.f32.mrf.mxu0  ;;  %v9960_v5 = vld [vmem:[#allocation2 + $0x152c] sm:$0xf]  ;;  %v8783_v15 = vld [vmem:[#allocation2 + $0x1418] sm:$0xf0]  ;;  %v6054_v41 = vld [vmem:[%s10661_s3 + $0xc0] sm:$0xff] }
 0x2fc   :  { %6014 = vmatpush.bf16.msrb.mxu3 %v9266_v25  ;;  %v10450_v44 = vadd.f32 %v5762_v60, %v5750_v53  ;;  %v8799_v25 = vld [vmem:[#allocation2 + $0x1438] sm:$0xf0]  ;;  %v9992_v29 = vld [vmem:[#allocation2 + $0x162c] sm:$0xf]  ;;  %v8930_v37 = vor.u32 %v9960_v5, %v8927_v9  ;;  %v6038_v60 = vld [vmem:[%s10661_s3 + $0x40] sm:$0xff] }
 0x2fd   :  { %5976 = vmatpush.bf16.msrb.mxu0 %v8866_v10  ;;  %v9055_v10 = vld [vmem:[#allocation2 + $0x1638] sm:$0xf0]  ;;  %v10024_v30 = vld [vmem:[#allocation2 + $0x172c] sm:$0xf]  ;;  %v6036_v55 = vld [vmem:[%s10661_s3 + $0x30] sm:$0xff] }
 0x2fe   :  { %5989 = vmatpush.bf16.msrb.mxu1 %v8994_v13  ;;  %v9183_v13 = vld [vmem:[#allocation2 + $0x1738] sm:$0xf0]  ;;  %v9058_v33 = vor.u32 %v9992_v29, %v9055_v10  ;;  %v9924_v18 = vld [vmem:[#allocation2 + $0x140c] sm:$0xf]  ;;  %v6068_v29 = vld [vmem:[%s10661_s3 + $0x130] sm:$0xff] }
 0x2ff   :  { %6002 = vmatpush.bf16.msrb.mxu2 %v9122_v23  ;;  %v8802_v23 = vor.u32 %v9928_v36, %v8799_v25  ;;  %v9186_v28 = vor.u32 %v10024_v30, %v9183_v13  ;;  %v8911_v46 = vld [vmem:[#allocation2 + $0x1518] sm:$0xf0]  ;;  %v9988_v1 = vld [vmem:[#allocation2 + $0x160c] sm:$0xf] }
 0x300   :  { %6015 = vmatpush.bf16.msrb.mxu3 %v9250_v4  ;;  %v9956_v4 = vld [vmem:[#allocation2 + $0x150c] sm:$0xf]  ;;  %v9039_v31 = vld [vmem:[#allocation2 + $0x1618] sm:$0xf0] }
 0x301   :  { %5977 = vmatpush.bf16.msrb.mxu0 %v8850_v49  ;;  %v5751_v45 = vpop.f32.mrf.mxu2  ;;  %v10020_v21 = vld [vmem:[#allocation2 + $0x170c] sm:$0xf]  ;;  %v8914_v63 = vor.u32 %v9956_v4, %v8911_v46  ;;  %v9042_v20 = vor.u32 %v9988_v1, %v9039_v31  ;;  %v6045_v22 = vld [vmem:[%s10661_s3 + $0x78] sm:$0xff]  ;;  %v6032_v46 = vld [vmem:[%s10661_s3 + $0x10] sm:$0xff] }
 0x302   :  { %5990 = vmatpush.bf16.msrb.mxu1 %v8978_v35  ;;  %v5764_v49 = vpop.f32.mrf.mxu3  ;;  %v9167_v35 = vld [vmem:[#allocation2 + $0x1718] sm:$0xf0]  ;;  %v6043_v50 = vld [vmem:[%s10661_s3 + $0x68] sm:$0xff]  ;;  %v6048_v1 = vld [vmem:[%s10661_s3 + $0x90] sm:$0xff] }
 0x303   :  { %6003 = vmatpush.bf16.msrb.mxu2 %v9106_v19  ;;  %v8786_v19 = vor.u32 %v9924_v18, %v8783_v15  ;;  %v9170_v26 = vor.u32 %v10020_v21, %v9167_v35  ;;  %v6061_v27 = vld [vmem:[%s10661_s3 + $0xf8] sm:$0xff]  ;;  %v6059_v14 = vld [vmem:[%s10661_s3 + $0xe8] sm:$0xff]  ;;  %v6066_v18 = vld [vmem:[%s10661_s3 + $0x120] sm:$0xff] }
 0x304   :  { %6016 = vmatpush.bf16.msrb.mxu3 %v9234_v32  ;;  %v6077_v32 = vld [vmem:[%s10661_s3 + $0x178] sm:$0xff]  ;;  %v6039_v57 = vld [vmem:[%s10661_s3 + $0x48] sm:$0xff]  ;;  %v6064_v31 = vld [vmem:[%s10661_s3 + $0x110] sm:$0xff] }
 0x305   :  { %5978 = vmatpush.bf16.msrb.mxu0 %v8834_v48  ;;  %v6041_v47 = vld [vmem:[%s10661_s3 + $0x58] sm:$0xff]  ;;  %v6055_v58 = vld [vmem:[%s10661_s3 + $0xc8] sm:$0xff] }
 0x306   :  { %5991 = vmatpush.bf16.msrb.mxu1 %v8962_v40  ;;  %v6057_v48 = vld [vmem:[%s10661_s3 + $0xd8] sm:$0xff]  ;;  %v6071_v53 = vld [vmem:[%s10661_s3 + $0x148] sm:$0xff] }
 0x307   :  { %6004 = vmatpush.bf16.msrb.mxu2 %v9090_v42  ;;  %v6073_v40 = vld [vmem:[%s10661_s3 + $0x158] sm:$0xff]  ;;  %v6035_v10 = vld [vmem:[%s10661_s3 + $0x28] sm:$0xff] }
 0x308   :  { %6017 = vmatpush.bf16.msrb.mxu3 %v9218_v38  ;;  %v6072_v38 = vld [vmem:[%s10661_s3 + $0x150] sm:$0xff]  ;;  %v6069_v36 = vld [vmem:[%s10661_s3 + $0x138] sm:$0xff]  ;;  %v6051_v30 = vld [vmem:[%s10661_s3 + $0xa8] sm:$0xff] }
 0x309   :  { %5979 = vmatpush.bf16.msrb.mxu0 %v8818_v62  ;;  %v6070_v62 = vld [vmem:[%s10661_s3 + $0x140] sm:$0xff]  ;;  %v6067_v13 = vld [vmem:[%s10661_s3 + $0x128] sm:$0xff]  ;;  %v6033_v4 = vld [vmem:[%s10661_s3 + $0x18] sm:$0xff] }
 0x30a   :  { %5992 = vmatpush.bf16.msrb.mxu1 %v8946_v51  ;;  %v6037_v51 = vld [vmem:[%s10661_s3 + $0x38] sm:$0xff]  ;;  %v6031_v49 = vld [vmem:[%s10661_s3 + $0x8] sm:$0xff] }
 0x30b   :  { %6005 = vmatpush.bf16.msrb.mxu2 %v9074_v3  ;;  %v6053_v3 = vld [vmem:[%s10661_s3 + $0xb8] sm:$0xff]  ;;  %v6047_v21 = vld [vmem:[%s10661_s3 + $0x88] sm:$0xff] }
 0x30c   :  { %6018 = vmatpush.bf16.msrb.mxu3 %v9202_v56  ;;  %v6052_v56 = vld [vmem:[%s10661_s3 + $0xb0] sm:$0xff]  ;;  %v6049_v45 = vld [vmem:[%s10661_s3 + $0x98] sm:$0xff]  ;;  %v6063_v35 = vld [vmem:[%s10661_s3 + $0x108] sm:$0xff] }
 0x30d   :  { %5980 = vmatpush.bf16.msrb.mxu0 %v8802_v23  ;;  %v6034_v23 = vld [vmem:[%s10661_s3 + $0x20] sm:$0xff] }
 0x30e   :  { %5993 = vmatpush.bf16.msrb.mxu1 %v8930_v37  ;;  %v6050_v37 = vld [vmem:[%s10661_s3 + $0xa0] sm:$0xff] }
 0x30f   :  { %6006 = vmatpush.bf16.msrb.mxu2 %v9058_v33 }
 0x310   :  { %6019 = vmatpush.bf16.msrb.mxu3 %v9186_v28  ;;  %v6065_v28 = vld [vmem:[%s10661_s3 + $0x118] sm:$0xff] }
 0x311   :  { %5981 = vmatpush.bf16.msrb.mxu0 %v8786_v19  ;;  %v5775_v42 = vpop.f32.mrf.mxu0  ;;  %v6030_v19 = vld [vmem:[%s10661_s3] sm:$0xff] }
 0x312   :  { %5994 = vmatpush.bf16.msrb.mxu1 %v8914_v63  ;;  %v5776_v17 = vadd.f32 %v5775_v42, %v10450_v44  ;;  %v5788_v24 = vpop.f32.mrf.mxu1  ;;  %v6046_v63 = vld [vmem:[%s10661_s3 + $0x80] sm:$0xff] }
 0x313   :  { %6007 = vmatpush.bf16.msrb.mxu2 %v9042_v20  ;;  %v6062_v20 = vld [vmem:[%s10661_s3 + $0x100] sm:$0xff] }
 0x314   :  { %6020 = vmatpush.bf16.msrb.mxu3 %v9170_v26  ;;  %5982 = vmatmul.bf16.vlgmr.msrb.gmra.mxu0 %v10312_v7  ;;  %v6075_v7 = vld [vmem:[%s10661_s3 + $0x168] sm:$0xff]  ;;  %v5789_v59 = vadd.f32 %v5788_v24, %v5776_v17  ;;  %v6026_v26 = vmax.f32 %v10353_v54, 0.0 }
 0x315   :  { %6098 = vmatpush.msra.mxu0 %v6045_v22  ;;  %5995 = vmatmul.bf16.vlgmr.msrb.gmra.mxu1 %v10316_v12  ;;  %v6058_v12 = vld [vmem:[%s10661_s3 + $0xe0] sm:$0xff]  ;;  %v6027_v22 = vmax.f32 %v10394_v43, 0.0  ;;  %v6091_v24 = vld [vmem:[%s10661_s3 + $0x1e8] sm:$0xff] }
 0x316   :  { %6118 = vmatpush.msra.mxu1 %v6061_v27  ;;  %6008 = vmatmul.bf16.vlgmr.msrb.gmra.mxu2 %v10314_v11  ;;  %v6042_v11 = vld [vmem:[%s10661_s3 + $0x60] sm:$0xff]  ;;  %v6028_v27 = vmax.f32 %v10444_v2, 0.0 }
 0x317   :  { %6138 = vmatpush.msra.mxu2 %v6077_v32  ;;  %6021 = vmatmul.bf16.vlgmr.msrb.gmra.mxu3 %v10318_v16  ;;  %v6074_v16 = vld [vmem:[%s10661_s3 + $0x160] sm:$0xff] }
 0x318   :  { %6099 = vmatpush.msra.mxu0 %v6044_v34  ;;  %6119 = vmatpush.msra.mxu1 %v6060_v39 }
 0x319   :  { %6139 = vmatpush.msra.mxu2 %v6076_v6  ;;  %v5801_v61 = vpop.f32.mrf.mxu2  ;;  %v5777_v5 = vpop.f32.mrf.mxu0 }
 0x31a   :  { %6100 = vmatpush.msra.mxu0 %v6043_v50  ;;  %6120 = vmatpush.msra.mxu1 %v6059_v14  ;;  %v5802_v44 = vadd.f32 %v5801_v61, %v5789_v59  ;;  %v5814_v0 = vpop.f32.mrf.mxu3  ;;  %v5790_v9 = vpop.f32.mrf.mxu1  ;;  %v6085_v61 = vld [vmem:[%s10661_s3 + $0x1b8] sm:$0xff] }
 0x31b   :  { %6140 = vmatpush.msra.mxu2 %v6075_v7  ;;  %v6080_v9 = vld [vmem:[%s10661_s3 + $0x190] sm:$0xff] }
 0x31c   :  { %6101 = vmatpush.msra.mxu0 %v6042_v11  ;;  %6121 = vmatpush.msra.mxu1 %v6058_v12  ;;  %v5815_v25 = vadd.f32 %v5814_v0, %v5802_v44  ;;  %v6084_v44 = vld [vmem:[%s10661_s3 + $0x1b0] sm:$0xff] }
 0x31d   :  { %6141 = vmatpush.msra.mxu2 %v6074_v16 }
 0x31e   :  { %6102 = vmatpush.msra.mxu0 %v6041_v47  ;;  %6122 = vmatpush.msra.mxu1 %v6057_v48 }
 0x31f   :  { %6142 = vmatpush.msra.mxu2 %v6073_v40 }
 0x320   :  { %6103 = vmatpush.msra.mxu0 %v6040_v8  ;;  %6123 = vmatpush.msra.mxu1 %v6056_v52  ;;  %v6093_v8 = vld [vmem:[%s10661_s3 + $0x1f8] sm:$0xff]  ;;  %v6092_v52 = vld [vmem:[%s10661_s3 + $0x1f0] sm:$0xff] }
 0x321   :  { %6143 = vmatpush.msra.mxu2 %v6072_v38  ;;  %v5803_v33 = vpop.f32.mrf.mxu2  ;;  %6158 = vmatpush.msra.mxu3 %v6093_v8  ;;  %v6090_v38 = vld [vmem:[%s10661_s3 + $0x1e0] sm:$0xff] }
 0x322   :  { %6104 = vmatpush.msra.mxu0 %v6039_v57  ;;  %6124 = vmatpush.msra.mxu1 %v6055_v58  ;;  %v5816_v15 = vpop.f32.mrf.mxu3  ;;  %v6089_v57 = vld [vmem:[%s10661_s3 + $0x1d8] sm:$0xff] }
 0x323   :  { %6144 = vmatpush.msra.mxu2 %v6071_v53  ;;  %6159 = vmatpush.msra.mxu3 %v6092_v52  ;;  %v6088_v53 = vld [vmem:[%s10661_s3 + $0x1d0] sm:$0xff] }
 0x324   :  { %6105 = vmatpush.msra.mxu0 %v6038_v60  ;;  %6125 = vmatpush.msra.mxu1 %v6054_v41  ;;  %v6087_v60 = vld [vmem:[%s10661_s3 + $0x1c8] sm:$0xff]  ;;  %v6086_v41 = vld [vmem:[%s10661_s3 + $0x1c0] sm:$0xff] }
 0x325   :  { %6145 = vmatpush.msra.mxu2 %v6070_v62  ;;  %6160 = vmatpush.msra.mxu3 %v6091_v24 }
 0x326   :  { %6106 = vmatpush.msra.mxu0 %v6037_v51  ;;  %6126 = vmatpush.msra.mxu1 %v6053_v3  ;;  %v6083_v51 = vld [vmem:[%s10661_s3 + $0x1a8] sm:$0xff]  ;;  %v6082_v3 = vld [vmem:[%s10661_s3 + $0x1a0] sm:$0xff] }
 0x327   :  { %6146 = vmatpush.msra.mxu2 %v6069_v36  ;;  %6161 = vmatpush.msra.mxu3 %v6090_v38  ;;  %v6081_v36 = vld [vmem:[%s10661_s3 + $0x198] sm:$0xff] }
 0x328   :  { %6107 = vmatpush.msra.mxu0 %v6036_v55  ;;  %6127 = vmatpush.msra.mxu1 %v6052_v56 }
 0x329   :  { %6147 = vmatpush.msra.mxu2 %v6068_v29  ;;  %6162 = vmatpush.msra.mxu3 %v6089_v57 }
 0x32a   :  { %6108 = vmatpush.msra.mxu0 %v6035_v10  ;;  %6128 = vmatpush.msra.mxu1 %v6051_v30  ;;  %v6079_v10 = vld [vmem:[%s10661_s3 + $0x188] sm:$0xff]  ;;  %v6078_v30 = vld [vmem:[%s10661_s3 + $0x180] sm:$0xff]  ;;  %s10174_s3 = smov [#allocation8]  }
 0x32b   :  { %6148 = vmatpush.msra.mxu2 %v6067_v13  ;;  %6163 = vmatpush.msra.mxu3 %v6088_v53  ;;  %s6198_s14 = sshll.u32 %s10174_s3, 4  ;;  %s6199_s14 = int_to_ptr.vmem [resolvable:$true] %s6198_s14 }
 0x32c   :  { %6109 = vmatpush.msra.mxu0 %v6034_v23  ;;  %6129 = vmatpush.msra.mxu1 %v6050_v37 }
 0x32d   :  { %6149 = vmatpush.msra.mxu2 %v6066_v18  ;;  %6164 = vmatpush.msra.mxu3 %v6087_v60 }
 0x32e   :  { %6110 = vmatpush.msra.mxu0 %v6033_v4  ;;  %6130 = vmatpush.msra.mxu1 %v6049_v45 }
 0x32f   :  { %6150 = vmatpush.msra.mxu2 %v6065_v28  ;;  %6165 = vmatpush.msra.mxu3 %v6086_v41 }
 0x330   :  { %6111 = vmatpush.msra.mxu0 %v6032_v46  ;;  %6131 = vmatpush.msra.mxu1 %v6048_v1 }
 0x331   :  { %6151 = vmatpush.msra.mxu2 %v6064_v31  ;;  %v5827_v32 = vpop.f32.mrf.mxu0  ;;  %6166 = vmatpush.msra.mxu3 %v6085_v61 }
 0x332   :  { %6112 = vmatpush.msra.mxu0 %v6031_v49  ;;  %6132 = vmatpush.msra.mxu1 %v6047_v21  ;;  %v5828_v34 = vadd.f32 %v5827_v32, %v5815_v25  ;;  %v5840_v39 = vpop.f32.mrf.mxu1 }
 0x333   :  { %6152 = vmatpush.msra.mxu2 %v6063_v35  ;;  %6167 = vmatpush.msra.mxu3 %v6084_v44 }
 0x334   :  { %6113 = vmatpush.msra.mxu0 %v6030_v19  ;;  %6133 = vmatpush.msra.mxu1 %v6046_v63  ;;  %v5841_v6 = vadd.f32 %v5840_v39, %v5828_v34  ;;  %v10057_v34 = vld [vmem:[#allocation7] ss:$0 sm:$0xff] }
 0x335   :  { %6153 = vmatpush.msra.mxu2 %v6062_v20  ;;  %6114 = vmatmul.f32.vlgmr.msra.gmra.mxu0 %v6026_v26 }
 0x336   :  { %6134 = vmatmul.f32.vlgmr.msra.gmra.mxu1 %v6027_v22  ;;  %6154 = vmatmul.f32.vlgmr.msra.gmra.mxu2 %v6028_v27 }
 0x337   :  { %6168 = vmatpush.msra.mxu3 %v6083_v51 }
 0x339   :  { %v5853_v50 = vpop.f32.mrf.mxu2  ;;  %v5829_v11 = vpop.f32.mrf.mxu0  ;;  %6169 = vmatpush.msra.mxu3 %v6082_v3 }
 0x33a   :  { %v5854_v14 = vadd.f32 %v5853_v50, %v5841_v6  ;;  %v5866_v7 = vpop.f32.mrf.mxu3  ;;  %v5842_v54 = vpop.f32.mrf.mxu1 }
 0x33b   :  { %6170 = vmatpush.msra.mxu3 %v6081_v36 }
 0x33c   :  { %v5867_v12 = vadd.f32 %v5866_v7, %v5854_v14 }
 0x33d   :  { %6171 = vmatpush.msra.mxu3 %v6080_v9 }
 0x33f   :  { %6172 = vmatpush.msra.mxu3 %v6079_v10 }
 0x341   :  { %v5855_v16 = vpop.f32.mrf.mxu2  ;;  %6173 = vmatpush.msra.mxu3 %v6078_v30 }
 0x342   :  { %v5868_v43 = vpop.f32.mrf.mxu3 }
 0x351   :  { %v5879_v47 = vpop.f32.mrf.mxu0 }
 0x352   :  { %v5892_v2 = vpop.f32.mrf.mxu1  ;;  %v5880_v5 = vadd.f32 %v5879_v47, %v5867_v12 }
 0x354   :  { %v5893_v13 = vadd.f32 %v5892_v2, %v5880_v5 }
 0x359   :  { %v5905_v48 = vpop.f32.mrf.mxu2  ;;  %v5881_v42 = vpop.f32.mrf.mxu0 }
 0x35a   :  { %v5918_v40 = vpop.f32.mrf.mxu3  ;;  %v5894_v17 = vpop.f32.mrf.mxu1  ;;  %v5906_v23 = vadd.f32 %v5905_v48, %v5893_v13 }
 0x35c   :  { %v5919_v18 = vadd.f32 %v5918_v40, %v5906_v23 }
 0x361   :  { %v5907_v58 = vpop.f32.mrf.mxu2 }
 0x362   :  { %v5920_v59 = vpop.f32.mrf.mxu3 }
 0x371   :  { %v5931_v62 = vpop.f32.mrf.mxu0 }
 0x372   :  { %v5944_v0 = vpop.f32.mrf.mxu1  ;;  %v5932_v15 = vadd.f32 %v5931_v62, %v5919_v18 }
 0x374   :  { %v5945_v4 = vadd.f32 %v5944_v0, %v5932_v15 }
 0x379   :  { %v5957_v25 = vpop.f32.mrf.mxu2  ;;  %v5933_v56 = vpop.f32.mrf.mxu0 }
 0x37a   :  { %v5970_v55 = vpop.f32.mrf.mxu3  ;;  %v5946_v29 = vpop.f32.mrf.mxu1  ;;  %v5958_v45 = vadd.f32 %v5957_v25, %v5945_v4 }
 0x37c   :  { %v5971_v28 = vadd.f32 %v5970_v55, %v5958_v45 }
 0x381   :  { %v5959_v37 = vpop.f32.mrf.mxu2 }
 0x382   :  { %v5972_v33 = vpop.f32.mrf.mxu3 }
 0x391   :  { %v5983_v46 = vpop.f32.mrf.mxu0 }
 0x392   :  { %v5996_v1 = vpop.f32.mrf.mxu1  ;;  %v5984_v31 = vadd.f32 %v5983_v46, %v5971_v28 }
 0x394   :  { %v5997_v49 = vadd.f32 %v5996_v1, %v5984_v31 }
 0x399   :  { %v6009_v21 = vpop.f32.mrf.mxu2  ;;  %v5985_v63 = vpop.f32.mrf.mxu0 }
 0x39a   :  { %v6022_v35 = vpop.f32.mrf.mxu3  ;;  %v6010_v19 = vadd.f32 %v6009_v21, %v5997_v49  ;;  %v5998_v20 = vpop.f32.mrf.mxu1 }
 0x39c   :  { %v6023_v26 = vadd.f32 %v6022_v35, %v6010_v19 }
 0x39e   :  { %v6029_v22 = vmax.f32 %v6023_v26, 0.0 }
 0x3a0   :  { %6174 = vmatmul.f32.vlgmr.msra.gmra.mxu3 %v6029_v22 }
 0x3a1   :  { %v6011_v27 = vpop.f32.mrf.mxu2 }
 0x3a2   :  { %v6024_v32 = vpop.f32.mrf.mxu3 }
 0x3b2   :  { %v6115_v39 = vpop.f32.mrf.mxu0 }
 0x3b3   :  { %v6116_v6 = vadd.f32 %v10057_v34, %v6115_v39  ;;  %v6135_v50 = vpop.f32.mrf.mxu1 }
 0x3b5   :  { %v6136_v7 = vadd.f32 %v6135_v50, %v6116_v6 }
 0x3b9   :  { %v6155_v14 = vpop.f32.mrf.mxu2 }
 0x3ba   :  { %v6156_v11 = vadd.f32 %v6155_v14, %v6136_v7 }
 0x423   :  { %v6175_v54 = vpop.f32.mrf.mxu3 }
 0x424   :  { %v6176_v12 = vadd.f32 %v6175_v54, %v6156_v11 }
 0x426   :  { %10058 = vtanh.f32 %v6176_v12 }
 0x42c   :  { %v10059_v16 = vpop.eup %10058 }
 0x42d   :  { %v6180_v43 = vsel %vm6179_vm0, %v10059_v16, -inf }
 0x42e   :  { %6181 = vmax.xlane.f32.xlu0 %v6180_v43 }
 0x4a1   :  { %v6182_v47 = vpop.xlane.xlu0 %6181 }
 0x4a2   :  { %v6183_v2 = vsub.f32 %v10059_v16, %v6182_v47 }
 0x4a4   :  { %v6184_v48 = vmul.f32 1.442695, %v6183_v2 }
 0x4a6   :  { %10060 = vpow2.f32 %v6184_v48 }
 0x4ac   :  { %v10061_v40 = vpop.eup %10060 }
 0x4ad   :  { %v6186_v42 = vsel %vm6179_vm0, %v10061_v40, 0.0 }
 0x4ae   :  { %6187 = vadd.xlane.f32.xlu0 %v6186_v42 }
 0x521   :  { %v6188_v8 = vpop.xlane.xlu0 %6187 }
 0x522   :  { %10062 = vlog2.f32 %v6188_v8 }
 0x528   :  { %v10063_v52 = vpop.eup %10062 }
 0x529   :  { %v6190_v17 = vmul.f32 0.6931472, %v10063_v52 }
 0x52b   :  { %v6191_v24 = vsub.f32 %v6183_v2, %v6190_v17 }
 0x52d   :  { %6192 = vst.msk [vmem:[#allocation8] sm:$0xff] %vm6179_vm0, %v6191_v24 }
 0x52e   :  { %6203 = dma.vmem_to_hbm [thread:$0]  %s6199_s14, 128, %s6201_s17, [#allocation4]  }
 0x52f   :  { %10167 = dma.done.wait [#allocation4], 128  }
 0x530   :  { %10168 = vsyncadd [#allocation4], 4294967168 }
 0x531   :  { %6208 = vsyncpa [#allocation3], 1 }
 0x532   :  { %6209 = vsyncpa [#allocation6], 1 }
 0x533   :  { %6210 = vsyncpa [#allocation4], 1 }

// kernel: mlpnet_modified_forward.1
= control target key start
LH: loop header
LB: loop body
LE: loop exit
PB: predicated region body
PF: predicated region fallthrough
CT: control target
= control target key end

     0   :  { %10 = vsyncpa [#allocation3], 0  ;;  %s10658_s0 = inlined_call_operand.vmem [shape: bf16[8,3072], index: 0, kind: input, shape index: {}]   ;;  %s10659_s1 = inlined_call_operand.hbm [shape: bf16[3072,512], index: 1, kind: input, shape index: {}]   ;;  %s10660_s2 = inlined_call_operand.hbm [shape: f32[1,512], index: 2, kind: input, shape index: {}]   ;;  %s10661_s3 = inlined_call_operand.vmem [shape: f32[512,10], index: 3, kind: input, shape index: {}]   ;;  %s10662_s4 = inlined_call_operand.hbm [shape: f32[1,10], index: 4, kind: input, shape index: {}]   ;;  %s10663_s5 = inlined_call_operand.hbm [shape: f32[8,10], index: 5, kind: output, shape index: {}]  }
   0x1   :  { %11 = vsyncpa [#allocation6], 0  ;;  %s33_s20 = sshll.u32 %s10660_s2, 4  ;;  %s34_s20 = int_to_ptr.hbm [resolvable:$true] %s33_s20 }
   0x2   :  { %12 = vsyncpa [#allocation4], 0  ;;  %s10169_s21 = smov [#allocation5]   ;;  %s19_s25 = sshll.u32 %s10659_s1, 4  ;;  %s20_s25 = int_to_ptr.hbm [resolvable:$true] %s19_s25 }
   0x3   :  { %s35_s22 = sshll.u32 %s10169_s21, 4  ;;  %s10170_s26 = smov [#allocation2]   ;;  %s36_s22 = int_to_ptr.vmem [resolvable:$true] %s35_s22 }
   0x4   :  { %38 = dma.hbm_to_vmem [thread:$0]  %s34_s20, 64, %s36_s22, [#allocation6]  }
   0x5   :  { %s21_s27 = sshll.u32 %s10170_s26, 4  ;;  %s10171_s28 = smov 256   ;;  %s22_s27 = int_to_ptr.vmem [resolvable:$true] %s21_s27 }
   0x6   :  { %s10172_s29 = smov 16   ;;  %s46_s2 = sshll.u32 %s10662_s4, 4  ;;  %s47_s2 = int_to_ptr.hbm [resolvable:$true] %s46_s2 }
   0x7   :  { %27 = dma.hbm_to_vmem [thread:$0]  %s20_s25, 98304, %s22_s27, [#allocation3], %s10171_s28, %s10171_s28, %s10172_s29  }
   0x8   :  { %s10173_s7 = smov [#allocation7]  }
   0x9   :  { %s48_s8 = sshll.u32 %s10173_s7, 4  ;;  %s49_s8 = int_to_ptr.vmem [resolvable:$true] %s48_s8 }
   0xa   :  { %51 = dma.hbm_to_vmem [thread:$0]  %s47_s2, 16, %s49_s8, [#allocation6]  }
   0xb   :  { %10163 = dma.done.wait [#allocation3], 98304  }
   0xc   :  { %10164 = vsyncadd [#allocation3], 4294868992 }
   0xd   :  { %10165 = dma.done.wait [#allocation6], 80  }
   0xe   :  { %10166 = vsyncadd [#allocation6], 4294967216  ;;  %v6325_v0 = vld [vmem:[#allocation2 + $0xe0] sm:$0xf]  ;;  %v9313_v1 = vld [vmem:[#allocation2 + $0xec] sm:$0xf0] }
   0xf   :  { %v6453_v2 = vld [vmem:[#allocation2 + $0x1e0] sm:$0xf]  ;;  %v6326_v3 = vor.u32 %v9313_v1, %v6325_v0  ;;  %v9345_v4 = vld [vmem:[#allocation2 + $0x1ec] sm:$0xf0]  ;;  %vm6179_vm0 = vcmask 80896   ;;  %s6200_s17 = sshll.u32 %s10663_s5, 4  ;;  %s6201_s17 = int_to_ptr.hbm [resolvable:$true] %s6200_s17 }
  0x10   :  { %v6581_v5 = vld [vmem:[#allocation2 + $0x2e0] sm:$0xf]  ;;  %v9377_v6 = vld [vmem:[#allocation2 + $0x2ec] sm:$0xf0]  ;;  %v6454_v7 = vor.u32 %v9345_v4, %v6453_v2 }
  0x11   :  { %v6582_v8 = vor.u32 %v9377_v6, %v6581_v5  ;;  %v6709_v9 = vld [vmem:[#allocation2 + $0x3e0] sm:$0xf]  ;;  %v9409_v10 = vld [vmem:[#allocation2 + $0x3ec] sm:$0xf0]  ;;  %4778 = vmatpush.bf16.msra.mxu0 %v6326_v3 }
  0x12   :  { %v6309_v11 = vld [vmem:[#allocation2 + $0xc0] sm:$0xf]  ;;  %v6710_v12 = vor.u32 %v9409_v10, %v6709_v9  ;;  %v9309_v13 = vld [vmem:[#allocation2 + $0xcc] sm:$0xf0]  ;;  %4791 = vmatpush.bf16.msra.mxu1 %v6454_v7 }
  0x13   :  { %v6437_v14 = vld [vmem:[#allocation2 + $0x1c0] sm:$0xf]  ;;  %v9341_v15 = vld [vmem:[#allocation2 + $0x1cc] sm:$0xf0]  ;;  %4804 = vmatpush.bf16.msra.mxu2 %v6582_v8  ;;  %v6310_v16 = vor.u32 %v9309_v13, %v6309_v11 }
  0x14   :  { %v6438_v17 = vor.u32 %v9341_v15, %v6437_v14  ;;  %v6565_v18 = vld [vmem:[#allocation2 + $0x2c0] sm:$0xf]  ;;  %v9373_v19 = vld [vmem:[#allocation2 + $0x2cc] sm:$0xf0]  ;;  %4817 = vmatpush.bf16.msra.mxu3 %v6710_v12 }
  0x15   :  { %v6693_v20 = vld [vmem:[#allocation2 + $0x3c0] sm:$0xf]  ;;  %v6566_v21 = vor.u32 %v9373_v19, %v6565_v18  ;;  %v9405_v22 = vld [vmem:[#allocation2 + $0x3cc] sm:$0xf0]  ;;  %4779 = vmatpush.bf16.msra.mxu0 %v6310_v16 }
  0x16   :  { %v6293_v23 = vld [vmem:[#allocation2 + $0xa0] sm:$0xf]  ;;  %v9305_v24 = vld [vmem:[#allocation2 + $0xac] sm:$0xf0]  ;;  %v6694_v25 = vor.u32 %v9405_v22, %v6693_v20  ;;  %4792 = vmatpush.bf16.msra.mxu1 %v6438_v17 }
  0x17   :  { %v6421_v26 = vld [vmem:[#allocation2 + $0x1a0] sm:$0xf]  ;;  %v9337_v27 = vld [vmem:[#allocation2 + $0x1ac] sm:$0xf0]  ;;  %v6294_v29 = vor.u32 %v9305_v24, %v6293_v23  ;;  %4805 = vmatpush.bf16.msra.mxu2 %v6566_v21 }
  0x18   :  { %v6549_v28 = vld [vmem:[#allocation2 + $0x2a0] sm:$0xf]  ;;  %v9369_v30 = vld [vmem:[#allocation2 + $0x2ac] sm:$0xf0]  ;;  %v6422_v33 = vor.u32 %v9337_v27, %v6421_v26  ;;  %4818 = vmatpush.bf16.msra.mxu3 %v6694_v25 }
  0x19   :  { %v6677_v31 = vld [vmem:[#allocation2 + $0x3a0] sm:$0xf]  ;;  %v9401_v32 = vld [vmem:[#allocation2 + $0x3ac] sm:$0xf0]  ;;  %v6550_v34 = vor.u32 %v9369_v30, %v6549_v28  ;;  %4780 = vmatpush.bf16.msra.mxu0 %v6294_v29 }
  0x1a   :  { %v6277_v35 = vld [vmem:[#allocation2 + $0x80] sm:$0xf]  ;;  %v9301_v36 = vld [vmem:[#allocation2 + $0x8c] sm:$0xf0]  ;;  %v6678_v38 = vor.u32 %v9401_v32, %v6677_v31  ;;  %4793 = vmatpush.bf16.msra.mxu1 %v6422_v33 }
  0x1b   :  { %v6405_v37 = vld [vmem:[#allocation2 + $0x180] sm:$0xf]  ;;  %v9333_v39 = vld [vmem:[#allocation2 + $0x18c] sm:$0xf0]  ;;  %v6278_v44 = vor.u32 %v9301_v36, %v6277_v35  ;;  %4806 = vmatpush.bf16.msra.mxu2 %v6550_v34 }
  0x1c   :  { %v6533_v40 = vld [vmem:[#allocation2 + $0x280] sm:$0xf]  ;;  %v9365_v41 = vld [vmem:[#allocation2 + $0x28c] sm:$0xf0]  ;;  %v6406_v45 = vor.u32 %v9333_v39, %v6405_v37  ;;  %4819 = vmatpush.bf16.msra.mxu3 %v6678_v38 }
  0x1d   :  { %v6661_v42 = vld [vmem:[#allocation2 + $0x380] sm:$0xf]  ;;  %v9397_v43 = vld [vmem:[#allocation2 + $0x38c] sm:$0xf0]  ;;  %v6534_v46 = vor.u32 %v9365_v41, %v6533_v40  ;;  %4781 = vmatpush.bf16.msra.mxu0 %v6278_v44 }
  0x1e   :  { %v6261_v47 = vld [vmem:[#allocation2 + $0x60] sm:$0xf]  ;;  %v9297_v48 = vld [vmem:[#allocation2 + $0x6c] sm:$0xf0]  ;;  %v6662_v50 = vor.u32 %v9397_v43, %v6661_v42  ;;  %4794 = vmatpush.bf16.msra.mxu1 %v6406_v45 }
  0x1f   :  { %v6389_v49 = vld [vmem:[#allocation2 + $0x160] sm:$0xf]  ;;  %v9329_v51 = vld [vmem:[#allocation2 + $0x16c] sm:$0xf0]  ;;  %v6262_v56 = vor.u32 %v9297_v48, %v6261_v47  ;;  %4807 = vmatpush.bf16.msra.mxu2 %v6534_v46 }
  0x20   :  { %v6517_v52 = vld [vmem:[#allocation2 + $0x260] sm:$0xf]  ;;  %v9361_v53 = vld [vmem:[#allocation2 + $0x26c] sm:$0xf0]  ;;  %v6390_v57 = vor.u32 %v9329_v51, %v6389_v49  ;;  %4820 = vmatpush.bf16.msra.mxu3 %v6662_v50 }
  0x21   :  { %v6645_v54 = vld [vmem:[#allocation2 + $0x360] sm:$0xf]  ;;  %v9393_v55 = vld [vmem:[#allocation2 + $0x36c] sm:$0xf0]  ;;  %v6518_v58 = vor.u32 %v9361_v53, %v6517_v52  ;;  %4782 = vmatpush.bf16.msra.mxu0 %v6262_v56 }
  0x22   :  { %v6245_v59 = vld [vmem:[#allocation2 + $0x40] sm:$0xf]  ;;  %v9293_v60 = vld [vmem:[#allocation2 + $0x4c] sm:$0xf0]  ;;  %v6646_v62 = vor.u32 %v9393_v55, %v6645_v54  ;;  %4795 = vmatpush.bf16.msra.mxu1 %v6390_v57 }
  0x23   :  { %v6373_v61 = vld [vmem:[#allocation2 + $0x140] sm:$0xf]  ;;  %v9325_v63 = vld [vmem:[#allocation2 + $0x14c] sm:$0xf0]  ;;  %v6246_v4 = vor.u32 %v9293_v60, %v6245_v59  ;;  %4808 = vmatpush.bf16.msra.mxu2 %v6518_v58 }
  0x24   :  { %v6501_v0 = vld [vmem:[#allocation2 + $0x240] sm:$0xf]  ;;  %v9357_v1 = vld [vmem:[#allocation2 + $0x24c] sm:$0xf0]  ;;  %v6374_v5 = vor.u32 %v9325_v63, %v6373_v61  ;;  %4821 = vmatpush.bf16.msra.mxu3 %v6646_v62 }
  0x25   :  { %v6629_v2 = vld [vmem:[#allocation2 + $0x340] sm:$0xf]  ;;  %v9389_v3 = vld [vmem:[#allocation2 + $0x34c] sm:$0xf0]  ;;  %v6502_v6 = vor.u32 %v9357_v1, %v6501_v0  ;;  %4783 = vmatpush.bf16.msra.mxu0 %v6246_v4 }
  0x26   :  { %v6229_v7 = vld [vmem:[#allocation2 + $0x20] sm:$0xf]  ;;  %v9289_v8 = vld [vmem:[#allocation2 + $0x2c] sm:$0xf0]  ;;  %v6630_v10 = vor.u32 %v9389_v3, %v6629_v2  ;;  %4796 = vmatpush.bf16.msra.mxu1 %v6374_v5  ;;  %v65_v2 = vld [vmem:[%s10658_s0 + $0x8] sm:$0xff] }
  0x27   :  { %v6357_v9 = vld [vmem:[#allocation2 + $0x120] sm:$0xf]  ;;  %v9321_v11 = vld [vmem:[#allocation2 + $0x12c] sm:$0xf0]  ;;  %v6230_v16 = vor.u32 %v9289_v8, %v6229_v7  ;;  %4809 = vmatpush.bf16.msra.mxu2 %v6502_v6  ;;  %v868_v8 = vunpack.c.l.b16 %v65_v2 }
  0x28   :  { %v6485_v12 = vld [vmem:[#allocation2 + $0x220] sm:$0xf]  ;;  %v9353_v13 = vld [vmem:[#allocation2 + $0x22c] sm:$0xf0]  ;;  %v6358_v19 = vor.u32 %v9321_v11, %v6357_v9  ;;  %4822 = vmatpush.bf16.msra.mxu3 %v6630_v10  ;;  %v869_v10 = vunpack.c.h.b16 %v65_v2 }
  0x29   :  { %v6613_v14 = vld [vmem:[#allocation2 + $0x320] sm:$0xf]  ;;  %v9385_v15 = vld [vmem:[#allocation2 + $0x32c] sm:$0xf0]  ;;  %v6486_v20 = vor.u32 %v9353_v13, %v6485_v12  ;;  %4784 = vmatpush.bf16.msra.mxu0 %v6230_v16 }
  0x2a   :  { %v6213_v17 = vld [vmem:[#allocation2] sm:$0xf]  ;;  %v9285_v18 = vld [vmem:[#allocation2 + $0xc] sm:$0xf0]  ;;  %v6614_v24 = vor.u32 %v9385_v15, %v6613_v14  ;;  %4797 = vmatpush.bf16.msra.mxu1 %v6358_v19 }
  0x2b   :  { %v6341_v21 = vld [vmem:[#allocation2 + $0x100] sm:$0xf]  ;;  %v9317_v22 = vld [vmem:[#allocation2 + $0x10c] sm:$0xf0]  ;;  %v6214_v31 = vor.u32 %v9285_v18, %v6213_v17  ;;  %4810 = vmatpush.bf16.msra.mxu2 %v6486_v20  ;;  %v10220_v18 = vpack.c.b16 %v868_v8, %v868_v8  ;;  %v10224_v20 = vpack.c.b16 %v869_v10, %v869_v10 }
  0x2c   :  { %v6469_v23 = vld [vmem:[#allocation2 + $0x200] sm:$0xf]  ;;  %v9349_v25 = vld [vmem:[#allocation2 + $0x20c] sm:$0xf0]  ;;  %v6342_v35 = vor.u32 %v9317_v22, %v6341_v21  ;;  %4823 = vmatpush.bf16.msra.mxu3 %v6614_v24 }
  0x2d   :  { %v6597_v26 = vld [vmem:[#allocation2 + $0x300] sm:$0xf]  ;;  %v9381_v27 = vld [vmem:[#allocation2 + $0x30c] sm:$0xf0]  ;;  %v6470_v36 = vor.u32 %v9349_v25, %v6469_v23  ;;  %4785 = vmatpush.bf16.msra.mxu0 %v6214_v31 }
  0x2e   :  { %v6837_v28 = vld [vmem:[#allocation2 + $0x4e0] sm:$0xf]  ;;  %v9441_v29 = vld [vmem:[#allocation2 + $0x4ec] sm:$0xf0]  ;;  %v6598_v39 = vor.u32 %v9381_v27, %v6597_v26  ;;  %4798 = vmatpush.bf16.msra.mxu1 %v6342_v35 }
  0x2f   :  { %v6965_v30 = vld [vmem:[#allocation2 + $0x5e0] sm:$0xf]  ;;  %v9473_v32 = vld [vmem:[#allocation2 + $0x5ec] sm:$0xf0]  ;;  %v6838_v40 = vor.u32 %v9441_v29, %v6837_v28  ;;  %4811 = vmatpush.bf16.msra.mxu2 %v6470_v36 }
  0x30   :  { %v7093_v33 = vld [vmem:[#allocation2 + $0x6e0] sm:$0xf]  ;;  %v9505_v34 = vld [vmem:[#allocation2 + $0x6ec] sm:$0xf0]  ;;  %v6966_v41 = vor.u32 %v9473_v32, %v6965_v30  ;;  %4824 = vmatpush.bf16.msra.mxu3 %v6598_v39 }
  0x31   :  { %v7221_v37 = vld [vmem:[#allocation2 + $0x7e0] sm:$0xf]  ;;  %v9537_v38 = vld [vmem:[#allocation2 + $0x7ec] sm:$0xf0]  ;;  %v7094_v42 = vor.u32 %v9505_v34, %v7093_v33  ;;  %4830 = vmatpush.bf16.msrb.mxu0 %v6838_v40 }
  0x32   :  { %v6821_v43 = vld [vmem:[#allocation2 + $0x4c0] sm:$0xf]  ;;  %v9437_v44 = vld [vmem:[#allocation2 + $0x4cc] sm:$0xf0]  ;;  %v7222_v46 = vor.u32 %v9537_v38, %v7221_v37  ;;  %4843 = vmatpush.bf16.msrb.mxu1 %v6966_v41  ;;  %4812 = vmatmul.bf16.vlgmr.msra.gmra.mxu2 %v10220_v18 }
  0x33   :  { %v6949_v45 = vld [vmem:[#allocation2 + $0x5c0] sm:$0xf]  ;;  %v9469_v47 = vld [vmem:[#allocation2 + $0x5cc] sm:$0xf0]  ;;  %v6822_v52 = vor.u32 %v9437_v44, %v6821_v43  ;;  %4856 = vmatpush.bf16.msrb.mxu2 %v7094_v42  ;;  %4825 = vmatmul.bf16.vlgmr.msra.gmra.mxu3 %v10224_v20 }
  0x34   :  { %v7077_v48 = vld [vmem:[#allocation2 + $0x6c0] sm:$0xf]  ;;  %v9501_v49 = vld [vmem:[#allocation2 + $0x6cc] sm:$0xf0]  ;;  %v6950_v54 = vor.u32 %v9469_v47, %v6949_v45  ;;  %4869 = vmatpush.bf16.msrb.mxu3 %v7222_v46 }
  0x35   :  { %v7205_v50 = vld [vmem:[#allocation2 + $0x7c0] sm:$0xf]  ;;  %v9533_v51 = vld [vmem:[#allocation2 + $0x7cc] sm:$0xf0]  ;;  %v7078_v55 = vor.u32 %v9501_v49, %v7077_v48  ;;  %4831 = vmatpush.bf16.msrb.mxu0 %v6822_v52 }
  0x36   :  { %v6805_v53 = vld [vmem:[#allocation2 + $0x4a0] sm:$0xf]  ;;  %v9433_v56 = vld [vmem:[#allocation2 + $0x4ac] sm:$0xf0]  ;;  %v7206_v59 = vor.u32 %v9533_v51, %v7205_v50  ;;  %4844 = vmatpush.bf16.msrb.mxu1 %v6950_v54 }
  0x37   :  { %v6933_v57 = vld [vmem:[#allocation2 + $0x5a0] sm:$0xf]  ;;  %v9465_v58 = vld [vmem:[#allocation2 + $0x5ac] sm:$0xf0]  ;;  %v6806_v0 = vor.u32 %v9433_v56, %v6805_v53  ;;  %4857 = vmatpush.bf16.msrb.mxu2 %v7078_v55 }
  0x38   :  { %v7061_v60 = vld [vmem:[#allocation2 + $0x6a0] sm:$0xf]  ;;  %v9497_v61 = vld [vmem:[#allocation2 + $0x6ac] sm:$0xf0]  ;;  %v6934_v1 = vor.u32 %v9465_v58, %v6933_v57  ;;  %4870 = vmatpush.bf16.msrb.mxu3 %v7206_v59 }
  0x39   :  { %v7189_v62 = vld [vmem:[#allocation2 + $0x7a0] sm:$0xf]  ;;  %v9529_v63 = vld [vmem:[#allocation2 + $0x7ac] sm:$0xf0]  ;;  %v7062_v4 = vor.u32 %v9497_v61, %v7061_v60  ;;  %4832 = vmatpush.bf16.msrb.mxu0 %v6806_v0 }
  0x3a   :  { %v64_v3 = vld [vmem:[%s10658_s0] sm:$0xff]  ;;  %v9429_v6 = vld [vmem:[#allocation2 + $0x48c] sm:$0xf0]  ;;  %v7190_v11 = vor.u32 %v9529_v63, %v7189_v62  ;;  %4845 = vmatpush.bf16.msrb.mxu1 %v6934_v1 }
  0x3b   :  { %v6789_v5 = vld [vmem:[#allocation2 + $0x480] sm:$0xf]  ;;  %v866_v9 = vunpack.c.l.b16 %v64_v3  ;;  %v9461_v12 = vld [vmem:[#allocation2 + $0x58c] sm:$0xf0]  ;;  %v867_v15 = vunpack.c.h.b16 %v64_v3  ;;  %4858 = vmatpush.bf16.msrb.mxu2 %v7062_v4  ;;  %v67_v3 = vld [vmem:[%s10658_s0 + $0x18] sm:$0xff] }
  0x3c   :  { %v6917_v7 = vld [vmem:[#allocation2 + $0x580] sm:$0xf]  ;;  %v9493_v14 = vld [vmem:[#allocation2 + $0x68c] sm:$0xf0]  ;;  %v6790_v21 = vor.u32 %v9429_v6, %v6789_v5  ;;  %4871 = vmatpush.bf16.msrb.mxu3 %v7190_v11 }
  0x3d   :  { %v7045_v13 = vld [vmem:[#allocation2 + $0x680] sm:$0xf]  ;;  %v9525_v17 = vld [vmem:[#allocation2 + $0x78c] sm:$0xf0]  ;;  %v10222_v19 = vpack.c.b16 %v866_v9, %v866_v9  ;;  %v10226_v22 = vpack.c.b16 %v867_v15, %v867_v15  ;;  %v6918_v23 = vor.u32 %v9461_v12, %v6917_v7  ;;  %v872_v15 = vunpack.c.l.b16 %v67_v3 }
  0x3e   :  { %v7173_v16 = vld [vmem:[#allocation2 + $0x780] sm:$0xf]  ;;  %v7046_v24 = vor.u32 %v9493_v14, %v7045_v13  ;;  %v9425_v26 = vld [vmem:[#allocation2 + $0x46c] sm:$0xf0]  ;;  %4833 = vmatpush.bf16.msrb.mxu0 %v6790_v21 }
  0x3f   :  { %v6773_v25 = vld [vmem:[#allocation2 + $0x460] sm:$0xf]  ;;  %v7174_v28 = vor.u32 %v9525_v17, %v7173_v16  ;;  %v9457_v29 = vld [vmem:[#allocation2 + $0x56c] sm:$0xf0]  ;;  %4786 = vmatmul.bf16.vlgmr.msra.gmra.mxu0 %v10222_v19  ;;  %4799 = vmatmul.bf16.vlgmr.msra.gmra.mxu1 %v10226_v22 }
  0x40   :  { %v6901_v27 = vld [vmem:[#allocation2 + $0x560] sm:$0xf]  ;;  %v9489_v31 = vld [vmem:[#allocation2 + $0x66c] sm:$0xf0]  ;;  %v6774_v34 = vor.u32 %v9425_v26, %v6773_v25  ;;  %4846 = vmatpush.bf16.msrb.mxu1 %v6918_v23  ;;  %4859 = vmatpush.bf16.msrb.mxu2 %v7046_v24  ;;  %v873_v25 = vunpack.c.h.b16 %v67_v3 }
  0x41   :  { %v7029_v30 = vld [vmem:[#allocation2 + $0x660] sm:$0xf]  ;;  %v9521_v33 = vld [vmem:[#allocation2 + $0x76c] sm:$0xf0]  ;;  %v6902_v35 = vor.u32 %v9457_v29, %v6901_v27  ;;  %4872 = vmatpush.bf16.msrb.mxu3 %v7174_v28 }
  0x42   :  { %v7157_v32 = vld [vmem:[#allocation2 + $0x760] sm:$0xf]  ;;  %v7030_v36 = vor.u32 %v9489_v31, %v7029_v30  ;;  %v9421_v38 = vld [vmem:[#allocation2 + $0x44c] sm:$0xf0]  ;;  %4834 = vmatpush.bf16.msrb.mxu0 %v6774_v34 }
  0x43   :  { %v6757_v37 = vld [vmem:[#allocation2 + $0x440] sm:$0xf]  ;;  %v7158_v40 = vor.u32 %v9521_v33, %v7157_v32  ;;  %v9453_v41 = vld [vmem:[#allocation2 + $0x54c] sm:$0xf0] }
  0x44   :  { %v6885_v39 = vld [vmem:[#allocation2 + $0x540] sm:$0xf]  ;;  %v9485_v43 = vld [vmem:[#allocation2 + $0x64c] sm:$0xf0]  ;;  %v6758_v46 = vor.u32 %v9421_v38, %v6757_v37  ;;  %4847 = vmatpush.bf16.msrb.mxu1 %v6902_v35  ;;  %4860 = vmatpush.bf16.msrb.mxu2 %v7030_v36  ;;  %v10238_v38 = vpack.c.b16 %v872_v15, %v872_v15 }
  0x45   :  { %v7013_v42 = vld [vmem:[#allocation2 + $0x640] sm:$0xf]  ;;  %v9517_v45 = vld [vmem:[#allocation2 + $0x74c] sm:$0xf0]  ;;  %v6886_v47 = vor.u32 %v9453_v41, %v6885_v39  ;;  %4873 = vmatpush.bf16.msrb.mxu3 %v7158_v40 }
  0x46   :  { %v7141_v44 = vld [vmem:[#allocation2 + $0x740] sm:$0xf]  ;;  %v7014_v48 = vor.u32 %v9485_v43, %v7013_v42  ;;  %v9417_v50 = vld [vmem:[#allocation2 + $0x42c] sm:$0xf0]  ;;  %4835 = vmatpush.bf16.msrb.mxu0 %v6758_v46  ;;  %v10242_v42 = vpack.c.b16 %v873_v25, %v873_v25 }
  0x47   :  { %v6741_v49 = vld [vmem:[#allocation2 + $0x420] sm:$0xf]  ;;  %v7142_v52 = vor.u32 %v9517_v45, %v7141_v44  ;;  %v9449_v53 = vld [vmem:[#allocation2 + $0x52c] sm:$0xf0] }
  0x48   :  { %v6869_v51 = vld [vmem:[#allocation2 + $0x520] sm:$0xf]  ;;  %v9481_v55 = vld [vmem:[#allocation2 + $0x62c] sm:$0xf0]  ;;  %v6742_v59 = vor.u32 %v9417_v50, %v6741_v49  ;;  %4848 = vmatpush.bf16.msrb.mxu1 %v6886_v47  ;;  %4861 = vmatpush.bf16.msrb.mxu2 %v7014_v48 }
  0x49   :  { %v6997_v54 = vld [vmem:[#allocation2 + $0x620] sm:$0xf]  ;;  %v9513_v57 = vld [vmem:[#allocation2 + $0x72c] sm:$0xf0]  ;;  %v6870_v63 = vor.u32 %v9449_v53, %v6869_v51  ;;  %4874 = vmatpush.bf16.msrb.mxu3 %v7142_v52 }
  0x4a   :  { %v7125_v56 = vld [vmem:[#allocation2 + $0x720] sm:$0xf]  ;;  %v9413_v60 = vld [vmem:[#allocation2 + $0x40c] sm:$0xf0]  ;;  %v6998_v0 = vor.u32 %v9481_v55, %v6997_v54  ;;  %4836 = vmatpush.bf16.msrb.mxu0 %v6742_v59 }
  0x4b   :  { %v6725_v58 = vld [vmem:[#allocation2 + $0x400] sm:$0xf]  ;;  %v9445_v62 = vld [vmem:[#allocation2 + $0x50c] sm:$0xf0]  ;;  %v7126_v4 = vor.u32 %v9513_v57, %v7125_v56 }
  0x4c   :  { %v6853_v61 = vld [vmem:[#allocation2 + $0x500] sm:$0xf]  ;;  %v9477_v2 = vld [vmem:[#allocation2 + $0x60c] sm:$0xf0]  ;;  %v6726_v11 = vor.u32 %v9413_v60, %v6725_v58  ;;  %4849 = vmatpush.bf16.msrb.mxu1 %v6870_v63  ;;  %4862 = vmatpush.bf16.msrb.mxu2 %v6998_v0 }
  0x4d   :  { %v6981_v1 = vld [vmem:[#allocation2 + $0x600] sm:$0xf]  ;;  %v9509_v6 = vld [vmem:[#allocation2 + $0x70c] sm:$0xf0]  ;;  %v6854_v16 = vor.u32 %v9445_v62, %v6853_v61  ;;  %4875 = vmatpush.bf16.msrb.mxu3 %v7126_v4 }
  0x4e   :  { %v7109_v5 = vld [vmem:[#allocation2 + $0x700] sm:$0xf]  ;;  %v66_v7 = vld [vmem:[%s10658_s0 + $0x10] sm:$0xff]  ;;  %v6982_v17 = vor.u32 %v9477_v2, %v6981_v1  ;;  %4837 = vmatpush.bf16.msrb.mxu0 %v6726_v11 }
  0x4f   :  { %v7349_v8 = vld [vmem:[#allocation2 + $0x8e0] sm:$0xf]  ;;  %v9569_v9 = vld [vmem:[#allocation2 + $0x8ec] sm:$0xf0]  ;;  %v870_v24 = vunpack.c.l.b16 %v66_v7  ;;  %v7110_v26 = vor.u32 %v9509_v6, %v7109_v5  ;;  %v871_v28 = vunpack.c.h.b16 %v66_v7 }
  0x50   :  { %v7477_v10 = vld [vmem:[#allocation2 + $0x9e0] sm:$0xf]  ;;  %v9601_v12 = vld [vmem:[#allocation2 + $0x9ec] sm:$0xf0]  ;;  %v7350_v27 = vor.u32 %v9569_v9, %v7349_v8  ;;  %4850 = vmatpush.bf16.msrb.mxu1 %v6854_v16  ;;  %4863 = vmatpush.bf16.msrb.mxu2 %v6982_v17 }
  0x51   :  { %v7605_v13 = vld [vmem:[#allocation2 + $0xae0] sm:$0xf]  ;;  %v9633_v14 = vld [vmem:[#allocation2 + $0xaec] sm:$0xf0]  ;;  %v7478_v29 = vor.u32 %v9601_v12, %v7477_v10  ;;  %v10240_v41 = vpack.c.b16 %v870_v24, %v870_v24  ;;  %4876 = vmatpush.bf16.msrb.mxu3 %v7110_v26  ;;  %v10244_v44 = vpack.c.b16 %v871_v28, %v871_v28 }
  0x52   :  { %v7733_v21 = vld [vmem:[#allocation2 + $0xbe0] sm:$0xf]  ;;  %v9665_v23 = vld [vmem:[#allocation2 + $0xbec] sm:$0xf0]  ;;  %v7606_v30 = vor.u32 %v9633_v14, %v7605_v13  ;;  %4882 = vmatpush.bf16.msra.mxu0 %v7350_v27 }
  0x53   :  { %v7333_v31 = vld [vmem:[#allocation2 + $0x8c0] sm:$0xf]  ;;  %v9565_v32 = vld [vmem:[#allocation2 + $0x8cc] sm:$0xf0]  ;;  %v7734_v34 = vor.u32 %v9665_v23, %v7733_v21  ;;  %4864 = vmatmul.bf16.vlgmr.msrb.gmra.mxu2 %v10238_v38  ;;  %4838 = vmatmul.bf16.vlgmr.msrb.gmra.mxu0 %v10240_v41 }
  0x54   :  { %v7461_v33 = vld [vmem:[#allocation2 + $0x9c0] sm:$0xf]  ;;  %v9597_v35 = vld [vmem:[#allocation2 + $0x9cc] sm:$0xf0]  ;;  %v7334_v43 = vor.u32 %v9565_v32, %v7333_v31  ;;  %4895 = vmatpush.bf16.msra.mxu1 %v7478_v29  ;;  %4908 = vmatpush.bf16.msra.mxu2 %v7606_v30 }
  0x55   :  { %v7589_v36 = vld [vmem:[#allocation2 + $0xac0] sm:$0xf]  ;;  %v9629_v37 = vld [vmem:[#allocation2 + $0xacc] sm:$0xf0]  ;;  %v7462_v45 = vor.u32 %v9597_v35, %v7461_v33  ;;  %4921 = vmatpush.bf16.msra.mxu3 %v7734_v34  ;;  %4851 = vmatmul.bf16.vlgmr.msrb.gmra.mxu1 %v10244_v44 }
  0x56   :  { %v7717_v39 = vld [vmem:[#allocation2 + $0xbc0] sm:$0xf]  ;;  %v9661_v40 = vld [vmem:[#allocation2 + $0xbcc] sm:$0xf0]  ;;  %v7590_v46 = vor.u32 %v9629_v37, %v7589_v36  ;;  %4877 = vmatmul.bf16.vlgmr.msrb.gmra.mxu3 %v10242_v42  ;;  %4883 = vmatpush.bf16.msra.mxu0 %v7334_v43 }
  0x57   :  { %v7317_v47 = vld [vmem:[#allocation2 + $0x8a0] sm:$0xf]  ;;  %v9561_v48 = vld [vmem:[#allocation2 + $0x8ac] sm:$0xf0]  ;;  %v7718_v50 = vor.u32 %v9661_v40, %v7717_v39 }
  0x58   :  { %v7445_v49 = vld [vmem:[#allocation2 + $0x9a0] sm:$0xf]  ;;  %v9593_v51 = vld [vmem:[#allocation2 + $0x9ac] sm:$0xf0]  ;;  %v7318_v56 = vor.u32 %v9561_v48, %v7317_v47  ;;  %4896 = vmatpush.bf16.msra.mxu1 %v7462_v45  ;;  %4909 = vmatpush.bf16.msra.mxu2 %v7590_v46 }
  0x59   :  { %v7573_v52 = vld [vmem:[#allocation2 + $0xaa0] sm:$0xf]  ;;  %v9625_v53 = vld [vmem:[#allocation2 + $0xaac] sm:$0xf0]  ;;  %v7446_v57 = vor.u32 %v9593_v51, %v7445_v49  ;;  %4922 = vmatpush.bf16.msra.mxu3 %v7718_v50 }
  0x5a   :  { %v7701_v54 = vld [vmem:[#allocation2 + $0xba0] sm:$0xf]  ;;  %v9657_v55 = vld [vmem:[#allocation2 + $0xbac] sm:$0xf0]  ;;  %v7574_v58 = vor.u32 %v9625_v53, %v7573_v52  ;;  %4884 = vmatpush.bf16.msra.mxu0 %v7318_v56 }
  0x5b   :  { %v7301_v59 = vld [vmem:[#allocation2 + $0x880] sm:$0xf]  ;;  %v9557_v60 = vld [vmem:[#allocation2 + $0x88c] sm:$0xf0]  ;;  %v7702_v62 = vor.u32 %v9657_v55, %v7701_v54 }
  0x5c   :  { %v7429_v61 = vld [vmem:[#allocation2 + $0x980] sm:$0xf]  ;;  %v9589_v63 = vld [vmem:[#allocation2 + $0x98c] sm:$0xf0]  ;;  %v7302_v4 = vor.u32 %v9557_v60, %v7301_v59  ;;  %4897 = vmatpush.bf16.msra.mxu1 %v7446_v57  ;;  %4910 = vmatpush.bf16.msra.mxu2 %v7574_v58 }
  0x5d   :  { %v7557_v0 = vld [vmem:[#allocation2 + $0xa80] sm:$0xf]  ;;  %v9621_v1 = vld [vmem:[#allocation2 + $0xa8c] sm:$0xf0]  ;;  %v7430_v5 = vor.u32 %v9589_v63, %v7429_v61  ;;  %4923 = vmatpush.bf16.msra.mxu3 %v7702_v62  ;;  %v69_v61 = vld [vmem:[%s10658_s0 + $0x28] sm:$0xff] }
  0x5e   :  { %v7685_v2 = vld [vmem:[#allocation2 + $0xb80] sm:$0xf]  ;;  %v9653_v3 = vld [vmem:[#allocation2 + $0xb8c] sm:$0xf0]  ;;  %v7558_v6 = vor.u32 %v9621_v1, %v7557_v0  ;;  %4885 = vmatpush.bf16.msra.mxu0 %v7302_v4 }
  0x5f   :  { %v7285_v7 = vld [vmem:[#allocation2 + $0x860] sm:$0xf]  ;;  %v9553_v8 = vld [vmem:[#allocation2 + $0x86c] sm:$0xf0]  ;;  %v7686_v10 = vor.u32 %v9653_v3, %v7685_v2 }
  0x60   :  { %v7413_v9 = vld [vmem:[#allocation2 + $0x960] sm:$0xf]  ;;  %v9585_v11 = vld [vmem:[#allocation2 + $0x96c] sm:$0xf0]  ;;  %v7286_v16 = vor.u32 %v9553_v8, %v7285_v7  ;;  %4898 = vmatpush.bf16.msra.mxu1 %v7430_v5  ;;  %4911 = vmatpush.bf16.msra.mxu2 %v7558_v6 }
  0x61   :  { %v7541_v12 = vld [vmem:[#allocation2 + $0xa60] sm:$0xf]  ;;  %v9617_v13 = vld [vmem:[#allocation2 + $0xa6c] sm:$0xf0]  ;;  %v7414_v17 = vor.u32 %v9585_v11, %v7413_v9  ;;  %4924 = vmatpush.bf16.msra.mxu3 %v7686_v10  ;;  %v876_v10 = vunpack.c.l.b16 %v69_v61 }
  0x62   :  { %v7669_v14 = vld [vmem:[#allocation2 + $0xb60] sm:$0xf]  ;;  %v9649_v15 = vld [vmem:[#allocation2 + $0xb6c] sm:$0xf0]  ;;  %v7542_v21 = vor.u32 %v9617_v13, %v7541_v12  ;;  %4886 = vmatpush.bf16.msra.mxu0 %v7286_v16 }
  0x63   :  { %v7269_v23 = vld [vmem:[#allocation2 + $0x840] sm:$0xf]  ;;  %v9549_v24 = vld [vmem:[#allocation2 + $0x84c] sm:$0xf0]  ;;  %v7670_v26 = vor.u32 %v9649_v15, %v7669_v14  ;;  %v877_v14 = vunpack.c.h.b16 %v69_v61 }
  0x64   :  { %v7397_v25 = vld [vmem:[#allocation2 + $0x940] sm:$0xf]  ;;  %v9581_v27 = vld [vmem:[#allocation2 + $0x94c] sm:$0xf0]  ;;  %v7270_v32 = vor.u32 %v9549_v24, %v7269_v23  ;;  %4899 = vmatpush.bf16.msra.mxu1 %v7414_v17  ;;  %4912 = vmatpush.bf16.msra.mxu2 %v7542_v21 }
  0x65   :  { %v7525_v28 = vld [vmem:[#allocation2 + $0xa40] sm:$0xf]  ;;  %v9613_v29 = vld [vmem:[#allocation2 + $0xa4c] sm:$0xf0]  ;;  %v7398_v34 = vor.u32 %v9581_v27, %v7397_v25  ;;  %4925 = vmatpush.bf16.msra.mxu3 %v7670_v26 }
  0x66   :  { %v7653_v30 = vld [vmem:[#allocation2 + $0xb40] sm:$0xf]  ;;  %v9645_v31 = vld [vmem:[#allocation2 + $0xb4c] sm:$0xf0]  ;;  %v7526_v35 = vor.u32 %v9613_v29, %v7525_v28  ;;  %4887 = vmatpush.bf16.msra.mxu0 %v7270_v32  ;;  %v10258_v29 = vpack.c.b16 %v876_v10, %v876_v10 }
  0x67   :  { %v7253_v33 = vld [vmem:[#allocation2 + $0x820] sm:$0xf]  ;;  %v9545_v36 = vld [vmem:[#allocation2 + $0x82c] sm:$0xf0]  ;;  %v7654_v40 = vor.u32 %v9645_v31, %v7653_v30 }
  0x68   :  { %v7381_v37 = vld [vmem:[#allocation2 + $0x920] sm:$0xf]  ;;  %v9577_v39 = vld [vmem:[#allocation2 + $0x92c] sm:$0xf0]  ;;  %v7254_v49 = vor.u32 %v9545_v36, %v7253_v33  ;;  %4900 = vmatpush.bf16.msra.mxu1 %v7398_v34  ;;  %4913 = vmatpush.bf16.msra.mxu2 %v7526_v35  ;;  %v10262_v33 = vpack.c.b16 %v877_v14, %v877_v14 }
  0x69   :  { %v7509_v43 = vld [vmem:[#allocation2 + $0xa20] sm:$0xf]  ;;  %v9609_v45 = vld [vmem:[#allocation2 + $0xa2c] sm:$0xf0]  ;;  %v7382_v53 = vor.u32 %v9577_v39, %v7381_v37  ;;  %4926 = vmatpush.bf16.msra.mxu3 %v7654_v40 }
  0x6a   :  { %v7637_v46 = vld [vmem:[#allocation2 + $0xb20] sm:$0xf]  ;;  %v9641_v47 = vld [vmem:[#allocation2 + $0xb2c] sm:$0xf0]  ;;  %v7510_v54 = vor.u32 %v9609_v45, %v7509_v43  ;;  %4888 = vmatpush.bf16.msra.mxu0 %v7254_v49 }
  0x6b   :  { %v7237_v48 = vld [vmem:[#allocation2 + $0x800] sm:$0xf]  ;;  %v9541_v50 = vld [vmem:[#allocation2 + $0x80c] sm:$0xf0]  ;;  %v7638_v58 = vor.u32 %v9641_v47, %v7637_v46 }
  0x6c   :  { %v7365_v51 = vld [vmem:[#allocation2 + $0x900] sm:$0xf]  ;;  %v9573_v52 = vld [vmem:[#allocation2 + $0x90c] sm:$0xf0]  ;;  %v7238_v1 = vor.u32 %v9541_v50, %v7237_v48  ;;  %4901 = vmatpush.bf16.msra.mxu1 %v7382_v53  ;;  %4914 = vmatpush.bf16.msra.mxu2 %v7510_v54 }
  0x6d   :  { %v7493_v55 = vld [vmem:[#allocation2 + $0xa00] sm:$0xf]  ;;  %v9605_v56 = vld [vmem:[#allocation2 + $0xa0c] sm:$0xf0]  ;;  %v7366_v6 = vor.u32 %v9573_v52, %v7365_v51  ;;  %4927 = vmatpush.bf16.msra.mxu3 %v7638_v58 }
  0x6e   :  { %v68_v57 = vld [vmem:[%s10658_s0 + $0x20] sm:$0xff]  ;;  %v9637_v60 = vld [vmem:[#allocation2 + $0xb0c] sm:$0xf0]  ;;  %v7494_v7 = vor.u32 %v9605_v56, %v7493_v55  ;;  %4889 = vmatpush.bf16.msra.mxu0 %v7238_v1 }
  0x6f   :  { %v7621_v59 = vld [vmem:[#allocation2 + $0xb00] sm:$0xf]  ;;  %v9697_v63 = vld [vmem:[#allocation2 + $0xcec] sm:$0xf0]  ;;  %v874_v5 = vunpack.c.l.b16 %v68_v57  ;;  %v875_v11 = vunpack.c.h.b16 %v68_v57 }
  0x70   :  { %v7861_v62 = vld [vmem:[#allocation2 + $0xce0] sm:$0xf]  ;;  %v9729_v2 = vld [vmem:[#allocation2 + $0xdec] sm:$0xf0]  ;;  %v7622_v12 = vor.u32 %v9637_v60, %v7621_v59  ;;  %4902 = vmatpush.bf16.msra.mxu1 %v7366_v6  ;;  %4915 = vmatpush.bf16.msra.mxu2 %v7494_v7 }
  0x71   :  { %v7989_v0 = vld [vmem:[#allocation2 + $0xde0] sm:$0xf]  ;;  %v9761_v4 = vld [vmem:[#allocation2 + $0xeec] sm:$0xf0]  ;;  %v7862_v13 = vor.u32 %v9697_v63, %v7861_v62  ;;  %v10256_v25 = vpack.c.b16 %v874_v5, %v874_v5  ;;  %v10260_v30 = vpack.c.b16 %v875_v11, %v875_v11 }
  0x72   :  { %v8117_v3 = vld [vmem:[#allocation2 + $0xee0] sm:$0xf]  ;;  %v9793_v9 = vld [vmem:[#allocation2 + $0xfec] sm:$0xf0]  ;;  %v7990_v15 = vor.u32 %v9729_v2, %v7989_v0  ;;  %4928 = vmatpush.bf16.msra.mxu3 %v7622_v12 }
  0x73   :  { %v8245_v8 = vld [vmem:[#allocation2 + $0xfe0] sm:$0xf]  ;;  %v8118_v16 = vor.u32 %v9761_v4, %v8117_v3  ;;  %v9693_v21 = vld [vmem:[#allocation2 + $0xccc] sm:$0xf0]  ;;  %4934 = vmatpush.bf16.msrb.mxu0 %v7862_v13  ;;  %4916 = vmatmul.bf16.vlgmr.msra.gmra.mxu2 %v10258_v29 }
  0x74   :  { %v7845_v17 = vld [vmem:[#allocation2 + $0xcc0] sm:$0xf]  ;;  %v8246_v24 = vor.u32 %v9793_v9, %v8245_v8  ;;  %v9725_v26 = vld [vmem:[#allocation2 + $0xdcc] sm:$0xf0]  ;;  %4947 = vmatpush.bf16.msrb.mxu1 %v7990_v15  ;;  %4890 = vmatmul.bf16.vlgmr.msra.gmra.mxu0 %v10256_v25 }
  0x75   :  { %v7973_v23 = vld [vmem:[#allocation2 + $0xdc0] sm:$0xf]  ;;  %v9757_v28 = vld [vmem:[#allocation2 + $0xecc] sm:$0xf0]  ;;  %v7846_v34 = vor.u32 %v9693_v21, %v7845_v17  ;;  %4960 = vmatpush.bf16.msrb.mxu2 %v8118_v16  ;;  %4903 = vmatmul.bf16.vlgmr.msra.gmra.mxu1 %v10260_v30 }
  0x76   :  { %v8101_v27 = vld [vmem:[#allocation2 + $0xec0] sm:$0xf]  ;;  %v9789_v32 = vld [vmem:[#allocation2 + $0xfcc] sm:$0xf0]  ;;  %v7974_v35 = vor.u32 %v9725_v26, %v7973_v23  ;;  %4973 = vmatpush.bf16.msrb.mxu3 %v8246_v24 }
  0x77   :  { %v8229_v31 = vld [vmem:[#allocation2 + $0xfc0] sm:$0xf]  ;;  %v8102_v36 = vor.u32 %v9757_v28, %v8101_v27  ;;  %v9689_v39 = vld [vmem:[#allocation2 + $0xcac] sm:$0xf0]  ;;  %4929 = vmatmul.bf16.vlgmr.msra.gmra.mxu3 %v10262_v33  ;;  %4935 = vmatpush.bf16.msrb.mxu0 %v7846_v34 }
  0x78   :  { %v7829_v37 = vld [vmem:[#allocation2 + $0xca0] sm:$0xf]  ;;  %v8230_v43 = vor.u32 %v9789_v32, %v8229_v31  ;;  %v9721_v45 = vld [vmem:[#allocation2 + $0xdac] sm:$0xf0]  ;;  %4948 = vmatpush.bf16.msrb.mxu1 %v7974_v35 }
  0x79   :  { %v7957_v40 = vld [vmem:[#allocation2 + $0xda0] sm:$0xf]  ;;  %v9753_v47 = vld [vmem:[#allocation2 + $0xeac] sm:$0xf0]  ;;  %v7830_v50 = vor.u32 %v9689_v39, %v7829_v37  ;;  %4961 = vmatpush.bf16.msrb.mxu2 %v8102_v36 }
  0x7a   :  { %v8085_v46 = vld [vmem:[#allocation2 + $0xea0] sm:$0xf]  ;;  %v9785_v49 = vld [vmem:[#allocation2 + $0xfac] sm:$0xf0]  ;;  %v7958_v51 = vor.u32 %v9721_v45, %v7957_v40  ;;  %4974 = vmatpush.bf16.msrb.mxu3 %v8230_v43 }
  0x7b   :  { %v8213_v48 = vld [vmem:[#allocation2 + $0xfa0] sm:$0xf]  ;;  %v8086_v52 = vor.u32 %v9753_v47, %v8085_v46  ;;  %v9685_v54 = vld [vmem:[#allocation2 + $0xc8c] sm:$0xf0]  ;;  %4936 = vmatpush.bf16.msrb.mxu0 %v7830_v50 }
  0x7c   :  { %v7813_v53 = vld [vmem:[#allocation2 + $0xc80] sm:$0xf]  ;;  %v8214_v56 = vor.u32 %v9785_v49, %v8213_v48  ;;  %v9717_v57 = vld [vmem:[#allocation2 + $0xd8c] sm:$0xf0]  ;;  %4949 = vmatpush.bf16.msrb.mxu1 %v7958_v51 }
  0x7d   :  { %v7941_v55 = vld [vmem:[#allocation2 + $0xd80] sm:$0xf]  ;;  %v9749_v59 = vld [vmem:[#allocation2 + $0xe8c] sm:$0xf0]  ;;  %v7814_v62 = vor.u32 %v9685_v54, %v7813_v53  ;;  %4962 = vmatpush.bf16.msrb.mxu2 %v8086_v52 }
  0x7e   :  { %v8069_v58 = vld [vmem:[#allocation2 + $0xe80] sm:$0xf]  ;;  %v9781_v61 = vld [vmem:[#allocation2 + $0xf8c] sm:$0xf0]  ;;  %v7942_v63 = vor.u32 %v9717_v57, %v7941_v55  ;;  %4975 = vmatpush.bf16.msrb.mxu3 %v8214_v56 }
  0x7f   :  { %v8197_v60 = vld [vmem:[#allocation2 + $0xf80] sm:$0xf]  ;;  %v8070_v0 = vor.u32 %v9749_v59, %v8069_v58  ;;  %v9681_v2 = vld [vmem:[#allocation2 + $0xc6c] sm:$0xf0]  ;;  %4937 = vmatpush.bf16.msrb.mxu0 %v7814_v62  ;;  %v71_v59 = vld [vmem:[%s10658_s0 + $0x38] sm:$0xff] }
  0x80   :  { %v7797_v1 = vld [vmem:[#allocation2 + $0xc60] sm:$0xf]  ;;  %v8198_v4 = vor.u32 %v9781_v61, %v8197_v60  ;;  %v9713_v5 = vld [vmem:[#allocation2 + $0xd6c] sm:$0xf0]  ;;  %4950 = vmatpush.bf16.msrb.mxu1 %v7942_v63 }
  0x81   :  { %v7925_v3 = vld [vmem:[#allocation2 + $0xd60] sm:$0xf]  ;;  %v9745_v7 = vld [vmem:[#allocation2 + $0xe6c] sm:$0xf0]  ;;  %v7798_v10 = vor.u32 %v9681_v2, %v7797_v1  ;;  %4963 = vmatpush.bf16.msrb.mxu2 %v8070_v0 }
  0x82   :  { %v8053_v6 = vld [vmem:[#allocation2 + $0xe60] sm:$0xf]  ;;  %v9777_v9 = vld [vmem:[#allocation2 + $0xf6c] sm:$0xf0]  ;;  %v7926_v11 = vor.u32 %v9713_v5, %v7925_v3  ;;  %4976 = vmatpush.bf16.msrb.mxu3 %v8198_v4 }
  0x83   :  { %v8181_v8 = vld [vmem:[#allocation2 + $0xf60] sm:$0xf]  ;;  %v8054_v12 = vor.u32 %v9745_v7, %v8053_v6  ;;  %v9677_v14 = vld [vmem:[#allocation2 + $0xc4c] sm:$0xf0]  ;;  %4938 = vmatpush.bf16.msrb.mxu0 %v7798_v10 }
  0x84   :  { %v7781_v13 = vld [vmem:[#allocation2 + $0xc40] sm:$0xf]  ;;  %v8182_v16 = vor.u32 %v9777_v9, %v8181_v8  ;;  %v9709_v17 = vld [vmem:[#allocation2 + $0xd4c] sm:$0xf0]  ;;  %4951 = vmatpush.bf16.msrb.mxu1 %v7926_v11  ;;  %v880_v8 = vunpack.c.l.b16 %v71_v59 }
  0x85   :  { %v7909_v15 = vld [vmem:[#allocation2 + $0xd40] sm:$0xf]  ;;  %v9741_v23 = vld [vmem:[#allocation2 + $0xe4c] sm:$0xf0]  ;;  %v7782_v27 = vor.u32 %v9677_v14, %v7781_v13  ;;  %4964 = vmatpush.bf16.msrb.mxu2 %v8054_v12  ;;  %v881_v12 = vunpack.c.h.b16 %v71_v59 }
  0x86   :  { %v8037_v21 = vld [vmem:[#allocation2 + $0xe40] sm:$0xf]  ;;  %v9773_v26 = vld [vmem:[#allocation2 + $0xf4c] sm:$0xf0]  ;;  %v7910_v28 = vor.u32 %v9709_v17, %v7909_v15  ;;  %4977 = vmatpush.bf16.msrb.mxu3 %v8182_v16 }
  0x87   :  { %v8165_v24 = vld [vmem:[#allocation2 + $0xf40] sm:$0xf]  ;;  %v8038_v31 = vor.u32 %v9741_v23, %v8037_v21  ;;  %v9673_v34 = vld [vmem:[#allocation2 + $0xc2c] sm:$0xf0]  ;;  %4939 = vmatpush.bf16.msrb.mxu0 %v7782_v27 }
  0x88   :  { %v7765_v32 = vld [vmem:[#allocation2 + $0xc20] sm:$0xf]  ;;  %v8166_v36 = vor.u32 %v9773_v26, %v8165_v24  ;;  %v9705_v37 = vld [vmem:[#allocation2 + $0xd2c] sm:$0xf0]  ;;  %4952 = vmatpush.bf16.msrb.mxu1 %v7910_v28  ;;  %v10276_v28 = vpack.c.b16 %v880_v8, %v880_v8 }
  0x89   :  { %v7893_v35 = vld [vmem:[#allocation2 + $0xd20] sm:$0xf]  ;;  %v9737_v40 = vld [vmem:[#allocation2 + $0xe2c] sm:$0xf0]  ;;  %v7766_v47 = vor.u32 %v9673_v34, %v7765_v32  ;;  %4965 = vmatpush.bf16.msrb.mxu2 %v8038_v31 }
  0x8a   :  { %v8021_v39 = vld [vmem:[#allocation2 + $0xe20] sm:$0xf]  ;;  %v9769_v45 = vld [vmem:[#allocation2 + $0xf2c] sm:$0xf0]  ;;  %v7894_v51 = vor.u32 %v9705_v37, %v7893_v35  ;;  %4978 = vmatpush.bf16.msrb.mxu3 %v8166_v36  ;;  %v10280_v35 = vpack.c.b16 %v881_v12, %v881_v12 }
  0x8b   :  { %v8149_v43 = vld [vmem:[#allocation2 + $0xf20] sm:$0xf]  ;;  %v9669_v48 = vld [vmem:[#allocation2 + $0xc0c] sm:$0xf0]  ;;  %v8022_v52 = vor.u32 %v9737_v40, %v8021_v39  ;;  %4940 = vmatpush.bf16.msrb.mxu0 %v7766_v47 }
  0x8c   :  { %v7749_v46 = vld [vmem:[#allocation2 + $0xc00] sm:$0xf]  ;;  %v9701_v50 = vld [vmem:[#allocation2 + $0xd0c] sm:$0xf0]  ;;  %v8150_v56 = vor.u32 %v9769_v45, %v8149_v43  ;;  %4953 = vmatpush.bf16.msrb.mxu1 %v7894_v51 }
  0x8d   :  { %v7877_v49 = vld [vmem:[#allocation2 + $0xd00] sm:$0xf]  ;;  %v9733_v54 = vld [vmem:[#allocation2 + $0xe0c] sm:$0xf0]  ;;  %v7750_v63 = vor.u32 %v9669_v48, %v7749_v46  ;;  %4966 = vmatpush.bf16.msrb.mxu2 %v8022_v52 }
  0x8e   :  { %v8005_v53 = vld [vmem:[#allocation2 + $0xe00] sm:$0xf]  ;;  %v70_v55 = vld [vmem:[%s10658_s0 + $0x30] sm:$0xff]  ;;  %v7878_v4 = vor.u32 %v9701_v50, %v7877_v49  ;;  %4979 = vmatpush.bf16.msrb.mxu3 %v8150_v56 }
  0x8f   :  { %v8133_v57 = vld [vmem:[#allocation2 + $0xf00] sm:$0xf]  ;;  %v9765_v58 = vld [vmem:[#allocation2 + $0xf0c] sm:$0xf0]  ;;  %v878_v3 = vunpack.c.l.b16 %v70_v55  ;;  %v8006_v5 = vor.u32 %v9733_v54, %v8005_v53  ;;  %v879_v9 = vunpack.c.h.b16 %v70_v55  ;;  %4941 = vmatpush.bf16.msrb.mxu0 %v7750_v63 }
  0x90   :  { %v8373_v60 = vld [vmem:[#allocation2 + $0x10e0] sm:$0xf]  ;;  %v9825_v61 = vld [vmem:[#allocation2 + $0x10ec] sm:$0xf0]  ;;  %v8134_v10 = vor.u32 %v9765_v58, %v8133_v57  ;;  %4954 = vmatpush.bf16.msrb.mxu1 %v7878_v4 }
  0x91   :  { %v8501_v62 = vld [vmem:[#allocation2 + $0x11e0] sm:$0xf]  ;;  %v9857_v0 = vld [vmem:[#allocation2 + $0x11ec] sm:$0xf0]  ;;  %v8374_v11 = vor.u32 %v9825_v61, %v8373_v60  ;;  %v10274_v23 = vpack.c.b16 %v878_v3, %v878_v3  ;;  %4967 = vmatpush.bf16.msrb.mxu2 %v8006_v5  ;;  %v10278_v31 = vpack.c.b16 %v879_v9, %v879_v9 }
  0x92   :  { %v8629_v1 = vld [vmem:[#allocation2 + $0x12e0] sm:$0xf]  ;;  %v9889_v2 = vld [vmem:[#allocation2 + $0x12ec] sm:$0xf0]  ;;  %v8502_v13 = vor.u32 %v9857_v0, %v8501_v62  ;;  %4980 = vmatpush.bf16.msrb.mxu3 %v8134_v10 }
  0x93   :  { %v8757_v6 = vld [vmem:[#allocation2 + $0x13e0] sm:$0xf]  ;;  %v9921_v7 = vld [vmem:[#allocation2 + $0x13ec] sm:$0xf0]  ;;  %v8630_v14 = vor.u32 %v9889_v2, %v8629_v1  ;;  %4986 = vmatpush.bf16.msra.mxu0 %v8374_v11  ;;  %4955 = vmatmul.bf16.vlgmr.msrb.gmra.mxu1 %v10278_v31 }
  0x94   :  { %v8357_v15 = vld [vmem:[#allocation2 + $0x10c0] sm:$0xf]  ;;  %v9821_v16 = vld [vmem:[#allocation2 + $0x10cc] sm:$0xf0]  ;;  %v8758_v21 = vor.u32 %v9921_v7, %v8757_v6  ;;  %4999 = vmatpush.bf16.msra.mxu1 %v8502_v13  ;;  %4942 = vmatmul.bf16.vlgmr.msrb.gmra.mxu0 %v10274_v23 }
  0x95   :  { %v8485_v17 = vld [vmem:[#allocation2 + $0x11c0] sm:$0xf]  ;;  %v9853_v24 = vld [vmem:[#allocation2 + $0x11cc] sm:$0xf0]  ;;  %v8358_v36 = vor.u32 %v9821_v16, %v8357_v15  ;;  %5012 = vmatpush.bf16.msra.mxu2 %v8630_v14  ;;  %4981 = vmatmul.bf16.vlgmr.msrb.gmra.mxu3 %v10280_v35 }
  0x96   :  { %v8613_v26 = vld [vmem:[#allocation2 + $0x12c0] sm:$0xf]  ;;  %v9885_v27 = vld [vmem:[#allocation2 + $0x12cc] sm:$0xf0]  ;;  %v8486_v37 = vor.u32 %v9853_v24, %v8485_v17  ;;  %5025 = vmatpush.bf16.msra.mxu3 %v8758_v21  ;;  %4968 = vmatmul.bf16.vlgmr.msrb.gmra.mxu2 %v10276_v28 }
  0x97   :  { %v8741_v32 = vld [vmem:[#allocation2 + $0x13c0] sm:$0xf]  ;;  %v9917_v34 = vld [vmem:[#allocation2 + $0x13cc] sm:$0xf0]  ;;  %v8614_v39 = vor.u32 %v9885_v27, %v8613_v26  ;;  %4987 = vmatpush.bf16.msra.mxu0 %v8358_v36 }
  0x98   :  { %v8341_v40 = vld [vmem:[#allocation2 + $0x10a0] sm:$0xf]  ;;  %v9817_v43 = vld [vmem:[#allocation2 + $0x10ac] sm:$0xf0]  ;;  %v8742_v46 = vor.u32 %v9917_v34, %v8741_v32  ;;  %5000 = vmatpush.bf16.msra.mxu1 %v8486_v37 }
  0x99   :  { %v8469_v45 = vld [vmem:[#allocation2 + $0x11a0] sm:$0xf]  ;;  %v9849_v47 = vld [vmem:[#allocation2 + $0x11ac] sm:$0xf0]  ;;  %v8342_v52 = vor.u32 %v9817_v43, %v8341_v40  ;;  %5013 = vmatpush.bf16.msra.mxu2 %v8614_v39 }
  0x9a   :  { %v8597_v48 = vld [vmem:[#allocation2 + $0x12a0] sm:$0xf]  ;;  %v9881_v49 = vld [vmem:[#allocation2 + $0x12ac] sm:$0xf0]  ;;  %v8470_v53 = vor.u32 %v9849_v47, %v8469_v45  ;;  %5026 = vmatpush.bf16.msra.mxu3 %v8742_v46 }
  0x9b   :  { %v8725_v50 = vld [vmem:[#allocation2 + $0x13a0] sm:$0xf]  ;;  %v9913_v51 = vld [vmem:[#allocation2 + $0x13ac] sm:$0xf0]  ;;  %v8598_v54 = vor.u32 %v9881_v49, %v8597_v48  ;;  %4988 = vmatpush.bf16.msra.mxu0 %v8342_v52 }
  0x9c   :  { %v8325_v55 = vld [vmem:[#allocation2 + $0x1080] sm:$0xf]  ;;  %v9813_v56 = vld [vmem:[#allocation2 + $0x108c] sm:$0xf0]  ;;  %v8726_v58 = vor.u32 %v9913_v51, %v8725_v50  ;;  %5001 = vmatpush.bf16.msra.mxu1 %v8470_v53 }
  0x9d   :  { %v8453_v57 = vld [vmem:[#allocation2 + $0x1180] sm:$0xf]  ;;  %v9845_v59 = vld [vmem:[#allocation2 + $0x118c] sm:$0xf0]  ;;  %v8326_v0 = vor.u32 %v9813_v56, %v8325_v55  ;;  %5014 = vmatpush.bf16.msra.mxu2 %v8598_v54 }
  0x9e   :  { %v8581_v60 = vld [vmem:[#allocation2 + $0x1280] sm:$0xf]  ;;  %v9877_v61 = vld [vmem:[#allocation2 + $0x128c] sm:$0xf0]  ;;  %v8454_v1 = vor.u32 %v9845_v59, %v8453_v57  ;;  %5027 = vmatpush.bf16.msra.mxu3 %v8726_v58 }
  0x9f   :  { %v8709_v62 = vld [vmem:[#allocation2 + $0x1380] sm:$0xf]  ;;  %v9909_v63 = vld [vmem:[#allocation2 + $0x138c] sm:$0xf0]  ;;  %v8582_v2 = vor.u32 %v9877_v61, %v8581_v60  ;;  %4989 = vmatpush.bf16.msra.mxu0 %v8326_v0 }
  0xa0   :  { %v8309_v3 = vld [vmem:[#allocation2 + $0x1060] sm:$0xf]  ;;  %v9809_v4 = vld [vmem:[#allocation2 + $0x106c] sm:$0xf0]  ;;  %v8710_v6 = vor.u32 %v9909_v63, %v8709_v62  ;;  %5002 = vmatpush.bf16.msra.mxu1 %v8454_v1  ;;  %v73_v1 = vld [vmem:[%s10658_s0 + $0x48] sm:$0xff] }
  0xa1   :  { %v8437_v5 = vld [vmem:[#allocation2 + $0x1160] sm:$0xf]  ;;  %v9841_v7 = vld [vmem:[#allocation2 + $0x116c] sm:$0xf0]  ;;  %v8310_v12 = vor.u32 %v9809_v4, %v8309_v3  ;;  %5015 = vmatpush.bf16.msra.mxu2 %v8582_v2 }
  0xa2   :  { %v8565_v8 = vld [vmem:[#allocation2 + $0x1260] sm:$0xf]  ;;  %v9873_v9 = vld [vmem:[#allocation2 + $0x126c] sm:$0xf0]  ;;  %v8438_v13 = vor.u32 %v9841_v7, %v8437_v5  ;;  %5028 = vmatpush.bf16.msra.mxu3 %v8710_v6 }
  0xa3   :  { %v8693_v10 = vld [vmem:[#allocation2 + $0x1360] sm:$0xf]  ;;  %v9905_v11 = vld [vmem:[#allocation2 + $0x136c] sm:$0xf0]  ;;  %v8566_v14 = vor.u32 %v9873_v9, %v8565_v8  ;;  %4990 = vmatpush.bf16.msra.mxu0 %v8310_v12 }
  0xa4   :  { %v8293_v15 = vld [vmem:[#allocation2 + $0x1040] sm:$0xf]  ;;  %v9805_v16 = vld [vmem:[#allocation2 + $0x104c] sm:$0xf0]  ;;  %v8694_v21 = vor.u32 %v9905_v11, %v8693_v10  ;;  %5003 = vmatpush.bf16.msra.mxu1 %v8438_v13 }
  0xa5   :  { %v8421_v17 = vld [vmem:[#allocation2 + $0x1140] sm:$0xf]  ;;  %v9837_v24 = vld [vmem:[#allocation2 + $0x114c] sm:$0xf0]  ;;  %v8294_v36 = vor.u32 %v9805_v16, %v8293_v15  ;;  %5016 = vmatpush.bf16.msra.mxu2 %v8566_v14  ;;  %v884_v14 = vunpack.c.l.b16 %v73_v1 }
  0xa6   :  { %v8549_v26 = vld [vmem:[#allocation2 + $0x1240] sm:$0xf]  ;;  %v9869_v27 = vld [vmem:[#allocation2 + $0x124c] sm:$0xf0]  ;;  %v8422_v37 = vor.u32 %v9837_v24, %v8421_v17  ;;  %5029 = vmatpush.bf16.msra.mxu3 %v8694_v21  ;;  %v885_v21 = vunpack.c.h.b16 %v73_v1 }
  0xa7   :  { %v8677_v32 = vld [vmem:[#allocation2 + $0x1340] sm:$0xf]  ;;  %v9901_v34 = vld [vmem:[#allocation2 + $0x134c] sm:$0xf0]  ;;  %v8550_v39 = vor.u32 %v9869_v27, %v8549_v26  ;;  %4991 = vmatpush.bf16.msra.mxu0 %v8294_v36 }
  0xa8   :  { %v8277_v40 = vld [vmem:[#allocation2 + $0x1020] sm:$0xf]  ;;  %v9801_v43 = vld [vmem:[#allocation2 + $0x102c] sm:$0xf0]  ;;  %v8678_v46 = vor.u32 %v9901_v34, %v8677_v32  ;;  %5004 = vmatpush.bf16.msra.mxu1 %v8422_v37 }
  0xa9   :  { %v8405_v45 = vld [vmem:[#allocation2 + $0x1120] sm:$0xf]  ;;  %v9833_v47 = vld [vmem:[#allocation2 + $0x112c] sm:$0xf0]  ;;  %v8278_v53 = vor.u32 %v9801_v43, %v8277_v40  ;;  %5017 = vmatpush.bf16.msra.mxu2 %v8550_v39 }
  0xaa   :  { %v8533_v48 = vld [vmem:[#allocation2 + $0x1220] sm:$0xf]  ;;  %v9865_v49 = vld [vmem:[#allocation2 + $0x122c] sm:$0xf0]  ;;  %v8406_v57 = vor.u32 %v9833_v47, %v8405_v45  ;;  %5030 = vmatpush.bf16.msra.mxu3 %v8678_v46  ;;  %v10294_v45 = vpack.c.b16 %v884_v14, %v884_v14 }
  0xab   :  { %v8661_v50 = vld [vmem:[#allocation2 + $0x1320] sm:$0xf]  ;;  %v9897_v51 = vld [vmem:[#allocation2 + $0x132c] sm:$0xf0]  ;;  %v8534_v58 = vor.u32 %v9865_v49, %v8533_v48  ;;  %4992 = vmatpush.bf16.msra.mxu0 %v8278_v53  ;;  %v10298_v49 = vpack.c.b16 %v885_v21, %v885_v21 }
  0xac   :  { %v8261_v52 = vld [vmem:[#allocation2 + $0x1000] sm:$0xf]  ;;  %v9797_v54 = vld [vmem:[#allocation2 + $0x100c] sm:$0xf0]  ;;  %v8662_v62 = vor.u32 %v9897_v51, %v8661_v50  ;;  %5005 = vmatpush.bf16.msra.mxu1 %v8406_v57 }
  0xad   :  { %v8389_v55 = vld [vmem:[#allocation2 + $0x1100] sm:$0xf]  ;;  %v9829_v56 = vld [vmem:[#allocation2 + $0x110c] sm:$0xf0]  ;;  %v8262_v5 = vor.u32 %v9797_v54, %v8261_v52  ;;  %5018 = vmatpush.bf16.msra.mxu2 %v8534_v58 }
  0xae   :  { %v8517_v59 = vld [vmem:[#allocation2 + $0x1200] sm:$0xf]  ;;  %v9861_v60 = vld [vmem:[#allocation2 + $0x120c] sm:$0xf0]  ;;  %v8390_v10 = vor.u32 %v9829_v56, %v8389_v55  ;;  %5031 = vmatpush.bf16.msra.mxu3 %v8662_v62 }
  0xaf   :  { %v72_v61 = vld [vmem:[%s10658_s0 + $0x40] sm:$0xff]  ;;  %v9893_v0 = vld [vmem:[#allocation2 + $0x130c] sm:$0xf0]  ;;  %v8518_v11 = vor.u32 %v9861_v60, %v8517_v59  ;;  %4993 = vmatpush.bf16.msra.mxu0 %v8262_v5 }
  0xb0   :  { %v8645_v63 = vld [vmem:[#allocation2 + $0x1300] sm:$0xf]  ;;  %v9953_v3 = vld [vmem:[#allocation2 + $0x14ec] sm:$0xf0]  ;;  %v882_v9 = vunpack.c.l.b16 %v72_v61  ;;  %v883_v15 = vunpack.c.h.b16 %v72_v61  ;;  %5006 = vmatpush.bf16.msra.mxu1 %v8390_v10 }
  0xb1   :  { %v8885_v2 = vld [vmem:[#allocation2 + $0x14e0] sm:$0xf]  ;;  %v9985_v6 = vld [vmem:[#allocation2 + $0x15ec] sm:$0xf0]  ;;  %v8646_v16 = vor.u32 %v9893_v0, %v8645_v63  ;;  %5019 = vmatpush.bf16.msra.mxu2 %v8518_v11 }
  0xb2   :  { %v9013_v4 = vld [vmem:[#allocation2 + $0x15e0] sm:$0xf]  ;;  %v10017_v8 = vld [vmem:[#allocation2 + $0x16ec] sm:$0xf0]  ;;  %v8886_v17 = vor.u32 %v9953_v3, %v8885_v2  ;;  %v10292_v37 = vpack.c.b16 %v882_v9, %v882_v9  ;;  %v10296_v46 = vpack.c.b16 %v883_v15, %v883_v15 }
  0xb3   :  { %v9141_v7 = vld [vmem:[#allocation2 + $0x16e0] sm:$0xf]  ;;  %v10049_v13 = vld [vmem:[#allocation2 + $0x17ec] sm:$0xf0]  ;;  %v9014_v24 = vor.u32 %v9985_v6, %v9013_v4  ;;  %5032 = vmatpush.bf16.msra.mxu3 %v8646_v16 }
  0xb4   :  { %v9269_v12 = vld [vmem:[#allocation2 + $0x17e0] sm:$0xf]  ;;  %v9142_v26 = vor.u32 %v10017_v8, %v9141_v7  ;;  %v9949_v32 = vld [vmem:[#allocation2 + $0x14cc] sm:$0xf0]  ;;  %5038 = vmatpush.bf16.msrb.mxu0 %v8886_v17  ;;  %5020 = vmatmul.bf16.vlgmr.msra.gmra.mxu2 %v10294_v45 }
  0xb5   :  { %v8869_v27 = vld [vmem:[#allocation2 + $0x14c0] sm:$0xf]  ;;  %v9270_v36 = vor.u32 %v10049_v13, %v9269_v12  ;;  %v9981_v39 = vld [vmem:[#allocation2 + $0x15cc] sm:$0xf0]  ;;  %5051 = vmatpush.bf16.msrb.mxu1 %v9014_v24  ;;  %4994 = vmatmul.bf16.vlgmr.msra.gmra.mxu0 %v10292_v37 }
  0xb6   :  { %v8997_v34 = vld [vmem:[#allocation2 + $0x15c0] sm:$0xf]  ;;  %v10013_v43 = vld [vmem:[#allocation2 + $0x16cc] sm:$0xf0]  ;;  %v8870_v50 = vor.u32 %v9949_v32, %v8869_v27  ;;  %5064 = vmatpush.bf16.msrb.mxu2 %v9142_v26  ;;  %5007 = vmatmul.bf16.vlgmr.msra.gmra.mxu1 %v10296_v46 }
  0xb7   :  { %v9125_v40 = vld [vmem:[#allocation2 + $0x16c0] sm:$0xf]  ;;  %v10045_v48 = vld [vmem:[#allocation2 + $0x17cc] sm:$0xf0]  ;;  %v8998_v51 = vor.u32 %v9981_v39, %v8997_v34  ;;  %5077 = vmatpush.bf16.msrb.mxu3 %v9270_v36 }
  0xb8   :  { %v9253_v47 = vld [vmem:[#allocation2 + $0x17c0] sm:$0xf]  ;;  %v9126_v52 = vor.u32 %v10013_v43, %v9125_v40  ;;  %v9945_v54 = vld [vmem:[#allocation2 + $0x14ac] sm:$0xf0]  ;;  %5033 = vmatmul.bf16.vlgmr.msra.gmra.mxu3 %v10298_v49  ;;  %5039 = vmatpush.bf16.msrb.mxu0 %v8870_v50 }
  0xb9   :  { %v8853_v53 = vld [vmem:[#allocation2 + $0x14a0] sm:$0xf]  ;;  %v9254_v56 = vor.u32 %v10045_v48, %v9253_v47  ;;  %v9977_v57 = vld [vmem:[#allocation2 + $0x15ac] sm:$0xf0]  ;;  %5052 = vmatpush.bf16.msrb.mxu1 %v8998_v51 }
  0xba   :  { %v8981_v55 = vld [vmem:[#allocation2 + $0x15a0] sm:$0xf]  ;;  %v10009_v59 = vld [vmem:[#allocation2 + $0x16ac] sm:$0xf0]  ;;  %v8854_v62 = vor.u32 %v9945_v54, %v8853_v53  ;;  %5065 = vmatpush.bf16.msrb.mxu2 %v9126_v52 }
  0xbb   :  { %v9109_v58 = vld [vmem:[#allocation2 + $0x16a0] sm:$0xf]  ;;  %v10041_v61 = vld [vmem:[#allocation2 + $0x17ac] sm:$0xf0]  ;;  %v8982_v63 = vor.u32 %v9977_v57, %v8981_v55  ;;  %5078 = vmatpush.bf16.msrb.mxu3 %v9254_v56 }
  0xbc   :  { %v9237_v60 = vld [vmem:[#allocation2 + $0x17a0] sm:$0xf]  ;;  %v9110_v0 = vor.u32 %v10009_v59, %v9109_v58  ;;  %v9941_v2 = vld [vmem:[#allocation2 + $0x148c] sm:$0xf0]  ;;  %5040 = vmatpush.bf16.msrb.mxu0 %v8854_v62  ;;  %v4787_v57 = vpop.f32.mrf.mxu0 }
  0xbd   :  { %v8837_v1 = vld [vmem:[#allocation2 + $0x1480] sm:$0xf]  ;;  %v9238_v4 = vor.u32 %v10041_v61, %v9237_v60  ;;  %v9973_v5 = vld [vmem:[#allocation2 + $0x158c] sm:$0xf0]  ;;  %5053 = vmatpush.bf16.msrb.mxu1 %v8982_v63 }
  0xbe   :  { %v8965_v3 = vld [vmem:[#allocation2 + $0x1580] sm:$0xf]  ;;  %v10005_v7 = vld [vmem:[#allocation2 + $0x168c] sm:$0xf0]  ;;  %v8838_v10 = vor.u32 %v9941_v2, %v8837_v1  ;;  %5066 = vmatpush.bf16.msrb.mxu2 %v9110_v0  ;;  %v4800_v0 = vpop.f32.mrf.mxu1 }
  0xbf   :  { %v9093_v6 = vld [vmem:[#allocation2 + $0x1680] sm:$0xf]  ;;  %v10037_v9 = vld [vmem:[#allocation2 + $0x178c] sm:$0xf0]  ;;  %v8966_v12 = vor.u32 %v9973_v5, %v8965_v3  ;;  %5079 = vmatpush.bf16.msrb.mxu3 %v9238_v4 }
  0xc0   :  { %v9221_v8 = vld [vmem:[#allocation2 + $0x1780] sm:$0xf]  ;;  %v9094_v13 = vor.u32 %v10005_v7, %v9093_v6  ;;  %v9937_v14 = vld [vmem:[#allocation2 + $0x146c] sm:$0xf0]  ;;  %5041 = vmatpush.bf16.msrb.mxu0 %v8838_v10 }
  0xc1   :  { %v8821_v11 = vld [vmem:[#allocation2 + $0x1460] sm:$0xf]  ;;  %v9969_v16 = vld [vmem:[#allocation2 + $0x156c] sm:$0xf0]  ;;  %v9222_v17 = vor.u32 %v10037_v9, %v9221_v8  ;;  %5054 = vmatpush.bf16.msrb.mxu1 %v8966_v12 }
  0xc2   :  { %v8949_v15 = vld [vmem:[#allocation2 + $0x1560] sm:$0xf]  ;;  %v10001_v24 = vld [vmem:[#allocation2 + $0x166c] sm:$0xf0]  ;;  %v8822_v34 = vor.u32 %v9937_v14, %v8821_v11  ;;  %5067 = vmatpush.bf16.msrb.mxu2 %v9094_v13 }
  0xc3   :  { %v9077_v21 = vld [vmem:[#allocation2 + $0x1660] sm:$0xf]  ;;  %v10033_v32 = vld [vmem:[#allocation2 + $0x176c] sm:$0xf0]  ;;  %v8950_v39 = vor.u32 %v9969_v16, %v8949_v15  ;;  %5080 = vmatpush.bf16.msrb.mxu3 %v9222_v17 }
  0xc4   :  { %v844_v26 = vld [vmem:[#allocation5] sm:$0xf]  ;;  %v9078_v40 = vor.u32 %v10001_v24, %v9077_v21  ;;  %v9933_v43 = vld [vmem:[#allocation2 + $0x144c] sm:$0xf0]  ;;  %5042 = vmatpush.bf16.msrb.mxu0 %v8822_v34  ;;  %v4813_v21 = vpop.f32.mrf.mxu2 }
  0xc5   :  { %v9205_v27 = vld [vmem:[#allocation2 + $0x1760] sm:$0xf]  ;;  %v846_v48 = vperm.slane %v844_v26, 0  ;;  %v9965_v51 = vld [vmem:[#allocation2 + $0x154c] sm:$0xf0]  ;;  %5055 = vmatpush.bf16.msrb.mxu1 %v8950_v39 }
  0xc6   :  { %v8805_v36 = vld [vmem:[#allocation2 + $0x1440] sm:$0xf]  ;;  %v9206_v50 = vor.u32 %v10033_v32, %v9205_v27  ;;  %v9997_v53 = vld [vmem:[#allocation2 + $0x164c] sm:$0xf0]  ;;  %5068 = vmatpush.bf16.msrb.mxu2 %v9078_v40  ;;  %v75_v32 = vld [vmem:[%s10658_s0 + $0x58] sm:$0xff] }
  0xc7   :  { %v8933_v47 = vld [vmem:[#allocation2 + $0x1540] sm:$0xf]  ;;  %v10029_v55 = vld [vmem:[#allocation2 + $0x174c] sm:$0xf0]  ;;  %v8806_v56 = vor.u32 %v9933_v43, %v8805_v36  ;;  %v4788_v63 = vadd.f32 %v4787_v57, %v846_v48  ;;  %v4826_v36 = vpop.f32.mrf.mxu3  ;;  %v9311_v39 = vld [vmem:[#allocation2 + $0xe4] sm:$0xf] }
  0xc8   :  { %v9061_v52 = vld [vmem:[#allocation2 + $0x1640] sm:$0xf]  ;;  %v8934_v58 = vor.u32 %v9965_v51, %v8933_v47  ;;  %v9929_v61 = vld [vmem:[#allocation2 + $0x142c] sm:$0xf0]  ;;  %5081 = vmatpush.bf16.msrb.mxu3 %v9206_v50  ;;  %v6327_v40 = vld [vmem:[#allocation2 + $0xf0] sm:$0xf0] }
  0xc9   :  { %v9189_v54 = vld [vmem:[#allocation2 + $0x1740] sm:$0xf]  ;;  %v9062_v59 = vor.u32 %v9997_v53, %v9061_v52  ;;  %v9961_v2 = vld [vmem:[#allocation2 + $0x152c] sm:$0xf0]  ;;  %v4801_v8 = vadd.f32 %v4800_v0, %v4788_v63  ;;  %5043 = vmatpush.bf16.msrb.mxu0 %v8806_v56  ;;  %v9343_v43 = vld [vmem:[#allocation2 + $0x1e4] sm:$0xf]  ;;  %v6330_v63 = vor.u32 %v9311_v39, %v6327_v40  ;;  %v889_v0 = vunpack.c.h.b16 %v75_v32 }
  0xca   :  { %v8789_v60 = vld [vmem:[#allocation2 + $0x1420] sm:$0xf]  ;;  %v9190_v1 = vor.u32 %v10029_v55, %v9189_v54  ;;  %v9993_v4 = vld [vmem:[#allocation2 + $0x162c] sm:$0xf0]  ;;  %5056 = vmatpush.bf16.msrb.mxu1 %v8934_v58  ;;  %v6455_v48 = vld [vmem:[#allocation2 + $0x1f0] sm:$0xf0]  ;;  %v4789_v54 = vpop.f32.mrf.mxu0 }
  0xcb   :  { %v8917_v62 = vld [vmem:[#allocation2 + $0x1520] sm:$0xf]  ;;  %v10025_v6 = vld [vmem:[#allocation2 + $0x172c] sm:$0xf0]  ;;  %v8790_v9 = vor.u32 %v9929_v61, %v8789_v60  ;;  %5069 = vmatpush.bf16.msrb.mxu2 %v9062_v59  ;;  %v4814_v34 = vadd.f32 %v4813_v21, %v4801_v8  ;;  %v9375_v50 = vld [vmem:[#allocation2 + $0x2e4] sm:$0xf]  ;;  %v888_v59 = vunpack.c.l.b16 %v75_v32  ;;  %v4802_v61 = vpop.f32.mrf.mxu1 }
  0xcc   :  { %v9045_v3 = vld [vmem:[#allocation2 + $0x1620] sm:$0xf]  ;;  %v9925_v10 = vld [vmem:[#allocation2 + $0x140c] sm:$0xf0]  ;;  %v8918_v13 = vor.u32 %v9961_v2, %v8917_v62  ;;  %5082 = vmatpush.bf16.msrb.mxu3 %v9190_v1  ;;  %v6583_v51 = vld [vmem:[#allocation2 + $0x2f0] sm:$0xf0]  ;;  %v6458_v1 = vor.u32 %v9343_v43, %v6455_v48 }
  0xcd   :  { %v9173_v5 = vld [vmem:[#allocation2 + $0x1720] sm:$0xf]  ;;  %v9957_v12 = vld [vmem:[#allocation2 + $0x150c] sm:$0xf0]  ;;  %v9046_v14 = vor.u32 %v9993_v4, %v9045_v3  ;;  %5044 = vmatpush.bf16.msrb.mxu0 %v8790_v9  ;;  %v10310_v53 = vadd.f32 %v4826_v36, %v4814_v34  ;;  %v9407_v57 = vld [vmem:[#allocation2 + $0x3e4] sm:$0xf]  ;;  %v6586_v2 = vor.u32 %v9375_v50, %v6583_v51 }
  0xce   :  { %v8773_v7 = vld [vmem:[#allocation2 + $0x1400] sm:$0xf]  ;;  %v9989_v16 = vld [vmem:[#allocation2 + $0x160c] sm:$0xf0]  ;;  %v9174_v24 = vor.u32 %v10025_v6, %v9173_v5  ;;  %5057 = vmatpush.bf16.msrb.mxu1 %v8918_v13  ;;  %v6711_v58 = vld [vmem:[#allocation2 + $0x3f0] sm:$0xf0] }
  0xcf   :  { %v8901_v11 = vld [vmem:[#allocation2 + $0x1500] sm:$0xf]  ;;  %v74_v17 = vld [vmem:[%s10658_s0 + $0x50] sm:$0xff]  ;;  %v8774_v47 = vor.u32 %v9925_v10, %v8773_v7  ;;  %5070 = vmatpush.bf16.msrb.mxu2 %v9046_v14  ;;  %v9307_v3 = vld [vmem:[#allocation2 + $0xc4] sm:$0xf]  ;;  %v6714_v6 = vor.u32 %v9407_v57, %v6711_v58  ;;  %v4828_v21 = vpop.f32.mrf.mxu3 }
  0xd0   :  { %v9029_v15 = vld [vmem:[#allocation2 + $0x1600] sm:$0xf]  ;;  %v10021_v27 = vld [vmem:[#allocation2 + $0x170c] sm:$0xf0]  ;;  %v886_v52 = vunpack.c.l.b16 %v74_v17  ;;  %v8902_v55 = vor.u32 %v9957_v12, %v8901_v11  ;;  %v887_v60 = vunpack.c.h.b16 %v74_v17  ;;  %5083 = vmatpush.bf16.msrb.mxu3 %v9174_v24  ;;  %v6311_v4 = vld [vmem:[#allocation2 + $0xd0] sm:$0xf0]  ;;  %v10314_v11 = vpack.c.b16 %v888_v59, %v888_v59 }
  0xd1   :  { %v9157_v26 = vld [vmem:[#allocation2 + $0x1700] sm:$0xf]  ;;  %v9030_v56 = vor.u32 %v9989_v16, %v9029_v15  ;;  %v9339_v5 = vld [vmem:[#allocation2 + $0x1c4] sm:$0xf]  ;;  %5045 = vmatpush.bf16.msrb.mxu0 %v8774_v47  ;;  %v6439_v8 = vld [vmem:[#allocation2 + $0x1d0] sm:$0xf0]  ;;  %v4815_v15 = vpop.f32.mrf.mxu2  ;;  %v10318_v16 = vpack.c.b16 %v889_v0, %v889_v0  ;;  %v6314_v17 = vor.u32 %v9307_v3, %v6311_v4 }
  0xd2   :  { %v9158_v62 = vor.u32 %v10021_v27, %v9157_v26  ;;  %v10312_v7 = vpack.c.b16 %v886_v52, %v886_v52  ;;  %v9371_v9 = vld [vmem:[#allocation2 + $0x2c4] sm:$0xf]  ;;  %v6567_v10 = vld [vmem:[#allocation2 + $0x2d0] sm:$0xf0]  ;;  %5058 = vmatpush.bf16.msrb.mxu1 %v8902_v55  ;;  %v10316_v12 = vpack.c.b16 %v887_v60, %v887_v60  ;;  %v6442_v24 = vor.u32 %v9339_v5, %v6439_v8  ;;  %v4839_v0 = vpop.f32.mrf.mxu0 }
  0xd3   :  { %5071 = vmatpush.bf16.msrb.mxu2 %v9030_v56  ;;  %v9403_v13 = vld [vmem:[#allocation2 + $0x3c4] sm:$0xf]  ;;  %v6695_v14 = vld [vmem:[#allocation2 + $0x3d0] sm:$0xf0]  ;;  %v6570_v26 = vor.u32 %v9371_v9, %v6567_v10  ;;  %v4852_v8 = vpop.f32.mrf.mxu1 }
  0xd4   :  { %5084 = vmatpush.bf16.msrb.mxu3 %v9158_v62  ;;  %v9303_v27 = vld [vmem:[#allocation2 + $0xa4] sm:$0xf]  ;;  %v6295_v32 = vld [vmem:[#allocation2 + $0xb0] sm:$0xf0]  ;;  %5046 = vmatmul.bf16.vlgmr.msrb.gmra.mxu0 %v10312_v7  ;;  %v6698_v36 = vor.u32 %v9403_v13, %v6695_v14 }
  0xd5   :  { %5090 = vmatpush.bf16.msra.mxu0 %v6330_v63  ;;  %v9335_v34 = vld [vmem:[#allocation2 + $0x1a4] sm:$0xf]  ;;  %v6423_v39 = vld [vmem:[#allocation2 + $0x1b0] sm:$0xf0]  ;;  %5059 = vmatmul.bf16.vlgmr.msrb.gmra.mxu1 %v10316_v12  ;;  %v6298_v50 = vor.u32 %v9303_v27, %v6295_v32 }
  0xd6   :  { %5103 = vmatpush.bf16.msra.mxu1 %v6458_v1  ;;  %v9367_v40 = vld [vmem:[#allocation2 + $0x2a4] sm:$0xf]  ;;  %v6551_v43 = vld [vmem:[#allocation2 + $0x2b0] sm:$0xf0]  ;;  %5072 = vmatmul.bf16.vlgmr.msrb.gmra.mxu2 %v10314_v11  ;;  %v6426_v51 = vor.u32 %v9335_v34, %v6423_v39 }
  0xd7   :  { %5116 = vmatpush.bf16.msra.mxu2 %v6586_v2  ;;  %v9399_v47 = vld [vmem:[#allocation2 + $0x3a4] sm:$0xf]  ;;  %v6679_v48 = vld [vmem:[#allocation2 + $0x3b0] sm:$0xf0]  ;;  %5085 = vmatmul.bf16.vlgmr.msrb.gmra.mxu3 %v10318_v16  ;;  %v6554_v52 = vor.u32 %v9367_v40, %v6551_v43 }
  0xd8   :  { %5129 = vmatpush.bf16.msra.mxu3 %v6714_v6  ;;  %v9299_v54 = vld [vmem:[#allocation2 + $0x84] sm:$0xf]  ;;  %v6279_v55 = vld [vmem:[#allocation2 + $0x90] sm:$0xf0]  ;;  %v6682_v57 = vor.u32 %v9399_v47, %v6679_v48  ;;  %v4840_v6 = vadd.f32 %v4839_v0, %v10310_v53 }
  0xd9   :  { %5091 = vmatpush.bf16.msra.mxu0 %v6314_v17  ;;  %v9331_v56 = vld [vmem:[#allocation2 + $0x184] sm:$0xf]  ;;  %v6407_v58 = vld [vmem:[#allocation2 + $0x190] sm:$0xf0]  ;;  %v6282_v63 = vor.u32 %v9299_v54, %v6279_v55  ;;  %v4865_v39 = vpop.f32.mrf.mxu2 }
  0xda   :  { %5104 = vmatpush.bf16.msra.mxu1 %v6442_v24  ;;  %v9363_v59 = vld [vmem:[#allocation2 + $0x284] sm:$0xf]  ;;  %v6535_v60 = vld [vmem:[#allocation2 + $0x290] sm:$0xf0]  ;;  %v6410_v1 = vor.u32 %v9331_v56, %v6407_v58  ;;  %v4853_v21 = vadd.f32 %v4852_v8, %v4840_v6  ;;  %v4841_v56 = vpop.f32.mrf.mxu0 }
  0xdb   :  { %5117 = vmatpush.bf16.msra.mxu2 %v6570_v26  ;;  %v9395_v61 = vld [vmem:[#allocation2 + $0x384] sm:$0xf]  ;;  %v6663_v62 = vld [vmem:[#allocation2 + $0x390] sm:$0xf0]  ;;  %v6538_v2 = vor.u32 %v9363_v59, %v6535_v60 }
  0xdc   :  { %5130 = vmatpush.bf16.msra.mxu3 %v6698_v36  ;;  %v9295_v3 = vld [vmem:[#allocation2 + $0x64] sm:$0xf]  ;;  %v6263_v4 = vld [vmem:[#allocation2 + $0x70] sm:$0xf0]  ;;  %v6666_v9 = vor.u32 %v9395_v61, %v6663_v62  ;;  %v4866_v48 = vadd.f32 %v4865_v39, %v4853_v21  ;;  %v4854_v62 = vpop.f32.mrf.mxu1 }
  0xdd   :  { %5092 = vmatpush.bf16.msra.mxu0 %v6298_v50  ;;  %v9327_v5 = vld [vmem:[#allocation2 + $0x164] sm:$0xf]  ;;  %v6391_v10 = vld [vmem:[#allocation2 + $0x170] sm:$0xf0]  ;;  %v6266_v24 = vor.u32 %v9295_v3, %v6263_v4  ;;  %v4878_v50 = vpop.f32.mrf.mxu3 }
  0xde   :  { %5105 = vmatpush.bf16.msra.mxu1 %v6426_v51  ;;  %v9359_v13 = vld [vmem:[#allocation2 + $0x264] sm:$0xf]  ;;  %v6519_v14 = vld [vmem:[#allocation2 + $0x270] sm:$0xf0]  ;;  %v6394_v26 = vor.u32 %v9327_v5, %v6391_v10  ;;  %v10325_v55 = vadd.f32 %v4878_v50, %v4866_v48 }
  0xdf   :  { %5118 = vmatpush.bf16.msra.mxu2 %v6554_v52  ;;  %v9391_v15 = vld [vmem:[#allocation2 + $0x364] sm:$0xf]  ;;  %v6647_v17 = vld [vmem:[#allocation2 + $0x370] sm:$0xf0]  ;;  %v6522_v27 = vor.u32 %v9359_v13, %v6519_v14 }
  0xe0   :  { %5131 = vmatpush.bf16.msra.mxu3 %v6682_v57  ;;  %v9291_v32 = vld [vmem:[#allocation2 + $0x44] sm:$0xf]  ;;  %v6247_v34 = vld [vmem:[#allocation2 + $0x50] sm:$0xf0]  ;;  %v6650_v53 = vor.u32 %v9391_v15, %v6647_v17 }
  0xe1   :  { %5093 = vmatpush.bf16.msra.mxu0 %v6282_v63  ;;  %v9323_v36 = vld [vmem:[#allocation2 + $0x144] sm:$0xf]  ;;  %v6375_v40 = vld [vmem:[#allocation2 + $0x150] sm:$0xf0]  ;;  %v6250_v54 = vor.u32 %v9291_v32, %v6247_v34  ;;  %v4867_v17 = vpop.f32.mrf.mxu2 }
  0xe2   :  { %5106 = vmatpush.bf16.msra.mxu1 %v6410_v1  ;;  %v9355_v43 = vld [vmem:[#allocation2 + $0x244] sm:$0xf]  ;;  %v6503_v47 = vld [vmem:[#allocation2 + $0x250] sm:$0xf0]  ;;  %v6378_v57 = vor.u32 %v9323_v36, %v6375_v40 }
  0xe3   :  { %5119 = vmatpush.bf16.msra.mxu2 %v6538_v2  ;;  %v9387_v51 = vld [vmem:[#allocation2 + $0x344] sm:$0xf]  ;;  %v6631_v52 = vld [vmem:[#allocation2 + $0x350] sm:$0xf0]  ;;  %v6506_v58 = vor.u32 %v9355_v43, %v6503_v47 }
  0xe4   :  { %5132 = vmatpush.bf16.msra.mxu3 %v6666_v9  ;;  %v9287_v59 = vld [vmem:[#allocation2 + $0x24] sm:$0xf]  ;;  %v6231_v60 = vld [vmem:[#allocation2 + $0x30] sm:$0xf0]  ;;  %v6634_v63 = vor.u32 %v9387_v51, %v6631_v52 }
  0xe5   :  { %5094 = vmatpush.bf16.msra.mxu0 %v6266_v24  ;;  %v9319_v61 = vld [vmem:[#allocation2 + $0x124] sm:$0xf]  ;;  %v6359_v0 = vld [vmem:[#allocation2 + $0x130] sm:$0xf0]  ;;  %v6234_v5 = vor.u32 %v9287_v59, %v6231_v60  ;;  %v4880_v32 = vpop.f32.mrf.mxu3 }
  0xe6   :  { %5107 = vmatpush.bf16.msra.mxu1 %v6394_v26  ;;  %v9351_v1 = vld [vmem:[#allocation2 + $0x224] sm:$0xf]  ;;  %v6487_v2 = vld [vmem:[#allocation2 + $0x230] sm:$0xf0]  ;;  %v6362_v9 = vor.u32 %v9319_v61, %v6359_v0 }
  0xe7   :  { %5120 = vmatpush.bf16.msra.mxu2 %v6522_v27  ;;  %v9383_v3 = vld [vmem:[#allocation2 + $0x324] sm:$0xf]  ;;  %v6615_v4 = vld [vmem:[#allocation2 + $0x330] sm:$0xf0]  ;;  %v6490_v10 = vor.u32 %v9351_v1, %v6487_v2 }
  0xe8   :  { %5133 = vmatpush.bf16.msra.mxu3 %v6650_v53  ;;  %v9283_v6 = vld [vmem:[#allocation2 + $0x4] sm:$0xf]  ;;  %v6215_v8 = vld [vmem:[#allocation2 + $0x10] sm:$0xf0]  ;;  %v6618_v21 = vor.u32 %v9383_v3, %v6615_v4 }
  0xe9   :  { %5095 = vmatpush.bf16.msra.mxu0 %v6250_v54  ;;  %v9315_v13 = vld [vmem:[#allocation2 + $0x104] sm:$0xf]  ;;  %v6343_v14 = vld [vmem:[#allocation2 + $0x110] sm:$0xf0]  ;;  %v6218_v53 = vor.u32 %v9283_v6, %v6215_v8 }
  0xea   :  { %5108 = vmatpush.bf16.msra.mxu1 %v6378_v57  ;;  %v9347_v15 = vld [vmem:[#allocation2 + $0x204] sm:$0xf]  ;;  %v6471_v24 = vld [vmem:[#allocation2 + $0x210] sm:$0xf0]  ;;  %v6346_v48 = vor.u32 %v9315_v13, %v6343_v14 }
  0xeb   :  { %5121 = vmatpush.bf16.msra.mxu2 %v6506_v58  ;;  %v9379_v26 = vld [vmem:[#allocation2 + $0x304] sm:$0xf]  ;;  %v6599_v27 = vld [vmem:[#allocation2 + $0x310] sm:$0xf0]  ;;  %v6474_v50 = vor.u32 %v9347_v15, %v6471_v24 }
  0xec   :  { %5134 = vmatpush.bf16.msra.mxu3 %v6634_v63  ;;  %v9439_v34 = vld [vmem:[#allocation2 + $0x4e4] sm:$0xf]  ;;  %v6839_v36 = vld [vmem:[#allocation2 + $0x4f0] sm:$0xf0]  ;;  %v6602_v54 = vor.u32 %v9379_v26, %v6599_v27 }
  0xed   :  { %v9471_v39 = vld [vmem:[#allocation2 + $0x5e4] sm:$0xf]  ;;  %5096 = vmatpush.bf16.msra.mxu0 %v6234_v5  ;;  %v6967_v40 = vld [vmem:[#allocation2 + $0x5f0] sm:$0xf0]  ;;  %v6842_v56 = vor.u32 %v9439_v34, %v6839_v36 }
  0xee   :  { %v9503_v43 = vld [vmem:[#allocation2 + $0x6e4] sm:$0xf]  ;;  %v7095_v47 = vld [vmem:[#allocation2 + $0x6f0] sm:$0xf0]  ;;  %5109 = vmatpush.bf16.msra.mxu1 %v6362_v9  ;;  %v6970_v57 = vor.u32 %v9471_v39, %v6967_v40 }
  0xef   :  { %5122 = vmatpush.bf16.msra.mxu2 %v6490_v10  ;;  %v9535_v51 = vld [vmem:[#allocation2 + $0x7e4] sm:$0xf]  ;;  %v7223_v52 = vld [vmem:[#allocation2 + $0x7f0] sm:$0xf0]  ;;  %v7098_v58 = vor.u32 %v9503_v43, %v7095_v47 }
  0xf0   :  { %5135 = vmatpush.bf16.msra.mxu3 %v6618_v21  ;;  %v9435_v59 = vld [vmem:[#allocation2 + $0x4c4] sm:$0xf]  ;;  %v6823_v60 = vld [vmem:[#allocation2 + $0x4d0] sm:$0xf0]  ;;  %v7226_v62 = vor.u32 %v9535_v51, %v7223_v52 }
  0xf1   :  { %v9467_v61 = vld [vmem:[#allocation2 + $0x5c4] sm:$0xf]  ;;  %5097 = vmatpush.bf16.msra.mxu0 %v6218_v53  ;;  %v6951_v63 = vld [vmem:[#allocation2 + $0x5d0] sm:$0xf0]  ;;  %v6826_v4 = vor.u32 %v9435_v59, %v6823_v60 }
  0xf2   :  { %v9499_v0 = vld [vmem:[#allocation2 + $0x6c4] sm:$0xf]  ;;  %v7079_v1 = vld [vmem:[#allocation2 + $0x6d0] sm:$0xf0]  ;;  %5110 = vmatpush.bf16.msra.mxu1 %v6346_v48  ;;  %v6954_v5 = vor.u32 %v9467_v61, %v6951_v63  ;;  %v4891_v48 = vpop.f32.mrf.mxu0 }
  0xf3   :  { %5123 = vmatpush.bf16.msra.mxu2 %v6474_v50  ;;  %v9531_v2 = vld [vmem:[#allocation2 + $0x7c4] sm:$0xf]  ;;  %v7207_v3 = vld [vmem:[#allocation2 + $0x7d0] sm:$0xf0]  ;;  %v7082_v6 = vor.u32 %v9499_v0, %v7079_v1  ;;  %v4892_v52 = vadd.f32 %v4891_v48, %v10325_v55 }
  0xf4   :  { %5136 = vmatpush.bf16.msra.mxu3 %v6602_v54  ;;  %v9431_v8 = vld [vmem:[#allocation2 + $0x4a4] sm:$0xf]  ;;  %v6807_v9 = vld [vmem:[#allocation2 + $0x4b0] sm:$0xf0]  ;;  %v7210_v13 = vor.u32 %v9531_v2, %v7207_v3  ;;  %5098 = vmatmul.bf16.vlgmr.msra.gmra.mxu0 %v10222_v19 }
  0xf5   :  { %5142 = vmatpush.bf16.msrb.mxu0 %v6842_v56  ;;  %v9463_v10 = vld [vmem:[#allocation2 + $0x5a4] sm:$0xf]  ;;  %v6935_v14 = vld [vmem:[#allocation2 + $0x5b0] sm:$0xf0]  ;;  %v6810_v26 = vor.u32 %v9431_v8, %v6807_v9  ;;  %5111 = vmatmul.bf16.vlgmr.msra.gmra.mxu1 %v10226_v22  ;;  %v4904_v56 = vpop.f32.mrf.mxu1 }
  0xf6   :  { %5155 = vmatpush.bf16.msrb.mxu1 %v6970_v57  ;;  %v9495_v15 = vld [vmem:[#allocation2 + $0x6a4] sm:$0xf]  ;;  %v7063_v17 = vld [vmem:[#allocation2 + $0x6b0] sm:$0xf0]  ;;  %5124 = vmatmul.bf16.vlgmr.msra.gmra.mxu2 %v10220_v18  ;;  %v6938_v27 = vor.u32 %v9463_v10, %v6935_v14  ;;  %v4905_v63 = vadd.f32 %v4904_v56, %v4892_v52  ;;  %v4917_v14 = vpop.f32.mrf.mxu2 }
  0xf7   :  { %5168 = vmatpush.bf16.msrb.mxu2 %v7098_v58  ;;  %v9527_v21 = vld [vmem:[#allocation2 + $0x7a4] sm:$0xf]  ;;  %v7191_v24 = vld [vmem:[#allocation2 + $0x7b0] sm:$0xf0]  ;;  %5137 = vmatmul.bf16.vlgmr.msra.gmra.mxu3 %v10224_v20  ;;  %v7066_v32 = vor.u32 %v9495_v15, %v7063_v17 }
  0xf8   :  { %5181 = vmatpush.bf16.msrb.mxu3 %v7226_v62  ;;  %v9427_v34 = vld [vmem:[#allocation2 + $0x484] sm:$0xf]  ;;  %v6791_v36 = vld [vmem:[#allocation2 + $0x490] sm:$0xf0]  ;;  %v7194_v53 = vor.u32 %v9527_v21, %v7191_v24  ;;  %v4918_v24 = vadd.f32 %v4917_v14, %v4905_v63 }
  0xf9   :  { %5143 = vmatpush.bf16.msrb.mxu0 %v6826_v4  ;;  %v9459_v39 = vld [vmem:[#allocation2 + $0x584] sm:$0xf]  ;;  %v6919_v40 = vld [vmem:[#allocation2 + $0x590] sm:$0xf0]  ;;  %v6794_v54 = vor.u32 %v9427_v34, %v6791_v36 }
  0xfa   :  { %5156 = vmatpush.bf16.msrb.mxu1 %v6954_v5  ;;  %v9491_v43 = vld [vmem:[#allocation2 + $0x684] sm:$0xf]  ;;  %v7047_v47 = vld [vmem:[#allocation2 + $0x690] sm:$0xf0]  ;;  %v6922_v57 = vor.u32 %v9459_v39, %v6919_v40  ;;  %v4893_v34 = vpop.f32.mrf.mxu0 }
  0xfb   :  { %5169 = vmatpush.bf16.msrb.mxu2 %v7082_v6  ;;  %v9523_v50 = vld [vmem:[#allocation2 + $0x784] sm:$0xf]  ;;  %v7175_v51 = vld [vmem:[#allocation2 + $0x790] sm:$0xf0]  ;;  %v7050_v58 = vor.u32 %v9491_v43, %v7047_v47 }
  0xfc   :  { %5182 = vmatpush.bf16.msrb.mxu3 %v7210_v13  ;;  %v9423_v59 = vld [vmem:[#allocation2 + $0x464] sm:$0xf]  ;;  %v6775_v60 = vld [vmem:[#allocation2 + $0x470] sm:$0xf0]  ;;  %v7178_v62 = vor.u32 %v9523_v50, %v7175_v51 }
  0xfd   :  { %5144 = vmatpush.bf16.msrb.mxu0 %v6810_v26  ;;  %v9455_v61 = vld [vmem:[#allocation2 + $0x564] sm:$0xf]  ;;  %v6903_v0 = vld [vmem:[#allocation2 + $0x570] sm:$0xf0]  ;;  %v6778_v5 = vor.u32 %v9423_v59, %v6775_v60  ;;  %v4930_v26 = vpop.f32.mrf.mxu3  ;;  %v4906_v39 = vpop.f32.mrf.mxu1 }
  0xfe   :  { %5157 = vmatpush.bf16.msrb.mxu1 %v6938_v27  ;;  %v9487_v1 = vld [vmem:[#allocation2 + $0x664] sm:$0xf]  ;;  %v7031_v2 = vld [vmem:[#allocation2 + $0x670] sm:$0xf0]  ;;  %v6906_v55 = vor.u32 %v9455_v61, %v6903_v0 }
  0xff   :  { %5170 = vmatpush.bf16.msrb.mxu2 %v7066_v32  ;;  %v9519_v3 = vld [vmem:[#allocation2 + $0x764] sm:$0xf]  ;;  %v7159_v4 = vld [vmem:[#allocation2 + $0x770] sm:$0xf0]  ;;  %v7034_v6 = vor.u32 %v9487_v1, %v7031_v2 }
 0x100   :  { %5183 = vmatpush.bf16.msrb.mxu3 %v7194_v53  ;;  %v9419_v8 = vld [vmem:[#allocation2 + $0x444] sm:$0xf]  ;;  %v6759_v9 = vld [vmem:[#allocation2 + $0x450] sm:$0xf0]  ;;  %v7162_v13 = vor.u32 %v9519_v3, %v7159_v4  ;;  %v10332_v53 = vadd.f32 %v4930_v26, %v4918_v24 }
 0x101   :  { %5145 = vmatpush.bf16.msrb.mxu0 %v6794_v54  ;;  %v9451_v10 = vld [vmem:[#allocation2 + $0x544] sm:$0xf]  ;;  %v6887_v15 = vld [vmem:[#allocation2 + $0x550] sm:$0xf0]  ;;  %v6762_v36 = vor.u32 %v9419_v8, %v6759_v9 }
 0x102   :  { %5158 = vmatpush.bf16.msrb.mxu1 %v6922_v57  ;;  %v9483_v17 = vld [vmem:[#allocation2 + $0x644] sm:$0xf]  ;;  %v7015_v21 = vld [vmem:[#allocation2 + $0x650] sm:$0xf0]  ;;  %v6890_v40 = vor.u32 %v9451_v10, %v6887_v15 }
 0x103   :  { %5171 = vmatpush.bf16.msrb.mxu2 %v7050_v58  ;;  %v9515_v27 = vld [vmem:[#allocation2 + $0x744] sm:$0xf]  ;;  %v7143_v32 = vld [vmem:[#allocation2 + $0x750] sm:$0xf0]  ;;  %v7018_v43 = vor.u32 %v9483_v17, %v7015_v21 }
 0x104   :  { %5184 = vmatpush.bf16.msrb.mxu3 %v7178_v62  ;;  %v9415_v47 = vld [vmem:[#allocation2 + $0x424] sm:$0xf]  ;;  %v6743_v48 = vld [vmem:[#allocation2 + $0x430] sm:$0xf0]  ;;  %v7146_v51 = vor.u32 %v9515_v27, %v7143_v32 }
 0x105   :  { %5146 = vmatpush.bf16.msrb.mxu0 %v6778_v5  ;;  %v9447_v50 = vld [vmem:[#allocation2 + $0x524] sm:$0xf]  ;;  %v6871_v52 = vld [vmem:[#allocation2 + $0x530] sm:$0xf0]  ;;  %v6746_v59 = vor.u32 %v9415_v47, %v6743_v48 }
 0x106   :  { %5159 = vmatpush.bf16.msrb.mxu1 %v6906_v55  ;;  %v9479_v54 = vld [vmem:[#allocation2 + $0x624] sm:$0xf]  ;;  %v6999_v56 = vld [vmem:[#allocation2 + $0x630] sm:$0xf0]  ;;  %v6874_v62 = vor.u32 %v9447_v50, %v6871_v52 }
 0x107   :  { %5172 = vmatpush.bf16.msrb.mxu2 %v7034_v6  ;;  %v9511_v57 = vld [vmem:[#allocation2 + $0x724] sm:$0xf]  ;;  %v7127_v58 = vld [vmem:[#allocation2 + $0x730] sm:$0xf0]  ;;  %v7002_v63 = vor.u32 %v9479_v54, %v6999_v56  ;;  %v4919_v6 = vpop.f32.mrf.mxu2 }
 0x108   :  { %5185 = vmatpush.bf16.msrb.mxu3 %v7162_v13  ;;  %v9411_v60 = vld [vmem:[#allocation2 + $0x404] sm:$0xf]  ;;  %v6727_v61 = vld [vmem:[#allocation2 + $0x410] sm:$0xf0]  ;;  %v7130_v3 = vor.u32 %v9511_v57, %v7127_v58  ;;  %v4932_v13 = vpop.f32.mrf.mxu3 }
 0x109   :  { %5147 = vmatpush.bf16.msrb.mxu0 %v6762_v36  ;;  %v9443_v0 = vld [vmem:[#allocation2 + $0x504] sm:$0xf]  ;;  %v6855_v1 = vld [vmem:[#allocation2 + $0x510] sm:$0xf0]  ;;  %v6730_v14 = vor.u32 %v9411_v60, %v6727_v61 }
 0x10a   :  { %5160 = vmatpush.bf16.msrb.mxu1 %v6890_v40  ;;  %v9475_v2 = vld [vmem:[#allocation2 + $0x604] sm:$0xf]  ;;  %v6983_v4 = vld [vmem:[#allocation2 + $0x610] sm:$0xf0]  ;;  %v6858_v24 = vor.u32 %v9443_v0, %v6855_v1 }
 0x10b   :  { %5173 = vmatpush.bf16.msrb.mxu2 %v7018_v43  ;;  %v9507_v5 = vld [vmem:[#allocation2 + $0x704] sm:$0xf]  ;;  %v7111_v55 = vld [vmem:[#allocation2 + $0x710] sm:$0xf0]  ;;  %v6986_v26 = vor.u32 %v9475_v2, %v6983_v4 }
 0x10c   :  { %5186 = vmatpush.bf16.msrb.mxu3 %v7146_v51  ;;  %v9567_v8 = vld [vmem:[#allocation2 + $0x8e4] sm:$0xf]  ;;  %v7351_v9 = vld [vmem:[#allocation2 + $0x8f0] sm:$0xf0]  ;;  %v7114_v34 = vor.u32 %v9507_v5, %v7111_v55 }
 0x10d   :  { %v9599_v10 = vld [vmem:[#allocation2 + $0x9e4] sm:$0xf]  ;;  %5148 = vmatpush.bf16.msrb.mxu0 %v6746_v59  ;;  %v7479_v15 = vld [vmem:[#allocation2 + $0x9f0] sm:$0xf0]  ;;  %v7354_v36 = vor.u32 %v9567_v8, %v7351_v9 }
 0x10e   :  { %v9631_v17 = vld [vmem:[#allocation2 + $0xae4] sm:$0xf]  ;;  %v7607_v21 = vld [vmem:[#allocation2 + $0xaf0] sm:$0xf0]  ;;  %5161 = vmatpush.bf16.msrb.mxu1 %v6874_v62  ;;  %v7482_v39 = vor.u32 %v9599_v10, %v7479_v15 }
 0x10f   :  { %5174 = vmatpush.bf16.msrb.mxu2 %v7002_v63  ;;  %v9663_v27 = vld [vmem:[#allocation2 + $0xbe4] sm:$0xf]  ;;  %v7735_v32 = vld [vmem:[#allocation2 + $0xbf0] sm:$0xf0]  ;;  %v7610_v40 = vor.u32 %v9631_v17, %v7607_v21 }
 0x110   :  { %5187 = vmatpush.bf16.msrb.mxu3 %v7130_v3  ;;  %v9563_v43 = vld [vmem:[#allocation2 + $0x8c4] sm:$0xf]  ;;  %v7335_v47 = vld [vmem:[#allocation2 + $0x8d0] sm:$0xf0]  ;;  %v7738_v50 = vor.u32 %v9663_v27, %v7735_v32 }
 0x111   :  { %v9595_v48 = vld [vmem:[#allocation2 + $0x9c4] sm:$0xf]  ;;  %5149 = vmatpush.bf16.msrb.mxu0 %v6730_v14  ;;  %v7463_v51 = vld [vmem:[#allocation2 + $0x9d0] sm:$0xf0]  ;;  %v7338_v58 = vor.u32 %v9563_v43, %v7335_v47 }
 0x112   :  { %v9627_v52 = vld [vmem:[#allocation2 + $0xac4] sm:$0xf]  ;;  %v7591_v54 = vld [vmem:[#allocation2 + $0xad0] sm:$0xf0]  ;;  %5162 = vmatpush.bf16.msrb.mxu1 %v6858_v24  ;;  %v7466_v59 = vor.u32 %v9595_v48, %v7463_v51  ;;  %v4943_v24 = vpop.f32.mrf.mxu0 }
 0x113   :  { %5175 = vmatpush.bf16.msrb.mxu2 %v6986_v26  ;;  %v9659_v56 = vld [vmem:[#allocation2 + $0xbc4] sm:$0xf]  ;;  %v7719_v57 = vld [vmem:[#allocation2 + $0xbd0] sm:$0xf0]  ;;  %v7594_v60 = vor.u32 %v9627_v52, %v7591_v54  ;;  %v4944_v32 = vadd.f32 %v4943_v24, %v10332_v53 }
 0x114   :  { %5188 = vmatpush.bf16.msrb.mxu3 %v7114_v34  ;;  %v9559_v61 = vld [vmem:[#allocation2 + $0x8a4] sm:$0xf]  ;;  %v7319_v62 = vld [vmem:[#allocation2 + $0x8b0] sm:$0xf0]  ;;  %v7722_v0 = vor.u32 %v9659_v56, %v7719_v57  ;;  %5150 = vmatmul.bf16.vlgmr.msrb.gmra.mxu0 %v10240_v41 }
 0x115   :  { %5194 = vmatpush.bf16.msra.mxu0 %v7354_v36  ;;  %v9591_v63 = vld [vmem:[#allocation2 + $0x9a4] sm:$0xf]  ;;  %v7447_v1 = vld [vmem:[#allocation2 + $0x9b0] sm:$0xf0]  ;;  %v7322_v55 = vor.u32 %v9559_v61, %v7319_v62  ;;  %5163 = vmatmul.bf16.vlgmr.msrb.gmra.mxu1 %v10244_v44  ;;  %v4956_v36 = vpop.f32.mrf.mxu1 }
 0x116   :  { %5207 = vmatpush.bf16.msra.mxu1 %v7482_v39  ;;  %5176 = vmatmul.bf16.vlgmr.msrb.gmra.mxu2 %v10238_v38  ;;  %v9623_v2 = vld [vmem:[#allocation2 + $0xaa4] sm:$0xf]  ;;  %v7575_v3 = vld [vmem:[#allocation2 + $0xab0] sm:$0xf0]  ;;  %v7450_v6 = vor.u32 %v9591_v63, %v7447_v1  ;;  %v4957_v51 = vadd.f32 %v4956_v36, %v4944_v32 }
 0x117   :  { %5220 = vmatpush.bf16.msra.mxu2 %v7610_v40  ;;  %v9655_v4 = vld [vmem:[#allocation2 + $0xba4] sm:$0xf]  ;;  %v7703_v5 = vld [vmem:[#allocation2 + $0xbb0] sm:$0xf0]  ;;  %5189 = vmatmul.bf16.vlgmr.msrb.gmra.mxu3 %v10242_v42  ;;  %v7578_v8 = vor.u32 %v9623_v2, %v7575_v3 }
 0x118   :  { %5233 = vmatpush.bf16.msra.mxu3 %v7738_v50  ;;  %v9555_v9 = vld [vmem:[#allocation2 + $0x884] sm:$0xf]  ;;  %v7303_v10 = vld [vmem:[#allocation2 + $0x890] sm:$0xf0]  ;;  %v7706_v14 = vor.u32 %v9655_v4, %v7703_v5 }
 0x119   :  { %5195 = vmatpush.bf16.msra.mxu0 %v7338_v58  ;;  %v9587_v13 = vld [vmem:[#allocation2 + $0x984] sm:$0xf]  ;;  %v7431_v15 = vld [vmem:[#allocation2 + $0x990] sm:$0xf0]  ;;  %v7306_v34 = vor.u32 %v9555_v9, %v7303_v10  ;;  %v4969_v1 = vpop.f32.mrf.mxu2 }
 0x11a   :  { %5208 = vmatpush.bf16.msra.mxu1 %v7466_v59  ;;  %v9619_v17 = vld [vmem:[#allocation2 + $0xa84] sm:$0xf]  ;;  %v7559_v21 = vld [vmem:[#allocation2 + $0xa90] sm:$0xf0]  ;;  %v7434_v39 = vor.u32 %v9587_v13, %v7431_v15  ;;  %v4970_v5 = vadd.f32 %v4969_v1, %v4957_v51  ;;  %v4945_v9 = vpop.f32.mrf.mxu0 }
 0x11b   :  { %5221 = vmatpush.bf16.msra.mxu2 %v7594_v60  ;;  %v9651_v26 = vld [vmem:[#allocation2 + $0xb84] sm:$0xf]  ;;  %v7687_v27 = vld [vmem:[#allocation2 + $0xb90] sm:$0xf0]  ;;  %v7562_v40 = vor.u32 %v9619_v17, %v7559_v21 }
 0x11c   :  { %5234 = vmatpush.bf16.msra.mxu3 %v7722_v0  ;;  %v9551_v43 = vld [vmem:[#allocation2 + $0x864] sm:$0xf]  ;;  %v7287_v47 = vld [vmem:[#allocation2 + $0x870] sm:$0xf0]  ;;  %v7690_v50 = vor.u32 %v9651_v26, %v7687_v27 }
 0x11d   :  { %5196 = vmatpush.bf16.msra.mxu0 %v7322_v55  ;;  %v9583_v48 = vld [vmem:[#allocation2 + $0x964] sm:$0xf]  ;;  %v7415_v52 = vld [vmem:[#allocation2 + $0x970] sm:$0xf0]  ;;  %v7290_v59 = vor.u32 %v9551_v43, %v7287_v47  ;;  %v4982_v55 = vpop.f32.mrf.mxu3  ;;  %v4958_v13 = vpop.f32.mrf.mxu1 }
 0x11e   :  { %5209 = vmatpush.bf16.msra.mxu1 %v7450_v6  ;;  %v9615_v54 = vld [vmem:[#allocation2 + $0xa64] sm:$0xf]  ;;  %v7543_v56 = vld [vmem:[#allocation2 + $0xa70] sm:$0xf0]  ;;  %v7418_v53 = vor.u32 %v9583_v48, %v7415_v52 }
 0x11f   :  { %5222 = vmatpush.bf16.msra.mxu2 %v7578_v8  ;;  %v9647_v57 = vld [vmem:[#allocation2 + $0xb64] sm:$0xf]  ;;  %v7671_v58 = vld [vmem:[#allocation2 + $0xb70] sm:$0xf0]  ;;  %v7546_v60 = vor.u32 %v9615_v54, %v7543_v56 }
 0x120   :  { %5235 = vmatpush.bf16.msra.mxu3 %v7706_v14  ;;  %v9547_v61 = vld [vmem:[#allocation2 + $0x844] sm:$0xf]  ;;  %v7271_v62 = vld [vmem:[#allocation2 + $0x850] sm:$0xf0]  ;;  %v7674_v0 = vor.u32 %v9647_v57, %v7671_v58  ;;  %v10339_v14 = vadd.f32 %v4982_v55, %v4970_v5 }
 0x121   :  { %5197 = vmatpush.bf16.msra.mxu0 %v7306_v34  ;;  %v9579_v63 = vld [vmem:[#allocation2 + $0x944] sm:$0xf]  ;;  %v7399_v2 = vld [vmem:[#allocation2 + $0x950] sm:$0xf0]  ;;  %v7274_v10 = vor.u32 %v9547_v61, %v7271_v62 }
 0x122   :  { %5210 = vmatpush.bf16.msra.mxu1 %v7434_v39  ;;  %v9611_v3 = vld [vmem:[#allocation2 + $0xa44] sm:$0xf]  ;;  %v7527_v4 = vld [vmem:[#allocation2 + $0xa50] sm:$0xf0]  ;;  %v7402_v15 = vor.u32 %v9579_v63, %v7399_v2 }
 0x123   :  { %5223 = vmatpush.bf16.msra.mxu2 %v7562_v40  ;;  %v9643_v6 = vld [vmem:[#allocation2 + $0xb44] sm:$0xf]  ;;  %v7655_v8 = vld [vmem:[#allocation2 + $0xb50] sm:$0xf0]  ;;  %v7530_v17 = vor.u32 %v9611_v3, %v7527_v4 }
 0x124   :  { %5236 = vmatpush.bf16.msra.mxu3 %v7690_v50  ;;  %v9543_v21 = vld [vmem:[#allocation2 + $0x824] sm:$0xf]  ;;  %v7255_v24 = vld [vmem:[#allocation2 + $0x830] sm:$0xf0]  ;;  %v7658_v27 = vor.u32 %v9643_v6, %v7655_v8 }
 0x125   :  { %5198 = vmatpush.bf16.msra.mxu0 %v7290_v59  ;;  %v9575_v26 = vld [vmem:[#allocation2 + $0x924] sm:$0xf]  ;;  %v7383_v32 = vld [vmem:[#allocation2 + $0x930] sm:$0xf0]  ;;  %v7258_v43 = vor.u32 %v9543_v21, %v7255_v24 }
 0x126   :  { %5211 = vmatpush.bf16.msra.mxu1 %v7418_v53  ;;  %v9607_v34 = vld [vmem:[#allocation2 + $0xa24] sm:$0xf]  ;;  %v7511_v36 = vld [vmem:[#allocation2 + $0xa30] sm:$0xf0]  ;;  %v7386_v50 = vor.u32 %v9575_v26, %v7383_v32 }
 0x127   :  { %5224 = vmatpush.bf16.msra.mxu2 %v7546_v60  ;;  %v9639_v39 = vld [vmem:[#allocation2 + $0xb24] sm:$0xf]  ;;  %v7639_v40 = vld [vmem:[#allocation2 + $0xb30] sm:$0xf0]  ;;  %v7514_v51 = vor.u32 %v9607_v34, %v7511_v36  ;;  %v4971_v60 = vpop.f32.mrf.mxu2 }
 0x128   :  { %5237 = vmatpush.bf16.msra.mxu3 %v7674_v0  ;;  %v9539_v47 = vld [vmem:[#allocation2 + $0x804] sm:$0xf]  ;;  %v7239_v48 = vld [vmem:[#allocation2 + $0x810] sm:$0xf0]  ;;  %v7642_v57 = vor.u32 %v9639_v39, %v7639_v40  ;;  %v4984_v0 = vpop.f32.mrf.mxu3 }
 0x129   :  { %5199 = vmatpush.bf16.msra.mxu0 %v7274_v10  ;;  %v9571_v52 = vld [vmem:[#allocation2 + $0x904] sm:$0xf]  ;;  %v7367_v54 = vld [vmem:[#allocation2 + $0x910] sm:$0xf0]  ;;  %v7242_v1 = vor.u32 %v9539_v47, %v7239_v48 }
 0x12a   :  { %5212 = vmatpush.bf16.msra.mxu1 %v7402_v15  ;;  %v9603_v56 = vld [vmem:[#allocation2 + $0xa04] sm:$0xf]  ;;  %v7495_v58 = vld [vmem:[#allocation2 + $0xa10] sm:$0xf0]  ;;  %v7370_v5 = vor.u32 %v9571_v52, %v7367_v54 }
 0x12b   :  { %5225 = vmatpush.bf16.msra.mxu2 %v7530_v17  ;;  %v9635_v59 = vld [vmem:[#allocation2 + $0xb04] sm:$0xf]  ;;  %v7623_v53 = vld [vmem:[#allocation2 + $0xb10] sm:$0xf0]  ;;  %v7498_v55 = vor.u32 %v9603_v56, %v7495_v58 }
 0x12c   :  { %5238 = vmatpush.bf16.msra.mxu3 %v7658_v27  ;;  %v9695_v61 = vld [vmem:[#allocation2 + $0xce4] sm:$0xf]  ;;  %v7863_v62 = vld [vmem:[#allocation2 + $0xcf0] sm:$0xf0]  ;;  %v7626_v9 = vor.u32 %v9635_v59, %v7623_v53 }
 0x12d   :  { %v9727_v63 = vld [vmem:[#allocation2 + $0xde4] sm:$0xf]  ;;  %5200 = vmatpush.bf16.msra.mxu0 %v7258_v43  ;;  %v7991_v2 = vld [vmem:[#allocation2 + $0xdf0] sm:$0xf0]  ;;  %v7866_v10 = vor.u32 %v9695_v61, %v7863_v62 }
 0x12e   :  { %v9759_v3 = vld [vmem:[#allocation2 + $0xee4] sm:$0xf]  ;;  %v8119_v4 = vld [vmem:[#allocation2 + $0xef0] sm:$0xf0]  ;;  %5213 = vmatpush.bf16.msra.mxu1 %v7386_v50  ;;  %v7994_v13 = vor.u32 %v9727_v63, %v7991_v2 }
 0x12f   :  { %5226 = vmatpush.bf16.msra.mxu2 %v7514_v51  ;;  %v9791_v6 = vld [vmem:[#allocation2 + $0xfe4] sm:$0xf]  ;;  %v8247_v8 = vld [vmem:[#allocation2 + $0xff0] sm:$0xf0]  ;;  %v8122_v15 = vor.u32 %v9759_v3, %v8119_v4 }
 0x130   :  { %5239 = vmatpush.bf16.msra.mxu3 %v7642_v57  ;;  %v9691_v17 = vld [vmem:[#allocation2 + $0xcc4] sm:$0xf]  ;;  %v7847_v21 = vld [vmem:[#allocation2 + $0xcd0] sm:$0xf0]  ;;  %v8250_v26 = vor.u32 %v9791_v6, %v8247_v8 }
 0x131   :  { %v9723_v24 = vld [vmem:[#allocation2 + $0xdc4] sm:$0xf]  ;;  %5201 = vmatpush.bf16.msra.mxu0 %v7242_v1  ;;  %v7975_v27 = vld [vmem:[#allocation2 + $0xdd0] sm:$0xf0]  ;;  %v7850_v40 = vor.u32 %v9691_v17, %v7847_v21 }
 0x132   :  { %v9755_v32 = vld [vmem:[#allocation2 + $0xec4] sm:$0xf]  ;;  %v8103_v34 = vld [vmem:[#allocation2 + $0xed0] sm:$0xf0]  ;;  %5214 = vmatpush.bf16.msra.mxu1 %v7370_v5  ;;  %v7978_v43 = vor.u32 %v9723_v24, %v7975_v27  ;;  %v4995_v5 = vpop.f32.mrf.mxu0 }
 0x133   :  { %5227 = vmatpush.bf16.msra.mxu2 %v7498_v55  ;;  %v9787_v36 = vld [vmem:[#allocation2 + $0xfc4] sm:$0xf]  ;;  %v8231_v39 = vld [vmem:[#allocation2 + $0xfd0] sm:$0xf0]  ;;  %v8106_v47 = vor.u32 %v9755_v32, %v8103_v34  ;;  %v4996_v8 = vadd.f32 %v4995_v5, %v10339_v14 }
 0x134   :  { %5240 = vmatpush.bf16.msra.mxu3 %v7626_v9  ;;  %v9687_v48 = vld [vmem:[#allocation2 + $0xca4] sm:$0xf]  ;;  %v7831_v50 = vld [vmem:[#allocation2 + $0xcb0] sm:$0xf0]  ;;  %5202 = vmatmul.bf16.vlgmr.msra.gmra.mxu0 %v10256_v25  ;;  %v8234_v52 = vor.u32 %v9787_v36, %v8231_v39 }
 0x135   :  { %5246 = vmatpush.bf16.msrb.mxu0 %v7866_v10  ;;  %v9719_v51 = vld [vmem:[#allocation2 + $0xda4] sm:$0xf]  ;;  %v7959_v54 = vld [vmem:[#allocation2 + $0xdb0] sm:$0xf0]  ;;  %5215 = vmatmul.bf16.vlgmr.msra.gmra.mxu1 %v10260_v30  ;;  %v7834_v53 = vor.u32 %v9687_v48, %v7831_v50  ;;  %v5008_v10 = vpop.f32.mrf.mxu1 }
 0x136   :  { %5259 = vmatpush.bf16.msrb.mxu1 %v7994_v13  ;;  %v9751_v56 = vld [vmem:[#allocation2 + $0xea4] sm:$0xf]  ;;  %v8087_v57 = vld [vmem:[#allocation2 + $0xeb0] sm:$0xf0]  ;;  %5228 = vmatmul.bf16.vlgmr.msra.gmra.mxu2 %v10258_v29  ;;  %v7962_v60 = vor.u32 %v9719_v51, %v7959_v54  ;;  %v5009_v27 = vadd.f32 %v5008_v10, %v4996_v8 }
 0x137   :  { %5272 = vmatpush.bf16.msrb.mxu2 %v8122_v15  ;;  %v9783_v58 = vld [vmem:[#allocation2 + $0xfa4] sm:$0xf]  ;;  %v8215_v59 = vld [vmem:[#allocation2 + $0xfb0] sm:$0xf0]  ;;  %5241 = vmatmul.bf16.vlgmr.msra.gmra.mxu3 %v10262_v33  ;;  %v8090_v61 = vor.u32 %v9751_v56, %v8087_v57  ;;  %v5021_v54 = vpop.f32.mrf.mxu2 }
 0x138   :  { %5285 = vmatpush.bf16.msrb.mxu3 %v8250_v26  ;;  %v9683_v62 = vld [vmem:[#allocation2 + $0xc84] sm:$0xf]  ;;  %v7815_v63 = vld [vmem:[#allocation2 + $0xc90] sm:$0xf0]  ;;  %v8218_v1 = vor.u32 %v9783_v58, %v8215_v59  ;;  %v5022_v59 = vadd.f32 %v5021_v54, %v5009_v27 }
 0x139   :  { %5247 = vmatpush.bf16.msrb.mxu0 %v7850_v40  ;;  %v9715_v0 = vld [vmem:[#allocation2 + $0xd84] sm:$0xf]  ;;  %v7943_v2 = vld [vmem:[#allocation2 + $0xd90] sm:$0xf0]  ;;  %v7818_v9 = vor.u32 %v9683_v62, %v7815_v63 }
 0x13a   :  { %5260 = vmatpush.bf16.msrb.mxu1 %v7978_v43  ;;  %v9747_v3 = vld [vmem:[#allocation2 + $0xe84] sm:$0xf]  ;;  %v8071_v4 = vld [vmem:[#allocation2 + $0xe90] sm:$0xf0]  ;;  %v7946_v13 = vor.u32 %v9715_v0, %v7943_v2  ;;  %v4997_v62 = vpop.f32.mrf.mxu0 }
 0x13b   :  { %5273 = vmatpush.bf16.msrb.mxu2 %v8106_v47  ;;  %v9779_v55 = vld [vmem:[#allocation2 + $0xf84] sm:$0xf]  ;;  %v8199_v6 = vld [vmem:[#allocation2 + $0xf90] sm:$0xf0]  ;;  %v8074_v15 = vor.u32 %v9747_v3, %v8071_v4 }
 0x13c   :  { %5286 = vmatpush.bf16.msrb.mxu3 %v8234_v52  ;;  %v9679_v17 = vld [vmem:[#allocation2 + $0xc64] sm:$0xf]  ;;  %v7799_v21 = vld [vmem:[#allocation2 + $0xc70] sm:$0xf0]  ;;  %v8202_v26 = vor.u32 %v9779_v55, %v8199_v6 }
 0x13d   :  { %5248 = vmatpush.bf16.msrb.mxu0 %v7834_v53  ;;  %v9711_v24 = vld [vmem:[#allocation2 + $0xd64] sm:$0xf]  ;;  %v7927_v32 = vld [vmem:[#allocation2 + $0xd70] sm:$0xf0]  ;;  %v7802_v43 = vor.u32 %v9679_v17, %v7799_v21  ;;  %v5034_v53 = vpop.f32.mrf.mxu3  ;;  %v5010_v0 = vpop.f32.mrf.mxu1 }
 0x13e   :  { %5261 = vmatpush.bf16.msrb.mxu1 %v7962_v60  ;;  %v9743_v34 = vld [vmem:[#allocation2 + $0xe64] sm:$0xf]  ;;  %v8055_v36 = vld [vmem:[#allocation2 + $0xe70] sm:$0xf0]  ;;  %v7930_v14 = vor.u32 %v9711_v24, %v7927_v32 }
 0x13f   :  { %5274 = vmatpush.bf16.msrb.mxu2 %v8090_v61  ;;  %v9775_v39 = vld [vmem:[#allocation2 + $0xf64] sm:$0xf]  ;;  %v8183_v40 = vld [vmem:[#allocation2 + $0xf70] sm:$0xf0]  ;;  %v8058_v47 = vor.u32 %v9743_v34, %v8055_v36 }
 0x140   :  { %5287 = vmatpush.bf16.msrb.mxu3 %v8218_v1  ;;  %v9675_v48 = vld [vmem:[#allocation2 + $0xc44] sm:$0xf]  ;;  %v7783_v50 = vld [vmem:[#allocation2 + $0xc50] sm:$0xf0]  ;;  %v8186_v52 = vor.u32 %v9775_v39, %v8183_v40  ;;  %v10346_v1 = vadd.f32 %v5034_v53, %v5022_v59 }
 0x141   :  { %5249 = vmatpush.bf16.msrb.mxu0 %v7818_v9  ;;  %v9707_v51 = vld [vmem:[#allocation2 + $0xd44] sm:$0xf]  ;;  %v7911_v56 = vld [vmem:[#allocation2 + $0xd50] sm:$0xf0]  ;;  %v7786_v63 = vor.u32 %v9675_v48, %v7783_v50 }
 0x142   :  { %5262 = vmatpush.bf16.msrb.mxu1 %v7946_v13  ;;  %v9739_v57 = vld [vmem:[#allocation2 + $0xe44] sm:$0xf]  ;;  %v8039_v58 = vld [vmem:[#allocation2 + $0xe50] sm:$0xf0]  ;;  %v7914_v2 = vor.u32 %v9707_v51, %v7911_v56 }
 0x143   :  { %5275 = vmatpush.bf16.msrb.mxu2 %v8074_v15  ;;  %v9771_v60 = vld [vmem:[#allocation2 + $0xf44] sm:$0xf]  ;;  %v8167_v61 = vld [vmem:[#allocation2 + $0xf50] sm:$0xf0]  ;;  %v8042_v3 = vor.u32 %v9739_v57, %v8039_v58 }
 0x144   :  { %5288 = vmatpush.bf16.msrb.mxu3 %v8202_v26  ;;  %v9671_v4 = vld [vmem:[#allocation2 + $0xc24] sm:$0xf]  ;;  %v7767_v5 = vld [vmem:[#allocation2 + $0xc30] sm:$0xf0]  ;;  %v8170_v6 = vor.u32 %v9771_v60, %v8167_v61 }
 0x145   :  { %5250 = vmatpush.bf16.msrb.mxu0 %v7802_v43  ;;  %v9703_v55 = vld [vmem:[#allocation2 + $0xd24] sm:$0xf]  ;;  %v7895_v8 = vld [vmem:[#allocation2 + $0xd30] sm:$0xf0]  ;;  %v7770_v17 = vor.u32 %v9671_v4, %v7767_v5 }
 0x146   :  { %5263 = vmatpush.bf16.msrb.mxu1 %v7930_v14  ;;  %v9735_v9 = vld [vmem:[#allocation2 + $0xe24] sm:$0xf]  ;;  %v8023_v10 = vld [vmem:[#allocation2 + $0xe30] sm:$0xf0]  ;;  %v7898_v26 = vor.u32 %v9703_v55, %v7895_v8 }
 0x147   :  { %5276 = vmatpush.bf16.msrb.mxu2 %v8058_v47  ;;  %v9767_v13 = vld [vmem:[#allocation2 + $0xf24] sm:$0xf]  ;;  %v8151_v15 = vld [vmem:[#allocation2 + $0xf30] sm:$0xf0]  ;;  %v8026_v27 = vor.u32 %v9735_v9, %v8023_v10  ;;  %v5023_v47 = vpop.f32.mrf.mxu2 }
 0x148   :  { %5289 = vmatpush.bf16.msrb.mxu3 %v8186_v52  ;;  %v9667_v21 = vld [vmem:[#allocation2 + $0xc04] sm:$0xf]  ;;  %v7751_v24 = vld [vmem:[#allocation2 + $0xc10] sm:$0xf0]  ;;  %v8154_v39 = vor.u32 %v9767_v13, %v8151_v15  ;;  %v5036_v52 = vpop.f32.mrf.mxu3 }
 0x149   :  { %5251 = vmatpush.bf16.msrb.mxu0 %v7786_v63  ;;  %v9699_v32 = vld [vmem:[#allocation2 + $0xd04] sm:$0xf]  ;;  %v7879_v34 = vld [vmem:[#allocation2 + $0xd10] sm:$0xf0]  ;;  %v7754_v54 = vor.u32 %v9667_v21, %v7751_v24 }
 0x14a   :  { %5264 = vmatpush.bf16.msrb.mxu1 %v7914_v2  ;;  %v9731_v36 = vld [vmem:[#allocation2 + $0xe04] sm:$0xf]  ;;  %v8007_v40 = vld [vmem:[#allocation2 + $0xe10] sm:$0xf0]  ;;  %v7882_v59 = vor.u32 %v9699_v32, %v7879_v34 }
 0x14b   :  { %5277 = vmatpush.bf16.msrb.mxu2 %v8042_v3  ;;  %v9763_v43 = vld [vmem:[#allocation2 + $0xf04] sm:$0xf]  ;;  %v8135_v14 = vld [vmem:[#allocation2 + $0xf10] sm:$0xf0]  ;;  %v8010_v53 = vor.u32 %v9731_v36, %v8007_v40 }
 0x14c   :  { %5290 = vmatpush.bf16.msrb.mxu3 %v8170_v6  ;;  %v9823_v48 = vld [vmem:[#allocation2 + $0x10e4] sm:$0xf]  ;;  %v8375_v50 = vld [vmem:[#allocation2 + $0x10f0] sm:$0xf0]  ;;  %v8138_v62 = vor.u32 %v9763_v43, %v8135_v14 }
 0x14d   :  { %v9855_v51 = vld [vmem:[#allocation2 + $0x11e4] sm:$0xf]  ;;  %5252 = vmatpush.bf16.msrb.mxu0 %v7770_v17  ;;  %v8503_v56 = vld [vmem:[#allocation2 + $0x11f0] sm:$0xf0]  ;;  %v8378_v63 = vor.u32 %v9823_v48, %v8375_v50 }
 0x14e   :  { %v9887_v57 = vld [vmem:[#allocation2 + $0x12e4] sm:$0xf]  ;;  %v8631_v58 = vld [vmem:[#allocation2 + $0x12f0] sm:$0xf0]  ;;  %5265 = vmatpush.bf16.msrb.mxu1 %v7898_v26  ;;  %v8506_v0 = vor.u32 %v9855_v51, %v8503_v56 }
 0x14f   :  { %5278 = vmatpush.bf16.msrb.mxu2 %v8026_v27  ;;  %v9919_v60 = vld [vmem:[#allocation2 + $0x13e4] sm:$0xf]  ;;  %v8759_v61 = vld [vmem:[#allocation2 + $0x13f0] sm:$0xf0]  ;;  %v8634_v2 = vor.u32 %v9887_v57, %v8631_v58 }
 0x150   :  { %5291 = vmatpush.bf16.msrb.mxu3 %v8154_v39  ;;  %v9819_v3 = vld [vmem:[#allocation2 + $0x10c4] sm:$0xf]  ;;  %v8359_v4 = vld [vmem:[#allocation2 + $0x10d0] sm:$0xf0]  ;;  %v8762_v55 = vor.u32 %v9919_v60, %v8759_v61 }
 0x151   :  { %v9851_v5 = vld [vmem:[#allocation2 + $0x11c4] sm:$0xf]  ;;  %5253 = vmatpush.bf16.msrb.mxu0 %v7754_v54  ;;  %v8487_v6 = vld [vmem:[#allocation2 + $0x11d0] sm:$0xf0]  ;;  %v8362_v15 = vor.u32 %v9819_v3, %v8359_v4 }
 0x152   :  { %v9883_v8 = vld [vmem:[#allocation2 + $0x12c4] sm:$0xf]  ;;  %v8615_v9 = vld [vmem:[#allocation2 + $0x12d0] sm:$0xf0]  ;;  %5266 = vmatpush.bf16.msrb.mxu1 %v7882_v59  ;;  %v8490_v17 = vor.u32 %v9851_v5, %v8487_v6  ;;  %v5047_v59 = vpop.f32.mrf.mxu0 }
 0x153   :  { %5279 = vmatpush.bf16.msrb.mxu2 %v8010_v53  ;;  %v9915_v10 = vld [vmem:[#allocation2 + $0x13c4] sm:$0xf]  ;;  %v8743_v13 = vld [vmem:[#allocation2 + $0x13d0] sm:$0xf0]  ;;  %v8618_v21 = vor.u32 %v9883_v8, %v8615_v9  ;;  %v5048_v61 = vadd.f32 %v5047_v59, %v10346_v1 }
 0x154   :  { %5292 = vmatpush.bf16.msrb.mxu3 %v8138_v62  ;;  %v9815_v24 = vld [vmem:[#allocation2 + $0x10a4] sm:$0xf]  ;;  %v8343_v26 = vld [vmem:[#allocation2 + $0x10b0] sm:$0xf0]  ;;  %5254 = vmatmul.bf16.vlgmr.msrb.gmra.mxu0 %v10274_v23  ;;  %v8746_v32 = vor.u32 %v9915_v10, %v8743_v13 }
 0x155   :  { %5298 = vmatpush.bf16.msra.mxu0 %v8378_v63  ;;  %v9847_v27 = vld [vmem:[#allocation2 + $0x11a4] sm:$0xf]  ;;  %v8471_v34 = vld [vmem:[#allocation2 + $0x11b0] sm:$0xf0]  ;;  %5267 = vmatmul.bf16.vlgmr.msrb.gmra.mxu1 %v10278_v31  ;;  %v8346_v14 = vor.u32 %v9815_v24, %v8343_v26  ;;  %v5060_v63 = vpop.f32.mrf.mxu1 }
 0x156   :  { %5311 = vmatpush.bf16.msra.mxu1 %v8506_v0  ;;  %v9879_v36 = vld [vmem:[#allocation2 + $0x12a4] sm:$0xf]  ;;  %v8599_v39 = vld [vmem:[#allocation2 + $0x12b0] sm:$0xf0]  ;;  %5280 = vmatmul.bf16.vlgmr.msrb.gmra.mxu2 %v10276_v28  ;;  %v8474_v47 = vor.u32 %v9847_v27, %v8471_v34  ;;  %v5061_v6 = vadd.f32 %v5060_v63, %v5048_v61 }
 0x157   :  { %5324 = vmatpush.bf16.msra.mxu2 %v8634_v2  ;;  %v9911_v40 = vld [vmem:[#allocation2 + $0x13a4] sm:$0xf]  ;;  %v8727_v43 = vld [vmem:[#allocation2 + $0x13b0] sm:$0xf0]  ;;  %5293 = vmatmul.bf16.vlgmr.msrb.gmra.mxu3 %v10280_v35  ;;  %v8602_v48 = vor.u32 %v9879_v36, %v8599_v39 }
 0x158   :  { %5337 = vmatpush.bf16.msra.mxu3 %v8762_v55  ;;  %v9811_v50 = vld [vmem:[#allocation2 + $0x1084] sm:$0xf]  ;;  %v8327_v51 = vld [vmem:[#allocation2 + $0x1090] sm:$0xf0]  ;;  %v8730_v54 = vor.u32 %v9911_v40, %v8727_v43 }
 0x159   :  { %5299 = vmatpush.bf16.msra.mxu0 %v8362_v15  ;;  %v9843_v52 = vld [vmem:[#allocation2 + $0x1184] sm:$0xf]  ;;  %v8455_v56 = vld [vmem:[#allocation2 + $0x1190] sm:$0xf0]  ;;  %v8330_v62 = vor.u32 %v9811_v50, %v8327_v51  ;;  %v5073_v34 = vpop.f32.mrf.mxu2 }
 0x15a   :  { %5312 = vmatpush.bf16.msra.mxu1 %v8490_v17  ;;  %v9875_v57 = vld [vmem:[#allocation2 + $0x1284] sm:$0xf]  ;;  %v8583_v58 = vld [vmem:[#allocation2 + $0x1290] sm:$0xf0]  ;;  %v8458_v0 = vor.u32 %v9843_v52, %v8455_v56  ;;  %v5074_v43 = vadd.f32 %v5073_v34, %v5061_v6  ;;  %v5049_v50 = vpop.f32.mrf.mxu0 }
 0x15b   :  { %5325 = vmatpush.bf16.msra.mxu2 %v8618_v21  ;;  %v9907_v53 = vld [vmem:[#allocation2 + $0x1384] sm:$0xf]  ;;  %v8711_v60 = vld [vmem:[#allocation2 + $0x1390] sm:$0xf0]  ;;  %v8586_v2 = vor.u32 %v9875_v57, %v8583_v58 }
 0x15c   :  { %5338 = vmatpush.bf16.msra.mxu3 %v8746_v32  ;;  %v9807_v3 = vld [vmem:[#allocation2 + $0x1064] sm:$0xf]  ;;  %v8311_v4 = vld [vmem:[#allocation2 + $0x1070] sm:$0xf0]  ;;  %v8714_v55 = vor.u32 %v9907_v53, %v8711_v60 }
 0x15d   :  { %5300 = vmatpush.bf16.msra.mxu0 %v8346_v14  ;;  %v9839_v5 = vld [vmem:[#allocation2 + $0x1164] sm:$0xf]  ;;  %v8439_v8 = vld [vmem:[#allocation2 + $0x1170] sm:$0xf0]  ;;  %v8314_v17 = vor.u32 %v9807_v3, %v8311_v4  ;;  %v5086_v14 = vpop.f32.mrf.mxu3  ;;  %v5062_v52 = vpop.f32.mrf.mxu1 }
 0x15e   :  { %5313 = vmatpush.bf16.msra.mxu1 %v8474_v47  ;;  %v9871_v9 = vld [vmem:[#allocation2 + $0x1264] sm:$0xf]  ;;  %v8567_v10 = vld [vmem:[#allocation2 + $0x1270] sm:$0xf0]  ;;  %v8442_v1 = vor.u32 %v9839_v5, %v8439_v8 }
 0x15f   :  { %5326 = vmatpush.bf16.msra.mxu2 %v8602_v48  ;;  %v9903_v13 = vld [vmem:[#allocation2 + $0x1364] sm:$0xf]  ;;  %v8695_v15 = vld [vmem:[#allocation2 + $0x1370] sm:$0xf0]  ;;  %v8570_v21 = vor.u32 %v9871_v9, %v8567_v10 }
 0x160   :  { %5339 = vmatpush.bf16.msra.mxu3 %v8730_v54  ;;  %v9803_v24 = vld [vmem:[#allocation2 + $0x1044] sm:$0xf]  ;;  %v8295_v26 = vld [vmem:[#allocation2 + $0x1050] sm:$0xf0]  ;;  %v8698_v32 = vor.u32 %v9903_v13, %v8695_v15  ;;  %v10353_v54 = vadd.f32 %v5086_v14, %v5074_v43 }
 0x161   :  { %5301 = vmatpush.bf16.msra.mxu0 %v8330_v62  ;;  %v9835_v27 = vld [vmem:[#allocation2 + $0x1144] sm:$0xf]  ;;  %v8423_v36 = vld [vmem:[#allocation2 + $0x1150] sm:$0xf0]  ;;  %v8298_v51 = vor.u32 %v9803_v24, %v8295_v26 }
 0x162   :  { %5314 = vmatpush.bf16.msra.mxu1 %v8458_v0  ;;  %v9867_v39 = vld [vmem:[#allocation2 + $0x1244] sm:$0xf]  ;;  %v8551_v40 = vld [vmem:[#allocation2 + $0x1250] sm:$0xf0]  ;;  %v8426_v56 = vor.u32 %v9835_v27, %v8423_v36 }
 0x163   :  { %5327 = vmatpush.bf16.msra.mxu2 %v8586_v2  ;;  %v9899_v47 = vld [vmem:[#allocation2 + $0x1344] sm:$0xf]  ;;  %v8679_v48 = vld [vmem:[#allocation2 + $0x1350] sm:$0xf0]  ;;  %v8554_v57 = vor.u32 %v9867_v39, %v8551_v40 }
 0x164   :  { %5340 = vmatpush.bf16.msra.mxu3 %v8714_v55  ;;  %v9799_v58 = vld [vmem:[#allocation2 + $0x1024] sm:$0xf]  ;;  %v8279_v59 = vld [vmem:[#allocation2 + $0x1030] sm:$0xf0]  ;;  %v8682_v60 = vor.u32 %v9899_v47, %v8679_v48 }
 0x165   :  { %5302 = vmatpush.bf16.msra.mxu0 %v8314_v17  ;;  %v9831_v53 = vld [vmem:[#allocation2 + $0x1124] sm:$0xf]  ;;  %v8407_v61 = vld [vmem:[#allocation2 + $0x1130] sm:$0xf0]  ;;  %v8282_v3 = vor.u32 %v9799_v58, %v8279_v59 }
 0x166   :  { %5315 = vmatpush.bf16.msra.mxu1 %v8442_v1  ;;  %v9863_v62 = vld [vmem:[#allocation2 + $0x1224] sm:$0xf]  ;;  %v8535_v63 = vld [vmem:[#allocation2 + $0x1230] sm:$0xf0]  ;;  %v8410_v55 = vor.u32 %v9831_v53, %v8407_v61 }
 0x167   :  { %5328 = vmatpush.bf16.msra.mxu2 %v8570_v21  ;;  %v9895_v0 = vld [vmem:[#allocation2 + $0x1324] sm:$0xf]  ;;  %v8663_v2 = vld [vmem:[#allocation2 + $0x1330] sm:$0xf0]  ;;  %v8538_v6 = vor.u32 %v9863_v62, %v8535_v63  ;;  %v5075_v21 = vpop.f32.mrf.mxu2 }
 0x168   :  { %5341 = vmatpush.bf16.msra.mxu3 %v8698_v32  ;;  %v9795_v4 = vld [vmem:[#allocation2 + $0x1004] sm:$0xf]  ;;  %v8263_v5 = vld [vmem:[#allocation2 + $0x1010] sm:$0xf0]  ;;  %v8666_v13 = vor.u32 %v9895_v0, %v8663_v2  ;;  %v5088_v32 = vpop.f32.mrf.mxu3 }
 0x169   :  { %5303 = vmatpush.bf16.msra.mxu0 %v8298_v51  ;;  %v9827_v8 = vld [vmem:[#allocation2 + $0x1104] sm:$0xf]  ;;  %v8391_v9 = vld [vmem:[#allocation2 + $0x1110] sm:$0xf0]  ;;  %v8266_v34 = vor.u32 %v9795_v4, %v8263_v5 }
 0x16a   :  { %5316 = vmatpush.bf16.msra.mxu1 %v8426_v56  ;;  %v9859_v10 = vld [vmem:[#allocation2 + $0x1204] sm:$0xf]  ;;  %v8519_v15 = vld [vmem:[#allocation2 + $0x1210] sm:$0xf0]  ;;  %v8394_v43 = vor.u32 %v9827_v8, %v8391_v9 }
 0x16b   :  { %5329 = vmatpush.bf16.msra.mxu2 %v8554_v57  ;;  %v9891_v17 = vld [vmem:[#allocation2 + $0x1304] sm:$0xf]  ;;  %v8647_v1 = vld [vmem:[#allocation2 + $0x1310] sm:$0xf0]  ;;  %v8522_v14 = vor.u32 %v9859_v10, %v8519_v15 }
 0x16c   :  { %5342 = vmatpush.bf16.msra.mxu3 %v8682_v60  ;;  %v9951_v24 = vld [vmem:[#allocation2 + $0x14e4] sm:$0xf]  ;;  %v8887_v26 = vld [vmem:[#allocation2 + $0x14f0] sm:$0xf0]  ;;  %v8650_v50 = vor.u32 %v9891_v17, %v8647_v1 }
 0x16d   :  { %v9983_v27 = vld [vmem:[#allocation2 + $0x15e4] sm:$0xf]  ;;  %5304 = vmatpush.bf16.msra.mxu0 %v8282_v3  ;;  %v9015_v36 = vld [vmem:[#allocation2 + $0x15f0] sm:$0xf0]  ;;  %v8890_v51 = vor.u32 %v9951_v24, %v8887_v26 }
 0x16e   :  { %v10015_v39 = vld [vmem:[#allocation2 + $0x16e4] sm:$0xf]  ;;  %v9143_v40 = vld [vmem:[#allocation2 + $0x16f0] sm:$0xf0]  ;;  %5317 = vmatpush.bf16.msra.mxu1 %v8410_v55  ;;  %v9018_v52 = vor.u32 %v9983_v27, %v9015_v36 }
 0x16f   :  { %5330 = vmatpush.bf16.msra.mxu2 %v8538_v6  ;;  %v10047_v47 = vld [vmem:[#allocation2 + $0x17e4] sm:$0xf]  ;;  %v9271_v48 = vld [vmem:[#allocation2 + $0x17f0] sm:$0xf0]  ;;  %v9146_v56 = vor.u32 %v10015_v39, %v9143_v40 }
 0x170   :  { %5343 = vmatpush.bf16.msra.mxu3 %v8666_v13  ;;  %v9947_v57 = vld [vmem:[#allocation2 + $0x14c4] sm:$0xf]  ;;  %v8871_v58 = vld [vmem:[#allocation2 + $0x14d0] sm:$0xf0]  ;;  %v9274_v53 = vor.u32 %v10047_v47, %v9271_v48 }
 0x171   :  { %v9979_v59 = vld [vmem:[#allocation2 + $0x15c4] sm:$0xf]  ;;  %5305 = vmatpush.bf16.msra.mxu0 %v8266_v34  ;;  %v8999_v60 = vld [vmem:[#allocation2 + $0x15d0] sm:$0xf0]  ;;  %v8874_v2 = vor.u32 %v9947_v57, %v8871_v58  ;;  %v10064_v34 = vld [vmem:[#allocation5] sm:$0xf] }
 0x172   :  { %v10011_v61 = vld [vmem:[#allocation2 + $0x16c4] sm:$0xf]  ;;  %v9127_v62 = vld [vmem:[#allocation2 + $0x16d0] sm:$0xf0]  ;;  %5318 = vmatpush.bf16.msra.mxu1 %v8394_v43  ;;  %v9002_v3 = vor.u32 %v9979_v59, %v8999_v60  ;;  %v847_v36 = vperm.slane %v10064_v34, 1  ;;  %v5112_v60 = vpop.f32.mrf.mxu1 }
 0x173   :  { %5331 = vmatpush.bf16.msra.mxu2 %v8522_v14  ;;  %v10043_v63 = vld [vmem:[#allocation2 + $0x17c4] sm:$0xf]  ;;  %v9255_v0 = vld [vmem:[#allocation2 + $0x17d0] sm:$0xf0]  ;;  %v9130_v4 = vor.u32 %v10011_v61, %v9127_v62 }
 0x174   :  { %5344 = vmatpush.bf16.msra.mxu3 %v8650_v50  ;;  %v9943_v5 = vld [vmem:[#allocation2 + $0x14a4] sm:$0xf]  ;;  %v8855_v55 = vld [vmem:[#allocation2 + $0x14b0] sm:$0xf0]  ;;  %5306 = vmatmul.bf16.vlgmr.msra.gmra.mxu0 %v10292_v37  ;;  %v9258_v8 = vor.u32 %v10043_v63, %v9255_v0 }
 0x175   :  { %5350 = vmatpush.bf16.msrb.mxu0 %v8890_v51  ;;  %v9975_v6 = vld [vmem:[#allocation2 + $0x15a4] sm:$0xf]  ;;  %v8983_v9 = vld [vmem:[#allocation2 + $0x15b0] sm:$0xf0]  ;;  %5319 = vmatmul.bf16.vlgmr.msra.gmra.mxu1 %v10296_v46  ;;  %v8858_v1 = vor.u32 %v9943_v5, %v8855_v55  ;;  %v5099_v51 = vpop.f32.mrf.mxu0 }
 0x176   :  { %5363 = vmatpush.bf16.msrb.mxu1 %v9018_v52  ;;  %v10007_v10 = vld [vmem:[#allocation2 + $0x16a4] sm:$0xf]  ;;  %v9111_v13 = vld [vmem:[#allocation2 + $0x16b0] sm:$0xf0]  ;;  %5332 = vmatmul.bf16.vlgmr.msra.gmra.mxu2 %v10294_v45  ;;  %v8986_v24 = vor.u32 %v9975_v6, %v8983_v9 }
 0x177   :  { %5376 = vmatpush.bf16.msrb.mxu2 %v9146_v56  ;;  %v10039_v15 = vld [vmem:[#allocation2 + $0x17a4] sm:$0xf]  ;;  %v9239_v17 = vld [vmem:[#allocation2 + $0x17b0] sm:$0xf0]  ;;  %5345 = vmatmul.bf16.vlgmr.msra.gmra.mxu3 %v10298_v49  ;;  %v9114_v26 = vor.u32 %v10007_v10, %v9111_v13 }
 0x178   :  { %5389 = vmatpush.bf16.msrb.mxu3 %v9274_v53  ;;  %v9939_v21 = vld [vmem:[#allocation2 + $0x1484] sm:$0xf]  ;;  %v8839_v27 = vld [vmem:[#allocation2 + $0x1490] sm:$0xf0]  ;;  %v9242_v39 = vor.u32 %v10039_v15, %v9239_v17  ;;  %v5100_v53 = vadd.f32 %v5099_v51, %v847_v36 }
 0x179   :  { %5351 = vmatpush.bf16.msrb.mxu0 %v8874_v2  ;;  %v9971_v32 = vld [vmem:[#allocation2 + $0x1584] sm:$0xf]  ;;  %v8967_v40 = vld [vmem:[#allocation2 + $0x1590] sm:$0xf0]  ;;  %v8842_v50 = vor.u32 %v9939_v21, %v8839_v27  ;;  %v5125_v13 = vpop.f32.mrf.mxu2 }
 0x17a   :  { %5364 = vmatpush.bf16.msrb.mxu1 %v9002_v3  ;;  %v10003_v43 = vld [vmem:[#allocation2 + $0x1684] sm:$0xf]  ;;  %v9095_v14 = vld [vmem:[#allocation2 + $0x1690] sm:$0xf0]  ;;  %v8970_v52 = vor.u32 %v9971_v32, %v8967_v40 }
 0x17b   :  { %5377 = vmatpush.bf16.msrb.mxu2 %v9130_v4  ;;  %v10035_v47 = vld [vmem:[#allocation2 + $0x1784] sm:$0xf]  ;;  %v9223_v48 = vld [vmem:[#allocation2 + $0x1790] sm:$0xf0]  ;;  %v9098_v56 = vor.u32 %v10003_v43, %v9095_v14  ;;  %v5113_v4 = vadd.f32 %v5112_v60, %v5100_v53 }
 0x17c   :  { %5390 = vmatpush.bf16.msrb.mxu3 %v9258_v8  ;;  %v9935_v57 = vld [vmem:[#allocation2 + $0x1464] sm:$0xf]  ;;  %v8823_v58 = vld [vmem:[#allocation2 + $0x1470] sm:$0xf0]  ;;  %v9226_v61 = vor.u32 %v10035_v47, %v9223_v48 }
 0x17d   :  { %5352 = vmatpush.bf16.msrb.mxu0 %v8858_v1  ;;  %v9967_v59 = vld [vmem:[#allocation2 + $0x1564] sm:$0xf]  ;;  %v8951_v62 = vld [vmem:[#allocation2 + $0x1570] sm:$0xf0]  ;;  %v8826_v5 = vor.u32 %v9935_v57, %v8823_v58 }
 0x17e   :  { %5365 = vmatpush.bf16.msrb.mxu1 %v8986_v24  ;;  %v9999_v63 = vld [vmem:[#allocation2 + $0x1664] sm:$0xf]  ;;  %v9079_v0 = vld [vmem:[#allocation2 + $0x1670] sm:$0xf0]  ;;  %v8954_v55 = vor.u32 %v9967_v59, %v8951_v62  ;;  %v5126_v24 = vadd.f32 %v5125_v13, %v5113_v4  ;;  %v9314_v13 = vld [vmem:[#allocation2 + $0xf4] sm:$0xf0] }
 0x17f   :  { %5378 = vmatpush.bf16.msrb.mxu2 %v9114_v26  ;;  %v10031_v2 = vld [vmem:[#allocation2 + $0x1764] sm:$0xf]  ;;  %v9207_v3 = vld [vmem:[#allocation2 + $0x1770] sm:$0xf0]  ;;  %v9082_v6 = vor.u32 %v9999_v63, %v9079_v0  ;;  %v5138_v26 = vpop.f32.mrf.mxu3 }
 0x180   :  { %5391 = vmatpush.bf16.msrb.mxu3 %v9242_v39  ;;  %v9931_v8 = vld [vmem:[#allocation2 + $0x1444] sm:$0xf]  ;;  %v8807_v9 = vld [vmem:[#allocation2 + $0x1450] sm:$0xf0]  ;;  %v9210_v15 = vor.u32 %v10031_v2, %v9207_v3  ;;  %v10359_v36 = vadd.f32 %v5138_v26, %v5126_v24  ;;  %v5101_v39 = vpop.f32.mrf.mxu0  ;;  %v9378_v24 = vld [vmem:[#allocation2 + $0x2f4] sm:$0xf0] }
 0x181   :  { %5353 = vmatpush.bf16.msrb.mxu0 %v8842_v50  ;;  %v9963_v10 = vld [vmem:[#allocation2 + $0x1544] sm:$0xf]  ;;  %v8935_v17 = vld [vmem:[#allocation2 + $0x1550] sm:$0xf0]  ;;  %v8810_v34 = vor.u32 %v9931_v8, %v8807_v9  ;;  %v5114_v50 = vpop.f32.mrf.mxu1  ;;  %v5127_v4 = vpop.f32.mrf.mxu2 }
 0x182   :  { %5366 = vmatpush.bf16.msrb.mxu1 %v8970_v52  ;;  %v9995_v1 = vld [vmem:[#allocation2 + $0x1644] sm:$0xf]  ;;  %v9063_v21 = vld [vmem:[#allocation2 + $0x1650] sm:$0xf0]  ;;  %v8938_v40 = vor.u32 %v9963_v10, %v8935_v17  ;;  %v6333_v10 = vld [vmem:[#allocation2 + $0xe8] sm:$0xf] }
 0x183   :  { %5379 = vmatpush.bf16.msrb.mxu2 %v9098_v56  ;;  %v10027_v27 = vld [vmem:[#allocation2 + $0x1744] sm:$0xf]  ;;  %v9191_v32 = vld [vmem:[#allocation2 + $0x1750] sm:$0xf0]  ;;  %v9066_v43 = vor.u32 %v9995_v1, %v9063_v21  ;;  %v9346_v1 = vld [vmem:[#allocation2 + $0x1f4] sm:$0xf0] }
 0x184   :  { %5392 = vmatpush.bf16.msrb.mxu3 %v9226_v61  ;;  %v9927_v14 = vld [vmem:[#allocation2 + $0x1424] sm:$0xf]  ;;  %v8791_v47 = vld [vmem:[#allocation2 + $0x1430] sm:$0xf0]  ;;  %v9194_v51 = vor.u32 %v10027_v27, %v9191_v32  ;;  %v6589_v21 = vld [vmem:[#allocation2 + $0x2e8] sm:$0xf] }
 0x185   :  { %5354 = vmatpush.bf16.msrb.mxu0 %v8826_v5  ;;  %v9959_v48 = vld [vmem:[#allocation2 + $0x1524] sm:$0xf]  ;;  %v8919_v52 = vld [vmem:[#allocation2 + $0x1530] sm:$0xf0]  ;;  %v8794_v53 = vor.u32 %v9927_v14, %v8791_v47  ;;  %v6717_v32 = vld [vmem:[#allocation2 + $0x3e8] sm:$0xf]  ;;  %v6590_v14 = vor.u32 %v9378_v24, %v6589_v21 }
 0x186   :  { %5367 = vmatpush.bf16.msrb.mxu1 %v8954_v55  ;;  %v9991_v56 = vld [vmem:[#allocation2 + $0x1624] sm:$0xf]  ;;  %v9047_v57 = vld [vmem:[#allocation2 + $0x1630] sm:$0xf0]  ;;  %v8922_v62 = vor.u32 %v9959_v48, %v8919_v52  ;;  %v6317_v47 = vld [vmem:[#allocation2 + $0xc8] sm:$0xf] }
 0x187   :  { %5380 = vmatpush.bf16.msrb.mxu2 %v9082_v6  ;;  %v10023_v58 = vld [vmem:[#allocation2 + $0x1724] sm:$0xf]  ;;  %v9175_v59 = vld [vmem:[#allocation2 + $0x1730] sm:$0xf0]  ;;  %v9050_v63 = vor.u32 %v9991_v56, %v9047_v57  ;;  %v5140_v9 = vpop.f32.mrf.mxu3  ;;  %v9310_v48 = vld [vmem:[#allocation2 + $0xd4] sm:$0xf0] }
 0x188   :  { %5393 = vmatpush.bf16.msrb.mxu3 %v9210_v15  ;;  %v9923_v60 = vld [vmem:[#allocation2 + $0x1404] sm:$0xf]  ;;  %v8775_v61 = vld [vmem:[#allocation2 + $0x1410] sm:$0xf0]  ;;  %v9178_v5 = vor.u32 %v10023_v58, %v9175_v59  ;;  %v6461_v15 = vld [vmem:[#allocation2 + $0x1e8] sm:$0xf] }
 0x189   :  { %5355 = vmatpush.bf16.msrb.mxu0 %v8810_v34  ;;  %v9955_v0 = vld [vmem:[#allocation2 + $0x1504] sm:$0xf]  ;;  %v8903_v2 = vld [vmem:[#allocation2 + $0x1510] sm:$0xf0]  ;;  %v8778_v17 = vor.u32 %v9923_v60, %v8775_v61  ;;  %v9410_v34 = vld [vmem:[#allocation2 + $0x3f4] sm:$0xf0] }
 0x18a   :  { %5368 = vmatpush.bf16.msrb.mxu1 %v8938_v40  ;;  %v9987_v3 = vld [vmem:[#allocation2 + $0x1604] sm:$0xf]  ;;  %v9031_v55 = vld [vmem:[#allocation2 + $0x1610] sm:$0xf0]  ;;  %v8906_v26 = vor.u32 %v9955_v0, %v8903_v2  ;;  %v6334_v40 = vor.u32 %v9314_v13, %v6333_v10  ;;  %v6445_v50 = vld [vmem:[#allocation2 + $0x1c8] sm:$0xf] }
 0x18b   :  { %5381 = vmatpush.bf16.msrb.mxu2 %v9066_v43  ;;  %v10019_v6 = vld [vmem:[#allocation2 + $0x1704] sm:$0xf]  ;;  %v9159_v8 = vld [vmem:[#allocation2 + $0x1710] sm:$0xf0]  ;;  %v9034_v27 = vor.u32 %v9987_v3, %v9031_v55  ;;  %v6462_v43 = vor.u32 %v9346_v1, %v6461_v15  ;;  %v9342_v52 = vld [vmem:[#allocation2 + $0x1d4] sm:$0xf0] }
 0x18c   :  { %5394 = vmatpush.bf16.msrb.mxu3 %v9194_v51  ;;  %v9162_v39 = vor.u32 %v10019_v6, %v9159_v8  ;;  %v6718_v51 = vor.u32 %v9410_v34, %v6717_v32  ;;  %v6573_v56 = vld [vmem:[#allocation2 + $0x2c8] sm:$0xf]  ;;  %v9374_v57 = vld [vmem:[#allocation2 + $0x2d4] sm:$0xf0]  ;;  %v6446_v60 = vor.u32 %v9342_v52, %v6445_v50 }
 0x18d   :  { %5356 = vmatpush.bf16.msrb.mxu0 %v8794_v53  ;;  %v6701_v58 = vld [vmem:[#allocation2 + $0x3c8] sm:$0xf]  ;;  %v9406_v59 = vld [vmem:[#allocation2 + $0x3d4] sm:$0xf0]  ;;  %v6318_v53 = vor.u32 %v9310_v48, %v6317_v47  ;;  %v6574_v61 = vor.u32 %v9374_v57, %v6573_v56 }
 0x18e   :  { %5369 = vmatpush.bf16.msrb.mxu1 %v8922_v62  ;;  %v6301_v62 = vld [vmem:[#allocation2 + $0xa8] sm:$0xf]  ;;  %v6702_v2 = vor.u32 %v9406_v59, %v6701_v58  ;;  %v9338_v3 = vld [vmem:[#allocation2 + $0x1b4] sm:$0xf0] }
 0x18f   :  { %5382 = vmatpush.bf16.msrb.mxu2 %v9050_v63  ;;  %v9306_v63 = vld [vmem:[#allocation2 + $0xb4] sm:$0xf0]  ;;  %v6429_v0 = vld [vmem:[#allocation2 + $0x1a8] sm:$0xf] }
 0x190   :  { %5395 = vmatpush.bf16.msrb.mxu3 %v9178_v5  ;;  %v6557_v4 = vld [vmem:[#allocation2 + $0x2a8] sm:$0xf]  ;;  %v9370_v5 = vld [vmem:[#allocation2 + $0x2b4] sm:$0xf0]  ;;  %v6302_v8 = vor.u32 %v9306_v63, %v6301_v62  ;;  %v6430_v9 = vor.u32 %v9338_v3, %v6429_v0 }
 0x191   :  { %5357 = vmatpush.bf16.msrb.mxu0 %v8778_v17  ;;  %v6685_v55 = vld [vmem:[#allocation2 + $0x3a8] sm:$0xf]  ;;  %v9402_v6 = vld [vmem:[#allocation2 + $0x3b4] sm:$0xf0]  ;;  %v6558_v10 = vor.u32 %v9370_v5, %v6557_v4 }
 0x192   :  { %5370 = vmatpush.bf16.msrb.mxu1 %v8906_v26  ;;  %v6285_v13 = vld [vmem:[#allocation2 + $0x88] sm:$0xf]  ;;  %v9302_v15 = vld [vmem:[#allocation2 + $0x94] sm:$0xf0]  ;;  %v6686_v1 = vor.u32 %v9402_v6, %v6685_v55 }
 0x193   :  { %5383 = vmatpush.bf16.msrb.mxu2 %v9034_v27  ;;  %v6413_v17 = vld [vmem:[#allocation2 + $0x188] sm:$0xf]  ;;  %v9334_v21 = vld [vmem:[#allocation2 + $0x194] sm:$0xf0]  ;;  %v6286_v34 = vor.u32 %v9302_v15, %v6285_v13 }
 0x194   :  { %5396 = vmatpush.bf16.msrb.mxu3 %v9162_v39  ;;  %5358 = vmatmul.bf16.vlgmr.msrb.gmra.mxu0 %v10312_v7  ;;  %v6541_v24 = vld [vmem:[#allocation2 + $0x288] sm:$0xf]  ;;  %v9366_v26 = vld [vmem:[#allocation2 + $0x294] sm:$0xf0]  ;;  %v5151_v39 = vpop.f32.mrf.mxu0 }
 0x195   :  { %5402 = vmatpush.bf16.msra.mxu0 %v6334_v40  ;;  %5371 = vmatmul.bf16.vlgmr.msrb.gmra.mxu1 %v10316_v12  ;;  %v6669_v27 = vld [vmem:[#allocation2 + $0x388] sm:$0xf]  ;;  %v9398_v32 = vld [vmem:[#allocation2 + $0x394] sm:$0xf0]  ;;  %v6414_v40 = vor.u32 %v9334_v21, %v6413_v17  ;;  %v5152_v50 = vadd.f32 %v5151_v39, %v10359_v36 }
 0x196   :  { %5415 = vmatpush.bf16.msra.mxu1 %v6462_v43  ;;  %5384 = vmatmul.bf16.vlgmr.msrb.gmra.mxu2 %v10314_v11  ;;  %v6542_v43 = vor.u32 %v9366_v26, %v6541_v24  ;;  %v9298_v47 = vld [vmem:[#allocation2 + $0x74] sm:$0xf0]  ;;  %v6397_v48 = vld [vmem:[#allocation2 + $0x168] sm:$0xf]  ;;  %v6670_v52 = vor.u32 %v9398_v32, %v6669_v27 }
 0x197   :  { %5428 = vmatpush.bf16.msra.mxu2 %v6590_v14  ;;  %5397 = vmatmul.bf16.vlgmr.msrb.gmra.mxu3 %v10318_v16  ;;  %v6269_v14 = vld [vmem:[#allocation2 + $0x68] sm:$0xf]  ;;  %v9330_v56 = vld [vmem:[#allocation2 + $0x174] sm:$0xf0] }
 0x198   :  { %5441 = vmatpush.bf16.msra.mxu3 %v6718_v51  ;;  %v5164_v51 = vpop.f32.mrf.mxu1  ;;  %v6525_v57 = vld [vmem:[#allocation2 + $0x268] sm:$0xf]  ;;  %v9362_v58 = vld [vmem:[#allocation2 + $0x274] sm:$0xf0]  ;;  %v6398_v62 = vor.u32 %v9330_v56, %v6397_v48 }
 0x199   :  { %5403 = vmatpush.bf16.msra.mxu0 %v6318_v53  ;;  %v6653_v59 = vld [vmem:[#allocation2 + $0x368] sm:$0xf]  ;;  %v9394_v53 = vld [vmem:[#allocation2 + $0x374] sm:$0xf0]  ;;  %v6526_v63 = vor.u32 %v9362_v58, %v6525_v57  ;;  %v5177_v4 = vpop.f32.mrf.mxu2 }
 0x19a   :  { %5416 = vmatpush.bf16.msra.mxu1 %v6446_v60  ;;  %v5165_v60 = vadd.f32 %v5164_v51, %v5152_v50  ;;  %v6253_v0 = vld [vmem:[#allocation2 + $0x48] sm:$0xf]  ;;  %v6654_v36 = vor.u32 %v9394_v53, %v6653_v59  ;;  %v9326_v5 = vld [vmem:[#allocation2 + $0x154] sm:$0xf0] }
 0x19b   :  { %5429 = vmatpush.bf16.msra.mxu2 %v6574_v61  ;;  %v6270_v61 = vor.u32 %v9298_v47, %v6269_v14  ;;  %v6381_v3 = vld [vmem:[#allocation2 + $0x148] sm:$0xf]  ;;  %v9358_v6 = vld [vmem:[#allocation2 + $0x254] sm:$0xf0] }
 0x19c   :  { %5442 = vmatpush.bf16.msra.mxu3 %v6702_v2  ;;  %v9294_v2 = vld [vmem:[#allocation2 + $0x54] sm:$0xf0]  ;;  %v6509_v55 = vld [vmem:[#allocation2 + $0x248] sm:$0xf]  ;;  %v6382_v21 = vor.u32 %v9326_v5, %v6381_v3 }
 0x19d   :  { %5404 = vmatpush.bf16.msra.mxu0 %v6302_v8  ;;  %v5178_v8 = vadd.f32 %v5177_v4, %v5165_v60  ;;  %v9390_v13 = vld [vmem:[#allocation2 + $0x354] sm:$0xf0]  ;;  %v6254_v15 = vor.u32 %v9294_v2, %v6253_v0  ;;  %v6510_v24 = vor.u32 %v9358_v6, %v6509_v55  ;;  %v6237_v26 = vld [vmem:[#allocation2 + $0x28] sm:$0xf] }
 0x19e   :  { %5417 = vmatpush.bf16.msra.mxu1 %v6430_v9  ;;  %v5190_v9 = vpop.f32.mrf.mxu3  ;;  %v9290_v27 = vld [vmem:[#allocation2 + $0x34] sm:$0xf0]  ;;  %v6365_v32 = vld [vmem:[#allocation2 + $0x128] sm:$0xf] }
 0x19f   :  { %5430 = vmatpush.bf16.msra.mxu2 %v6558_v10  ;;  %v6637_v10 = vld [vmem:[#allocation2 + $0x348] sm:$0xf]  ;;  %v10366_v17 = vadd.f32 %v5190_v9, %v5178_v8  ;;  %v9354_v14 = vld [vmem:[#allocation2 + $0x234] sm:$0xf0]  ;;  %v6238_v50 = vor.u32 %v9290_v27, %v6237_v26 }
 0x1a0   :  { %5443 = vmatpush.bf16.msra.mxu3 %v6686_v1  ;;  %v5153_v1 = vpop.f32.mrf.mxu0  ;;  %v6638_v39 = vor.u32 %v9390_v13, %v6637_v10  ;;  %v6621_v47 = vld [vmem:[#allocation2 + $0x328] sm:$0xf]  ;;  %v9386_v48 = vld [vmem:[#allocation2 + $0x334] sm:$0xf0] }
 0x1a1   :  { %5405 = vmatpush.bf16.msra.mxu0 %v6286_v34  ;;  %v5166_v34 = vpop.f32.mrf.mxu1  ;;  %v6221_v51 = vld [vmem:[#allocation2 + $0x8] sm:$0xf]  ;;  %v9318_v59 = vld [vmem:[#allocation2 + $0x114] sm:$0xf0]  ;;  %v5179_v60 = vpop.f32.mrf.mxu2 }
 0x1a2   :  { %5418 = vmatpush.bf16.msra.mxu1 %v6414_v40  ;;  %v9322_v40 = vld [vmem:[#allocation2 + $0x134] sm:$0xf0]  ;;  %v6349_v58 = vld [vmem:[#allocation2 + $0x108] sm:$0xf] }
 0x1a3   :  { %5431 = vmatpush.bf16.msra.mxu2 %v6542_v43  ;;  %v6493_v43 = vld [vmem:[#allocation2 + $0x228] sm:$0xf]  ;;  %v6366_v56 = vor.u32 %v9322_v40, %v6365_v32  ;;  %v9382_v0 = vld [vmem:[#allocation2 + $0x314] sm:$0xf0]  ;;  %v6350_v9 = vor.u32 %v9318_v59, %v6349_v58 }
 0x1a4   :  { %5444 = vmatpush.bf16.msra.mxu3 %v6670_v52  ;;  %v9286_v52 = vld [vmem:[#allocation2 + $0x14] sm:$0xf0]  ;;  %v6494_v57 = vor.u32 %v9354_v14, %v6493_v43  ;;  %v6477_v53 = vld [vmem:[#allocation2 + $0x208] sm:$0xf] }
 0x1a5   :  { %5406 = vmatpush.bf16.msra.mxu0 %v6270_v61  ;;  %v6622_v61 = vor.u32 %v9386_v48, %v6621_v47  ;;  %v6845_v3 = vld [vmem:[#allocation2 + $0x4e8] sm:$0xf]  ;;  %v9442_v4 = vld [vmem:[#allocation2 + $0x4f4] sm:$0xf0]  ;;  %v6222_v5 = vor.u32 %v9286_v52, %v6221_v51 }
 0x1a6   :  { %5419 = vmatpush.bf16.msra.mxu1 %v6398_v62  ;;  %v9350_v62 = vld [vmem:[#allocation2 + $0x214] sm:$0xf0]  ;;  %v5192_v2 = vpop.f32.mrf.mxu3  ;;  %v7101_v6 = vld [vmem:[#allocation2 + $0x6e8] sm:$0xf] }
 0x1a7   :  { %5432 = vmatpush.bf16.msra.mxu2 %v6526_v63  ;;  %v6605_v63 = vld [vmem:[#allocation2 + $0x308] sm:$0xf]  ;;  %v9474_v55 = vld [vmem:[#allocation2 + $0x5f4] sm:$0xf0]  ;;  %v6478_v10 = vor.u32 %v9350_v62, %v6477_v53 }
 0x1a8   :  { %5445 = vmatpush.bf16.msra.mxu3 %v6654_v36  ;;  %v6973_v36 = vld [vmem:[#allocation2 + $0x5e8] sm:$0xf]  ;;  %v9506_v8 = vld [vmem:[#allocation2 + $0x6f4] sm:$0xf0]  ;;  %v6606_v1 = vor.u32 %v9382_v0, %v6605_v63 }
 0x1a9   :  { %5407 = vmatpush.bf16.msra.mxu0 %v6254_v15  ;;  %v7229_v13 = vld [vmem:[#allocation2 + $0x7e8] sm:$0xf]  ;;  %v9538_v15 = vld [vmem:[#allocation2 + $0x7f4] sm:$0xf0]  ;;  %v7102_v26 = vor.u32 %v9506_v8, %v7101_v6 }
 0x1aa   :  { %5420 = vmatpush.bf16.msra.mxu1 %v6382_v21  ;;  %v6846_v21 = vor.u32 %v9442_v4, %v6845_v3  ;;  %v6829_v27 = vld [vmem:[#allocation2 + $0x4c8] sm:$0xf]  ;;  %v9438_v32 = vld [vmem:[#allocation2 + $0x4d4] sm:$0xf0] }
 0x1ab   :  { %5433 = vmatpush.bf16.msra.mxu2 %v6510_v24  ;;  %v6974_v24 = vor.u32 %v9474_v55, %v6973_v36  ;;  %v6957_v34 = vld [vmem:[#allocation2 + $0x5c8] sm:$0xf]  ;;  %v9470_v40 = vld [vmem:[#allocation2 + $0x5d4] sm:$0xf0] }
 0x1ac   :  { %5446 = vmatpush.bf16.msra.mxu3 %v6638_v39  ;;  %v7230_v39 = vor.u32 %v9538_v15, %v7229_v13  ;;  %v7085_v43 = vld [vmem:[#allocation2 + $0x6c8] sm:$0xf]  ;;  %v9502_v14 = vld [vmem:[#allocation2 + $0x6d4] sm:$0xf0]  ;;  %v6958_v51 = vor.u32 %v9470_v40, %v6957_v34 }
 0x1ad   :  { %5408 = vmatpush.bf16.msra.mxu0 %v6238_v50  ;;  %v7213_v47 = vld [vmem:[#allocation2 + $0x7c8] sm:$0xf]  ;;  %v9534_v48 = vld [vmem:[#allocation2 + $0x7d4] sm:$0xf0]  ;;  %v6830_v50 = vor.u32 %v9438_v32, %v6829_v27  ;;  %v7086_v52 = vor.u32 %v9502_v14, %v7085_v43 }
 0x1ae   :  { %5421 = vmatpush.bf16.msra.mxu1 %v6366_v56  ;;  %v6813_v56 = vld [vmem:[#allocation2 + $0x4a8] sm:$0xf]  ;;  %v7214_v59 = vor.u32 %v9534_v48, %v7213_v47  ;;  %v9466_v53 = vld [vmem:[#allocation2 + $0x5b4] sm:$0xf0] }
 0x1af   :  { %5434 = vmatpush.bf16.msra.mxu2 %v6494_v57  ;;  %v9434_v57 = vld [vmem:[#allocation2 + $0x4b4] sm:$0xf0]  ;;  %v6941_v58 = vld [vmem:[#allocation2 + $0x5a8] sm:$0xf] }
 0x1b0   :  { %5447 = vmatpush.bf16.msra.mxu3 %v6622_v61  ;;  %v7069_v60 = vld [vmem:[#allocation2 + $0x6a8] sm:$0xf]  ;;  %v9498_v61 = vld [vmem:[#allocation2 + $0x6b4] sm:$0xf0]  ;;  %v6814_v0 = vor.u32 %v9434_v57, %v6813_v56  ;;  %v6942_v2 = vor.u32 %v9466_v53, %v6941_v58 }
 0x1b1   :  { %5409 = vmatpush.bf16.msra.mxu0 %v6222_v5  ;;  %v7197_v62 = vld [vmem:[#allocation2 + $0x7a8] sm:$0xf]  ;;  %v9530_v63 = vld [vmem:[#allocation2 + $0x7b4] sm:$0xf0]  ;;  %v7070_v3 = vor.u32 %v9498_v61, %v7069_v60 }
 0x1b2   :  { %5422 = vmatpush.bf16.msra.mxu1 %v6350_v9  ;;  %v6797_v4 = vld [vmem:[#allocation2 + $0x488] sm:$0xf]  ;;  %v9430_v36 = vld [vmem:[#allocation2 + $0x494] sm:$0xf0]  ;;  %v7198_v55 = vor.u32 %v9530_v63, %v7197_v62 }
 0x1b3   :  { %5435 = vmatpush.bf16.msra.mxu2 %v6478_v10  ;;  %v6925_v5 = vld [vmem:[#allocation2 + $0x588] sm:$0xf]  ;;  %v9462_v6 = vld [vmem:[#allocation2 + $0x594] sm:$0xf0]  ;;  %v5203_v10 = vpop.f32.mrf.mxu0 }
 0x1b4   :  { %5448 = vmatpush.bf16.msra.mxu3 %v6606_v1  ;;  %5410 = vmatmul.bf16.vlgmr.msra.gmra.mxu0 %v10222_v19  ;;  %v7053_v8 = vld [vmem:[#allocation2 + $0x688] sm:$0xf]  ;;  %v9494_v9 = vld [vmem:[#allocation2 + $0x694] sm:$0xf0]  ;;  %v5204_v1 = vadd.f32 %v5203_v10, %v10366_v17 }
 0x1b5   :  { %5454 = vmatpush.bf16.msrb.mxu0 %v6846_v21  ;;  %5423 = vmatmul.bf16.vlgmr.msra.gmra.mxu1 %v10226_v22  ;;  %v7181_v13 = vld [vmem:[#allocation2 + $0x788] sm:$0xf]  ;;  %v9526_v15 = vld [vmem:[#allocation2 + $0x794] sm:$0xf0]  ;;  %v6798_v21 = vor.u32 %v9430_v36, %v6797_v4  ;;  %v7054_v27 = vor.u32 %v9494_v9, %v7053_v8 }
 0x1b6   :  { %5467 = vmatpush.bf16.msrb.mxu1 %v6974_v24  ;;  %5436 = vmatmul.bf16.vlgmr.msra.gmra.mxu2 %v10220_v18  ;;  %v5216_v24 = vpop.f32.mrf.mxu1  ;;  %v6781_v32 = vld [vmem:[#allocation2 + $0x468] sm:$0xf]  ;;  %v9426_v34 = vld [vmem:[#allocation2 + $0x474] sm:$0xf0]  ;;  %v7182_v40 = vor.u32 %v9526_v15, %v7181_v13 }
 0x1b7   :  { %5480 = vmatpush.bf16.msrb.mxu2 %v7102_v26  ;;  %5449 = vmatmul.bf16.vlgmr.msra.gmra.mxu3 %v10224_v20  ;;  %v6926_v26 = vor.u32 %v9462_v6, %v6925_v5  ;;  %v5217_v43 = vadd.f32 %v5216_v24, %v5204_v1  ;;  %v9458_v14 = vld [vmem:[#allocation2 + $0x574] sm:$0xf0]  ;;  %v7037_v47 = vld [vmem:[#allocation2 + $0x668] sm:$0xf] }
 0x1b8   :  { %5493 = vmatpush.bf16.msrb.mxu3 %v7230_v39  ;;  %v6909_v39 = vld [vmem:[#allocation2 + $0x568] sm:$0xf]  ;;  %v9490_v48 = vld [vmem:[#allocation2 + $0x674] sm:$0xf0] }
 0x1b9   :  { %5455 = vmatpush.bf16.msrb.mxu0 %v6830_v50  ;;  %v7165_v50 = vld [vmem:[#allocation2 + $0x768] sm:$0xf]  ;;  %v6910_v17 = vor.u32 %v9458_v14, %v6909_v39  ;;  %v7038_v56 = vor.u32 %v9490_v48, %v7037_v47  ;;  %v9422_v58 = vld [vmem:[#allocation2 + $0x454] sm:$0xf0]  ;;  %v5229_v60 = vpop.f32.mrf.mxu2 }
 0x1ba   :  { %5468 = vmatpush.bf16.msrb.mxu1 %v6958_v51  ;;  %v9522_v51 = vld [vmem:[#allocation2 + $0x774] sm:$0xf0]  ;;  %v6765_v57 = vld [vmem:[#allocation2 + $0x448] sm:$0xf] }
 0x1bb   :  { %5481 = vmatpush.bf16.msrb.mxu2 %v7086_v52  ;;  %v6782_v52 = vor.u32 %v9426_v34, %v6781_v32  ;;  %v7166_v53 = vor.u32 %v9522_v51, %v7165_v50  ;;  %v9454_v61 = vld [vmem:[#allocation2 + $0x554] sm:$0xf0]  ;;  %v7021_v62 = vld [vmem:[#allocation2 + $0x648] sm:$0xf]  ;;  %v5205_v36 = vpop.f32.mrf.mxu0  ;;  %v6766_v5 = vor.u32 %v9422_v58, %v6765_v57 }
 0x1bc   :  { %5494 = vmatpush.bf16.msrb.mxu3 %v7214_v59  ;;  %v6893_v59 = vld [vmem:[#allocation2 + $0x548] sm:$0xf]  ;;  %v9486_v63 = vld [vmem:[#allocation2 + $0x654] sm:$0xf0] }
 0x1bd   :  { %5456 = vmatpush.bf16.msrb.mxu0 %v6814_v0  ;;  %v5230_v0 = vadd.f32 %v5229_v60, %v5217_v43  ;;  %v9518_v4 = vld [vmem:[#allocation2 + $0x754] sm:$0xf0]  ;;  %v6894_v8 = vor.u32 %v9454_v61, %v6893_v59  ;;  %v7022_v9 = vor.u32 %v9486_v63, %v7021_v62  ;;  %v6749_v10 = vld [vmem:[#allocation2 + $0x428] sm:$0xf] }
 0x1be   :  { %5469 = vmatpush.bf16.msrb.mxu1 %v6942_v2  ;;  %v5242_v2 = vpop.f32.mrf.mxu3  ;;  %v9418_v13 = vld [vmem:[#allocation2 + $0x434] sm:$0xf0]  ;;  %v6877_v15 = vld [vmem:[#allocation2 + $0x528] sm:$0xf] }
 0x1bf   :  { %5482 = vmatpush.bf16.msrb.mxu2 %v7070_v3  ;;  %v7149_v3 = vld [vmem:[#allocation2 + $0x748] sm:$0xf]  ;;  %v10373_v6 = vadd.f32 %v5242_v2, %v5230_v0  ;;  %v9514_v32 = vld [vmem:[#allocation2 + $0x734] sm:$0xf0]  ;;  %v6750_v34 = vor.u32 %v9418_v13, %v6749_v10 }
 0x1c0   :  { %5495 = vmatpush.bf16.msrb.mxu3 %v7198_v55  ;;  %v5218_v55 = vpop.f32.mrf.mxu1  ;;  %v7150_v1 = vor.u32 %v9518_v4, %v7149_v3  ;;  %v7005_v24 = vld [vmem:[#allocation2 + $0x628] sm:$0xf]  ;;  %v9446_v48 = vld [vmem:[#allocation2 + $0x514] sm:$0xf0] }
 0x1c1   :  { %5457 = vmatpush.bf16.msrb.mxu0 %v6798_v21  ;;  %v9450_v21 = vld [vmem:[#allocation2 + $0x534] sm:$0xf0]  ;;  %v6733_v39 = vld [vmem:[#allocation2 + $0x408] sm:$0xf]  ;;  %v5231_v57 = vpop.f32.mrf.mxu2 }
 0x1c2   :  { %5470 = vmatpush.bf16.msrb.mxu1 %v6926_v26  ;;  %v9482_v26 = vld [vmem:[#allocation2 + $0x634] sm:$0xf0]  ;;  %v6878_v43 = vor.u32 %v9450_v21, %v6877_v15  ;;  %v6861_v47 = vld [vmem:[#allocation2 + $0x508] sm:$0xf] }
 0x1c3   :  { %5483 = vmatpush.bf16.msrb.mxu2 %v7054_v27  ;;  %v7133_v27 = vld [vmem:[#allocation2 + $0x728] sm:$0xf]  ;;  %v7006_v14 = vor.u32 %v9482_v26, %v7005_v24  ;;  %v9570_v59 = vld [vmem:[#allocation2 + $0x8f4] sm:$0xf0]  ;;  %v6862_v2 = vor.u32 %v9446_v48, %v6861_v47 }
 0x1c4   :  { %5496 = vmatpush.bf16.msrb.mxu3 %v7182_v40  ;;  %v9414_v40 = vld [vmem:[#allocation2 + $0x414] sm:$0xf0]  ;;  %v6989_v50 = vld [vmem:[#allocation2 + $0x608] sm:$0xf]  ;;  %v7134_v51 = vor.u32 %v9514_v32, %v7133_v27 }
 0x1c5   :  { %5458 = vmatpush.bf16.msrb.mxu0 %v6782_v52  ;;  %v9478_v52 = vld [vmem:[#allocation2 + $0x614] sm:$0xf0]  ;;  %v7357_v58 = vld [vmem:[#allocation2 + $0x8e8] sm:$0xf]  ;;  %v6734_v61 = vor.u32 %v9414_v40, %v6733_v39 }
 0x1c6   :  { %5471 = vmatpush.bf16.msrb.mxu1 %v6910_v17  ;;  %v7117_v17 = vld [vmem:[#allocation2 + $0x708] sm:$0xf]  ;;  %v5244_v60 = vpop.f32.mrf.mxu3  ;;  %v9602_v62 = vld [vmem:[#allocation2 + $0x9f4] sm:$0xf0]  ;;  %v6990_v3 = vor.u32 %v9478_v52, %v6989_v50  ;;  %v7358_v55 = vor.u32 %v9570_v59, %v7357_v58 }
 0x1c7   :  { %5484 = vmatpush.bf16.msrb.mxu2 %v7038_v56  ;;  %v9510_v56 = vld [vmem:[#allocation2 + $0x714] sm:$0xf0]  ;;  %v7613_v63 = vld [vmem:[#allocation2 + $0xae8] sm:$0xf] }
 0x1c8   :  { %5497 = vmatpush.bf16.msrb.mxu3 %v7166_v53  ;;  %v7485_v53 = vld [vmem:[#allocation2 + $0x9e8] sm:$0xf]  ;;  %v9634_v0 = vld [vmem:[#allocation2 + $0xaf4] sm:$0xf0] }
 0x1c9   :  { %5459 = vmatpush.bf16.msrb.mxu0 %v6766_v5  ;;  %v7741_v4 = vld [vmem:[#allocation2 + $0xbe8] sm:$0xf]  ;;  %v9666_v36 = vld [vmem:[#allocation2 + $0xbf4] sm:$0xf0]  ;;  %v7118_v5 = vor.u32 %v9510_v56, %v7117_v17 }
 0x1ca   :  { %5472 = vmatpush.bf16.msrb.mxu1 %v6894_v8  ;;  %v7486_v8 = vor.u32 %v9602_v62, %v7485_v53  ;;  %v7341_v10 = vld [vmem:[#allocation2 + $0x8c8] sm:$0xf]  ;;  %v9566_v13 = vld [vmem:[#allocation2 + $0x8d4] sm:$0xf0] }
 0x1cb   :  { %5485 = vmatpush.bf16.msrb.mxu2 %v7022_v9  ;;  %v7614_v9 = vor.u32 %v9634_v0, %v7613_v63  ;;  %v7469_v15 = vld [vmem:[#allocation2 + $0x9c8] sm:$0xf]  ;;  %v9598_v21 = vld [vmem:[#allocation2 + $0x9d4] sm:$0xf0] }
 0x1cc   :  { %5498 = vmatpush.bf16.msrb.mxu3 %v7150_v1  ;;  %v7742_v1 = vor.u32 %v9666_v36, %v7741_v4  ;;  %v7597_v24 = vld [vmem:[#allocation2 + $0xac8] sm:$0xf]  ;;  %v9630_v26 = vld [vmem:[#allocation2 + $0xad4] sm:$0xf0]  ;;  %v7470_v39 = vor.u32 %v9598_v21, %v7469_v15 }
 0x1cd   :  { %5460 = vmatpush.bf16.msrb.mxu0 %v6750_v34  ;;  %v7725_v27 = vld [vmem:[#allocation2 + $0xbc8] sm:$0xf]  ;;  %v9662_v32 = vld [vmem:[#allocation2 + $0xbd4] sm:$0xf0]  ;;  %v7342_v34 = vor.u32 %v9566_v13, %v7341_v10  ;;  %v7598_v40 = vor.u32 %v9630_v26, %v7597_v24 }
 0x1ce   :  { %5473 = vmatpush.bf16.msrb.mxu1 %v6878_v43  ;;  %v7325_v43 = vld [vmem:[#allocation2 + $0x8a8] sm:$0xf]  ;;  %v7726_v48 = vor.u32 %v9662_v32, %v7725_v27  ;;  %v9594_v50 = vld [vmem:[#allocation2 + $0x9b4] sm:$0xf0] }
 0x1cf   :  { %5486 = vmatpush.bf16.msrb.mxu2 %v7006_v14  ;;  %v9562_v14 = vld [vmem:[#allocation2 + $0x8b4] sm:$0xf0]  ;;  %v7453_v47 = vld [vmem:[#allocation2 + $0x9a8] sm:$0xf] }
 0x1d0   :  { %5499 = vmatpush.bf16.msrb.mxu3 %v7134_v51  ;;  %v7581_v51 = vld [vmem:[#allocation2 + $0xaa8] sm:$0xf]  ;;  %v9626_v52 = vld [vmem:[#allocation2 + $0xab4] sm:$0xf0]  ;;  %v7326_v57 = vor.u32 %v9562_v14, %v7325_v43  ;;  %v7454_v58 = vor.u32 %v9594_v50, %v7453_v47 }
 0x1d1   :  { %5461 = vmatpush.bf16.msrb.mxu0 %v6734_v61  ;;  %v7709_v17 = vld [vmem:[#allocation2 + $0xba8] sm:$0xf]  ;;  %v9658_v56 = vld [vmem:[#allocation2 + $0xbb4] sm:$0xf0]  ;;  %v7582_v59 = vor.u32 %v9626_v52, %v7581_v51 }
 0x1d2   :  { %5474 = vmatpush.bf16.msrb.mxu1 %v6862_v2  ;;  %v7309_v53 = vld [vmem:[#allocation2 + $0x888] sm:$0xf]  ;;  %v9558_v60 = vld [vmem:[#allocation2 + $0x894] sm:$0xf0]  ;;  %v7710_v62 = vor.u32 %v9658_v56, %v7709_v17 }
 0x1d3   :  { %5487 = vmatpush.bf16.msrb.mxu2 %v6990_v3  ;;  %v7437_v61 = vld [vmem:[#allocation2 + $0x988] sm:$0xf]  ;;  %v9590_v63 = vld [vmem:[#allocation2 + $0x994] sm:$0xf0]  ;;  %v5255_v3 = vpop.f32.mrf.mxu0 }
 0x1d4   :  { %5500 = vmatpush.bf16.msrb.mxu3 %v7118_v5  ;;  %5462 = vmatmul.bf16.vlgmr.msrb.gmra.mxu0 %v10240_v41  ;;  %v7565_v0 = vld [vmem:[#allocation2 + $0xa88] sm:$0xf]  ;;  %v9622_v2 = vld [vmem:[#allocation2 + $0xa94] sm:$0xf0]  ;;  %v5256_v5 = vadd.f32 %v5255_v3, %v10373_v6 }
 0x1d5   :  { %5506 = vmatpush.bf16.msra.mxu0 %v7358_v55  ;;  %5475 = vmatmul.bf16.vlgmr.msrb.gmra.mxu1 %v10244_v44  ;;  %v7693_v4 = vld [vmem:[#allocation2 + $0xb88] sm:$0xf]  ;;  %v9654_v36 = vld [vmem:[#allocation2 + $0xb94] sm:$0xf0]  ;;  %v7310_v55 = vor.u32 %v9558_v60, %v7309_v53  ;;  %v7566_v10 = vor.u32 %v9622_v2, %v7565_v0 }
 0x1d6   :  { %5519 = vmatpush.bf16.msra.mxu1 %v7486_v8  ;;  %5488 = vmatmul.bf16.vlgmr.msrb.gmra.mxu2 %v10238_v38  ;;  %v5268_v8 = vpop.f32.mrf.mxu1  ;;  %v7293_v13 = vld [vmem:[#allocation2 + $0x868] sm:$0xf]  ;;  %v9554_v15 = vld [vmem:[#allocation2 + $0x874] sm:$0xf0]  ;;  %v7694_v21 = vor.u32 %v9654_v36, %v7693_v4 }
 0x1d7   :  { %5532 = vmatpush.bf16.msra.mxu2 %v7614_v9  ;;  %5501 = vmatmul.bf16.vlgmr.msrb.gmra.mxu3 %v10242_v42  ;;  %v7438_v9 = vor.u32 %v9590_v63, %v7437_v61  ;;  %v5269_v24 = vadd.f32 %v5268_v8, %v5256_v5  ;;  %v9586_v26 = vld [vmem:[#allocation2 + $0x974] sm:$0xf0]  ;;  %v7549_v27 = vld [vmem:[#allocation2 + $0xa68] sm:$0xf] }
 0x1d8   :  { %5545 = vmatpush.bf16.msra.mxu3 %v7742_v1  ;;  %v7421_v1 = vld [vmem:[#allocation2 + $0x968] sm:$0xf]  ;;  %v9618_v32 = vld [vmem:[#allocation2 + $0xa74] sm:$0xf0] }
 0x1d9   :  { %5507 = vmatpush.bf16.msra.mxu0 %v7342_v34  ;;  %v7677_v34 = vld [vmem:[#allocation2 + $0xb68] sm:$0xf]  ;;  %v7422_v6 = vor.u32 %v9586_v26, %v7421_v1  ;;  %v7550_v43 = vor.u32 %v9618_v32, %v7549_v27  ;;  %v9550_v47 = vld [vmem:[#allocation2 + $0x854] sm:$0xf0]  ;;  %v5281_v51 = vpop.f32.mrf.mxu2 }
 0x1da   :  { %5520 = vmatpush.bf16.msra.mxu1 %v7470_v39  ;;  %v9650_v39 = vld [vmem:[#allocation2 + $0xb74] sm:$0xf0]  ;;  %v7277_v14 = vld [vmem:[#allocation2 + $0x848] sm:$0xf] }
 0x1db   :  { %5533 = vmatpush.bf16.msra.mxu2 %v7598_v40  ;;  %v7294_v40 = vor.u32 %v9554_v15, %v7293_v13  ;;  %v7678_v50 = vor.u32 %v9650_v39, %v7677_v34  ;;  %v9582_v52 = vld [vmem:[#allocation2 + $0x954] sm:$0xf0]  ;;  %v7533_v17 = vld [vmem:[#allocation2 + $0xa48] sm:$0xf]  ;;  %v5257_v60 = vpop.f32.mrf.mxu0  ;;  %v7278_v61 = vor.u32 %v9550_v47, %v7277_v14 }
 0x1dc   :  { %5546 = vmatpush.bf16.msra.mxu3 %v7726_v48  ;;  %v7405_v48 = vld [vmem:[#allocation2 + $0x948] sm:$0xf]  ;;  %v9614_v56 = vld [vmem:[#allocation2 + $0xa54] sm:$0xf0] }
 0x1dd   :  { %5508 = vmatpush.bf16.msra.mxu0 %v7326_v57  ;;  %v5282_v57 = vadd.f32 %v5281_v51, %v5269_v24  ;;  %v9646_v53 = vld [vmem:[#allocation2 + $0xb54] sm:$0xf0]  ;;  %v7406_v0 = vor.u32 %v9582_v52, %v7405_v48  ;;  %v7534_v2 = vor.u32 %v9614_v56, %v7533_v17  ;;  %v7261_v3 = vld [vmem:[#allocation2 + $0x828] sm:$0xf] }
 0x1de   :  { %5521 = vmatpush.bf16.msra.mxu1 %v7454_v58  ;;  %v5294_v58 = vpop.f32.mrf.mxu3  ;;  %v9546_v4 = vld [vmem:[#allocation2 + $0x834] sm:$0xf0]  ;;  %v7389_v36 = vld [vmem:[#allocation2 + $0x928] sm:$0xf] }
 0x1df   :  { %5534 = vmatpush.bf16.msra.mxu2 %v7582_v59  ;;  %v7661_v59 = vld [vmem:[#allocation2 + $0xb48] sm:$0xf]  ;;  %v10380_v63 = vadd.f32 %v5294_v58, %v5282_v57  ;;  %v9642_v13 = vld [vmem:[#allocation2 + $0xb34] sm:$0xf0]  ;;  %v7262_v15 = vor.u32 %v9546_v4, %v7261_v3 }
 0x1e0   :  { %5547 = vmatpush.bf16.msra.mxu3 %v7710_v62  ;;  %v5270_v62 = vpop.f32.mrf.mxu1  ;;  %v7662_v5 = vor.u32 %v9646_v53, %v7661_v59  ;;  %v7517_v8 = vld [vmem:[#allocation2 + $0xa28] sm:$0xf]  ;;  %v9574_v32 = vld [vmem:[#allocation2 + $0x914] sm:$0xf0] }
 0x1e1   :  { %5509 = vmatpush.bf16.msra.mxu0 %v7310_v55  ;;  %v9578_v55 = vld [vmem:[#allocation2 + $0x934] sm:$0xf0]  ;;  %v7245_v1 = vld [vmem:[#allocation2 + $0x808] sm:$0xf]  ;;  %v5283_v14 = vpop.f32.mrf.mxu2 }
 0x1e2   :  { %5522 = vmatpush.bf16.msra.mxu1 %v7438_v9  ;;  %v9610_v9 = vld [vmem:[#allocation2 + $0xa34] sm:$0xf0]  ;;  %v7390_v24 = vor.u32 %v9578_v55, %v7389_v36  ;;  %v7373_v27 = vld [vmem:[#allocation2 + $0x908] sm:$0xf] }
 0x1e3   :  { %5535 = vmatpush.bf16.msra.mxu2 %v7566_v10  ;;  %v7645_v10 = vld [vmem:[#allocation2 + $0xb28] sm:$0xf]  ;;  %v7518_v26 = vor.u32 %v9610_v9, %v7517_v8  ;;  %v9698_v48 = vld [vmem:[#allocation2 + $0xcf4] sm:$0xf0]  ;;  %v7374_v58 = vor.u32 %v9574_v32, %v7373_v27 }
 0x1e4   :  { %5548 = vmatpush.bf16.msra.mxu3 %v7694_v21  ;;  %v9542_v21 = vld [vmem:[#allocation2 + $0x814] sm:$0xf0]  ;;  %v7501_v34 = vld [vmem:[#allocation2 + $0xa08] sm:$0xf]  ;;  %v7646_v39 = vor.u32 %v9642_v13, %v7645_v10 }
 0x1e5   :  { %5510 = vmatpush.bf16.msra.mxu0 %v7294_v40  ;;  %v9606_v40 = vld [vmem:[#allocation2 + $0xa14] sm:$0xf0]  ;;  %v7869_v47 = vld [vmem:[#allocation2 + $0xce8] sm:$0xf]  ;;  %v7246_v52 = vor.u32 %v9542_v21, %v7245_v1 }
 0x1e6   :  { %5523 = vmatpush.bf16.msra.mxu1 %v7422_v6  ;;  %v7629_v6 = vld [vmem:[#allocation2 + $0xb08] sm:$0xf]  ;;  %v5296_v51 = vpop.f32.mrf.mxu3  ;;  %v9730_v17 = vld [vmem:[#allocation2 + $0xdf4] sm:$0xf0]  ;;  %v7502_v59 = vor.u32 %v9606_v40, %v7501_v34  ;;  %v7870_v62 = vor.u32 %v9698_v48, %v7869_v47 }
 0x1e7   :  { %5536 = vmatpush.bf16.msra.mxu2 %v7550_v43  ;;  %v9638_v43 = vld [vmem:[#allocation2 + $0xb14] sm:$0xf0]  ;;  %v8125_v56 = vld [vmem:[#allocation2 + $0xee8] sm:$0xf] }
 0x1e8   :  { %5549 = vmatpush.bf16.msra.mxu3 %v7678_v50  ;;  %v7997_v50 = vld [vmem:[#allocation2 + $0xde8] sm:$0xf]  ;;  %v9762_v57 = vld [vmem:[#allocation2 + $0xef4] sm:$0xf0] }
 0x1e9   :  { %5511 = vmatpush.bf16.msra.mxu0 %v7278_v61  ;;  %v8253_v53 = vld [vmem:[#allocation2 + $0xfe8] sm:$0xf]  ;;  %v9794_v60 = vld [vmem:[#allocation2 + $0xff4] sm:$0xf0]  ;;  %v7630_v61 = vor.u32 %v9638_v43, %v7629_v6 }
 0x1ea   :  { %5524 = vmatpush.bf16.msra.mxu1 %v7406_v0  ;;  %v7998_v0 = vor.u32 %v9730_v17, %v7997_v50  ;;  %v7853_v3 = vld [vmem:[#allocation2 + $0xcc8] sm:$0xf]  ;;  %v9694_v4 = vld [vmem:[#allocation2 + $0xcd4] sm:$0xf0] }
 0x1eb   :  { %5537 = vmatpush.bf16.msra.mxu2 %v7534_v2  ;;  %v8126_v2 = vor.u32 %v9762_v57, %v8125_v56  ;;  %v7981_v36 = vld [vmem:[#allocation2 + $0xdc8] sm:$0xf]  ;;  %v9726_v55 = vld [vmem:[#allocation2 + $0xdd4] sm:$0xf0] }
 0x1ec   :  { %5550 = vmatpush.bf16.msra.mxu3 %v7662_v5  ;;  %v8254_v5 = vor.u32 %v9794_v60, %v8253_v53  ;;  %v8109_v8 = vld [vmem:[#allocation2 + $0xec8] sm:$0xf]  ;;  %v9758_v9 = vld [vmem:[#allocation2 + $0xed4] sm:$0xf0]  ;;  %v7982_v1 = vor.u32 %v9726_v55, %v7981_v36 }
 0x1ed   :  { %5512 = vmatpush.bf16.msra.mxu0 %v7262_v15  ;;  %v8237_v10 = vld [vmem:[#allocation2 + $0xfc8] sm:$0xf]  ;;  %v9790_v13 = vld [vmem:[#allocation2 + $0xfd4] sm:$0xf0]  ;;  %v7854_v15 = vor.u32 %v9694_v4, %v7853_v3  ;;  %v8110_v21 = vor.u32 %v9758_v9, %v8109_v8 }
 0x1ee   :  { %5525 = vmatpush.bf16.msra.mxu1 %v7390_v24  ;;  %v7837_v24 = vld [vmem:[#allocation2 + $0xca8] sm:$0xf]  ;;  %v8238_v32 = vor.u32 %v9790_v13, %v8237_v10  ;;  %v9722_v34 = vld [vmem:[#allocation2 + $0xdb4] sm:$0xf0] }
 0x1ef   :  { %5538 = vmatpush.bf16.msra.mxu2 %v7518_v26  ;;  %v9690_v26 = vld [vmem:[#allocation2 + $0xcb4] sm:$0xf0]  ;;  %v7965_v27 = vld [vmem:[#allocation2 + $0xda8] sm:$0xf] }
 0x1f0   :  { %5551 = vmatpush.bf16.msra.mxu3 %v7646_v39  ;;  %v8093_v39 = vld [vmem:[#allocation2 + $0xea8] sm:$0xf]  ;;  %v9754_v40 = vld [vmem:[#allocation2 + $0xeb4] sm:$0xf0]  ;;  %v7838_v14 = vor.u32 %v9690_v26, %v7837_v24  ;;  %v7966_v47 = vor.u32 %v9722_v34, %v7965_v27 }
 0x1f1   :  { %5513 = vmatpush.bf16.msra.mxu0 %v7246_v52  ;;  %v8221_v6 = vld [vmem:[#allocation2 + $0xfa8] sm:$0xf]  ;;  %v9786_v43 = vld [vmem:[#allocation2 + $0xfb4] sm:$0xf0]  ;;  %v8094_v48 = vor.u32 %v9754_v40, %v8093_v39 }
 0x1f2   :  { %5526 = vmatpush.bf16.msra.mxu1 %v7374_v58  ;;  %v7821_v50 = vld [vmem:[#allocation2 + $0xc88] sm:$0xf]  ;;  %v9686_v51 = vld [vmem:[#allocation2 + $0xc94] sm:$0xf0]  ;;  %v8222_v17 = vor.u32 %v9786_v43, %v8221_v6 }
 0x1f3   :  { %5539 = vmatpush.bf16.msra.mxu2 %v7502_v59  ;;  %v7949_v52 = vld [vmem:[#allocation2 + $0xd88] sm:$0xf]  ;;  %v9718_v56 = vld [vmem:[#allocation2 + $0xd94] sm:$0xf0]  ;;  %v5307_v59 = vpop.f32.mrf.mxu0 }
 0x1f4   :  { %5552 = vmatpush.bf16.msra.mxu3 %v7630_v61  ;;  %5514 = vmatmul.bf16.vlgmr.msra.gmra.mxu0 %v10256_v25  ;;  %v8077_v57 = vld [vmem:[#allocation2 + $0xe88] sm:$0xf]  ;;  %v9750_v58 = vld [vmem:[#allocation2 + $0xe94] sm:$0xf0]  ;;  %v5308_v61 = vadd.f32 %v5307_v59, %v10380_v63 }
 0x1f5   :  { %5558 = vmatpush.bf16.msrb.mxu0 %v7870_v62  ;;  %5527 = vmatmul.bf16.vlgmr.msra.gmra.mxu1 %v10260_v30  ;;  %v8205_v53 = vld [vmem:[#allocation2 + $0xf88] sm:$0xf]  ;;  %v9782_v60 = vld [vmem:[#allocation2 + $0xf94] sm:$0xf0]  ;;  %v7822_v62 = vor.u32 %v9686_v51, %v7821_v50  ;;  %v8078_v3 = vor.u32 %v9750_v58, %v8077_v57 }
 0x1f6   :  { %5571 = vmatpush.bf16.msrb.mxu1 %v7998_v0  ;;  %5540 = vmatmul.bf16.vlgmr.msra.gmra.mxu2 %v10258_v29  ;;  %v5320_v0 = vpop.f32.mrf.mxu1  ;;  %v7805_v4 = vld [vmem:[#allocation2 + $0xc68] sm:$0xf]  ;;  %v9682_v36 = vld [vmem:[#allocation2 + $0xc74] sm:$0xf0]  ;;  %v8206_v55 = vor.u32 %v9782_v60, %v8205_v53 }
 0x1f7   :  { %5584 = vmatpush.bf16.msrb.mxu2 %v8126_v2  ;;  %5553 = vmatmul.bf16.vlgmr.msra.gmra.mxu3 %v10262_v33  ;;  %v7950_v2 = vor.u32 %v9718_v56, %v7949_v52  ;;  %v5321_v8 = vadd.f32 %v5320_v0, %v5308_v61  ;;  %v9714_v9 = vld [vmem:[#allocation2 + $0xd74] sm:$0xf0]  ;;  %v8061_v10 = vld [vmem:[#allocation2 + $0xe68] sm:$0xf] }
 0x1f8   :  { %5597 = vmatpush.bf16.msrb.mxu3 %v8254_v5  ;;  %v7933_v5 = vld [vmem:[#allocation2 + $0xd68] sm:$0xf]  ;;  %v9746_v13 = vld [vmem:[#allocation2 + $0xe74] sm:$0xf0] }
 0x1f9   :  { %5559 = vmatpush.bf16.msrb.mxu0 %v7854_v15  ;;  %v8189_v15 = vld [vmem:[#allocation2 + $0xf68] sm:$0xf]  ;;  %v7934_v63 = vor.u32 %v9714_v9, %v7933_v5  ;;  %v8062_v24 = vor.u32 %v9746_v13, %v8061_v10  ;;  %v9678_v27 = vld [vmem:[#allocation2 + $0xc54] sm:$0xf0]  ;;  %v5333_v39 = vpop.f32.mrf.mxu2 }
 0x1fa   :  { %5572 = vmatpush.bf16.msrb.mxu1 %v7982_v1  ;;  %v9778_v1 = vld [vmem:[#allocation2 + $0xf74] sm:$0xf0]  ;;  %v7789_v26 = vld [vmem:[#allocation2 + $0xc48] sm:$0xf] }
 0x1fb   :  { %5585 = vmatpush.bf16.msrb.mxu2 %v8110_v21  ;;  %v7806_v21 = vor.u32 %v9682_v36, %v7805_v4  ;;  %v8190_v34 = vor.u32 %v9778_v1, %v8189_v15  ;;  %v9710_v40 = vld [vmem:[#allocation2 + $0xd54] sm:$0xf0]  ;;  %v8045_v6 = vld [vmem:[#allocation2 + $0xe48] sm:$0xf]  ;;  %v5309_v51 = vpop.f32.mrf.mxu0  ;;  %v7790_v52 = vor.u32 %v9678_v27, %v7789_v26 }
 0x1fc   :  { %5598 = vmatpush.bf16.msrb.mxu3 %v8238_v32  ;;  %v7917_v32 = vld [vmem:[#allocation2 + $0xd48] sm:$0xf]  ;;  %v9742_v43 = vld [vmem:[#allocation2 + $0xe54] sm:$0xf0] }
 0x1fd   :  { %5560 = vmatpush.bf16.msrb.mxu0 %v7838_v14  ;;  %v5334_v14 = vadd.f32 %v5333_v39, %v5321_v8  ;;  %v9774_v50 = vld [vmem:[#allocation2 + $0xf54] sm:$0xf0]  ;;  %v7918_v57 = vor.u32 %v9710_v40, %v7917_v32  ;;  %v8046_v58 = vor.u32 %v9742_v43, %v8045_v6  ;;  %v7773_v59 = vld [vmem:[#allocation2 + $0xc28] sm:$0xf] }
 0x1fe   :  { %5573 = vmatpush.bf16.msrb.mxu1 %v7966_v47  ;;  %v5346_v47 = vpop.f32.mrf.mxu3  ;;  %v9674_v53 = vld [vmem:[#allocation2 + $0xc34] sm:$0xf0]  ;;  %v7901_v60 = vld [vmem:[#allocation2 + $0xd28] sm:$0xf] }
 0x1ff   :  { %5586 = vmatpush.bf16.msrb.mxu2 %v8094_v48  ;;  %v8173_v48 = vld [vmem:[#allocation2 + $0xf48] sm:$0xf]  ;;  %v10387_v56 = vadd.f32 %v5346_v47, %v5334_v14  ;;  %v9770_v4 = vld [vmem:[#allocation2 + $0xf34] sm:$0xf0]  ;;  %v7774_v36 = vor.u32 %v9674_v53, %v7773_v59 }
 0x200   :  { %5599 = vmatpush.bf16.msrb.mxu3 %v8222_v17  ;;  %v5322_v17 = vpop.f32.mrf.mxu1  ;;  %v8174_v61 = vor.u32 %v9774_v50, %v8173_v48  ;;  %v8029_v0 = vld [vmem:[#allocation2 + $0xe28] sm:$0xf]  ;;  %v9702_v13 = vld [vmem:[#allocation2 + $0xd14] sm:$0xf0] }
 0x201   :  { %5561 = vmatpush.bf16.msrb.mxu0 %v7822_v62  ;;  %v9706_v62 = vld [vmem:[#allocation2 + $0xd34] sm:$0xf0]  ;;  %v7757_v5 = vld [vmem:[#allocation2 + $0xc08] sm:$0xf]  ;;  %v5335_v26 = vpop.f32.mrf.mxu2 }
 0x202   :  { %5574 = vmatpush.bf16.msrb.mxu1 %v7950_v2  ;;  %v9738_v2 = vld [vmem:[#allocation2 + $0xe34] sm:$0xf0]  ;;  %v7902_v8 = vor.u32 %v9706_v62, %v7901_v60  ;;  %v7885_v10 = vld [vmem:[#allocation2 + $0xd08] sm:$0xf] }
 0x203   :  { %5587 = vmatpush.bf16.msrb.mxu2 %v8078_v3  ;;  %v8157_v3 = vld [vmem:[#allocation2 + $0xf28] sm:$0xf]  ;;  %v8030_v9 = vor.u32 %v9738_v2, %v8029_v0  ;;  %v9826_v32 = vld [vmem:[#allocation2 + $0x10f4] sm:$0xf0]  ;;  %v7886_v47 = vor.u32 %v9702_v13, %v7885_v10 }
 0x204   :  { %5600 = vmatpush.bf16.msrb.mxu3 %v8206_v55  ;;  %v9670_v55 = vld [vmem:[#allocation2 + $0xc14] sm:$0xf0]  ;;  %v8013_v15 = vld [vmem:[#allocation2 + $0xe08] sm:$0xf]  ;;  %v8158_v1 = vor.u32 %v9770_v4, %v8157_v3 }
 0x205   :  { %5562 = vmatpush.bf16.msrb.mxu0 %v7806_v21  ;;  %v9734_v21 = vld [vmem:[#allocation2 + $0xe14] sm:$0xf0]  ;;  %v8381_v27 = vld [vmem:[#allocation2 + $0x10e8] sm:$0xf]  ;;  %v7758_v40 = vor.u32 %v9670_v55, %v7757_v5 }
 0x206   :  { %5575 = vmatpush.bf16.msrb.mxu1 %v7934_v63  ;;  %v8141_v63 = vld [vmem:[#allocation2 + $0xf08] sm:$0xf]  ;;  %v5348_v39 = vpop.f32.mrf.mxu3  ;;  %v9858_v6 = vld [vmem:[#allocation2 + $0x11f4] sm:$0xf0]  ;;  %v8014_v48 = vor.u32 %v9734_v21, %v8013_v15  ;;  %v8382_v17 = vor.u32 %v9826_v32, %v8381_v27 }
 0x207   :  { %5588 = vmatpush.bf16.msrb.mxu2 %v8062_v24  ;;  %v9766_v24 = vld [vmem:[#allocation2 + $0xf14] sm:$0xf0]  ;;  %v8637_v43 = vld [vmem:[#allocation2 + $0x12e8] sm:$0xf] }
 0x208   :  { %5601 = vmatpush.bf16.msrb.mxu3 %v8190_v34  ;;  %v8509_v34 = vld [vmem:[#allocation2 + $0x11e8] sm:$0xf]  ;;  %v9890_v14 = vld [vmem:[#allocation2 + $0x12f4] sm:$0xf0] }
 0x209   :  { %5563 = vmatpush.bf16.msrb.mxu0 %v7790_v52  ;;  %v8765_v50 = vld [vmem:[#allocation2 + $0x13e8] sm:$0xf]  ;;  %v9922_v51 = vld [vmem:[#allocation2 + $0x13f4] sm:$0xf0]  ;;  %v8142_v52 = vor.u32 %v9766_v24, %v8141_v63 }
 0x20a   :  { %5576 = vmatpush.bf16.msrb.mxu1 %v7918_v57  ;;  %v8510_v57 = vor.u32 %v9858_v6, %v8509_v34  ;;  %v8365_v59 = vld [vmem:[#allocation2 + $0x10c8] sm:$0xf]  ;;  %v9822_v53 = vld [vmem:[#allocation2 + $0x10d4] sm:$0xf0] }
 0x20b   :  { %5589 = vmatpush.bf16.msrb.mxu2 %v8046_v58  ;;  %v8638_v58 = vor.u32 %v9890_v14, %v8637_v43  ;;  %v8493_v60 = vld [vmem:[#allocation2 + $0x11c8] sm:$0xf]  ;;  %v9854_v62 = vld [vmem:[#allocation2 + $0x11d4] sm:$0xf0] }
 0x20c   :  { %5602 = vmatpush.bf16.msrb.mxu3 %v8174_v61  ;;  %v8766_v61 = vor.u32 %v9922_v51, %v8765_v50  ;;  %v8621_v0 = vld [vmem:[#allocation2 + $0x12c8] sm:$0xf]  ;;  %v9886_v2 = vld [vmem:[#allocation2 + $0x12d4] sm:$0xf0]  ;;  %v8494_v5 = vor.u32 %v9854_v62, %v8493_v60 }
 0x20d   :  { %5564 = vmatpush.bf16.msrb.mxu0 %v7774_v36  ;;  %v8749_v3 = vld [vmem:[#allocation2 + $0x13c8] sm:$0xf]  ;;  %v9918_v4 = vld [vmem:[#allocation2 + $0x13d4] sm:$0xf0]  ;;  %v8366_v36 = vor.u32 %v9822_v53, %v8365_v59  ;;  %v8622_v55 = vor.u32 %v9886_v2, %v8621_v0 }
 0x20e   :  { %5577 = vmatpush.bf16.msrb.mxu1 %v7902_v8  ;;  %v8349_v8 = vld [vmem:[#allocation2 + $0x10a8] sm:$0xf]  ;;  %v8750_v13 = vor.u32 %v9918_v4, %v8749_v3  ;;  %v9850_v15 = vld [vmem:[#allocation2 + $0x11b4] sm:$0xf0] }
 0x20f   :  { %5590 = vmatpush.bf16.msrb.mxu2 %v8030_v9  ;;  %v9818_v9 = vld [vmem:[#allocation2 + $0x10b4] sm:$0xf0]  ;;  %v8477_v10 = vld [vmem:[#allocation2 + $0x11a8] sm:$0xf] }
 0x210   :  { %5603 = vmatpush.bf16.msrb.mxu3 %v8158_v1  ;;  %v8605_v1 = vld [vmem:[#allocation2 + $0x12a8] sm:$0xf]  ;;  %v9882_v21 = vld [vmem:[#allocation2 + $0x12b4] sm:$0xf0]  ;;  %v8350_v26 = vor.u32 %v9818_v9, %v8349_v8  ;;  %v8478_v27 = vor.u32 %v9850_v15, %v8477_v10 }
 0x211   :  { %5565 = vmatpush.bf16.msrb.mxu0 %v7758_v40  ;;  %v8733_v63 = vld [vmem:[#allocation2 + $0x13a8] sm:$0xf]  ;;  %v9914_v24 = vld [vmem:[#allocation2 + $0x13b4] sm:$0xf0]  ;;  %v8606_v32 = vor.u32 %v9882_v21, %v8605_v1 }
 0x212   :  { %5578 = vmatpush.bf16.msrb.mxu1 %v7886_v47  ;;  %v8333_v34 = vld [vmem:[#allocation2 + $0x1088] sm:$0xf]  ;;  %v9814_v39 = vld [vmem:[#allocation2 + $0x1094] sm:$0xf0]  ;;  %v8734_v6 = vor.u32 %v9914_v24, %v8733_v63 }
 0x213   :  { %5591 = vmatpush.bf16.msrb.mxu2 %v8014_v48  ;;  %v8461_v40 = vld [vmem:[#allocation2 + $0x1188] sm:$0xf]  ;;  %v9846_v43 = vld [vmem:[#allocation2 + $0x1194] sm:$0xf0]  ;;  %v5359_v48 = vpop.f32.mrf.mxu0 }
 0x214   :  { %5604 = vmatpush.bf16.msrb.mxu3 %v8142_v52  ;;  %5566 = vmatmul.bf16.vlgmr.msrb.gmra.mxu0 %v10274_v23  ;;  %v8589_v14 = vld [vmem:[#allocation2 + $0x1288] sm:$0xf]  ;;  %v9878_v47 = vld [vmem:[#allocation2 + $0x1294] sm:$0xf0]  ;;  %v5360_v52 = vadd.f32 %v5359_v48, %v10387_v56 }
 0x215   :  { %5610 = vmatpush.bf16.msra.mxu0 %v8382_v17  ;;  %5579 = vmatmul.bf16.vlgmr.msrb.gmra.mxu1 %v10278_v31  ;;  %v8717_v50 = vld [vmem:[#allocation2 + $0x1388] sm:$0xf]  ;;  %v9910_v51 = vld [vmem:[#allocation2 + $0x1394] sm:$0xf0]  ;;  %v8334_v17 = vor.u32 %v9814_v39, %v8333_v34  ;;  %v8590_v59 = vor.u32 %v9878_v47, %v8589_v14 }
 0x216   :  { %5623 = vmatpush.bf16.msra.mxu1 %v8510_v57  ;;  %5592 = vmatmul.bf16.vlgmr.msrb.gmra.mxu2 %v10276_v28  ;;  %v5372_v57 = vpop.f32.mrf.mxu1  ;;  %v8317_v53 = vld [vmem:[#allocation2 + $0x1068] sm:$0xf]  ;;  %v9810_v60 = vld [vmem:[#allocation2 + $0x1074] sm:$0xf0]  ;;  %v8718_v62 = vor.u32 %v9910_v51, %v8717_v50 }
 0x217   :  { %5636 = vmatpush.bf16.msra.mxu2 %v8638_v58  ;;  %5605 = vmatmul.bf16.vlgmr.msrb.gmra.mxu3 %v10280_v35  ;;  %v8462_v58 = vor.u32 %v9846_v43, %v8461_v40  ;;  %v5373_v0 = vadd.f32 %v5372_v57, %v5360_v52  ;;  %v9842_v2 = vld [vmem:[#allocation2 + $0x1174] sm:$0xf0]  ;;  %v8573_v3 = vld [vmem:[#allocation2 + $0x1268] sm:$0xf] }
 0x218   :  { %5649 = vmatpush.bf16.msra.mxu3 %v8766_v61  ;;  %v8445_v61 = vld [vmem:[#allocation2 + $0x1168] sm:$0xf]  ;;  %v9874_v4 = vld [vmem:[#allocation2 + $0x1274] sm:$0xf0] }
 0x219   :  { %5611 = vmatpush.bf16.msra.mxu0 %v8366_v36  ;;  %v8701_v36 = vld [vmem:[#allocation2 + $0x1368] sm:$0xf]  ;;  %v8446_v56 = vor.u32 %v9842_v2, %v8445_v61  ;;  %v8574_v8 = vor.u32 %v9874_v4, %v8573_v3  ;;  %v9806_v10 = vld [vmem:[#allocation2 + $0x1054] sm:$0xf0]  ;;  %v5385_v1 = vpop.f32.mrf.mxu2 }
 0x21a   :  { %5624 = vmatpush.bf16.msra.mxu1 %v8494_v5  ;;  %v9906_v5 = vld [vmem:[#allocation2 + $0x1374] sm:$0xf0]  ;;  %v8301_v9 = vld [vmem:[#allocation2 + $0x1048] sm:$0xf] }
 0x21b   :  { %5637 = vmatpush.bf16.msra.mxu2 %v8622_v55  ;;  %v8318_v55 = vor.u32 %v9810_v60, %v8317_v53  ;;  %v8702_v15 = vor.u32 %v9906_v5, %v8701_v36  ;;  %v9838_v21 = vld [vmem:[#allocation2 + $0x1154] sm:$0xf0]  ;;  %v8557_v63 = vld [vmem:[#allocation2 + $0x1248] sm:$0xf]  ;;  %v5361_v39 = vpop.f32.mrf.mxu0  ;;  %v8302_v40 = vor.u32 %v9806_v10, %v8301_v9 }
 0x21c   :  { %5650 = vmatpush.bf16.msra.mxu3 %v8750_v13  ;;  %v8429_v13 = vld [vmem:[#allocation2 + $0x1148] sm:$0xf]  ;;  %v9870_v24 = vld [vmem:[#allocation2 + $0x1254] sm:$0xf0] }
 0x21d   :  { %5612 = vmatpush.bf16.msra.mxu0 %v8350_v26  ;;  %v5386_v26 = vadd.f32 %v5385_v1, %v5373_v0  ;;  %v9902_v34 = vld [vmem:[#allocation2 + $0x1354] sm:$0xf0]  ;;  %v8430_v14 = vor.u32 %v9838_v21, %v8429_v13  ;;  %v8558_v47 = vor.u32 %v9870_v24, %v8557_v63  ;;  %v8285_v48 = vld [vmem:[#allocation2 + $0x1028] sm:$0xf] }
 0x21e   :  { %5625 = vmatpush.bf16.msra.mxu1 %v8478_v27  ;;  %v5398_v27 = vpop.f32.mrf.mxu3  ;;  %v9802_v50 = vld [vmem:[#allocation2 + $0x1034] sm:$0xf0]  ;;  %v8413_v51 = vld [vmem:[#allocation2 + $0x1128] sm:$0xf] }
 0x21f   :  { %5638 = vmatpush.bf16.msra.mxu2 %v8606_v32  ;;  %v8685_v32 = vld [vmem:[#allocation2 + $0x1348] sm:$0xf]  ;;  %v10394_v43 = vadd.f32 %v5398_v27, %v5386_v26  ;;  %v9898_v53 = vld [vmem:[#allocation2 + $0x1334] sm:$0xf0]  ;;  %v8286_v60 = vor.u32 %v9802_v50, %v8285_v48 }
 0x220   :  { %5651 = vmatpush.bf16.msra.mxu3 %v8734_v6  ;;  %v5374_v6 = vpop.f32.mrf.mxu1  ;;  %v8686_v52 = vor.u32 %v9902_v34, %v8685_v32  ;;  %v8541_v57 = vld [vmem:[#allocation2 + $0x1228] sm:$0xf]  ;;  %v9830_v4 = vld [vmem:[#allocation2 + $0x1114] sm:$0xf0] }
 0x221   :  { %5613 = vmatpush.bf16.msra.mxu0 %v8334_v17  ;;  %v9834_v17 = vld [vmem:[#allocation2 + $0x1134] sm:$0xf0]  ;;  %v8269_v61 = vld [vmem:[#allocation2 + $0x1008] sm:$0xf]  ;;  %v5387_v9 = vpop.f32.mrf.mxu2 }
 0x222   :  { %5626 = vmatpush.bf16.msra.mxu1 %v8462_v58  ;;  %v9866_v58 = vld [vmem:[#allocation2 + $0x1234] sm:$0xf0]  ;;  %v8414_v0 = vor.u32 %v9834_v17, %v8413_v51  ;;  %v8397_v3 = vld [vmem:[#allocation2 + $0x1108] sm:$0xf] }
 0x223   :  { %5639 = vmatpush.bf16.msra.mxu2 %v8590_v59  ;;  %v8669_v59 = vld [vmem:[#allocation2 + $0x1328] sm:$0xf]  ;;  %v8542_v2 = vor.u32 %v9866_v58, %v8541_v57  ;;  %v9954_v13 = vld [vmem:[#allocation2 + $0x14f4] sm:$0xf0]  ;;  %v8398_v27 = vor.u32 %v9830_v4, %v8397_v3 }
 0x224   :  { %5652 = vmatpush.bf16.msra.mxu3 %v8718_v62  ;;  %v9798_v62 = vld [vmem:[#allocation2 + $0x1014] sm:$0xf0]  ;;  %v8525_v36 = vld [vmem:[#allocation2 + $0x1208] sm:$0xf]  ;;  %v8670_v5 = vor.u32 %v9898_v53, %v8669_v59 }
 0x225   :  { %5614 = vmatpush.bf16.msra.mxu0 %v8318_v55  ;;  %v9862_v55 = vld [vmem:[#allocation2 + $0x1214] sm:$0xf0]  ;;  %v8893_v10 = vld [vmem:[#allocation2 + $0x14e8] sm:$0xf]  ;;  %v8270_v21 = vor.u32 %v9798_v62, %v8269_v61 }
 0x226   :  { %5627 = vmatpush.bf16.msra.mxu1 %v8446_v56  ;;  %v8653_v56 = vld [vmem:[#allocation2 + $0x1308] sm:$0xf]  ;;  %v5400_v1 = vpop.f32.mrf.mxu3  ;;  %v9986_v63 = vld [vmem:[#allocation2 + $0x15f4] sm:$0xf0]  ;;  %v8526_v32 = vor.u32 %v9862_v55, %v8525_v36  ;;  %v8894_v6 = vor.u32 %v9954_v13, %v8893_v10 }
 0x227   :  { %5640 = vmatpush.bf16.msra.mxu2 %v8574_v8  ;;  %v9894_v8 = vld [vmem:[#allocation2 + $0x1314] sm:$0xf0]  ;;  %v9149_v24 = vld [vmem:[#allocation2 + $0x16e8] sm:$0xf] }
 0x228   :  { %5653 = vmatpush.bf16.msra.mxu3 %v8702_v15  ;;  %v9021_v15 = vld [vmem:[#allocation2 + $0x15e8] sm:$0xf]  ;;  %v10018_v26 = vld [vmem:[#allocation2 + $0x16f4] sm:$0xf0] }
 0x229   :  { %5615 = vmatpush.bf16.msra.mxu0 %v8302_v40  ;;  %v9277_v34 = vld [vmem:[#allocation2 + $0x17e8] sm:$0xf]  ;;  %v10050_v39 = vld [vmem:[#allocation2 + $0x17f4] sm:$0xf0]  ;;  %v8654_v40 = vor.u32 %v9894_v8, %v8653_v56 }
 0x22a   :  { %5628 = vmatpush.bf16.msra.mxu1 %v8430_v14  ;;  %v9022_v14 = vor.u32 %v9986_v63, %v9021_v15  ;;  %v8877_v48 = vld [vmem:[#allocation2 + $0x14c8] sm:$0xf]  ;;  %v9950_v50 = vld [vmem:[#allocation2 + $0x14d4] sm:$0xf0] }
 0x22b   :  { %5641 = vmatpush.bf16.msra.mxu2 %v8558_v47  ;;  %v9150_v47 = vor.u32 %v10018_v26, %v9149_v24  ;;  %v9005_v51 = vld [vmem:[#allocation2 + $0x15c8] sm:$0xf]  ;;  %v9982_v17 = vld [vmem:[#allocation2 + $0x15d4] sm:$0xf0] }
 0x22c   :  { %5654 = vmatpush.bf16.msra.mxu3 %v8686_v52  ;;  %v9278_v52 = vor.u32 %v10050_v39, %v9277_v34  ;;  %v9133_v57 = vld [vmem:[#allocation2 + $0x16c8] sm:$0xf]  ;;  %v10014_v58 = vld [vmem:[#allocation2 + $0x16d4] sm:$0xf0]  ;;  %v9006_v61 = vor.u32 %v9982_v17, %v9005_v51 }
 0x22d   :  { %5616 = vmatpush.bf16.msra.mxu0 %v8286_v60  ;;  %v9261_v59 = vld [vmem:[#allocation2 + $0x17c8] sm:$0xf]  ;;  %v10046_v53 = vld [vmem:[#allocation2 + $0x17d4] sm:$0xf0]  ;;  %v8878_v60 = vor.u32 %v9950_v50, %v8877_v48  ;;  %v9134_v62 = vor.u32 %v10014_v58, %v9133_v57 }
 0x22e   :  { %5629 = vmatpush.bf16.msra.mxu1 %v8414_v0  ;;  %v8861_v0 = vld [vmem:[#allocation2 + $0x14a8] sm:$0xf]  ;;  %v9262_v4 = vor.u32 %v10046_v53, %v9261_v59  ;;  %v9978_v36 = vld [vmem:[#allocation2 + $0x15b4] sm:$0xf0] }
 0x22f   :  { %5642 = vmatpush.bf16.msra.mxu2 %v8542_v2  ;;  %v9946_v2 = vld [vmem:[#allocation2 + $0x14b4] sm:$0xf0]  ;;  %v8989_v3 = vld [vmem:[#allocation2 + $0x15a8] sm:$0xf] }
 0x230   :  { %5655 = vmatpush.bf16.msra.mxu3 %v8670_v5  ;;  %v9117_v5 = vld [vmem:[#allocation2 + $0x16a8] sm:$0xf]  ;;  %v10010_v55 = vld [vmem:[#allocation2 + $0x16b4] sm:$0xf0]  ;;  %v8862_v9 = vor.u32 %v9946_v2, %v8861_v0  ;;  %v8990_v10 = vor.u32 %v9978_v36, %v8989_v3 }
 0x231   :  { %5617 = vmatpush.bf16.msra.mxu0 %v8270_v21  ;;  %v9245_v56 = vld [vmem:[#allocation2 + $0x17a8] sm:$0xf]  ;;  %v10042_v8 = vld [vmem:[#allocation2 + $0x17b4] sm:$0xf0]  ;;  %v9118_v13 = vor.u32 %v10010_v55, %v9117_v5 }
 0x232   :  { %5630 = vmatpush.bf16.msra.mxu1 %v8398_v27  ;;  %v8845_v15 = vld [vmem:[#allocation2 + $0x1488] sm:$0xf]  ;;  %v9942_v1 = vld [vmem:[#allocation2 + $0x1494] sm:$0xf0]  ;;  %v9246_v63 = vor.u32 %v10042_v8, %v9245_v56  ;;  %v10402_v51 = vpop.f32.mrf.mxu1 }
 0x233   :  { %5643 = vmatpush.bf16.msra.mxu2 %v8526_v32  ;;  %v8973_v21 = vld [vmem:[#allocation2 + $0x1588] sm:$0xf]  ;;  %v9974_v24 = vld [vmem:[#allocation2 + $0x1594] sm:$0xf0]  ;;  %v8846_v39 = vor.u32 %v9942_v1, %v8845_v15 }
 0x234   :  { %5656 = vmatpush.bf16.msra.mxu3 %v8654_v40  ;;  %5618 = vmatmul.bf16.vlgmr.msra.gmra.mxu0 %v10292_v37  ;;  %v9101_v26 = vld [vmem:[#allocation2 + $0x1688] sm:$0xf]  ;;  %v10006_v27 = vld [vmem:[#allocation2 + $0x1694] sm:$0xf0]  ;;  %v10400_v40 = vpop.f32.mrf.mxu0 }
 0x235   :  { %5662 = vmatpush.bf16.msrb.mxu0 %v8894_v6  ;;  %5631 = vmatmul.bf16.vlgmr.msra.gmra.mxu1 %v10296_v46  ;;  %v9229_v32 = vld [vmem:[#allocation2 + $0x1788] sm:$0xf]  ;;  %v10038_v34 = vld [vmem:[#allocation2 + $0x1794] sm:$0xf0]  ;;  %v8974_v6 = vor.u32 %v9974_v24, %v8973_v21 }
 0x236   :  { %5675 = vmatpush.bf16.msrb.mxu1 %v9022_v14  ;;  %5644 = vmatmul.bf16.vlgmr.msra.gmra.mxu2 %v10294_v45  ;;  %v9102_v14 = vor.u32 %v10006_v27, %v9101_v26  ;;  %v9938_v48 = vld [vmem:[#allocation2 + $0x1474] sm:$0xf0]  ;;  %v8957_v50 = vld [vmem:[#allocation2 + $0x1568] sm:$0xf] }
 0x237   :  { %5688 = vmatpush.bf16.msrb.mxu2 %v9150_v47  ;;  %5657 = vmatmul.bf16.vlgmr.msra.gmra.mxu3 %v10298_v49  ;;  %v8829_v47 = vld [vmem:[#allocation2 + $0x1468] sm:$0xf]  ;;  %v9970_v17 = vld [vmem:[#allocation2 + $0x1574] sm:$0xf0] }
 0x238   :  { %5701 = vmatpush.bf16.msrb.mxu3 %v9278_v52  ;;  %v9230_v52 = vor.u32 %v10038_v34, %v9229_v32  ;;  %v9085_v57 = vld [vmem:[#allocation2 + $0x1668] sm:$0xf]  ;;  %v10002_v58 = vld [vmem:[#allocation2 + $0x1674] sm:$0xf0] }
 0x239   :  { %5663 = vmatpush.bf16.msrb.mxu0 %v8878_v60  ;;  %v9213_v59 = vld [vmem:[#allocation2 + $0x1768] sm:$0xf]  ;;  %v10034_v53 = vld [vmem:[#allocation2 + $0x1774] sm:$0xf0]  ;;  %v8830_v60 = vor.u32 %v9938_v48, %v8829_v47  ;;  %v10065_v48 = vld [vmem:[#allocation5] sm:$0xf] }
 0x23a   :  { %5676 = vmatpush.bf16.msrb.mxu1 %v9006_v61  ;;  %v8958_v61 = vor.u32 %v9970_v17, %v8957_v50  ;;  %v8813_v0 = vld [vmem:[#allocation2 + $0x1448] sm:$0xf]  ;;  %v9934_v2 = vld [vmem:[#allocation2 + $0x1454] sm:$0xf0]  ;;  %v9214_v36 = vor.u32 %v10034_v53, %v9213_v59  ;;  %v10406_v8 = vpop.f32.mrf.mxu3  ;;  %v5426_v27 = vpop.f32.mrf.mxu1  ;;  %v848_v50 = vperm.slane %v10065_v48, 2 }
 0x23b   :  { %5689 = vmatpush.bf16.msrb.mxu2 %v9134_v62  ;;  %v9086_v62 = vor.u32 %v10002_v58, %v9085_v57  ;;  %v8941_v3 = vld [vmem:[#allocation2 + $0x1548] sm:$0xf]  ;;  %v9966_v5 = vld [vmem:[#allocation2 + $0x1554] sm:$0xf0]  ;;  %v6719_v27 = vld [vmem:[#allocation2 + $0x3f8] sm:$0xf0] }
 0x23c   :  { %5702 = vmatpush.bf16.msrb.mxu3 %v9262_v4  ;;  %v10404_v4 = vpop.f32.mrf.mxu2  ;;  %v9069_v55 = vld [vmem:[#allocation2 + $0x1648] sm:$0xf]  ;;  %v9998_v56 = vld [vmem:[#allocation2 + $0x1654] sm:$0xf0]  ;;  %v5413_v15 = vpop.f32.mrf.mxu0  ;;  %v8942_v1 = vor.u32 %v9966_v5, %v8941_v3  ;;  %v9340_v48 = vld [vmem:[#allocation2 + $0x1cc] sm:$0xf] }
 0x23d   :  { %5664 = vmatpush.bf16.msrb.mxu0 %v8862_v9  ;;  %v9197_v9 = vld [vmem:[#allocation2 + $0x1748] sm:$0xf]  ;;  %v9070_v21 = vor.u32 %v9998_v56, %v9069_v55  ;;  %v9930_v24 = vld [vmem:[#allocation2 + $0x1434] sm:$0xf0]  ;;  %v9312_v55 = vld [vmem:[#allocation2 + $0xec] sm:$0xf] }
 0x23e   :  { %5677 = vmatpush.bf16.msrb.mxu1 %v8990_v10  ;;  %v10030_v10 = vld [vmem:[#allocation2 + $0x1754] sm:$0xf0]  ;;  %v8925_v26 = vld [vmem:[#allocation2 + $0x1528] sm:$0xf]  ;;  %v6335_v56 = vld [vmem:[#allocation2 + $0xf8] sm:$0xf0] }
 0x23f   :  { %5690 = vmatpush.bf16.msrb.mxu2 %v9118_v13  ;;  %v8814_v13 = vor.u32 %v9934_v2, %v8813_v0  ;;  %v9198_v32 = vor.u32 %v10030_v10, %v9197_v9  ;;  %v9962_v34 = vld [vmem:[#allocation2 + $0x1534] sm:$0xf0]  ;;  %v8781_v17 = vld [vmem:[#allocation2 + $0x1408] sm:$0xf]  ;;  %v9344_v9 = vld [vmem:[#allocation2 + $0x1ec] sm:$0xf]  ;;  %v5412_v10 = vadd.f32 %v10400_v40, %v848_v50 }
 0x240   :  { %5703 = vmatpush.bf16.msrb.mxu3 %v9246_v63  ;;  %v8797_v63 = vld [vmem:[#allocation2 + $0x1428] sm:$0xf]  ;;  %v10026_v47 = vld [vmem:[#allocation2 + $0x1734] sm:$0xf0]  ;;  %v8926_v58 = vor.u32 %v9962_v34, %v8925_v26  ;;  %v6463_v15 = vld [vmem:[#allocation2 + $0x1f8] sm:$0xf0]  ;;  %v6338_v34 = vor.u32 %v9312_v55, %v6335_v56 }
 0x241   :  { %5665 = vmatpush.bf16.msrb.mxu0 %v8846_v39  ;;  %v9053_v39 = vld [vmem:[#allocation2 + $0x1628] sm:$0xf]  ;;  %v9926_v57 = vld [vmem:[#allocation2 + $0x1414] sm:$0xf0]  ;;  %v9408_v26 = vld [vmem:[#allocation2 + $0x3ec] sm:$0xf]  ;;  %v5425_v40 = vadd.f32 %v10402_v51, %v5412_v10 }
 0x242   :  { %5678 = vmatpush.bf16.msrb.mxu1 %v8974_v6  ;;  %v9994_v6 = vld [vmem:[#allocation2 + $0x1634] sm:$0xf0]  ;;  %v8909_v53 = vld [vmem:[#allocation2 + $0x1508] sm:$0xf]  ;;  %v5452_v5 = vpop.f32.mrf.mxu3  ;;  %v6722_v50 = vor.u32 %v9408_v26, %v6719_v27  ;;  %v6303_v51 = vld [vmem:[#allocation2 + $0xb8] sm:$0xf0] }
 0x243   :  { %5691 = vmatpush.bf16.msrb.mxu2 %v9102_v14  ;;  %v9181_v14 = vld [vmem:[#allocation2 + $0x1728] sm:$0xf]  ;;  %v9054_v59 = vor.u32 %v9994_v6, %v9053_v39  ;;  %v9990_v2 = vld [vmem:[#allocation2 + $0x1614] sm:$0xf0]  ;;  %v6466_v39 = vor.u32 %v9344_v9, %v6463_v15  ;;  %v9368_v5 = vld [vmem:[#allocation2 + $0x2ac] sm:$0xf] }
 0x244   :  { %5704 = vmatpush.bf16.msrb.mxu3 %v9230_v52  ;;  %v8798_v52 = vor.u32 %v9930_v24, %v8797_v63  ;;  %v9182_v0 = vor.u32 %v10026_v47, %v9181_v14  ;;  %v9165_v3 = vld [vmem:[#allocation2 + $0x1708] sm:$0xf]  ;;  %v9308_v14 = vld [vmem:[#allocation2 + $0xcc] sm:$0xf]  ;;  %v6319_v47 = vld [vmem:[#allocation2 + $0xd8] sm:$0xf0] }
 0x245   :  { %5666 = vmatpush.bf16.msrb.mxu0 %v8830_v60  ;;  %v9958_v60 = vld [vmem:[#allocation2 + $0x1514] sm:$0xf0]  ;;  %v6559_v55 = vld [vmem:[#allocation2 + $0x2b8] sm:$0xf0]  ;;  %v9400_v56 = vld [vmem:[#allocation2 + $0x3ac] sm:$0xf] }
 0x246   :  { %5679 = vmatpush.bf16.msrb.mxu1 %v8958_v61  ;;  %v9037_v61 = vld [vmem:[#allocation2 + $0x1608] sm:$0xf]  ;;  %v8910_v63 = vor.u32 %v9958_v60, %v8909_v53  ;;  %v6322_v53 = vor.u32 %v9308_v14, %v6319_v47  ;;  %v6687_v9 = vld [vmem:[#allocation2 + $0x3b8] sm:$0xf0]  ;;  %v9364_v27 = vld [vmem:[#allocation2 + $0x28c] sm:$0xf] }
 0x247   :  { %5692 = vmatpush.bf16.msrb.mxu2 %v9086_v62  ;;  %v5439_v62 = vpop.f32.mrf.mxu2  ;;  %v9038_v24 = vor.u32 %v9990_v2, %v9037_v61  ;;  %v9336_v2 = vld [vmem:[#allocation2 + $0x1ac] sm:$0xf]  ;;  %v6415_v26 = vld [vmem:[#allocation2 + $0x198] sm:$0xf0] }
 0x248   :  { %5705 = vmatpush.bf16.msrb.mxu3 %v9214_v36  ;;  %v10022_v36 = vld [vmem:[#allocation2 + $0x1714] sm:$0xf0]  ;;  %v5438_v62 = vadd.f32 %v10404_v4, %v5425_v40  ;;  %v9296_v40 = vld [vmem:[#allocation2 + $0x6c] sm:$0xf] }
 0x249   :  { %5667 = vmatpush.bf16.msrb.mxu0 %v8814_v13  ;;  %v8782_v13 = vor.u32 %v9926_v57, %v8781_v17  ;;  %v9372_v17 = vld [vmem:[#allocation2 + $0x2cc] sm:$0xf]  ;;  %v6575_v57 = vld [vmem:[#allocation2 + $0x2d8] sm:$0xf0] }
 0x24a   :  { %5680 = vmatpush.bf16.msrb.mxu1 %v8942_v1  ;;  %v9376_v1 = vld [vmem:[#allocation2 + $0x2ec] sm:$0xf]  ;;  %v6578_v61 = vor.u32 %v9372_v17, %v6575_v57  ;;  %v5451_v15 = vadd.f32 %v10406_v8, %v5438_v62 }
 0x24b   :  { %5693 = vmatpush.bf16.msrb.mxu2 %v9070_v21  ;;  %v6591_v21 = vld [vmem:[#allocation2 + $0x2f8] sm:$0xf0]  ;;  %v9328_v8 = vld [vmem:[#allocation2 + $0x16c] sm:$0xf] }
 0x24c   :  { %5706 = vmatpush.bf16.msrb.mxu3 %v9198_v32  ;;  %v9166_v32 = vor.u32 %v10022_v36, %v9165_v3  ;;  %v6594_v6 = vor.u32 %v9376_v1, %v6591_v21  ;;  %v6431_v36 = vld [vmem:[#allocation2 + $0x1b8] sm:$0xf0]  ;;  %v9300_v1 = vld [vmem:[#allocation2 + $0x8c] sm:$0xf] }
 0x24d   :  { %5668 = vmatpush.bf16.msrb.mxu0 %v8798_v52  ;;  %v6447_v52 = vld [vmem:[#allocation2 + $0x1d8] sm:$0xf0]  ;;  %v6434_v10 = vor.u32 %v9336_v2, %v6431_v36 }
 0x24e   :  { %5681 = vmatpush.bf16.msrb.mxu1 %v8926_v58  ;;  %v9404_v58 = vld [vmem:[#allocation2 + $0x3cc] sm:$0xf]  ;;  %v6450_v60 = vor.u32 %v9340_v48, %v6447_v52  ;;  %v6287_v21 = vld [vmem:[#allocation2 + $0x98] sm:$0xf0] }
 0x24f   :  { %5694 = vmatpush.bf16.msrb.mxu2 %v9054_v59  ;;  %v6703_v59 = vld [vmem:[#allocation2 + $0x3d8] sm:$0xf0] }
 0x250   :  { %5707 = vmatpush.bf16.msrb.mxu3 %v9182_v0  ;;  %v9304_v0 = vld [vmem:[#allocation2 + $0xac] sm:$0xf]  ;;  %v6706_v3 = vor.u32 %v9404_v58, %v6703_v59  ;;  %v6399_v58 = vld [vmem:[#allocation2 + $0x178] sm:$0xf0] }
 0x251   :  { %5669 = vmatpush.bf16.msrb.mxu0 %v8782_v13  ;;  %v6306_v4 = vor.u32 %v9304_v0, %v6303_v51  ;;  %v6562_v13 = vor.u32 %v9368_v5, %v6559_v55  ;;  %v5463_v14 = vpop.f32.mrf.mxu0  ;;  %v9360_v59 = vld [vmem:[#allocation2 + $0x26c] sm:$0xf]  ;;  %v6402_v51 = vor.u32 %v9328_v8, %v6399_v58  ;;  %v6255_v36 = vld [vmem:[#allocation2 + $0x58] sm:$0xf0] }
 0x252   :  { %5682 = vmatpush.bf16.msrb.mxu1 %v8910_v63  ;;  %v9332_v63 = vld [vmem:[#allocation2 + $0x18c] sm:$0xf]  ;;  %v5464_v52 = vadd.f32 %v5463_v14, %v5451_v15  ;;  %v5476_v17 = vpop.f32.mrf.mxu1  ;;  %v6223_v58 = vld [vmem:[#allocation2 + $0x18] sm:$0xf0] }
 0x253   :  { %5695 = vmatpush.bf16.msrb.mxu2 %v9038_v24  ;;  %v6690_v24 = vor.u32 %v9400_v56, %v6687_v9  ;;  %v6418_v47 = vor.u32 %v9332_v63, %v6415_v26  ;;  %v9324_v5 = vld [vmem:[#allocation2 + $0x14c] sm:$0xf]  ;;  %v6383_v9 = vld [vmem:[#allocation2 + $0x158] sm:$0xf0] }
 0x254   :  { %5708 = vmatpush.bf16.msrb.mxu3 %v9166_v32  ;;  %5670 = vmatmul.bf16.vlgmr.msrb.gmra.mxu0 %v10312_v7  ;;  %v6543_v32 = vld [vmem:[#allocation2 + $0x298] sm:$0xf0]  ;;  %v5477_v62 = vadd.f32 %v5476_v17, %v5464_v52  ;;  %v9384_v8 = vld [vmem:[#allocation2 + $0x32c] sm:$0xf] }
 0x255   :  { %5714 = vmatpush.bf16.msra.mxu0 %v6338_v34  ;;  %5683 = vmatmul.bf16.vlgmr.msrb.gmra.mxu1 %v10316_v12  ;;  %v9396_v34 = vld [vmem:[#allocation2 + $0x38c] sm:$0xf]  ;;  %v6546_v48 = vor.u32 %v9364_v27, %v6543_v32  ;;  %v6386_v27 = vor.u32 %v9324_v5, %v6383_v9  ;;  %v6623_v52 = vld [vmem:[#allocation2 + $0x338] sm:$0xf0] }
 0x256   :  { %5727 = vmatpush.bf16.msra.mxu1 %v6466_v39  ;;  %5696 = vmatmul.bf16.vlgmr.msrb.gmra.mxu2 %v10314_v11  ;;  %v6671_v39 = vld [vmem:[#allocation2 + $0x398] sm:$0xf0]  ;;  %v9472_v9 = vld [vmem:[#allocation2 + $0x5ec] sm:$0xf] }
 0x257   :  { %5740 = vmatpush.bf16.msra.mxu2 %v6594_v6  ;;  %5709 = vmatmul.bf16.vlgmr.msrb.gmra.mxu3 %v10318_v16  ;;  %v6290_v6 = vor.u32 %v9300_v1, %v6287_v21  ;;  %v6674_v57 = vor.u32 %v9396_v34, %v6671_v39  ;;  %v9388_v1 = vld [vmem:[#allocation2 + $0x34c] sm:$0xf]  ;;  %v6639_v21 = vld [vmem:[#allocation2 + $0x358] sm:$0xf0] }
 0x258   :  { %5753 = vmatpush.bf16.msra.mxu3 %v6722_v50  ;;  %v6271_v50 = vld [vmem:[#allocation2 + $0x78] sm:$0xf0]  ;;  %v9288_v34 = vld [vmem:[#allocation2 + $0x2c] sm:$0xf] }
 0x259   :  { %5715 = vmatpush.bf16.msra.mxu0 %v6322_v53  ;;  %v6527_v53 = vld [vmem:[#allocation2 + $0x278] sm:$0xf0]  ;;  %v6274_v0 = vor.u32 %v9296_v40, %v6271_v50  ;;  %v5489_v55 = vpop.f32.mrf.mxu2  ;;  %v5465_v26 = vpop.f32.mrf.mxu0  ;;  %v9352_v40 = vld [vmem:[#allocation2 + $0x22c] sm:$0xf] }
 0x25a   :  { %5728 = vmatpush.bf16.msra.mxu1 %v6450_v60  ;;  %v9392_v60 = vld [vmem:[#allocation2 + $0x36c] sm:$0xf]  ;;  %v6530_v2 = vor.u32 %v9360_v59, %v6527_v53  ;;  %v5502_v15 = vpop.f32.mrf.mxu3  ;;  %v6239_v39 = vld [vmem:[#allocation2 + $0x38] sm:$0xf0]  ;;  %v5478_v14 = vpop.f32.mrf.mxu1 }
 0x25b   :  { %5741 = vmatpush.bf16.msra.mxu2 %v6578_v61  ;;  %v6655_v61 = vld [vmem:[#allocation2 + $0x378] sm:$0xf0]  ;;  %v6242_v17 = vor.u32 %v9288_v34, %v6239_v39 }
 0x25c   :  { %5754 = vmatpush.bf16.msra.mxu3 %v6706_v3  ;;  %v9292_v3 = vld [vmem:[#allocation2 + $0x4c] sm:$0xf]  ;;  %v6658_v56 = vor.u32 %v9392_v60, %v6655_v61  ;;  %v6495_v50 = vld [vmem:[#allocation2 + $0x238] sm:$0xf0] }
 0x25d   :  { %5716 = vmatpush.bf16.msra.mxu0 %v6306_v4  ;;  %v9356_v4 = vld [vmem:[#allocation2 + $0x24c] sm:$0xf]  ;;  %v6258_v63 = vor.u32 %v9292_v3, %v6255_v36  ;;  %v6498_v53 = vor.u32 %v9352_v40, %v6495_v50  ;;  %v6351_v61 = vld [vmem:[#allocation2 + $0x118] sm:$0xf0] }
 0x25e   :  { %5729 = vmatpush.bf16.msra.mxu1 %v6434_v10  ;;  %v6511_v10 = vld [vmem:[#allocation2 + $0x258] sm:$0xf0]  ;;  %v9316_v60 = vld [vmem:[#allocation2 + $0x10c] sm:$0xf] }
 0x25f   :  { %5742 = vmatpush.bf16.msra.mxu2 %v6562_v13  ;;  %v5490_v13 = vadd.f32 %v5489_v55, %v5477_v62  ;;  %v6514_v32 = vor.u32 %v9356_v4, %v6511_v10  ;;  %v9348_v62 = vld [vmem:[#allocation2 + $0x20c] sm:$0xf]  ;;  %v6607_v36 = vld [vmem:[#allocation2 + $0x318] sm:$0xf0] }
 0x260   :  { %5755 = vmatpush.bf16.msra.mxu3 %v6690_v24  ;;  %v9380_v3 = vld [vmem:[#allocation2 + $0x30c] sm:$0xf]  ;;  %v6975_v10 = vld [vmem:[#allocation2 + $0x5f8] sm:$0xf0] }
 0x261   :  { %5717 = vmatpush.bf16.msra.mxu0 %v6290_v6  ;;  %v10416_v24 = vadd.f32 %v5502_v15, %v5490_v13  ;;  %v9320_v6 = vld [vmem:[#allocation2 + $0x12c] sm:$0xf]  ;;  %v7103_v15 = vld [vmem:[#allocation2 + $0x6f8] sm:$0xf0]  ;;  %v6978_v34 = vor.u32 %v9472_v9, %v6975_v10 }
 0x262   :  { %5730 = vmatpush.bf16.msra.mxu1 %v6418_v47  ;;  %v6642_v47 = vor.u32 %v9388_v1, %v6639_v21  ;;  %v5504_v5 = vpop.f32.mrf.mxu3  ;;  %v9440_v55 = vld [vmem:[#allocation2 + $0x4ec] sm:$0xf]  ;;  %v6354_v1 = vor.u32 %v9316_v60, %v6351_v61  ;;  %v7231_v26 = vld [vmem:[#allocation2 + $0x7f8] sm:$0xf0] }
 0x263   :  { %5743 = vmatpush.bf16.msra.mxu2 %v6546_v48  ;;  %v6367_v48 = vld [vmem:[#allocation2 + $0x138] sm:$0xf0]  ;;  %v9504_v13 = vld [vmem:[#allocation2 + $0x6ec] sm:$0xf] }
 0x264   :  { %5756 = vmatpush.bf16.msra.mxu3 %v6674_v57  ;;  %v9284_v57 = vld [vmem:[#allocation2 + $0xc] sm:$0xf]  ;;  %v6370_v59 = vor.u32 %v9320_v6, %v6367_v48  ;;  %v7106_v39 = vor.u32 %v9504_v13, %v7103_v15  ;;  %v6831_v14 = vld [vmem:[#allocation2 + $0x4d8] sm:$0xf0] }
 0x265   :  { %5718 = vmatpush.bf16.msra.mxu0 %v6274_v0  ;;  %v5491_v0 = vpop.f32.mrf.mxu2  ;;  %v6226_v4 = vor.u32 %v9284_v57, %v6223_v58  ;;  %v9436_v6 = vld [vmem:[#allocation2 + $0x4cc] sm:$0xf]  ;;  %v6959_v40 = vld [vmem:[#allocation2 + $0x5d8] sm:$0xf0] }
 0x266   :  { %5731 = vmatpush.bf16.msra.mxu1 %v6402_v51  ;;  %v6626_v51 = vor.u32 %v9384_v8, %v6623_v52  ;;  %v9500_v50 = vld [vmem:[#allocation2 + $0x6cc] sm:$0xf]  ;;  %v7087_v8 = vld [vmem:[#allocation2 + $0x6d8] sm:$0xf0]  ;;  %v6834_v57 = vor.u32 %v9436_v6, %v6831_v14 }
 0x267   :  { %5744 = vmatpush.bf16.msra.mxu2 %v6530_v2  ;;  %v6479_v2 = vld [vmem:[#allocation2 + $0x218] sm:$0xf0]  ;;  %v9532_v52 = vld [vmem:[#allocation2 + $0x7cc] sm:$0xf] }
 0x268   :  { %5757 = vmatpush.bf16.msra.mxu3 %v6658_v56  ;;  %v6847_v56 = vld [vmem:[#allocation2 + $0x4f8] sm:$0xf0]  ;;  %v6482_v21 = vor.u32 %v9348_v62, %v6479_v2  ;;  %v9464_v61 = vld [vmem:[#allocation2 + $0x5ac] sm:$0xf] }
 0x269   :  { %5719 = vmatpush.bf16.msra.mxu0 %v6258_v63  ;;  %v9536_v63 = vld [vmem:[#allocation2 + $0x7ec] sm:$0xf]  ;;  %v6815_v60 = vld [vmem:[#allocation2 + $0x4b8] sm:$0xf0] }
 0x26a   :  { %5732 = vmatpush.bf16.msra.mxu1 %v6386_v27  ;;  %v6610_v27 = vor.u32 %v9380_v3, %v6607_v36  ;;  %v7234_v48 = vor.u32 %v9536_v63, %v7231_v26  ;;  %v6943_v0 = vld [vmem:[#allocation2 + $0x5b8] sm:$0xf0]  ;;  %v9528_v3 = vld [vmem:[#allocation2 + $0x7ac] sm:$0xf] }
 0x26b   :  { %5745 = vmatpush.bf16.msra.mxu2 %v6514_v32  ;;  %v6850_v32 = vor.u32 %v9440_v55, %v6847_v56  ;;  %v7071_v2 = vld [vmem:[#allocation2 + $0x6b8] sm:$0xf0]  ;;  %v6946_v55 = vor.u32 %v9464_v61, %v6943_v0  ;;  %v9428_v9 = vld [vmem:[#allocation2 + $0x48c] sm:$0xf] }
 0x26c   :  { %5758 = vmatpush.bf16.msra.mxu3 %v6642_v47  ;;  %v9468_v47 = vld [vmem:[#allocation2 + $0x5cc] sm:$0xf]  ;;  %v7199_v36 = vld [vmem:[#allocation2 + $0x7b8] sm:$0xf0] }
 0x26d   :  { %5720 = vmatpush.bf16.msra.mxu0 %v6242_v17  ;;  %v7215_v17 = vld [vmem:[#allocation2 + $0x7d8] sm:$0xf0]  ;;  %v6962_v58 = vor.u32 %v9468_v47, %v6959_v40  ;;  %v9460_v10 = vld [vmem:[#allocation2 + $0x58c] sm:$0xf]  ;;  %v7202_v13 = vor.u32 %v9528_v3, %v7199_v36 }
 0x26e   :  { %5733 = vmatpush.bf16.msra.mxu1 %v6370_v59  ;;  %v7090_v59 = vor.u32 %v9500_v50, %v7087_v8  ;;  %v7218_v62 = vor.u32 %v9532_v52, %v7215_v17  ;;  %v9492_v15 = vld [vmem:[#allocation2 + $0x68c] sm:$0xf]  ;;  %v7183_v63 = vld [vmem:[#allocation2 + $0x798] sm:$0xf0] }
 0x26f   :  { %5746 = vmatpush.bf16.msra.mxu2 %v6498_v53  ;;  %v9432_v53 = vld [vmem:[#allocation2 + $0x4ac] sm:$0xf]  ;;  %v7039_v50 = vld [vmem:[#allocation2 + $0x678] sm:$0xf0] }
 0x270   :  { %5759 = vmatpush.bf16.msra.mxu3 %v6626_v51  ;;  %v9496_v51 = vld [vmem:[#allocation2 + $0x6ac] sm:$0xf]  ;;  %v6818_v5 = vor.u32 %v9432_v53, %v6815_v60  ;;  %v7167_v52 = vld [vmem:[#allocation2 + $0x778] sm:$0xf0] }
 0x271   :  { %5721 = vmatpush.bf16.msra.mxu0 %v6226_v4  ;;  %v7074_v56 = vor.u32 %v9496_v51, %v7071_v2  ;;  %v6799_v4 = vld [vmem:[#allocation2 + $0x498] sm:$0xf0]  ;;  %v9456_v6 = vld [vmem:[#allocation2 + $0x56c] sm:$0xf] }
 0x272   :  { %5734 = vmatpush.bf16.msra.mxu1 %v6354_v1  ;;  %v7055_v1 = vld [vmem:[#allocation2 + $0x698] sm:$0xf0]  ;;  %v6802_v26 = vor.u32 %v9428_v9, %v6799_v4  ;;  %v9488_v40 = vld [vmem:[#allocation2 + $0x66c] sm:$0xf] }
 0x273   :  { %5747 = vmatpush.bf16.msra.mxu2 %v6482_v21  ;;  %v5515_v21 = vpop.f32.mrf.mxu0  ;;  %v9520_v8 = vld [vmem:[#allocation2 + $0x76c] sm:$0xf]  ;;  %v7023_v51 = vld [vmem:[#allocation2 + $0x658] sm:$0xf0] }
 0x274   :  { %5760 = vmatpush.bf16.msra.mxu3 %v6610_v27  ;;  %5722 = vmatmul.bf16.vlgmr.msra.gmra.mxu0 %v10222_v19  ;;  %v9524_v19 = vld [vmem:[#allocation2 + $0x78c] sm:$0xf]  ;;  %v7170_v60 = vor.u32 %v9520_v8, %v7167_v52  ;;  %v7119_v52 = vld [vmem:[#allocation2 + $0x718] sm:$0xf0] }
 0x275   :  { %5766 = vmatpush.bf16.msrb.mxu0 %v6850_v32  ;;  %5735 = vmatmul.bf16.vlgmr.msra.gmra.mxu1 %v10226_v22  ;;  %v5528_v22 = vpop.f32.mrf.mxu1  ;;  %v7058_v32 = vor.u32 %v9492_v15, %v7055_v1  ;;  %v7186_v14 = vor.u32 %v9524_v19, %v7183_v63  ;;  %v9452_v53 = vld [vmem:[#allocation2 + $0x54c] sm:$0xf]  ;;  %v6751_v15 = vld [vmem:[#allocation2 + $0x438] sm:$0xf0] }
 0x276   :  { %5779 = vmatpush.bf16.msrb.mxu1 %v6978_v34  ;;  %5748 = vmatmul.bf16.vlgmr.msra.gmra.mxu2 %v10220_v18  ;;  %v6927_v18 = vld [vmem:[#allocation2 + $0x598] sm:$0xf0]  ;;  %v9424_v34 = vld [vmem:[#allocation2 + $0x46c] sm:$0xf] }
 0x277   :  { %5792 = vmatpush.bf16.msrb.mxu2 %v7106_v39  ;;  %5761 = vmatmul.bf16.vlgmr.msra.gmra.mxu3 %v10224_v20  ;;  %v5516_v20 = vadd.f32 %v5515_v21, %v10416_v24  ;;  %v6930_v27 = vor.u32 %v9460_v10, %v6927_v18  ;;  %v6783_v39 = vld [vmem:[#allocation2 + $0x478] sm:$0xf0]  ;;  %v9484_v0 = vld [vmem:[#allocation2 + $0x64c] sm:$0xf] }
 0x278   :  { %5805 = vmatpush.bf16.msrb.mxu3 %v7234_v48  ;;  %v6911_v48 = vld [vmem:[#allocation2 + $0x578] sm:$0xf0]  ;;  %v6786_v17 = vor.u32 %v9424_v34, %v6783_v39  ;;  %v9516_v36 = vld [vmem:[#allocation2 + $0x74c] sm:$0xf] }
 0x279   :  { %5767 = vmatpush.bf16.msrb.mxu0 %v6834_v57  ;;  %v5529_v47 = vadd.f32 %v5528_v22, %v5516_v20  ;;  %v6914_v24 = vor.u32 %v9456_v6, %v6911_v48  ;;  %v7042_v57 = vor.u32 %v9488_v40, %v7039_v50  ;;  %v5541_v61 = vpop.f32.mrf.mxu2  ;;  %v9416_v18 = vld [vmem:[#allocation2 + $0x42c] sm:$0xf]  ;;  %v6879_v19 = vld [vmem:[#allocation2 + $0x538] sm:$0xf0] }
 0x27a   :  { %5780 = vmatpush.bf16.msrb.mxu1 %v6962_v58  ;;  %v9420_v58 = vld [vmem:[#allocation2 + $0x44c] sm:$0xf]  ;;  %v5554_v3 = vpop.f32.mrf.mxu3  ;;  %v7007_v20 = vld [vmem:[#allocation2 + $0x638] sm:$0xf0] }
 0x27b   :  { %5793 = vmatpush.bf16.msrb.mxu2 %v7090_v59  ;;  %v6767_v59 = vld [vmem:[#allocation2 + $0x458] sm:$0xf0]  ;;  %v5542_v2 = vadd.f32 %v5541_v61, %v5529_v47  ;;  %v9448_v1 = vld [vmem:[#allocation2 + $0x52c] sm:$0xf] }
 0x27c   :  { %5806 = vmatpush.bf16.msrb.mxu3 %v7218_v62  ;;  %v6895_v62 = vld [vmem:[#allocation2 + $0x558] sm:$0xf0]  ;;  %v9480_v63 = vld [vmem:[#allocation2 + $0x62c] sm:$0xf]  ;;  %v6882_v39 = vor.u32 %v9448_v1, %v6879_v19 }
 0x27d   :  { %5768 = vmatpush.bf16.msrb.mxu0 %v6818_v5  ;;  %v7151_v5 = vld [vmem:[#allocation2 + $0x758] sm:$0xf0]  ;;  %v5530_v9 = vpop.f32.mrf.mxu1  ;;  %v10423_v4 = vadd.f32 %v5554_v3, %v5542_v2  ;;  %v6898_v10 = vor.u32 %v9452_v53, %v6895_v62  ;;  %v7010_v6 = vor.u32 %v9480_v63, %v7007_v20  ;;  %v9476_v48 = vld [vmem:[#allocation2 + $0x60c] sm:$0xf] }
 0x27e   :  { %5781 = vmatpush.bf16.msrb.mxu1 %v6946_v55  ;;  %v5517_v55 = vpop.f32.mrf.mxu0  ;;  %v7154_v21 = vor.u32 %v9516_v36, %v7151_v5  ;;  %v7135_v22 = vld [vmem:[#allocation2 + $0x738] sm:$0xf0]  ;;  %v9508_v8 = vld [vmem:[#allocation2 + $0x70c] sm:$0xf] }
 0x27f   :  { %5794 = vmatpush.bf16.msrb.mxu2 %v7074_v56  ;;  %v6770_v56 = vor.u32 %v9420_v58, %v6767_v59  ;;  %v6735_v34 = vld [vmem:[#allocation2 + $0x418] sm:$0xf0]  ;;  %v9600_v58 = vld [vmem:[#allocation2 + $0x9ec] sm:$0xf]  ;;  %v7122_v36 = vor.u32 %v9508_v8, %v7119_v52 }
 0x280   :  { %5807 = vmatpush.bf16.msrb.mxu3 %v7202_v13  ;;  %v7026_v13 = vor.u32 %v9484_v0, %v7023_v51  ;;  %v6863_v47 = vld [vmem:[#allocation2 + $0x518] sm:$0xf0]  ;;  %v9632_v61 = vld [vmem:[#allocation2 + $0xaec] sm:$0xf] }
 0x281   :  { %5769 = vmatpush.bf16.msrb.mxu0 %v6802_v26  ;;  %v9512_v26 = vld [vmem:[#allocation2 + $0x72c] sm:$0xf]  ;;  %v6991_v50 = vld [vmem:[#allocation2 + $0x618] sm:$0xf0] }
 0x282   :  { %5782 = vmatpush.bf16.msrb.mxu1 %v6930_v27  ;;  %v6754_v27 = vor.u32 %v9416_v18, %v6751_v15  ;;  %v7138_v40 = vor.u32 %v9512_v26, %v7135_v22  ;;  %v5556_v59 = vpop.f32.mrf.mxu3  ;;  %v7615_v62 = vld [vmem:[#allocation2 + $0xaf8] sm:$0xf0]  ;;  %v6994_v51 = vor.u32 %v9476_v48, %v6991_v50  ;;  %v9664_v2 = vld [vmem:[#allocation2 + $0xbec] sm:$0xf] }
 0x283   :  { %5795 = vmatpush.bf16.msrb.mxu2 %v7058_v32  ;;  %v9412_v32 = vld [vmem:[#allocation2 + $0x40c] sm:$0xf]  ;;  %v7743_v3 = vld [vmem:[#allocation2 + $0xbf8] sm:$0xf0] }
 0x284   :  { %5808 = vmatpush.bf16.msrb.mxu3 %v7186_v14  ;;  %v9444_v14 = vld [vmem:[#allocation2 + $0x50c] sm:$0xf]  ;;  %v6738_v53 = vor.u32 %v9412_v32, %v6735_v34  ;;  %v7746_v18 = vor.u32 %v9664_v2, %v7743_v3  ;;  %v7471_v15 = vld [vmem:[#allocation2 + $0x9d8] sm:$0xf0] }
 0x285   :  { %5770 = vmatpush.bf16.msrb.mxu0 %v6786_v17  ;;  %v5543_v17 = vpop.f32.mrf.mxu2  ;;  %v6866_v0 = vor.u32 %v9444_v14, %v6863_v47  ;;  %v9564_v9 = vld [vmem:[#allocation2 + $0x8cc] sm:$0xf]  ;;  %v7727_v63 = vld [vmem:[#allocation2 + $0xbd8] sm:$0xf0] }
 0x286   :  { %5783 = vmatpush.bf16.msrb.mxu1 %v6914_v24  ;;  %v9568_v24 = vld [vmem:[#allocation2 + $0x8ec] sm:$0xf]  ;;  %v7327_v32 = vld [vmem:[#allocation2 + $0x8b8] sm:$0xf0] }
 0x287   :  { %5796 = vmatpush.bf16.msrb.mxu2 %v7042_v57  ;;  %v7359_v57 = vld [vmem:[#allocation2 + $0x8f8] sm:$0xf0]  ;;  %v9628_v1 = vld [vmem:[#allocation2 + $0xacc] sm:$0xf] }
 0x288   :  { %5809 = vmatpush.bf16.msrb.mxu3 %v7170_v60  ;;  %v7487_v60 = vld [vmem:[#allocation2 + $0x9f8] sm:$0xf0]  ;;  %v7362_v5 = vor.u32 %v9568_v24, %v7359_v57  ;;  %v9660_v19 = vld [vmem:[#allocation2 + $0xbcc] sm:$0xf] }
 0x289   :  { %5771 = vmatpush.bf16.msrb.mxu0 %v6770_v56  ;;  %v7490_v55 = vor.u32 %v9600_v58, %v7487_v60  ;;  %v7618_v56 = vor.u32 %v9632_v61, %v7615_v62  ;;  %v9592_v34 = vld [vmem:[#allocation2 + $0x9ac] sm:$0xf]  ;;  %v7583_v47 = vld [vmem:[#allocation2 + $0xab8] sm:$0xf0] }
 0x28a   :  { %5784 = vmatpush.bf16.msrb.mxu1 %v6898_v10  ;;  %v7343_v10 = vld [vmem:[#allocation2 + $0x8d8] sm:$0xf0]  ;;  %v9624_v14 = vld [vmem:[#allocation2 + $0xaac] sm:$0xf] }
 0x28b   :  { %5797 = vmatpush.bf16.msrb.mxu2 %v7026_v13  ;;  %v9596_v13 = vld [vmem:[#allocation2 + $0x9cc] sm:$0xf]  ;;  %v7346_v20 = vor.u32 %v9564_v9, %v7343_v10  ;;  %v7586_v52 = vor.u32 %v9624_v14, %v7583_v47  ;;  %v7311_v24 = vld [vmem:[#allocation2 + $0x898] sm:$0xf0] }
 0x28c   :  { %5810 = vmatpush.bf16.msrb.mxu3 %v7154_v21  ;;  %v7599_v21 = vld [vmem:[#allocation2 + $0xad8] sm:$0xf0]  ;;  %v7474_v26 = vor.u32 %v9596_v13, %v7471_v15  ;;  %v9656_v48 = vld [vmem:[#allocation2 + $0xbac] sm:$0xf] }
 0x28d   :  { %5772 = vmatpush.bf16.msrb.mxu0 %v6754_v27  ;;  %v7602_v22 = vor.u32 %v9628_v1, %v7599_v21  ;;  %v9560_v27 = vld [vmem:[#allocation2 + $0x8ac] sm:$0xf]  ;;  %v7439_v58 = vld [vmem:[#allocation2 + $0x998] sm:$0xf0] }
 0x28e   :  { %5785 = vmatpush.bf16.msrb.mxu1 %v6882_v39  ;;  %v7730_v39 = vor.u32 %v9660_v19, %v7727_v63  ;;  %v7330_v50 = vor.u32 %v9560_v27, %v7327_v32  ;;  %v9556_v17 = vld [vmem:[#allocation2 + $0x88c] sm:$0xf]  ;;  %v7695_v61 = vld [vmem:[#allocation2 + $0xb98] sm:$0xf0] }
 0x28f   :  { %5798 = vmatpush.bf16.msrb.mxu2 %v7010_v6  ;;  %v7455_v6 = vld [vmem:[#allocation2 + $0x9b8] sm:$0xf0]  ;;  %v9620_v59 = vld [vmem:[#allocation2 + $0xa8c] sm:$0xf]  ;;  %v7314_v62 = vor.u32 %v9556_v17, %v7311_v24 }
 0x290   :  { %5811 = vmatpush.bf16.msrb.mxu3 %v7138_v40  ;;  %v7711_v40 = vld [vmem:[#allocation2 + $0xbb8] sm:$0xf0]  ;;  %v7458_v8 = vor.u32 %v9592_v34, %v7455_v6  ;;  %v9552_v2 = vld [vmem:[#allocation2 + $0x86c] sm:$0xf] }
 0x291   :  { %5773 = vmatpush.bf16.msrb.mxu0 %v6738_v53  ;;  %v7714_v57 = vor.u32 %v9656_v48, %v7711_v40  ;;  %v7567_v53 = vld [vmem:[#allocation2 + $0xa98] sm:$0xf0]  ;;  %v5567_v60 = vpop.f32.mrf.mxu0  ;;  %v9616_v9 = vld [vmem:[#allocation2 + $0xa6c] sm:$0xf] }
 0x292   :  { %5786 = vmatpush.bf16.msrb.mxu1 %v6866_v0  ;;  %v7295_v3 = vld [vmem:[#allocation2 + $0x878] sm:$0xf0]  ;;  %v9648_v13 = vld [vmem:[#allocation2 + $0xb6c] sm:$0xf] }
 0x293   :  { %5799 = vmatpush.bf16.msrb.mxu2 %v6994_v51  ;;  %v7570_v51 = vor.u32 %v9620_v59, %v7567_v53  ;;  %v7551_v10 = vld [vmem:[#allocation2 + $0xa78] sm:$0xf0]  ;;  %v7298_v15 = vor.u32 %v9552_v2, %v7295_v3  ;;  %v9548_v21 = vld [vmem:[#allocation2 + $0x84c] sm:$0xf] }
 0x294   :  { %5812 = vmatpush.bf16.msrb.mxu3 %v7122_v36  ;;  %5774 = vmatmul.bf16.vlgmr.msrb.gmra.mxu0 %v10240_v41  ;;  %v9652_v41 = vld [vmem:[#allocation2 + $0xb8c] sm:$0xf]  ;;  %v7554_v1 = vor.u32 %v9616_v9, %v7551_v10  ;;  %v7279_v19 = vld [vmem:[#allocation2 + $0x858] sm:$0xf0] }
 0x295   :  { %5818 = vmatpush.bf16.msra.mxu0 %v7362_v5  ;;  %5787 = vmatmul.bf16.vlgmr.msrb.gmra.mxu1 %v10244_v44  ;;  %v5580_v44 = vpop.f32.mrf.mxu1  ;;  %v9584_v36 = vld [vmem:[#allocation2 + $0x96c] sm:$0xf]  ;;  %v7698_v5 = vor.u32 %v9652_v41, %v7695_v61  ;;  %v7535_v32 = vld [vmem:[#allocation2 + $0xa58] sm:$0xf0]  ;;  %v7282_v48 = vor.u32 %v9548_v21, %v7279_v19 }
 0x296   :  { %5831 = vmatpush.bf16.msra.mxu1 %v7490_v55  ;;  %5800 = vmatmul.bf16.vlgmr.msrb.gmra.mxu2 %v10238_v38  ;;  %v9588_v38 = vld [vmem:[#allocation2 + $0x98c] sm:$0xf]  ;;  %v7663_v14 = vld [vmem:[#allocation2 + $0xb58] sm:$0xf0] }
 0x297   :  { %5844 = vmatpush.bf16.msra.mxu2 %v7618_v56  ;;  %5813 = vmatmul.bf16.vlgmr.msrb.gmra.mxu3 %v10242_v42  ;;  %v5568_v42 = vadd.f32 %v5567_v60, %v10423_v4  ;;  %v7442_v0 = vor.u32 %v9588_v38, %v7439_v58  ;;  %v7423_v56 = vld [vmem:[#allocation2 + $0x978] sm:$0xf0]  ;;  %v9580_v63 = vld [vmem:[#allocation2 + $0x94c] sm:$0xf] }
 0x298   :  { %5857 = vmatpush.bf16.msra.mxu3 %v7746_v18  ;;  %v7679_v18 = vld [vmem:[#allocation2 + $0xb78] sm:$0xf0]  ;;  %v7426_v4 = vor.u32 %v9584_v36, %v7423_v56  ;;  %v9612_v27 = vld [vmem:[#allocation2 + $0xa4c] sm:$0xf] }
 0x299   :  { %5819 = vmatpush.bf16.msra.mxu0 %v7346_v20  ;;  %v5581_v55 = vadd.f32 %v5580_v44, %v5568_v42  ;;  %v7682_v20 = vor.u32 %v9648_v13, %v7679_v18  ;;  %v9644_v6 = vld [vmem:[#allocation2 + $0xb4c] sm:$0xf]  ;;  %v5569_v47 = vpop.f32.mrf.mxu0  ;;  %v7263_v24 = vld [vmem:[#allocation2 + $0x838] sm:$0xf0] }
 0x29a   :  { %5832 = vmatpush.bf16.msra.mxu1 %v7474_v26  ;;  %v5593_v26 = vpop.f32.mrf.mxu2  ;;  %v9544_v17 = vld [vmem:[#allocation2 + $0x82c] sm:$0xf]  ;;  %v7391_v58 = vld [vmem:[#allocation2 + $0x938] sm:$0xf0] }
 0x29b   :  { %5845 = vmatpush.bf16.msra.mxu2 %v7602_v22  ;;  %v7407_v22 = vld [vmem:[#allocation2 + $0x958] sm:$0xf0]  ;;  %v5594_v34 = vadd.f32 %v5593_v26, %v5581_v55  ;;  %v9576_v38 = vld [vmem:[#allocation2 + $0x92c] sm:$0xf]  ;;  %v7266_v61 = vor.u32 %v9544_v17, %v7263_v24 }
 0x29c   :  { %5858 = vmatpush.bf16.msra.mxu3 %v7730_v39  ;;  %v5606_v39 = vpop.f32.mrf.mxu3  ;;  %v9608_v59 = vld [vmem:[#allocation2 + $0xa2c] sm:$0xf]  ;;  %v7519_v53 = vld [vmem:[#allocation2 + $0xa38] sm:$0xf0]  ;;  %v7394_v44 = vor.u32 %v9576_v38, %v7391_v58 }
 0x29d   :  { %5820 = vmatpush.bf16.msra.mxu0 %v7330_v50  ;;  %v5582_v40 = vpop.f32.mrf.mxu1  ;;  %v10430_v50 = vadd.f32 %v5606_v39, %v5594_v34  ;;  %v9640_v60 = vld [vmem:[#allocation2 + $0xb2c] sm:$0xf]  ;;  %v7647_v41 = vld [vmem:[#allocation2 + $0xb38] sm:$0xf0] }
 0x29e   :  { %5833 = vmatpush.bf16.msra.mxu1 %v7458_v8  ;;  %v7410_v8 = vor.u32 %v9580_v63, %v7407_v22  ;;  %v9540_v42 = vld [vmem:[#allocation2 + $0x80c] sm:$0xf]  ;;  %v7375_v2 = vld [vmem:[#allocation2 + $0x918] sm:$0xf0]  ;;  %v7650_v36 = vor.u32 %v9640_v60, %v7647_v41 }
 0x29f   :  { %5846 = vmatpush.bf16.msra.mxu2 %v7586_v52  ;;  %v7538_v52 = vor.u32 %v9612_v27, %v7535_v32  ;;  %v9604_v3 = vld [vmem:[#allocation2 + $0xa0c] sm:$0xf]  ;;  %v7631_v56 = vld [vmem:[#allocation2 + $0xb18] sm:$0xf0] }
 0x2a0   :  { %5859 = vmatpush.bf16.msra.mxu3 %v7714_v57  ;;  %v7666_v57 = vor.u32 %v9644_v6, %v7663_v14  ;;  %v9636_v55 = vld [vmem:[#allocation2 + $0xb0c] sm:$0xf]  ;;  %v7871_v13 = vld [vmem:[#allocation2 + $0xcf8] sm:$0xf0] }
 0x2a1   :  { %5821 = vmatpush.bf16.msra.mxu0 %v7314_v62  ;;  %v7247_v62 = vld [vmem:[#allocation2 + $0x818] sm:$0xf0]  ;;  %v9696_v10 = vld [vmem:[#allocation2 + $0xcec] sm:$0xf]  ;;  %v7634_v27 = vor.u32 %v9636_v55, %v7631_v56 }
 0x2a2   :  { %5834 = vmatpush.bf16.msra.mxu1 %v7442_v0  ;;  %v7522_v0 = vor.u32 %v9608_v59, %v7519_v53  ;;  %v5595_v9 = vpop.f32.mrf.mxu2  ;;  %v9728_v18 = vld [vmem:[#allocation2 + $0xdec] sm:$0xf]  ;;  %v8127_v19 = vld [vmem:[#allocation2 + $0xef8] sm:$0xf0]  ;;  %v7874_v32 = vor.u32 %v9696_v10, %v7871_v13 }
 0x2a3   :  { %5847 = vmatpush.bf16.msra.mxu2 %v7570_v51  ;;  %v9572_v51 = vld [vmem:[#allocation2 + $0x90c] sm:$0xf]  ;;  %v8255_v22 = vld [vmem:[#allocation2 + $0xff8] sm:$0xf0] }
 0x2a4   :  { %5860 = vmatpush.bf16.msra.mxu3 %v7698_v5  ;;  %v7503_v5 = vld [vmem:[#allocation2 + $0xa18] sm:$0xf0]  ;;  %v9760_v21 = vld [vmem:[#allocation2 + $0xeec] sm:$0xf]  ;;  %v7378_v63 = vor.u32 %v9572_v51, %v7375_v2 }
 0x2a5   :  { %5822 = vmatpush.bf16.msra.mxu0 %v7298_v15  ;;  %v5608_v15 = vpop.f32.mrf.mxu3  ;;  %v9792_v26 = vld [vmem:[#allocation2 + $0xfec] sm:$0xf]  ;;  %v8130_v39 = vor.u32 %v9760_v21, %v8127_v19  ;;  %v7855_v14 = vld [vmem:[#allocation2 + $0xcd8] sm:$0xf0] }
 0x2a6   :  { %5835 = vmatpush.bf16.msra.mxu1 %v7426_v4  ;;  %v7250_v4 = vor.u32 %v9540_v42, %v7247_v62  ;;  %v9692_v6 = vld [vmem:[#allocation2 + $0xccc] sm:$0xf]  ;;  %v7983_v40 = vld [vmem:[#allocation2 + $0xdd8] sm:$0xf0] }
 0x2a7   :  { %5848 = vmatpush.bf16.msra.mxu2 %v7554_v1  ;;  %v7999_v1 = vld [vmem:[#allocation2 + $0xdf8] sm:$0xf0]  ;;  %v9724_v47 = vld [vmem:[#allocation2 + $0xdcc] sm:$0xf]  ;;  %v7858_v38 = vor.u32 %v9692_v6, %v7855_v14 }
 0x2a8   :  { %5861 = vmatpush.bf16.msra.mxu3 %v7682_v20  ;;  %v7506_v20 = vor.u32 %v9604_v3, %v7503_v5  ;;  %v8002_v34 = vor.u32 %v9728_v18, %v7999_v1  ;;  %v9788_v17 = vld [vmem:[#allocation2 + $0xfcc] sm:$0xf]  ;;  %v8239_v24 = vld [vmem:[#allocation2 + $0xfd8] sm:$0xf0] }
 0x2a9   :  { %5823 = vmatpush.bf16.msra.mxu0 %v7282_v48  ;;  %v8258_v48 = vor.u32 %v9792_v26, %v8255_v22  ;;  %v9688_v59 = vld [vmem:[#allocation2 + $0xcac] sm:$0xf]  ;;  %v7839_v53 = vld [vmem:[#allocation2 + $0xcb8] sm:$0xf0]  ;;  %v8242_v41 = vor.u32 %v9788_v17, %v8239_v24 }
 0x2aa   :  { %5836 = vmatpush.bf16.msra.mxu1 %v7410_v8  ;;  %v9756_v8 = vld [vmem:[#allocation2 + $0xecc] sm:$0xf]  ;;  %v8095_v62 = vld [vmem:[#allocation2 + $0xeb8] sm:$0xf0]  ;;  %v7842_v51 = vor.u32 %v9688_v59, %v7839_v53 }
 0x2ab   :  { %5849 = vmatpush.bf16.msra.mxu2 %v7538_v52  ;;  %v8111_v52 = vld [vmem:[#allocation2 + $0xed8] sm:$0xf0]  ;;  %v9720_v60 = vld [vmem:[#allocation2 + $0xdac] sm:$0xf] }
 0x2ac   :  { %5862 = vmatpush.bf16.msra.mxu3 %v7666_v57  ;;  %v7986_v57 = vor.u32 %v9724_v47, %v7983_v40  ;;  %v8114_v58 = vor.u32 %v9756_v8, %v8111_v52  ;;  %v9752_v42 = vld [vmem:[#allocation2 + $0xeac] sm:$0xf]  ;;  %v7951_v56 = vld [vmem:[#allocation2 + $0xd98] sm:$0xf0] }
 0x2ad   :  { %5824 = vmatpush.bf16.msra.mxu0 %v7266_v61  ;;  %v7967_v61 = vld [vmem:[#allocation2 + $0xdb8] sm:$0xf0]  ;;  %v8098_v3 = vor.u32 %v9752_v42, %v8095_v62  ;;  %v9716_v5 = vld [vmem:[#allocation2 + $0xd8c] sm:$0xf] }
 0x2ae   :  { %5837 = vmatpush.bf16.msra.mxu1 %v7394_v44  ;;  %v9784_v44 = vld [vmem:[#allocation2 + $0xfac] sm:$0xf]  ;;  %v7970_v2 = vor.u32 %v9720_v60, %v7967_v61  ;;  %v8207_v13 = vld [vmem:[#allocation2 + $0xf98] sm:$0xf0] }
 0x2af   :  { %5850 = vmatpush.bf16.msra.mxu2 %v7522_v0  ;;  %v8223_v0 = vld [vmem:[#allocation2 + $0xfb8] sm:$0xf0]  ;;  %v9748_v9 = vld [vmem:[#allocation2 + $0xe8c] sm:$0xf] }
 0x2b0   :  { %5863 = vmatpush.bf16.msra.mxu3 %v7650_v36  ;;  %v9684_v36 = vld [vmem:[#allocation2 + $0xc8c] sm:$0xf]  ;;  %v8226_v55 = vor.u32 %v9784_v44, %v8223_v0  ;;  %v7807_v19 = vld [vmem:[#allocation2 + $0xc78] sm:$0xf0] }
 0x2b1   :  { %5825 = vmatpush.bf16.msra.mxu0 %v7250_v4  ;;  %v5619_v10 = vpop.f32.mrf.mxu0  ;;  %v7954_v4 = vor.u32 %v9716_v5, %v7951_v56  ;;  %v9680_v21 = vld [vmem:[#allocation2 + $0xc6c] sm:$0xf]  ;;  %v7935_v22 = vld [vmem:[#allocation2 + $0xd78] sm:$0xf0] }
 0x2b2   :  { %5838 = vmatpush.bf16.msra.mxu1 %v7378_v63  ;;  %v5632_v15 = vpop.f32.mrf.mxu1  ;;  %v9712_v63 = vld [vmem:[#allocation2 + $0xd6c] sm:$0xf]  ;;  %v7810_v6 = vor.u32 %v9680_v21, %v7807_v19  ;;  %v7919_v17 = vld [vmem:[#allocation2 + $0xd58] sm:$0xf0] }
 0x2b3   :  { %5851 = vmatpush.bf16.msra.mxu2 %v7506_v20  ;;  %v9676_v47 = vld [vmem:[#allocation2 + $0xc4c] sm:$0xf]  ;;  %v8175_v53 = vld [vmem:[#allocation2 + $0xf58] sm:$0xf0] }
 0x2b4   :  { %5864 = vmatpush.bf16.msra.mxu3 %v7634_v27  ;;  %5826 = vmatmul.bf16.vlgmr.msra.gmra.mxu0 %v10256_v25  ;;  %v7823_v25 = vld [vmem:[#allocation2 + $0xc98] sm:$0xf0]  ;;  %v9744_v27 = vld [vmem:[#allocation2 + $0xe6c] sm:$0xf] }
 0x2b5   :  { %5870 = vmatpush.bf16.msrb.mxu0 %v7874_v32  ;;  %5839 = vmatmul.bf16.vlgmr.msra.gmra.mxu1 %v10260_v30  ;;  %v9780_v30 = vld [vmem:[#allocation2 + $0xf8c] sm:$0xf]  ;;  %v7826_v18 = vor.u32 %v9684_v36, %v7823_v25  ;;  %v8063_v32 = vld [vmem:[#allocation2 + $0xe78] sm:$0xf0] }
 0x2b6   :  { %5883 = vmatpush.bf16.msrb.mxu1 %v8002_v34  ;;  %5852 = vmatmul.bf16.vlgmr.msra.gmra.mxu2 %v10258_v29  ;;  %v8079_v29 = vld [vmem:[#allocation2 + $0xe98] sm:$0xf0]  ;;  %v8210_v20 = vor.u32 %v9780_v30, %v8207_v13  ;;  %v9776_v34 = vld [vmem:[#allocation2 + $0xf6c] sm:$0xf]  ;;  %v8066_v14 = vor.u32 %v9744_v27, %v8063_v32 }
 0x2b7   :  { %5896 = vmatpush.bf16.msrb.mxu2 %v8130_v39  ;;  %5865 = vmatmul.bf16.vlgmr.msra.gmra.mxu3 %v10262_v33  ;;  %v5620_v33 = vadd.f32 %v5619_v10, %v10430_v50  ;;  %v8082_v1 = vor.u32 %v9748_v9, %v8079_v29  ;;  %v8191_v39 = vld [vmem:[#allocation2 + $0xf78] sm:$0xf0]  ;;  %v7938_v50 = vor.u32 %v9712_v63, %v7935_v22  ;;  %v9708_v40 = vld [vmem:[#allocation2 + $0xd4c] sm:$0xf] }
 0x2b8   :  { %5909 = vmatpush.bf16.msrb.mxu3 %v8258_v48  ;;  %v7791_v48 = vld [vmem:[#allocation2 + $0xc58] sm:$0xf0]  ;;  %v8194_v8 = vor.u32 %v9776_v34, %v8191_v39  ;;  %v9740_v24 = vld [vmem:[#allocation2 + $0xe4c] sm:$0xf]  ;;  %v7922_v62 = vor.u32 %v9708_v40, %v7919_v17 }
 0x2b9   :  { %5871 = vmatpush.bf16.msrb.mxu0 %v7858_v38  ;;  %v5633_v26 = vadd.f32 %v5632_v15, %v5620_v33  ;;  %v5645_v52 = vpop.f32.mrf.mxu2  ;;  %v8047_v38 = vld [vmem:[#allocation2 + $0xe58] sm:$0xf0]  ;;  %v9772_v59 = vld [vmem:[#allocation2 + $0xf4c] sm:$0xf]  ;;  %v5621_v60 = vpop.f32.mrf.mxu0 }
 0x2ba   :  { %5884 = vmatpush.bf16.msrb.mxu1 %v7986_v57  ;;  %v5634_v61 = vpop.f32.mrf.mxu1  ;;  %v8050_v44 = vor.u32 %v9740_v24, %v8047_v38  ;;  %v9672_v0 = vld [vmem:[#allocation2 + $0xc2c] sm:$0xf]  ;;  %v7903_v36 = vld [vmem:[#allocation2 + $0xd38] sm:$0xf0] }
 0x2bb   :  { %5897 = vmatpush.bf16.msrb.mxu2 %v8114_v58  ;;  %v5646_v57 = vadd.f32 %v5645_v52, %v5633_v26  ;;  %v5658_v58 = vpop.f32.mrf.mxu3  ;;  %v9736_v25 = vld [vmem:[#allocation2 + $0xe2c] sm:$0xf]  ;;  %v8031_v5 = vld [vmem:[#allocation2 + $0xe38] sm:$0xf0] }
 0x2bc   :  { %5910 = vmatpush.bf16.msrb.mxu3 %v8242_v41  ;;  %v7794_v41 = vor.u32 %v9676_v47, %v7791_v48  ;;  %v8159_v56 = vld [vmem:[#allocation2 + $0xf38] sm:$0xf0]  ;;  %v9668_v29 = vld [vmem:[#allocation2 + $0xc0c] sm:$0xf]  ;;  %v8034_v13 = vor.u32 %v9736_v25, %v8031_v5 }
 0x2bd   :  { %5872 = vmatpush.bf16.msrb.mxu0 %v7842_v51  ;;  %v10437_v42 = vadd.f32 %v5658_v58, %v5646_v57  ;;  %v7775_v51 = vld [vmem:[#allocation2 + $0xc38] sm:$0xf0]  ;;  %v9700_v33 = vld [vmem:[#allocation2 + $0xd0c] sm:$0xf] }
 0x2be   :  { %5885 = vmatpush.bf16.msrb.mxu1 %v7970_v2  ;;  %v9704_v2 = vld [vmem:[#allocation2 + $0xd2c] sm:$0xf]  ;;  %v7778_v9 = vor.u32 %v9672_v0, %v7775_v51  ;;  %v7759_v10 = vld [vmem:[#allocation2 + $0xc18] sm:$0xf0] }
 0x2bf   :  { %5898 = vmatpush.bf16.msrb.mxu2 %v8098_v3  ;;  %v8178_v3 = vor.u32 %v9772_v59, %v8175_v53  ;;  %v7906_v30 = vor.u32 %v9704_v2, %v7903_v36  ;;  %v9732_v15 = vld [vmem:[#allocation2 + $0xe0c] sm:$0xf]  ;;  %v8143_v19 = vld [vmem:[#allocation2 + $0xf18] sm:$0xf0]  ;;  %v7762_v32 = vor.u32 %v9668_v29, %v7759_v10 }
 0x2c0   :  { %5911 = vmatpush.bf16.msrb.mxu3 %v8226_v55  ;;  %v9768_v55 = vld [vmem:[#allocation2 + $0xf2c] sm:$0xf]  ;;  %v8383_v26 = vld [vmem:[#allocation2 + $0x10f8] sm:$0xf0] }
 0x2c1   :  { %5873 = vmatpush.bf16.msrb.mxu0 %v7826_v18  ;;  %v7887_v18 = vld [vmem:[#allocation2 + $0xd18] sm:$0xf0]  ;;  %v9764_v21 = vld [vmem:[#allocation2 + $0xf0c] sm:$0xf]  ;;  %v5647_v63 = vpop.f32.mrf.mxu2 }
 0x2c2   :  { %5886 = vmatpush.bf16.msrb.mxu1 %v7954_v4  ;;  %v8162_v4 = vor.u32 %v9768_v55, %v8159_v56  ;;  %v9856_v22 = vld [vmem:[#allocation2 + $0x11ec] sm:$0xf]  ;;  %v8511_v34 = vld [vmem:[#allocation2 + $0x11f8] sm:$0xf0]  ;;  %v8146_v40 = vor.u32 %v9764_v21, %v8143_v19 }
 0x2c3   :  { %5899 = vmatpush.bf16.msrb.mxu2 %v8082_v1  ;;  %v8015_v1 = vld [vmem:[#allocation2 + $0xe18] sm:$0xf0]  ;;  %v5660_v27 = vpop.f32.mrf.mxu3  ;;  %v9888_v39 = vld [vmem:[#allocation2 + $0x12ec] sm:$0xf]  ;;  %v8514_v52 = vor.u32 %v9856_v22, %v8511_v34 }
 0x2c4   :  { %5912 = vmatpush.bf16.msrb.mxu3 %v8210_v20  ;;  %v9824_v20 = vld [vmem:[#allocation2 + $0x10ec] sm:$0xf]  ;;  %v8767_v48 = vld [vmem:[#allocation2 + $0x13f8] sm:$0xf0] }
 0x2c5   :  { %5874 = vmatpush.bf16.msrb.mxu0 %v7810_v6  ;;  %v8639_v6 = vld [vmem:[#allocation2 + $0x12f8] sm:$0xf0]  ;;  %v9920_v47 = vld [vmem:[#allocation2 + $0x13ec] sm:$0xf] }
 0x2c6   :  { %5887 = vmatpush.bf16.msrb.mxu1 %v7938_v50  ;;  %v7890_v50 = vor.u32 %v9700_v33, %v7887_v18  ;;  %v8642_v17 = vor.u32 %v9888_v39, %v8639_v6  ;;  %v9820_v24 = vld [vmem:[#allocation2 + $0x10cc] sm:$0xf]  ;;  %v8367_v38 = vld [vmem:[#allocation2 + $0x10d8] sm:$0xf0]  ;;  %v8770_v58 = vor.u32 %v9920_v47, %v8767_v48 }
 0x2c7   :  { %5900 = vmatpush.bf16.msrb.mxu2 %v8066_v14  ;;  %v8018_v14 = vor.u32 %v9732_v15, %v8015_v1  ;;  %v9852_v57 = vld [vmem:[#allocation2 + $0x11cc] sm:$0xf]  ;;  %v8495_v59 = vld [vmem:[#allocation2 + $0x11d8] sm:$0xf0] }
 0x2c8   :  { %5913 = vmatpush.bf16.msrb.mxu3 %v8194_v8  ;;  %v8386_v8 = vor.u32 %v9824_v20, %v8383_v26  ;;  %v9884_v53 = vld [vmem:[#allocation2 + $0x12cc] sm:$0xf]  ;;  %v8623_v60 = vld [vmem:[#allocation2 + $0x12d8] sm:$0xf0] }
 0x2c9   :  { %5875 = vmatpush.bf16.msrb.mxu0 %v7794_v41  ;;  %v9916_v41 = vld [vmem:[#allocation2 + $0x13cc] sm:$0xf]  ;;  %v8751_v61 = vld [vmem:[#allocation2 + $0x13d8] sm:$0xf0]  ;;  %v8626_v0 = vor.u32 %v9884_v53, %v8623_v60 }
 0x2ca   :  { %5888 = vmatpush.bf16.msrb.mxu1 %v7922_v62  ;;  %v8370_v62 = vor.u32 %v9820_v24, %v8367_v38  ;;  %v9816_v51 = vld [vmem:[#allocation2 + $0x10ac] sm:$0xf]  ;;  %v8351_v2 = vld [vmem:[#allocation2 + $0x10b8] sm:$0xf0]  ;;  %v8754_v36 = vor.u32 %v9916_v41, %v8751_v61 }
 0x2cb   :  { %5901 = vmatpush.bf16.msrb.mxu2 %v8050_v44  ;;  %v8498_v44 = vor.u32 %v9852_v57, %v8495_v59  ;;  %v8479_v25 = vld [vmem:[#allocation2 + $0x11b8] sm:$0xf0]  ;;  %v9880_v5 = vld [vmem:[#allocation2 + $0x12ac] sm:$0xf]  ;;  %v8354_v29 = vor.u32 %v9816_v51, %v8351_v2 }
 0x2cc   :  { %5914 = vmatpush.bf16.msrb.mxu3 %v8178_v3  ;;  %v9848_v3 = vld [vmem:[#allocation2 + $0x11ac] sm:$0xf]  ;;  %v8607_v55 = vld [vmem:[#allocation2 + $0x12b8] sm:$0xf0] }
 0x2cd   :  { %5876 = vmatpush.bf16.msrb.mxu0 %v7778_v9  ;;  %v9912_v56 = vld [vmem:[#allocation2 + $0x13ac] sm:$0xf]  ;;  %v8735_v9 = vld [vmem:[#allocation2 + $0x13b8] sm:$0xf0]  ;;  %v8482_v10 = vor.u32 %v9848_v3, %v8479_v25 }
 0x2ce   :  { %5889 = vmatpush.bf16.msrb.mxu1 %v7906_v30  ;;  %v8610_v30 = vor.u32 %v9880_v5, %v8607_v55  ;;  %v9844_v33 = vld [vmem:[#allocation2 + $0x118c] sm:$0xf]  ;;  %v8738_v18 = vor.u32 %v9912_v56, %v8735_v9  ;;  %v8463_v15 = vld [vmem:[#allocation2 + $0x1198] sm:$0xf0] }
 0x2cf   :  { %5902 = vmatpush.bf16.msrb.mxu2 %v8034_v13  ;;  %v9812_v13 = vld [vmem:[#allocation2 + $0x108c] sm:$0xf]  ;;  %v8719_v21 = vld [vmem:[#allocation2 + $0x1398] sm:$0xf0]  ;;  %v8466_v20 = vor.u32 %v9844_v33, %v8463_v15 }
 0x2d0   :  { %5915 = vmatpush.bf16.msrb.mxu3 %v8162_v4  ;;  %v9876_v4 = vld [vmem:[#allocation2 + $0x128c] sm:$0xf]  ;;  %v8319_v27 = vld [vmem:[#allocation2 + $0x1078] sm:$0xf0] }
 0x2d1   :  { %5877 = vmatpush.bf16.msrb.mxu0 %v7762_v32  ;;  %v5671_v1 = vpop.f32.mrf.mxu0  ;;  %v9808_v22 = vld [vmem:[#allocation2 + $0x106c] sm:$0xf]  ;;  %v8447_v6 = vld [vmem:[#allocation2 + $0x1178] sm:$0xf0] }
 0x2d2   :  { %5890 = vmatpush.bf16.msrb.mxu1 %v7890_v50  ;;  %v5684_v63 = vpop.f32.mrf.mxu1  ;;  %v9840_v32 = vld [vmem:[#allocation2 + $0x116c] sm:$0xf]  ;;  %v8703_v48 = vld [vmem:[#allocation2 + $0x1378] sm:$0xf0] }
 0x2d3   :  { %5903 = vmatpush.bf16.msrb.mxu2 %v8018_v14  ;;  %v9872_v50 = vld [vmem:[#allocation2 + $0x126c] sm:$0xf]  ;;  %v8575_v14 = vld [vmem:[#allocation2 + $0x1278] sm:$0xf0] }
 0x2d4   :  { %5916 = vmatpush.bf16.msrb.mxu3 %v8146_v40  ;;  %5878 = vmatmul.bf16.vlgmr.msrb.gmra.mxu0 %v10274_v23  ;;  %v8335_v23 = vld [vmem:[#allocation2 + $0x1098] sm:$0xf0]  ;;  %v9904_v47 = vld [vmem:[#allocation2 + $0x136c] sm:$0xf]  ;;  %v8322_v40 = vor.u32 %v9808_v22, %v8319_v27 }
 0x2d5   :  { %5922 = vmatpush.bf16.msra.mxu0 %v8386_v8  ;;  %5891 = vmatmul.bf16.vlgmr.msrb.gmra.mxu1 %v10278_v31  ;;  %v9908_v31 = vld [vmem:[#allocation2 + $0x138c] sm:$0xf]  ;;  %v8338_v19 = vor.u32 %v9812_v13, %v8335_v23  ;;  %v8578_v8 = vor.u32 %v9872_v50, %v8575_v14  ;;  %v8706_v38 = vor.u32 %v9904_v47, %v8703_v48  ;;  %v8559_v53 = vld [vmem:[#allocation2 + $0x1258] sm:$0xf0] }
 0x2d6   :  { %5935 = vmatpush.bf16.msra.mxu1 %v8514_v52  ;;  %5904 = vmatmul.bf16.vlgmr.msrb.gmra.mxu2 %v10276_v28  ;;  %v8591_v28 = vld [vmem:[#allocation2 + $0x1298] sm:$0xf0]  ;;  %v8722_v34 = vor.u32 %v9908_v31, %v8719_v21  ;;  %v9804_v52 = vld [vmem:[#allocation2 + $0x104c] sm:$0xf] }
 0x2d7   :  { %5948 = vmatpush.bf16.msra.mxu2 %v8642_v17  ;;  %5917 = vmatmul.bf16.vlgmr.msrb.gmra.mxu3 %v10280_v35  ;;  %v5672_v35 = vadd.f32 %v5671_v1, %v10437_v42  ;;  %v8594_v26 = vor.u32 %v9876_v4, %v8591_v28  ;;  %v8450_v42 = vor.u32 %v9840_v32, %v8447_v6  ;;  %v8303_v17 = vld [vmem:[#allocation2 + $0x1058] sm:$0xf0]  ;;  %v9836_v24 = vld [vmem:[#allocation2 + $0x114c] sm:$0xf] }
 0x2d8   :  { %5961 = vmatpush.bf16.msra.mxu3 %v8770_v58  ;;  %v8431_v58 = vld [vmem:[#allocation2 + $0x1158] sm:$0xf0]  ;;  %v9868_v59 = vld [vmem:[#allocation2 + $0x124c] sm:$0xf] }
 0x2d9   :  { %5923 = vmatpush.bf16.msra.mxu0 %v8370_v62  ;;  %v5685_v39 = vadd.f32 %v5684_v63, %v5672_v35  ;;  %v5697_v57 = vpop.f32.mrf.mxu2  ;;  %v9900_v61 = vld [vmem:[#allocation2 + $0x134c] sm:$0xf]  ;;  %v8687_v62 = vld [vmem:[#allocation2 + $0x1358] sm:$0xf0]  ;;  %v8434_v3 = vor.u32 %v9836_v24, %v8431_v58 }
 0x2da   :  { %5936 = vmatpush.bf16.msra.mxu1 %v8498_v44  ;;  %v5710_v41 = vpop.f32.mrf.mxu3  ;;  %v5673_v44 = vpop.f32.mrf.mxu0  ;;  %v9800_v25 = vld [vmem:[#allocation2 + $0x102c] sm:$0xf]  ;;  %v8287_v5 = vld [vmem:[#allocation2 + $0x1038] sm:$0xf0]  ;;  %v8690_v56 = vor.u32 %v9900_v61, %v8687_v62 }
 0x2db   :  { %5949 = vmatpush.bf16.msra.mxu2 %v8626_v0  ;;  %v5698_v60 = vadd.f32 %v5697_v57, %v5685_v39  ;;  %v8306_v0 = vor.u32 %v9804_v52, %v8303_v17  ;;  %v5686_v51 = vpop.f32.mrf.mxu1  ;;  %v9832_v55 = vld [vmem:[#allocation2 + $0x112c] sm:$0xf]  ;;  %v8415_v9 = vld [vmem:[#allocation2 + $0x1138] sm:$0xf0]  ;;  %v8290_v23 = vor.u32 %v9800_v25, %v8287_v5 }
 0x2dc   :  { %5962 = vmatpush.bf16.msra.mxu3 %v8754_v36  ;;  %v8562_v36 = vor.u32 %v9868_v59, %v8559_v53  ;;  %v8671_v13 = vld [vmem:[#allocation2 + $0x1338] sm:$0xf0]  ;;  %v9796_v33 = vld [vmem:[#allocation2 + $0x100c] sm:$0xf]  ;;  %v8418_v15 = vor.u32 %v9832_v55, %v8415_v9 }
 0x2dd   :  { %5924 = vmatpush.bf16.msra.mxu0 %v8354_v29  ;;  %v10444_v2 = vadd.f32 %v5710_v41, %v5698_v60  ;;  %v9864_v29 = vld [vmem:[#allocation2 + $0x122c] sm:$0xf]  ;;  %v8399_v1 = vld [vmem:[#allocation2 + $0x1118] sm:$0xf0] }
 0x2de   :  { %5937 = vmatpush.bf16.msra.mxu1 %v8482_v10  ;;  %v8543_v10 = vld [vmem:[#allocation2 + $0x1238] sm:$0xf0]  ;;  %v9828_v28 = vld [vmem:[#allocation2 + $0x110c] sm:$0xf] }
 0x2df   :  { %5950 = vmatpush.bf16.msra.mxu2 %v8610_v30  ;;  %v9896_v30 = vld [vmem:[#allocation2 + $0x132c] sm:$0xf]  ;;  %v8546_v4 = vor.u32 %v9864_v29, %v8543_v10  ;;  %v8527_v35 = vld [vmem:[#allocation2 + $0x1218] sm:$0xf0]  ;;  %v8402_v14 = vor.u32 %v9828_v28, %v8399_v1 }
 0x2e0   :  { %5963 = vmatpush.bf16.msra.mxu3 %v8738_v18  ;;  %v8271_v18 = vld [vmem:[#allocation2 + $0x1018] sm:$0xf0]  ;;  %v9860_v31 = vld [vmem:[#allocation2 + $0x120c] sm:$0xf]  ;;  %v8674_v21 = vor.u32 %v9896_v30, %v8671_v13 }
 0x2e1   :  { %5925 = vmatpush.bf16.msra.mxu0 %v8338_v19  ;;  %v9892_v19 = vld [vmem:[#allocation2 + $0x130c] sm:$0xf]  ;;  %v8655_v63 = vld [vmem:[#allocation2 + $0x1318] sm:$0xf0]  ;;  %v8530_v47 = vor.u32 %v9860_v31, %v8527_v35 }
 0x2e2   :  { %5938 = vmatpush.bf16.msra.mxu1 %v8466_v20  ;;  %v5699_v20 = vpop.f32.mrf.mxu2  ;;  %v8895_v22 = vld [vmem:[#allocation2 + $0x14f8] sm:$0xf0]  ;;  %v9984_v27 = vld [vmem:[#allocation2 + $0x15ec] sm:$0xf]  ;;  %v5712_v32 = vpop.f32.mrf.mxu3 }
 0x2e3   :  { %5951 = vmatpush.bf16.msra.mxu2 %v8594_v26  ;;  %v9952_v26 = vld [vmem:[#allocation2 + $0x14ec] sm:$0xf]  ;;  %v9023_v39 = vld [vmem:[#allocation2 + $0x15f8] sm:$0xf0] }
 0x2e4   :  { %5964 = vmatpush.bf16.msra.mxu3 %v8722_v34  ;;  %v8274_v34 = vor.u32 %v9796_v33, %v8271_v18  ;;  %v10016_v6 = vld [vmem:[#allocation2 + $0x16ec] sm:$0xf]  ;;  %v9151_v50 = vld [vmem:[#allocation2 + $0x16f8] sm:$0xf0]  ;;  %v9026_v52 = vor.u32 %v9984_v27, %v9023_v39  ;;  %v10066_v18 = vld [vmem:[#allocation5] sm:$0xf] }
 0x2e5   :  { %5926 = vmatpush.bf16.msra.mxu0 %v8322_v40  ;;  %v10048_v48 = vld [vmem:[#allocation2 + $0x17ec] sm:$0xf]  ;;  %v9279_v40 = vld [vmem:[#allocation2 + $0x17f8] sm:$0xf0]  ;;  %v9154_v17 = vor.u32 %v10016_v6, %v9151_v50 }
 0x2e6   :  { %5939 = vmatpush.bf16.msra.mxu1 %v8450_v42  ;;  %v8658_v42 = vor.u32 %v9892_v19, %v8655_v63  ;;  %v9948_v24 = vld [vmem:[#allocation2 + $0x14cc] sm:$0xf]  ;;  %v9282_v58 = vor.u32 %v10048_v48, %v9279_v40  ;;  %v9007_v59 = vld [vmem:[#allocation2 + $0x15d8] sm:$0xf0] }
 0x2e7   :  { %5952 = vmatpush.bf16.msra.mxu2 %v8578_v8  ;;  %v8898_v8 = vor.u32 %v9952_v26, %v8895_v22  ;;  %v9980_v57 = vld [vmem:[#allocation2 + $0x15cc] sm:$0xf]  ;;  %v9135_v60 = vld [vmem:[#allocation2 + $0x16d8] sm:$0xf0] }
 0x2e8   :  { %5965 = vmatpush.bf16.msra.mxu3 %v8706_v38  ;;  %v8879_v38 = vld [vmem:[#allocation2 + $0x14d8] sm:$0xf0]  ;;  %v10012_v53 = vld [vmem:[#allocation2 + $0x16cc] sm:$0xf]  ;;  %v9010_v44 = vor.u32 %v9980_v57, %v9007_v59 }
 0x2e9   :  { %5927 = vmatpush.bf16.msra.mxu0 %v8306_v0  ;;  %v10044_v41 = vld [vmem:[#allocation2 + $0x17cc] sm:$0xf]  ;;  %v9263_v61 = vld [vmem:[#allocation2 + $0x17d8] sm:$0xf0]  ;;  %v8882_v62 = vor.u32 %v9948_v24, %v8879_v38  ;;  %v9138_v0 = vor.u32 %v10012_v53, %v9135_v60 }
 0x2ea   :  { %5940 = vmatpush.bf16.msra.mxu1 %v8434_v3  ;;  %v9944_v51 = vld [vmem:[#allocation2 + $0x14ac] sm:$0xf]  ;;  %v8863_v3 = vld [vmem:[#allocation2 + $0x14b8] sm:$0xf0]  ;;  %v9266_v25 = vor.u32 %v10044_v41, %v9263_v61 }
 0x2eb   :  { %5953 = vmatpush.bf16.msra.mxu2 %v8562_v36  ;;  %v9976_v36 = vld [vmem:[#allocation2 + $0x15ac] sm:$0xf]  ;;  %v8991_v5 = vld [vmem:[#allocation2 + $0x15b8] sm:$0xf0]  ;;  %v8866_v10 = vor.u32 %v9944_v51, %v8863_v3 }
 0x2ec   :  { %5966 = vmatpush.bf16.msra.mxu3 %v8690_v56  ;;  %v10008_v55 = vld [vmem:[#allocation2 + $0x16ac] sm:$0xf]  ;;  %v9119_v56 = vld [vmem:[#allocation2 + $0x16b8] sm:$0xf0]  ;;  %v8994_v13 = vor.u32 %v9976_v36, %v8991_v5 }
 0x2ed   :  { %5928 = vmatpush.bf16.msra.mxu0 %v8290_v23  ;;  %v10040_v9 = vld [vmem:[#allocation2 + $0x17ac] sm:$0xf]  ;;  %v9247_v29 = vld [vmem:[#allocation2 + $0x17b8] sm:$0xf0]  ;;  %v9122_v23 = vor.u32 %v10008_v55, %v9119_v56 }
 0x2ee   :  { %5941 = vmatpush.bf16.msra.mxu1 %v8418_v15  ;;  %v9940_v30 = vld [vmem:[#allocation2 + $0x148c] sm:$0xf]  ;;  %v849_v15 = vperm.slane %v10066_v18, 3  ;;  %v9231_v31 = vld [vmem:[#allocation2 + $0x1798] sm:$0xf0] }
 0x2ef   :  { %5954 = vmatpush.bf16.msra.mxu2 %v8546_v4  ;;  %v9972_v33 = vld [vmem:[#allocation2 + $0x158c] sm:$0xf]  ;;  %v9250_v4 = vor.u32 %v10040_v9, %v9247_v29  ;;  %v8831_v20 = vld [vmem:[#allocation2 + $0x1478] sm:$0xf0] }
 0x2f0   :  { %5967 = vmatpush.bf16.msra.mxu3 %v8674_v21  ;;  %v10004_v28 = vld [vmem:[#allocation2 + $0x168c] sm:$0xf]  ;;  %v9087_v6 = vld [vmem:[#allocation2 + $0x1678] sm:$0xf0] }
 0x2f1   :  { %5929 = vmatpush.bf16.msra.mxu0 %v8274_v34  ;;  %v10036_v1 = vld [vmem:[#allocation2 + $0x178c] sm:$0xf]  ;;  %v5723_v21 = vpop.f32.mrf.mxu0  ;;  %v8959_v34 = vld [vmem:[#allocation2 + $0x1578] sm:$0xf0] }
 0x2f2   :  { %5942 = vmatpush.bf16.msra.mxu1 %v8402_v14  ;;  %v9936_v63 = vld [vmem:[#allocation2 + $0x146c] sm:$0xf]  ;;  %v5724_v22 = vadd.f32 %v5723_v21, %v849_v15  ;;  %v5736_v27 = vpop.f32.mrf.mxu1  ;;  %v9234_v32 = vor.u32 %v10036_v1, %v9231_v31  ;;  %v9215_v14 = vld [vmem:[#allocation2 + $0x1778] sm:$0xf0] }
 0x2f3   :  { %5955 = vmatpush.bf16.msra.mxu2 %v8530_v47  ;;  %v9968_v26 = vld [vmem:[#allocation2 + $0x156c] sm:$0xf]  ;;  %v8834_v48 = vor.u32 %v9936_v63, %v8831_v20  ;;  %v8943_v57 = vld [vmem:[#allocation2 + $0x1558] sm:$0xf0] }
 0x2f4   :  { %5968 = vmatpush.bf16.msra.mxu3 %v8658_v42  ;;  %5930 = vmatmul.bf16.vlgmr.msra.gmra.mxu0 %v10292_v37  ;;  %v8847_v37 = vld [vmem:[#allocation2 + $0x1498] sm:$0xf0]  ;;  %v10000_v39 = vld [vmem:[#allocation2 + $0x166c] sm:$0xf]  ;;  %v5737_v47 = vadd.f32 %v5736_v27, %v5724_v22  ;;  %v8962_v40 = vor.u32 %v9968_v26, %v8959_v34  ;;  %v6044_v34 = vld [vmem:[%s10661_s3 + $0x70] sm:$0xff] }
 0x2f5   :  { %5974 = vmatpush.bf16.msrb.mxu0 %v8898_v8  ;;  %5943 = vmatmul.bf16.vlgmr.msra.gmra.mxu1 %v10296_v46  ;;  %v9103_v46 = vld [vmem:[#allocation2 + $0x1698] sm:$0xf0]  ;;  %v10032_v50 = vld [vmem:[#allocation2 + $0x176c] sm:$0xf]  ;;  %v9090_v42 = vor.u32 %v10000_v39, %v9087_v6  ;;  %v6060_v39 = vld [vmem:[%s10661_s3 + $0xf0] sm:$0xff] }
 0x2f6   :  { %5987 = vmatpush.bf16.msrb.mxu1 %v9026_v52  ;;  %5956 = vmatmul.bf16.vlgmr.msra.gmra.mxu2 %v10294_v45  ;;  %v8975_v45 = vld [vmem:[#allocation2 + $0x1598] sm:$0xf0]  ;;  %v9106_v19 = vor.u32 %v10004_v28, %v9103_v46  ;;  %v9932_v8 = vld [vmem:[#allocation2 + $0x144c] sm:$0xf]  ;;  %v9218_v38 = vor.u32 %v10032_v50, %v9215_v14  ;;  %v6076_v6 = vld [vmem:[%s10661_s3 + $0x170] sm:$0xff] }
 0x2f7   :  { %6000 = vmatpush.bf16.msrb.mxu2 %v9154_v17  ;;  %5969 = vmatmul.bf16.vlgmr.msra.gmra.mxu3 %v10298_v49  ;;  %v8850_v49 = vor.u32 %v9940_v30, %v8847_v37  ;;  %v8978_v35 = vor.u32 %v9972_v33, %v8975_v45  ;;  %v8815_v52 = vld [vmem:[#allocation2 + $0x1458] sm:$0xf0]  ;;  %v9964_v17 = vld [vmem:[#allocation2 + $0x154c] sm:$0xf] }
 0x2f8   :  { %6013 = vmatpush.bf16.msrb.mxu3 %v9282_v58  ;;  %v9996_v58 = vld [vmem:[#allocation2 + $0x164c] sm:$0xf]  ;;  %v9071_v59 = vld [vmem:[#allocation2 + $0x1658] sm:$0xf0]  ;;  %v8946_v51 = vor.u32 %v9964_v17, %v8943_v57 }
 0x2f9   :  { %5975 = vmatpush.bf16.msrb.mxu0 %v8882_v62  ;;  %v5749_v24 = vpop.f32.mrf.mxu2  ;;  %v10028_v41 = vld [vmem:[#allocation2 + $0x174c] sm:$0xf]  ;;  %v9199_v61 = vld [vmem:[#allocation2 + $0x1758] sm:$0xf0]  ;;  %v8818_v62 = vor.u32 %v9932_v8, %v8815_v52  ;;  %v9074_v3 = vor.u32 %v9996_v58, %v9071_v59  ;;  %v6040_v8 = vld [vmem:[%s10661_s3 + $0x50] sm:$0xff] }
 0x2fa   :  { %5988 = vmatpush.bf16.msrb.mxu1 %v9010_v44  ;;  %v5750_v53 = vadd.f32 %v5749_v24, %v5737_v47  ;;  %v5762_v60 = vpop.f32.mrf.mxu3  ;;  %v9928_v36 = vld [vmem:[#allocation2 + $0x142c] sm:$0xf]  ;;  %v5738_v55 = vpop.f32.mrf.mxu1  ;;  %v9202_v56 = vor.u32 %v10028_v41, %v9199_v61  ;;  %v8927_v9 = vld [vmem:[#allocation2 + $0x1538] sm:$0xf0]  ;;  %v6056_v52 = vld [vmem:[%s10661_s3 + $0xd0] sm:$0xff] }
 0x2fb   :  { %6001 = vmatpush.bf16.msrb.mxu2 %v9138_v0  ;;  %v5725_v0 = vpop.f32.mrf.mxu0  ;;  %v9960_v5 = vld [vmem:[#allocation2 + $0x152c] sm:$0xf]  ;;  %v8783_v15 = vld [vmem:[#allocation2 + $0x1418] sm:$0xf0]  ;;  %v6054_v41 = vld [vmem:[%s10661_s3 + $0xc0] sm:$0xff] }
 0x2fc   :  { %6014 = vmatpush.bf16.msrb.mxu3 %v9266_v25  ;;  %v10450_v44 = vadd.f32 %v5762_v60, %v5750_v53  ;;  %v8799_v25 = vld [vmem:[#allocation2 + $0x1438] sm:$0xf0]  ;;  %v9992_v29 = vld [vmem:[#allocation2 + $0x162c] sm:$0xf]  ;;  %v8930_v37 = vor.u32 %v9960_v5, %v8927_v9  ;;  %v6038_v60 = vld [vmem:[%s10661_s3 + $0x40] sm:$0xff] }
 0x2fd   :  { %5976 = vmatpush.bf16.msrb.mxu0 %v8866_v10  ;;  %v9055_v10 = vld [vmem:[#allocation2 + $0x1638] sm:$0xf0]  ;;  %v10024_v30 = vld [vmem:[#allocation2 + $0x172c] sm:$0xf]  ;;  %v6036_v55 = vld [vmem:[%s10661_s3 + $0x30] sm:$0xff] }
 0x2fe   :  { %5989 = vmatpush.bf16.msrb.mxu1 %v8994_v13  ;;  %v9183_v13 = vld [vmem:[#allocation2 + $0x1738] sm:$0xf0]  ;;  %v9058_v33 = vor.u32 %v9992_v29, %v9055_v10  ;;  %v9924_v18 = vld [vmem:[#allocation2 + $0x140c] sm:$0xf]  ;;  %v6068_v29 = vld [vmem:[%s10661_s3 + $0x130] sm:$0xff] }
 0x2ff   :  { %6002 = vmatpush.bf16.msrb.mxu2 %v9122_v23  ;;  %v8802_v23 = vor.u32 %v9928_v36, %v8799_v25  ;;  %v9186_v28 = vor.u32 %v10024_v30, %v9183_v13  ;;  %v8911_v46 = vld [vmem:[#allocation2 + $0x1518] sm:$0xf0]  ;;  %v9988_v1 = vld [vmem:[#allocation2 + $0x160c] sm:$0xf] }
 0x300   :  { %6015 = vmatpush.bf16.msrb.mxu3 %v9250_v4  ;;  %v9956_v4 = vld [vmem:[#allocation2 + $0x150c] sm:$0xf]  ;;  %v9039_v31 = vld [vmem:[#allocation2 + $0x1618] sm:$0xf0] }
 0x301   :  { %5977 = vmatpush.bf16.msrb.mxu0 %v8850_v49  ;;  %v5751_v45 = vpop.f32.mrf.mxu2  ;;  %v10020_v21 = vld [vmem:[#allocation2 + $0x170c] sm:$0xf]  ;;  %v8914_v63 = vor.u32 %v9956_v4, %v8911_v46  ;;  %v9042_v20 = vor.u32 %v9988_v1, %v9039_v31  ;;  %v6045_v22 = vld [vmem:[%s10661_s3 + $0x78] sm:$0xff]  ;;  %v6032_v46 = vld [vmem:[%s10661_s3 + $0x10] sm:$0xff] }
 0x302   :  { %5990 = vmatpush.bf16.msrb.mxu1 %v8978_v35  ;;  %v5764_v49 = vpop.f32.mrf.mxu3  ;;  %v9167_v35 = vld [vmem:[#allocation2 + $0x1718] sm:$0xf0]  ;;  %v6043_v50 = vld [vmem:[%s10661_s3 + $0x68] sm:$0xff]  ;;  %v6048_v1 = vld [vmem:[%s10661_s3 + $0x90] sm:$0xff] }
 0x303   :  { %6003 = vmatpush.bf16.msrb.mxu2 %v9106_v19  ;;  %v8786_v19 = vor.u32 %v9924_v18, %v8783_v15  ;;  %v9170_v26 = vor.u32 %v10020_v21, %v9167_v35  ;;  %v6061_v27 = vld [vmem:[%s10661_s3 + $0xf8] sm:$0xff]  ;;  %v6059_v14 = vld [vmem:[%s10661_s3 + $0xe8] sm:$0xff]  ;;  %v6066_v18 = vld [vmem:[%s10661_s3 + $0x120] sm:$0xff] }
 0x304   :  { %6016 = vmatpush.bf16.msrb.mxu3 %v9234_v32  ;;  %v6077_v32 = vld [vmem:[%s10661_s3 + $0x178] sm:$0xff]  ;;  %v6039_v57 = vld [vmem:[%s10661_s3 + $0x48] sm:$0xff]  ;;  %v6064_v31 = vld [vmem:[%s10661_s3 + $0x110] sm:$0xff] }
 0x305   :  { %5978 = vmatpush.bf16.msrb.mxu0 %v8834_v48  ;;  %v6041_v47 = vld [vmem:[%s10661_s3 + $0x58] sm:$0xff]  ;;  %v6055_v58 = vld [vmem:[%s10661_s3 + $0xc8] sm:$0xff] }
 0x306   :  { %5991 = vmatpush.bf16.msrb.mxu1 %v8962_v40  ;;  %v6057_v48 = vld [vmem:[%s10661_s3 + $0xd8] sm:$0xff]  ;;  %v6071_v53 = vld [vmem:[%s10661_s3 + $0x148] sm:$0xff] }
 0x307   :  { %6004 = vmatpush.bf16.msrb.mxu2 %v9090_v42  ;;  %v6073_v40 = vld [vmem:[%s10661_s3 + $0x158] sm:$0xff]  ;;  %v6035_v10 = vld [vmem:[%s10661_s3 + $0x28] sm:$0xff] }
 0x308   :  { %6017 = vmatpush.bf16.msrb.mxu3 %v9218_v38  ;;  %v6072_v38 = vld [vmem:[%s10661_s3 + $0x150] sm:$0xff]  ;;  %v6069_v36 = vld [vmem:[%s10661_s3 + $0x138] sm:$0xff]  ;;  %v6051_v30 = vld [vmem:[%s10661_s3 + $0xa8] sm:$0xff] }
 0x309   :  { %5979 = vmatpush.bf16.msrb.mxu0 %v8818_v62  ;;  %v6070_v62 = vld [vmem:[%s10661_s3 + $0x140] sm:$0xff]  ;;  %v6067_v13 = vld [vmem:[%s10661_s3 + $0x128] sm:$0xff]  ;;  %v6033_v4 = vld [vmem:[%s10661_s3 + $0x18] sm:$0xff] }
 0x30a   :  { %5992 = vmatpush.bf16.msrb.mxu1 %v8946_v51  ;;  %v6037_v51 = vld [vmem:[%s10661_s3 + $0x38] sm:$0xff]  ;;  %v6031_v49 = vld [vmem:[%s10661_s3 + $0x8] sm:$0xff] }
 0x30b   :  { %6005 = vmatpush.bf16.msrb.mxu2 %v9074_v3  ;;  %v6053_v3 = vld [vmem:[%s10661_s3 + $0xb8] sm:$0xff]  ;;  %v6047_v21 = vld [vmem:[%s10661_s3 + $0x88] sm:$0xff] }
 0x30c   :  { %6018 = vmatpush.bf16.msrb.mxu3 %v9202_v56  ;;  %v6052_v56 = vld [vmem:[%s10661_s3 + $0xb0] sm:$0xff]  ;;  %v6049_v45 = vld [vmem:[%s10661_s3 + $0x98] sm:$0xff]  ;;  %v6063_v35 = vld [vmem:[%s10661_s3 + $0x108] sm:$0xff] }
 0x30d   :  { %5980 = vmatpush.bf16.msrb.mxu0 %v8802_v23  ;;  %v6034_v23 = vld [vmem:[%s10661_s3 + $0x20] sm:$0xff] }
 0x30e   :  { %5993 = vmatpush.bf16.msrb.mxu1 %v8930_v37  ;;  %v6050_v37 = vld [vmem:[%s10661_s3 + $0xa0] sm:$0xff] }
 0x30f   :  { %6006 = vmatpush.bf16.msrb.mxu2 %v9058_v33 }
 0x310   :  { %6019 = vmatpush.bf16.msrb.mxu3 %v9186_v28  ;;  %v6065_v28 = vld [vmem:[%s10661_s3 + $0x118] sm:$0xff] }
 0x311   :  { %5981 = vmatpush.bf16.msrb.mxu0 %v8786_v19  ;;  %v5775_v42 = vpop.f32.mrf.mxu0  ;;  %v6030_v19 = vld [vmem:[%s10661_s3] sm:$0xff] }
 0x312   :  { %5994 = vmatpush.bf16.msrb.mxu1 %v8914_v63  ;;  %v5776_v17 = vadd.f32 %v5775_v42, %v10450_v44  ;;  %v5788_v24 = vpop.f32.mrf.mxu1  ;;  %v6046_v63 = vld [vmem:[%s10661_s3 + $0x80] sm:$0xff] }
 0x313   :  { %6007 = vmatpush.bf16.msrb.mxu2 %v9042_v20  ;;  %v6062_v20 = vld [vmem:[%s10661_s3 + $0x100] sm:$0xff] }
 0x314   :  { %6020 = vmatpush.bf16.msrb.mxu3 %v9170_v26  ;;  %5982 = vmatmul.bf16.vlgmr.msrb.gmra.mxu0 %v10312_v7  ;;  %v6075_v7 = vld [vmem:[%s10661_s3 + $0x168] sm:$0xff]  ;;  %v5789_v59 = vadd.f32 %v5788_v24, %v5776_v17  ;;  %v6026_v26 = vmax.f32 %v10353_v54, 0.0 }
 0x315   :  { %6098 = vmatpush.msra.mxu0 %v6045_v22  ;;  %5995 = vmatmul.bf16.vlgmr.msrb.gmra.mxu1 %v10316_v12  ;;  %v6058_v12 = vld [vmem:[%s10661_s3 + $0xe0] sm:$0xff]  ;;  %v6027_v22 = vmax.f32 %v10394_v43, 0.0  ;;  %v6091_v24 = vld [vmem:[%s10661_s3 + $0x1e8] sm:$0xff] }
 0x316   :  { %6118 = vmatpush.msra.mxu1 %v6061_v27  ;;  %6008 = vmatmul.bf16.vlgmr.msrb.gmra.mxu2 %v10314_v11  ;;  %v6042_v11 = vld [vmem:[%s10661_s3 + $0x60] sm:$0xff]  ;;  %v6028_v27 = vmax.f32 %v10444_v2, 0.0 }
 0x317   :  { %6138 = vmatpush.msra.mxu2 %v6077_v32  ;;  %6021 = vmatmul.bf16.vlgmr.msrb.gmra.mxu3 %v10318_v16  ;;  %v6074_v16 = vld [vmem:[%s10661_s3 + $0x160] sm:$0xff] }
 0x318   :  { %6099 = vmatpush.msra.mxu0 %v6044_v34  ;;  %6119 = vmatpush.msra.mxu1 %v6060_v39 }
 0x319   :  { %6139 = vmatpush.msra.mxu2 %v6076_v6  ;;  %v5801_v61 = vpop.f32.mrf.mxu2  ;;  %v5777_v5 = vpop.f32.mrf.mxu0 }
 0x31a   :  { %6100 = vmatpush.msra.mxu0 %v6043_v50  ;;  %6120 = vmatpush.msra.mxu1 %v6059_v14  ;;  %v5802_v44 = vadd.f32 %v5801_v61, %v5789_v59  ;;  %v5814_v0 = vpop.f32.mrf.mxu3  ;;  %v5790_v9 = vpop.f32.mrf.mxu1  ;;  %v6085_v61 = vld [vmem:[%s10661_s3 + $0x1b8] sm:$0xff] }
 0x31b   :  { %6140 = vmatpush.msra.mxu2 %v6075_v7  ;;  %v6080_v9 = vld [vmem:[%s10661_s3 + $0x190] sm:$0xff] }
 0x31c   :  { %6101 = vmatpush.msra.mxu0 %v6042_v11  ;;  %6121 = vmatpush.msra.mxu1 %v6058_v12  ;;  %v5815_v25 = vadd.f32 %v5814_v0, %v5802_v44  ;;  %v6084_v44 = vld [vmem:[%s10661_s3 + $0x1b0] sm:$0xff] }
 0x31d   :  { %6141 = vmatpush.msra.mxu2 %v6074_v16 }
 0x31e   :  { %6102 = vmatpush.msra.mxu0 %v6041_v47  ;;  %6122 = vmatpush.msra.mxu1 %v6057_v48 }
 0x31f   :  { %6142 = vmatpush.msra.mxu2 %v6073_v40 }
 0x320   :  { %6103 = vmatpush.msra.mxu0 %v6040_v8  ;;  %6123 = vmatpush.msra.mxu1 %v6056_v52  ;;  %v6093_v8 = vld [vmem:[%s10661_s3 + $0x1f8] sm:$0xff]  ;;  %v6092_v52 = vld [vmem:[%s10661_s3 + $0x1f0] sm:$0xff] }
 0x321   :  { %6143 = vmatpush.msra.mxu2 %v6072_v38  ;;  %v5803_v33 = vpop.f32.mrf.mxu2  ;;  %6158 = vmatpush.msra.mxu3 %v6093_v8  ;;  %v6090_v38 = vld [vmem:[%s10661_s3 + $0x1e0] sm:$0xff] }
 0x322   :  { %6104 = vmatpush.msra.mxu0 %v6039_v57  ;;  %6124 = vmatpush.msra.mxu1 %v6055_v58  ;;  %v5816_v15 = vpop.f32.mrf.mxu3  ;;  %v6089_v57 = vld [vmem:[%s10661_s3 + $0x1d8] sm:$0xff] }
 0x323   :  { %6144 = vmatpush.msra.mxu2 %v6071_v53  ;;  %6159 = vmatpush.msra.mxu3 %v6092_v52  ;;  %v6088_v53 = vld [vmem:[%s10661_s3 + $0x1d0] sm:$0xff] }
 0x324   :  { %6105 = vmatpush.msra.mxu0 %v6038_v60  ;;  %6125 = vmatpush.msra.mxu1 %v6054_v41  ;;  %v6087_v60 = vld [vmem:[%s10661_s3 + $0x1c8] sm:$0xff]  ;;  %v6086_v41 = vld [vmem:[%s10661_s3 + $0x1c0] sm:$0xff] }
 0x325   :  { %6145 = vmatpush.msra.mxu2 %v6070_v62  ;;  %6160 = vmatpush.msra.mxu3 %v6091_v24 }
 0x326   :  { %6106 = vmatpush.msra.mxu0 %v6037_v51  ;;  %6126 = vmatpush.msra.mxu1 %v6053_v3  ;;  %v6083_v51 = vld [vmem:[%s10661_s3 + $0x1a8] sm:$0xff]  ;;  %v6082_v3 = vld [vmem:[%s10661_s3 + $0x1a0] sm:$0xff] }
 0x327   :  { %6146 = vmatpush.msra.mxu2 %v6069_v36  ;;  %6161 = vmatpush.msra.mxu3 %v6090_v38  ;;  %v6081_v36 = vld [vmem:[%s10661_s3 + $0x198] sm:$0xff] }
 0x328   :  { %6107 = vmatpush.msra.mxu0 %v6036_v55  ;;  %6127 = vmatpush.msra.mxu1 %v6052_v56 }
 0x329   :  { %6147 = vmatpush.msra.mxu2 %v6068_v29  ;;  %6162 = vmatpush.msra.mxu3 %v6089_v57 }
 0x32a   :  { %6108 = vmatpush.msra.mxu0 %v6035_v10  ;;  %6128 = vmatpush.msra.mxu1 %v6051_v30  ;;  %v6079_v10 = vld [vmem:[%s10661_s3 + $0x188] sm:$0xff]  ;;  %v6078_v30 = vld [vmem:[%s10661_s3 + $0x180] sm:$0xff]  ;;  %s10174_s3 = smov [#allocation8]  }
 0x32b   :  { %6148 = vmatpush.msra.mxu2 %v6067_v13  ;;  %6163 = vmatpush.msra.mxu3 %v6088_v53  ;;  %s6198_s14 = sshll.u32 %s10174_s3, 4  ;;  %s6199_s14 = int_to_ptr.vmem [resolvable:$true] %s6198_s14 }
 0x32c   :  { %6109 = vmatpush.msra.mxu0 %v6034_v23  ;;  %6129 = vmatpush.msra.mxu1 %v6050_v37 }
 0x32d   :  { %6149 = vmatpush.msra.mxu2 %v6066_v18  ;;  %6164 = vmatpush.msra.mxu3 %v6087_v60 }
 0x32e   :  { %6110 = vmatpush.msra.mxu0 %v6033_v4  ;;  %6130 = vmatpush.msra.mxu1 %v6049_v45 }
 0x32f   :  { %6150 = vmatpush.msra.mxu2 %v6065_v28  ;;  %6165 = vmatpush.msra.mxu3 %v6086_v41 }
 0x330   :  { %6111 = vmatpush.msra.mxu0 %v6032_v46  ;;  %6131 = vmatpush.msra.mxu1 %v6048_v1 }
 0x331   :  { %6151 = vmatpush.msra.mxu2 %v6064_v31  ;;  %v5827_v32 = vpop.f32.mrf.mxu0  ;;  %6166 = vmatpush.msra.mxu3 %v6085_v61 }
 0x332   :  { %6112 = vmatpush.msra.mxu0 %v6031_v49  ;;  %6132 = vmatpush.msra.mxu1 %v6047_v21  ;;  %v5828_v34 = vadd.f32 %v5827_v32, %v5815_v25  ;;  %v5840_v39 = vpop.f32.mrf.mxu1 }
 0x333   :  { %6152 = vmatpush.msra.mxu2 %v6063_v35  ;;  %6167 = vmatpush.msra.mxu3 %v6084_v44 }
 0x334   :  { %6113 = vmatpush.msra.mxu0 %v6030_v19  ;;  %6133 = vmatpush.msra.mxu1 %v6046_v63  ;;  %v5841_v6 = vadd.f32 %v5840_v39, %v5828_v34  ;;  %v10057_v34 = vld [vmem:[#allocation7] ss:$0 sm:$0xff] }
 0x335   :  { %6153 = vmatpush.msra.mxu2 %v6062_v20  ;;  %6114 = vmatmul.f32.vlgmr.msra.gmra.mxu0 %v6026_v26 }
 0x336   :  { %6134 = vmatmul.f32.vlgmr.msra.gmra.mxu1 %v6027_v22  ;;  %6154 = vmatmul.f32.vlgmr.msra.gmra.mxu2 %v6028_v27 }
 0x337   :  { %6168 = vmatpush.msra.mxu3 %v6083_v51 }
 0x339   :  { %v5853_v50 = vpop.f32.mrf.mxu2  ;;  %v5829_v11 = vpop.f32.mrf.mxu0  ;;  %6169 = vmatpush.msra.mxu3 %v6082_v3 }
 0x33a   :  { %v5854_v14 = vadd.f32 %v5853_v50, %v5841_v6  ;;  %v5866_v7 = vpop.f32.mrf.mxu3  ;;  %v5842_v54 = vpop.f32.mrf.mxu1 }
 0x33b   :  { %6170 = vmatpush.msra.mxu3 %v6081_v36 }
 0x33c   :  { %v5867_v12 = vadd.f32 %v5866_v7, %v5854_v14 }
 0x33d   :  { %6171 = vmatpush.msra.mxu3 %v6080_v9 }
 0x33f   :  { %6172 = vmatpush.msra.mxu3 %v6079_v10 }
 0x341   :  { %v5855_v16 = vpop.f32.mrf.mxu2  ;;  %6173 = vmatpush.msra.mxu3 %v6078_v30 }
 0x342   :  { %v5868_v43 = vpop.f32.mrf.mxu3 }
 0x351   :  { %v5879_v47 = vpop.f32.mrf.mxu0 }
 0x352   :  { %v5892_v2 = vpop.f32.mrf.mxu1  ;;  %v5880_v5 = vadd.f32 %v5879_v47, %v5867_v12 }
 0x354   :  { %v5893_v13 = vadd.f32 %v5892_v2, %v5880_v5 }
 0x359   :  { %v5905_v48 = vpop.f32.mrf.mxu2  ;;  %v5881_v42 = vpop.f32.mrf.mxu0 }
 0x35a   :  { %v5918_v40 = vpop.f32.mrf.mxu3  ;;  %v5894_v17 = vpop.f32.mrf.mxu1  ;;  %v5906_v23 = vadd.f32 %v5905_v48, %v5893_v13 }
 0x35c   :  { %v5919_v18 = vadd.f32 %v5918_v40, %v5906_v23 }
 0x361   :  { %v5907_v58 = vpop.f32.mrf.mxu2 }
 0x362   :  { %v5920_v59 = vpop.f32.mrf.mxu3 }
 0x371   :  { %v5931_v62 = vpop.f32.mrf.mxu0 }
 0x372   :  { %v5944_v0 = vpop.f32.mrf.mxu1  ;;  %v5932_v15 = vadd.f32 %v5931_v62, %v5919_v18 }
 0x374   :  { %v5945_v4 = vadd.f32 %v5944_v0, %v5932_v15 }
 0x379   :  { %v5957_v25 = vpop.f32.mrf.mxu2  ;;  %v5933_v56 = vpop.f32.mrf.mxu0 }
 0x37a   :  { %v5970_v55 = vpop.f32.mrf.mxu3  ;;  %v5946_v29 = vpop.f32.mrf.mxu1  ;;  %v5958_v45 = vadd.f32 %v5957_v25, %v5945_v4 }
 0x37c   :  { %v5971_v28 = vadd.f32 %v5970_v55, %v5958_v45 }
 0x381   :  { %v5959_v37 = vpop.f32.mrf.mxu2 }
 0x382   :  { %v5972_v33 = vpop.f32.mrf.mxu3 }
 0x391   :  { %v5983_v46 = vpop.f32.mrf.mxu0 }
 0x392   :  { %v5996_v1 = vpop.f32.mrf.mxu1  ;;  %v5984_v31 = vadd.f32 %v5983_v46, %v5971_v28 }
 0x394   :  { %v5997_v49 = vadd.f32 %v5996_v1, %v5984_v31 }
 0x399   :  { %v6009_v21 = vpop.f32.mrf.mxu2  ;;  %v5985_v63 = vpop.f32.mrf.mxu0 }
 0x39a   :  { %v6022_v35 = vpop.f32.mrf.mxu3  ;;  %v6010_v19 = vadd.f32 %v6009_v21, %v5997_v49  ;;  %v5998_v20 = vpop.f32.mrf.mxu1 }
 0x39c   :  { %v6023_v26 = vadd.f32 %v6022_v35, %v6010_v19 }
 0x39e   :  { %v6029_v22 = vmax.f32 %v6023_v26, 0.0 }
 0x3a0   :  { %6174 = vmatmul.f32.vlgmr.msra.gmra.mxu3 %v6029_v22 }
 0x3a1   :  { %v6011_v27 = vpop.f32.mrf.mxu2 }
 0x3a2   :  { %v6024_v32 = vpop.f32.mrf.mxu3 }
 0x3b2   :  { %v6115_v39 = vpop.f32.mrf.mxu0 }
 0x3b3   :  { %v6116_v6 = vadd.f32 %v10057_v34, %v6115_v39  ;;  %v6135_v50 = vpop.f32.mrf.mxu1 }
 0x3b5   :  { %v6136_v7 = vadd.f32 %v6135_v50, %v6116_v6 }
 0x3b9   :  { %v6155_v14 = vpop.f32.mrf.mxu2 }
 0x3ba   :  { %v6156_v11 = vadd.f32 %v6155_v14, %v6136_v7 }
 0x423   :  { %v6175_v54 = vpop.f32.mrf.mxu3 }
 0x424   :  { %v6176_v12 = vadd.f32 %v6175_v54, %v6156_v11 }
 0x426   :  { %10058 = vtanh.f32 %v6176_v12 }
 0x42c   :  { %v10059_v16 = vpop.eup %10058 }
 0x42d   :  { %v6180_v43 = vsel %vm6179_vm0, %v10059_v16, -inf }
 0x42e   :  { %6181 = vmax.xlane.f32.xlu0 %v6180_v43 }
 0x4a1   :  { %v6182_v47 = vpop.xlane.xlu0 %6181 }
 0x4a2   :  { %v6183_v2 = vsub.f32 %v10059_v16, %v6182_v47 }
 0x4a4   :  { %v6184_v48 = vmul.f32 1.442695, %v6183_v2 }
 0x4a6   :  { %10060 = vpow2.f32 %v6184_v48 }
 0x4ac   :  { %v10061_v40 = vpop.eup %10060 }
 0x4ad   :  { %v6186_v42 = vsel %vm6179_vm0, %v10061_v40, 0.0 }
 0x4ae   :  { %6187 = vadd.xlane.f32.xlu0 %v6186_v42 }
 0x521   :  { %v6188_v8 = vpop.xlane.xlu0 %6187 }
 0x522   :  { %10062 = vlog2.f32 %v6188_v8 }
 0x528   :  { %v10063_v52 = vpop.eup %10062 }
 0x529   :  { %v6190_v17 = vmul.f32 0.6931472, %v10063_v52 }
 0x52b   :  { %v6191_v24 = vsub.f32 %v6183_v2, %v6190_v17 }
 0x52d   :  { %6192 = vst.msk [vmem:[#allocation8] sm:$0xff] %vm6179_vm0, %v6191_v24 }
 0x52e   :  { %6203 = dma.vmem_to_hbm [thread:$0]  %s6199_s14, 128, %s6201_s17, [#allocation4]  }
 0x52f   :  { %10167 = dma.done.wait [#allocation4], 128  }
 0x530   :  { %10168 = vsyncadd [#allocation4], 4294967168 }
 0x531   :  { %6208 = vsyncpa [#allocation3], 1 }
 0x532   :  { %6209 = vsyncpa [#allocation6], 1 }
 0x533   :  { %6210 = vsyncpa [#allocation4], 1 }

</bundles_post_ra>
